<compile_context>
chip_gen: v7x
topology: tpu7x:2x2x1
jax: 0.10.0
libtpu: 0.0.40
codegen_flags: <defaults>
</compile_context>

<pallas_src>
import functools

import jax
import jax.numpy as jnp
from jax.experimental import pallas as pl
from jax.experimental.pallas import tpu as pltpu

KSIZE = 4
STRIDE = 2
LAYER_CHANNELS = ((3, 32), (32, 64), (64, 128), (128, 256))


def _round_up(x, m):
    return ((x + m - 1) // m) * m


def _conv_out(n):
    return (n - KSIZE) // STRIDE + 1


def _plan(h0, w0):
    """Static per-layer geometry (Python ints, resolved at trace time)."""
    layers = []
    h, w = h0, w0
    for cin, cout in LAYER_CHANNELS:
        ho, wo = _conv_out(h), _conv_out(w)
        assert ho >= 1 and wo >= 1, "input too small for 4 conv layers"
        layers.append(dict(hin=h, win=w, cin=cin, cout=cout,
                           hout=ho, wout=wo, wsel=_round_up(wo, 8)))
        h, w = ho, wo
    # Scratch widths: hold the producer's wsel columns AND cover the consumer's reads
    # (max column read by the next layer = 2*(wsel_next - 1) + 3).
    for i, lay in enumerate(layers):
        need_store = lay["wsel"]
        need_read = (2 * (layers[i + 1]["wsel"] - 1) + KSIZE
                     if i + 1 < len(layers) else 0)
        lay["wbuf"] = _round_up(max(need_store, need_read), 8)
    w_in_pad = max(w0, 2 * (layers[0]["wsel"] - 1) + KSIZE)
    return layers, w_in_pad


def _elu(x):
    # ELU(alpha=1): x if x > 0 else exp(x) - 1
    return jnp.where(x > 0.0, x, jnp.exp(jnp.minimum(x, 0.0)) - 1.0)


# ---------------------------------------------------------------------------
# Fused kernel: all 4 conv+ELU layers for one batch element; activations in VMEM.
# ---------------------------------------------------------------------------
def _encoder_kernel(layers, x_ref, w1, b1, w2, b2, w3, b3, w4, b4,
                    o_ref, a1_ref, a2_ref, a3_ref):
    scratch = (a1_ref, a2_ref, a3_ref)
    weights = (w2, w3, w4)           # per-tap packed: (16, Cin, Cout) bf16
    biases = (b2, b3, b4)            # (1, Cout) f32

    # Zero the never-written pad columns of each activation scratch once, so the
    # (dropped) garbage outputs they feed stay finite and deterministic.
    for li, lay in enumerate(layers[:-1]):
        wsel, wbuf = lay["wsel"], lay["wbuf"]
        if wbuf > wsel:
            scratch[li][:, pl.ds(wsel, wbuf - wsel), :] = jnp.zeros(
                (lay["hout"], wbuf - wsel, lay["cout"]), jnp.float32)

    # ---- Layer 1: input was im2col'd in the wrapper -> dense K=48 matmuls ----
    lay = layers[0]
    h1, wsel1, cout1 = lay["hout"], lay["wsel"], lay["cout"]
    row_chunk = max(1, 256 // wsel1)           # bound live f32 rows (vreg pressure)
    r = 0
    while r < h1:
        nr = min(row_chunk, h1 - r)
        lhs = x_ref[pl.ds(r * wsel1, nr * wsel1), :]          # bf16 (nr*wsel1, 48)
        y = jnp.dot(lhs, w1[...], preferred_element_type=jnp.float32)
        y = _elu(y + b1[...])
        a1_ref[pl.ds(r, nr), pl.ds(0, wsel1), :] = y.reshape(nr, wsel1, cout1)
        r += nr

    # ---- Layers 2..4: per-tap MXU matmuls, activations stay resident in VMEM ----
    src = a1_ref
    last = len(layers) - 1
    for li in range(1, len(layers)):
        lay = layers[li]
        hout, wout, wsel = lay["hout"], lay["wout"], lay["wsel"]
        cin, cout = lay["cin"], lay["cout"]
        w_ref, b_ref = weights[li - 1], biases[li - 1]

        acc = jnp.zeros((hout * wsel, cout), jnp.float32)
        for kh in range(KSIZE):
            for kw in range(KSIZE):
                # stride-2 window: element (i, j, c) = src[kh + 2i, kw + 2j, c]
                patch = src[pl.ds(kh, hout, stride=STRIDE),
                            pl.ds(kw, wsel, stride=STRIDE), :]
                lhs = patch.reshape(hout * wsel, cin).astype(jnp.bfloat16)
                acc = acc + jnp.dot(lhs, w_ref[kh * KSIZE + kw],
                                    preferred_element_type=jnp.float32)
        y = _elu(acc + b_ref[...])

        if li == last:
            # Store only the valid rows (h-major, w-minor), lane-dense over Cout=256.
            for i in range(hout):
                o_ref[pl.ds(i * wout, wout), :] = y[i * wsel:i * wsel + wout, :]
        else:
            scratch[li][:, pl.ds(0, wsel), :] = y.reshape(hout, wsel, cout)
            src = scratch[li]


# ---------------------------------------------------------------------------
# One-time parameter packing (outside the jitted forward).
# ---------------------------------------------------------------------------
def pack_params(params):
    """(Cout,Cin,4,4) torch-style weights -> kernel layout, cast to bf16."""
    packed = []
    for li, ((w, b), (cin, cout)) in enumerate(zip(params, LAYER_CHANNELS)):
        wt = jnp.transpose(w, (2, 3, 1, 0))                    # (kh, kw, cin, cout)
        if li == 0:
            wp = wt.reshape(KSIZE * KSIZE * cin, cout)         # fully folded K = 48
        else:
            wp = wt.reshape(KSIZE * KSIZE, cin, cout)          # per-tap (16, cin, cout)
        packed.append((wp.astype(jnp.bfloat16),
                       b.reshape(1, cout).astype(jnp.float32)))
    return packed


# ---------------------------------------------------------------------------
# Wrapper: one pallas_call for the whole encoder.
# ---------------------------------------------------------------------------
@jax.jit
def observation_encoder(x_nchw, packed):
    """Forward pass identical to PyTorch ObservationEncoder.forward."""
    bsz, c0, h0, w0 = x_nchw.shape
    assert c0 == LAYER_CHANNELS[0][0]
    layers, w_in_pad = _plan(h0, w0)
    lay1, last = layers[0], layers[-1]
    h1, wsel1 = lay1["hout"], lay1["wsel"]

    x = jnp.transpose(x_nchw, (0, 2, 3, 1)).astype(jnp.float32)   # NCHW -> NHWC
    if w_in_pad > w0:
        x = jnp.pad(x, ((0, 0), (0, 0), (0, w_in_pad - w0), (0, 0)))

    # Layer-1 im2col in XLA: (B, h1*wsel1, 48) patches, K ordered (kh, kw, c).
    taps = []
    for kh in range(KSIZE):
        for kw in range(KSIZE):
            taps.append(jax.lax.slice(
                x, (0, kh, kw, 0),
                (bsz, kh + STRIDE * (h1 - 1) + 1,
                 kw + STRIDE * (wsel1 - 1) + 1, c0),
                (1, STRIDE, STRIDE, 1)))
    patches = jnp.concatenate(taps, axis=-1)                      # (B, h1, wsel1, 48)
    patches = patches.reshape(bsz, h1 * wsel1,
                              KSIZE * KSIZE * c0).astype(jnp.bfloat16)

    rows_out = last["hout"] * last["wout"]

    flat_args = [patches]
    in_specs = [pl.BlockSpec((None, h1 * wsel1, KSIZE * KSIZE * c0),
                             lambda b: (b, 0, 0))]
    for (wp, bp) in packed:
        flat_args += [wp, bp]
        idx_w = (lambda b: (0, 0)) if wp.ndim == 2 else (lambda b: (0, 0, 0))
        in_specs += [pl.BlockSpec(wp.shape, idx_w),
                     pl.BlockSpec(bp.shape, lambda b: (0, 0))]

    out = pl.pallas_call(
        functools.partial(_encoder_kernel, layers),
        out_shape=jax.ShapeDtypeStruct((bsz, rows_out, last["cout"]), jnp.float32),
        grid=(bsz,),
        in_specs=in_specs,
        out_specs=pl.BlockSpec((None, rows_out, last["cout"]), lambda b: (b, 0, 0)),
        scratch_shapes=[pltpu.VMEM((lay["hout"], lay["wbuf"], lay["cout"]), jnp.float32)
                        for lay in layers[:-1]],
        compiler_params=pltpu.CompilerParams(dimension_semantics=("parallel",)),
    )(*flat_args)

    # (B, H4*W4, 256) -> torch NCHW flatten order (B, 256*H4*W4).
    return jnp.transpose(out, (0, 2, 1)).reshape(bsz, -1)


# ---------------------------------------------------------------------------
# Deterministic parameter init (PyTorch Conv2d default: U(-1/sqrt(fan_in), +))
# ---------------------------------------------------------------------------
def init_params(key):
    params = []
    for c_in, c_out in LAYER_CHANNELS:
        key, kw_, kb_ = jax.random.split(key, 3)
        fan_in = c_in * KSIZE * KSIZE
        bound = 1.0 / jnp.sqrt(fan_in)
        w = jax.random.uniform(kw_, (c_out, c_in, KSIZE, KSIZE),
                               minval=-bound, maxval=bound, dtype=jnp.float32)
        b = jax.random.uniform(kb_, (c_out,),
                               minval=-bound, maxval=bound, dtype=jnp.float32)
        params.append((w, b))
    return params


# ---------------------------------------------------------------------------
# Pure-JAX reference (lax.conv) for a correctness sanity check
# ---------------------------------------------------------------------------
def reference_encoder(x_nchw, params):
    x = x_nchw
    for w, b in params:
        x = jax.lax.conv_general_dilated(
            x, w, window_strides=(STRIDE, STRIDE), padding="VALID",
            dimension_numbers=("NCHW", "OIHW", "NCHW"),
            precision=jax.lax.Precision.HIGHEST)
        x = x + b.reshape(1, -1, 1, 1)
        x = jnp.where(x > 0.0, x, jnp.exp(jnp.minimum(x, 0.0)) - 1.0)
    return x.reshape(x.shape[0], -1)


if __name__ == "__main__":
    key = jax.random.PRNGKey(0)
    k_params, k_x = jax.random.split(key)

    params = init_params(k_params)
    packed = pack_params(params)          # one-time weight re-layout / bf16 cast

    # Small input consistent with the module: NCHW, 3 input channels.
    # 64 -> 31 -> 14 -> 6 -> 2 spatial; embed = 256 * 2 * 2 = 1024.
    x = jax.random.normal(k_x, (2, 3, 64, 64), dtype=jnp.float32)

    out = jax.block_until_ready(observation_encoder(x, packed))
    assert out.shape == (2, 256 * 2 * 2), out.shape

    # Reference uses the same bf16-rounded weights (in f32) so the comparison
    # isolates kernel correctness; accumulation in the kernel stays f32.
    params_q = [(w.astype(jnp.bfloat16).astype(jnp.float32), b) for w, b in params]
    ref = jax.block_until_ready(reference_encoder(x, params_q))
    max_err = float(jnp.max(jnp.abs(out - ref)))
    if not bool(jnp.allclose(out, ref, atol=2e-2, rtol=2e-2)):
        raise AssertionError(f"Pallas output mismatch vs reference, max_err={max_err}")

    print("KERNEL_OK")
</pallas_src>

<mosaic_0001>
module attributes {stable_mosaic.version = 11 : i64} {
  func.func @_encoder_kernel(%arg0: i32, %arg1: memref<1x992x48xbf16, #tpu.memory_space<vmem>>, %arg2: memref<48x32xbf16, #tpu.memory_space<vmem>>, %arg3: memref<1x32xf32, #tpu.memory_space<vmem>>, %arg4: memref<16x32x64xbf16, #tpu.memory_space<vmem>>, %arg5: memref<1x64xf32, #tpu.memory_space<vmem>>, %arg6: memref<16x64x128xbf16, #tpu.memory_space<vmem>>, %arg7: memref<1x128xf32, #tpu.memory_space<vmem>>, %arg8: memref<16x128x256xbf16, #tpu.memory_space<vmem>>, %arg9: memref<1x256xf32, #tpu.memory_space<vmem>>, %arg10: memref<1x4x256xf32, #tpu.memory_space<vmem>>, %arg11: memref<31x40x32xf32, #tpu.memory_space<vmem>>, %arg12: memref<14x24x64xf32, #tpu.memory_space<vmem>>, %arg13: memref<6x24x128xf32, #tpu.memory_space<vmem>>) attributes {dimension_semantics = [#tpu.dimension_semantics<parallel>], iteration_bounds = array<i64: 2>, scalar_prefetch = 0 : i64, scratch_operands = 3 : i64, tpu.core_type = #tpu.core_type<tc>, window_params = [{transform_indices = @transform_0, window_bounds = array<i64: 1, 992, 48>}, {pipeline_mode = #tpu.pipeline_mode<synchronous>, transform_indices = @transform_1, window_bounds = array<i64: 48, 32>}, {pipeline_mode = #tpu.pipeline_mode<synchronous>, transform_indices = @transform_2, window_bounds = array<i64: 1, 32>}, {pipeline_mode = #tpu.pipeline_mode<synchronous>, transform_indices = @transform_3, window_bounds = array<i64: 16, 32, 64>}, {pipeline_mode = #tpu.pipeline_mode<synchronous>, transform_indices = @transform_4, window_bounds = array<i64: 1, 64>}, {pipeline_mode = #tpu.pipeline_mode<synchronous>, transform_indices = @transform_5, window_bounds = array<i64: 16, 64, 128>}, {pipeline_mode = #tpu.pipeline_mode<synchronous>, transform_indices = @transform_6, window_bounds = array<i64: 1, 128>}, {pipeline_mode = #tpu.pipeline_mode<synchronous>, transform_indices = @transform_7, window_bounds = array<i64: 16, 128, 256>}, {pipeline_mode = #tpu.pipeline_mode<synchronous>, transform_indices = @transform_8, window_bounds = array<i64: 1, 256>}, {transform_indices = @transform_9, window_bounds = array<i64: 1, 4, 256>}]} {
    %cst = arith.constant 0.000000e+00 : f32
    %0 = vector.broadcast %cst : f32 to vector<31x8x32xf32>
    %c0 = arith.constant 0 : index
    %c32 = arith.constant 32 : index
    %c0_0 = arith.constant 0 : index
    %1 = vector.load %arg11[%c0, %c32, %c0_0] : memref<31x40x32xf32, #tpu.memory_space<vmem>>, vector<31x8x32xf32>
    tpu.vector_store %arg11[%c0, %c32, %c0_0], %0 {strides = array<i32>} : memref<31x40x32xf32, #tpu.memory_space<vmem>>, vector<31x8x32xf32>,
    %cst_1 = arith.constant 0.000000e+00 : f32
    %2 = vector.broadcast %cst_1 : f32 to vector<14x8x64xf32>
    %c0_2 = arith.constant 0 : index
    %c16 = arith.constant 16 : index
    %c0_3 = arith.constant 0 : index
    %3 = vector.load %arg12[%c0_2, %c16, %c0_3] : memref<14x24x64xf32, #tpu.memory_space<vmem>>, vector<14x8x64xf32>
    tpu.vector_store %arg12[%c0_2, %c16, %c0_3], %2 {strides = array<i32>} : memref<14x24x64xf32, #tpu.memory_space<vmem>>, vector<14x8x64xf32>,
    %cst_4 = arith.constant 0.000000e+00 : f32
    %4 = vector.broadcast %cst_4 : f32 to vector<6x16x128xf32>
    %c0_5 = arith.constant 0 : index
    %c8 = arith.constant 8 : index
    %c0_6 = arith.constant 0 : index
    %5 = vector.load %arg13[%c0_5, %c8, %c0_6] : memref<6x24x128xf32, #tpu.memory_space<vmem>>, vector<6x16x128xf32>
    tpu.vector_store %arg13[%c0_5, %c8, %c0_6], %4 {strides = array<i32>} : memref<6x24x128xf32, #tpu.memory_space<vmem>>, vector<6x16x128xf32>,
    %c0_7 = arith.constant 0 : index
    %c0_8 = arith.constant 0 : index
    %c0_9 = arith.constant 0 : index
    %6 = vector.load %arg1[%c0_7, %c0_8, %c0_9] : memref<1x992x48xbf16, #tpu.memory_space<vmem>>, vector<1x256x48xbf16>
    %7 = vector.shape_cast %6 : vector<1x256x48xbf16> to vector<256x48xbf16>
    %c0_10 = arith.constant 0 : index
    %c0_11 = arith.constant 0 : index
    %8 = vector.load %arg2[%c0_10, %c0_11] : memref<48x32xbf16, #tpu.memory_space<vmem>>, vector<48x32xbf16>
    %cst_12 = arith.constant dense<0.000000e+00> : vector<256x32xf32>
    %9 = tpu.matmul %7, %8, %cst_12 {dimension_numbers = #tpu.dot_dimension_numbers<[1], [0], [0], [1], [0, 0, 1, 1], [], []>} : vector<256x48xbf16>, vector<48x32xbf16>, vector<256x32xf32> -> vector<256x32xf32>
    %c0_13 = arith.constant 0 : index
    %c0_14 = arith.constant 0 : index
    %10 = vector.load %arg3[%c0_13, %c0_14] : memref<1x32xf32, #tpu.memory_space<vmem>>, vector<1x32xf32>
    %11 = vector.broadcast %10 : vector<1x32xf32> to vector<256x32xf32>
    %12 = arith.addf %9, %11 : vector<256x32xf32>
    %cst_15 = arith.constant 0.000000e+00 : f32
    %13 = vector.broadcast %cst_15 : f32 to vector<256x32xf32>
    %14 = arith.cmpf ogt, %12, %13 : vector<256x32xf32>
    %cst_16 = arith.constant 0.000000e+00 : f32
    %15 = vector.broadcast %cst_16 : f32 to vector<256x32xf32>
    %16 = arith.minimumf %12, %15 : vector<256x32xf32>
    %17 = math.exp %16 : vector<256x32xf32>
    %cst_17 = arith.constant 1.000000e+00 : f32
    %18 = vector.broadcast %cst_17 : f32 to vector<256x32xf32>
    %19 = arith.subf %17, %18 : vector<256x32xf32>
    %20 = arith.select %14, %12, %19 : vector<256x32xi1>, vector<256x32xf32>
    %21 = vector.shape_cast %20 : vector<256x32xf32> to vector<8x32x32xf32>
    %c0_18 = arith.constant 0 : index
    %c0_19 = arith.constant 0 : index
    %c0_20 = arith.constant 0 : index
    %22 = vector.load %arg11[%c0_18, %c0_19, %c0_20] : memref<31x40x32xf32, #tpu.memory_space<vmem>>, vector<8x32x32xf32>
    tpu.vector_store %arg11[%c0_18, %c0_19, %c0_20], %21 {strides = array<i32>} : memref<31x40x32xf32, #tpu.memory_space<vmem>>, vector<8x32x32xf32>,
    %c0_21 = arith.constant 0 : index
    %c256 = arith.constant 256 : index
    %c0_22 = arith.constant 0 : index
    %23 = vector.load %arg1[%c0_21, %c256, %c0_22] : memref<1x992x48xbf16, #tpu.memory_space<vmem>>, vector<1x256x48xbf16>
    %24 = vector.shape_cast %23 : vector<1x256x48xbf16> to vector<256x48xbf16>
    %c0_23 = arith.constant 0 : index
    %c0_24 = arith.constant 0 : index
    %25 = vector.load %arg2[%c0_23, %c0_24] : memref<48x32xbf16, #tpu.memory_space<vmem>>, vector<48x32xbf16>
    %cst_25 = arith.constant dense<0.000000e+00> : vector<256x32xf32>
    %26 = tpu.matmul %24, %25, %cst_25 {dimension_numbers = #tpu.dot_dimension_numbers<[1], [0], [0], [1], [0, 0, 1, 1], [], []>} : vector<256x48xbf16>, vector<48x32xbf16>, vector<256x32xf32> -> vector<256x32xf32>
    %c0_26 = arith.constant 0 : index
    %c0_27 = arith.constant 0 : index
    %27 = vector.load %arg3[%c0_26, %c0_27] : memref<1x32xf32, #tpu.memory_space<vmem>>, vector<1x32xf32>
    %28 = vector.broadcast %27 : vector<1x32xf32> to vector<256x32xf32>
    %29 = arith.addf %26, %28 : vector<256x32xf32>
    %cst_28 = arith.constant 0.000000e+00 : f32
    %30 = vector.broadcast %cst_28 : f32 to vector<256x32xf32>
    %31 = arith.cmpf ogt, %29, %30 : vector<256x32xf32>
    %cst_29 = arith.constant 0.000000e+00 : f32
    %32 = vector.broadcast %cst_29 : f32 to vector<256x32xf32>
    %33 = arith.minimumf %29, %32 : vector<256x32xf32>
    %34 = math.exp %33 : vector<256x32xf32>
    %cst_30 = arith.constant 1.000000e+00 : f32
    %35 = vector.broadcast %cst_30 : f32 to vector<256x32xf32>
    %36 = arith.subf %34, %35 : vector<256x32xf32>
    %37 = arith.select %31, %29, %36 : vector<256x32xi1>, vector<256x32xf32>
    %38 = vector.shape_cast %37 : vector<256x32xf32> to vector<8x32x32xf32>
    %c8_31 = arith.constant 8 : index
    %c0_32 = arith.constant 0 : index
    %c0_33 = arith.constant 0 : index
    %39 = vector.load %arg11[%c8_31, %c0_32, %c0_33] : memref<31x40x32xf32, #tpu.memory_space<vmem>>, vector<8x32x32xf32>
    tpu.vector_store %arg11[%c8_31, %c0_32, %c0_33], %38 {strides = array<i32>} : memref<31x40x32xf32, #tpu.memory_space<vmem>>, vector<8x32x32xf32>,
    %c0_34 = arith.constant 0 : index
    %c512 = arith.constant 512 : index
    %c0_35 = arith.constant 0 : index
    %40 = vector.load %arg1[%c0_34, %c512, %c0_35] : memref<1x992x48xbf16, #tpu.memory_space<vmem>>, vector<1x256x48xbf16>
    %41 = vector.shape_cast %40 : vector<1x256x48xbf16> to vector<256x48xbf16>
    %c0_36 = arith.constant 0 : index
    %c0_37 = arith.constant 0 : index
    %42 = vector.load %arg2[%c0_36, %c0_37] : memref<48x32xbf16, #tpu.memory_space<vmem>>, vector<48x32xbf16>
    %cst_38 = arith.constant dense<0.000000e+00> : vector<256x32xf32>
    %43 = tpu.matmul %41, %42, %cst_38 {dimension_numbers = #tpu.dot_dimension_numbers<[1], [0], [0], [1], [0, 0, 1, 1], [], []>} : vector<256x48xbf16>, vector<48x32xbf16>, vector<256x32xf32> -> vector<256x32xf32>
    %c0_39 = arith.constant 0 : index
    %c0_40 = arith.constant 0 : index
    %44 = vector.load %arg3[%c0_39, %c0_40] : memref<1x32xf32, #tpu.memory_space<vmem>>, vector<1x32xf32>
    %45 = vector.broadcast %44 : vector<1x32xf32> to vector<256x32xf32>
    %46 = arith.addf %43, %45 : vector<256x32xf32>
    %cst_41 = arith.constant 0.000000e+00 : f32
    %47 = vector.broadcast %cst_41 : f32 to vector<256x32xf32>
    %48 = arith.cmpf ogt, %46, %47 : vector<256x32xf32>
    %cst_42 = arith.constant 0.000000e+00 : f32
    %49 = vector.broadcast %cst_42 : f32 to vector<256x32xf32>
    %50 = arith.minimumf %46, %49 : vector<256x32xf32>
    %51 = math.exp %50 : vector<256x32xf32>
    %cst_43 = arith.constant 1.000000e+00 : f32
    %52 = vector.broadcast %cst_43 : f32 to vector<256x32xf32>
    %53 = arith.subf %51, %52 : vector<256x32xf32>
    %54 = arith.select %48, %46, %53 : vector<256x32xi1>, vector<256x32xf32>
    %55 = vector.shape_cast %54 : vector<256x32xf32> to vector<8x32x32xf32>
    %c16_44 = arith.constant 16 : index
    %c0_45 = arith.constant 0 : index
    %c0_46 = arith.constant 0 : index
    %56 = vector.load %arg11[%c16_44, %c0_45, %c0_46] : memref<31x40x32xf32, #tpu.memory_space<vmem>>, vector<8x32x32xf32>
    tpu.vector_store %arg11[%c16_44, %c0_45, %c0_46], %55 {strides = array<i32>} : memref<31x40x32xf32, #tpu.memory_space<vmem>>, vector<8x32x32xf32>,
    %c0_47 = arith.constant 0 : index
    %c768 = arith.constant 768 : index
    %c0_48 = arith.constant 0 : index
    %57 = vector.load %arg1[%c0_47, %c768, %c0_48] : memref<1x992x48xbf16, #tpu.memory_space<vmem>>, vector<1x224x48xbf16>
    %58 = vector.shape_cast %57 : vector<1x224x48xbf16> to vector<224x48xbf16>
    %c0_49 = arith.constant 0 : index
    %c0_50 = arith.constant 0 : index
    %59 = vector.load %arg2[%c0_49, %c0_50] : memref<48x32xbf16, #tpu.memory_space<vmem>>, vector<48x32xbf16>
    %cst_51 = arith.constant dense<0.000000e+00> : vector<224x32xf32>
    %60 = tpu.matmul %58, %59, %cst_51 {dimension_numbers = #tpu.dot_dimension_numbers<[1], [0], [0], [1], [0, 0, 1, 1], [], []>} : vector<224x48xbf16>, vector<48x32xbf16>, vector<224x32xf32> -> vector<224x32xf32>
    %c0_52 = arith.constant 0 : index
    %c0_53 = arith.constant 0 : index
    %61 = vector.load %arg3[%c0_52, %c0_53] : memref<1x32xf32, #tpu.memory_space<vmem>>, vector<1x32xf32>
    %62 = vector.broadcast %61 : vector<1x32xf32> to vector<224x32xf32>
    %63 = arith.addf %60, %62 : vector<224x32xf32>
    %cst_54 = arith.constant 0.000000e+00 : f32
    %64 = vector.broadcast %cst_54 : f32 to vector<224x32xf32>
    %65 = arith.cmpf ogt, %63, %64 : vector<224x32xf32>
    %cst_55 = arith.constant 0.000000e+00 : f32
    %66 = vector.broadcast %cst_55 : f32 to vector<224x32xf32>
    %67 = arith.minimumf %63, %66 : vector<224x32xf32>
    %68 = math.exp %67 : vector<224x32xf32>
    %cst_56 = arith.constant 1.000000e+00 : f32
    %69 = vector.broadcast %cst_56 : f32 to vector<224x32xf32>
    %70 = arith.subf %68, %69 : vector<224x32xf32>
    %71 = arith.select %65, %63, %70 : vector<224x32xi1>, vector<224x32xf32>
    %72 = vector.shape_cast %71 : vector<224x32xf32> to vector<7x32x32xf32>
    %c24 = arith.constant 24 : index
    %c0_57 = arith.constant 0 : index
    %c0_58 = arith.constant 0 : index
    %73 = vector.load %arg11[%c24, %c0_57, %c0_58] : memref<31x40x32xf32, #tpu.memory_space<vmem>>, vector<7x32x32xf32>
    tpu.vector_store %arg11[%c24, %c0_57, %c0_58], %72 {strides = array<i32>} : memref<31x40x32xf32, #tpu.memory_space<vmem>>, vector<7x32x32xf32>,
    %cst_59 = arith.constant 0.000000e+00 : f32
    %74 = vector.broadcast %cst_59 : f32 to vector<224x64xf32>
    %c0_60 = arith.constant 0 : index
    %c0_61 = arith.constant 0 : index
    %c0_62 = arith.constant 0 : index
    %75 = tpu.strided_load %arg11[%c0_60, %c0_61, %c0_62] {strides = array<i32: 2, 2, 1>} : memref<31x40x32xf32, #tpu.memory_space<vmem>>, vector<14x16x32xf32>
    %76 = vector.shape_cast %75 : vector<14x16x32xf32> to vector<224x32xf32>
    %77 = arith.truncf %76 : vector<224x32xf32> to vector<224x32xbf16>
    %c0_63 = arith.constant 0 : index
    %c0_64 = arith.constant 0 : index
    %c0_65 = arith.constant 0 : index
    %78 = vector.load %arg4[%c0_63, %c0_64, %c0_65] : memref<16x32x64xbf16, #tpu.memory_space<vmem>>, vector<1x32x64xbf16>
    %79 = vector.shape_cast %78 : vector<1x32x64xbf16> to vector<32x64xbf16>
    %cst_66 = arith.constant dense<0.000000e+00> : vector<224x64xf32>
    %80 = tpu.matmul %77, %79, %cst_66 {dimension_numbers = #tpu.dot_dimension_numbers<[1], [0], [0], [1], [0, 0, 1, 1], [], []>} : vector<224x32xbf16>, vector<32x64xbf16>, vector<224x64xf32> -> vector<224x64xf32>
    %81 = arith.addf %74, %80 : vector<224x64xf32>
    %c0_67 = arith.constant 0 : index
    %c1 = arith.constant 1 : index
    %c0_68 = arith.constant 0 : index
    %82 = tpu.strided_load %arg11[%c0_67, %c1, %c0_68] {strides = array<i32: 2, 2, 1>} : memref<31x40x32xf32, #tpu.memory_space<vmem>>, vector<14x16x32xf32>
    %83 = vector.shape_cast %82 : vector<14x16x32xf32> to vector<224x32xf32>
    %84 = arith.truncf %83 : vector<224x32xf32> to vector<224x32xbf16>
    %c1_69 = arith.constant 1 : index
    %c0_70 = arith.constant 0 : index
    %c0_71 = arith.constant 0 : index
    %85 = vector.load %arg4[%c1_69, %c0_70, %c0_71] : memref<16x32x64xbf16, #tpu.memory_space<vmem>>, vector<1x32x64xbf16>
    %86 = vector.shape_cast %85 : vector<1x32x64xbf16> to vector<32x64xbf16>
    %cst_72 = arith.constant dense<0.000000e+00> : vector<224x64xf32>
    %87 = tpu.matmul %84, %86, %cst_72 {dimension_numbers = #tpu.dot_dimension_numbers<[1], [0], [0], [1], [0, 0, 1, 1], [], []>} : vector<224x32xbf16>, vector<32x64xbf16>, vector<224x64xf32> -> vector<224x64xf32>
    %88 = arith.addf %81, %87 : vector<224x64xf32>
    %c0_73 = arith.constant 0 : index
    %c2 = arith.constant 2 : index
    %c0_74 = arith.constant 0 : index
    %89 = tpu.strided_load %arg11[%c0_73, %c2, %c0_74] {strides = array<i32: 2, 2, 1>} : memref<31x40x32xf32, #tpu.memory_space<vmem>>, vector<14x16x32xf32>
    %90 = vector.shape_cast %89 : vector<14x16x32xf32> to vector<224x32xf32>
    %91 = arith.truncf %90 : vector<224x32xf32> to vector<224x32xbf16>
    %c2_75 = arith.constant 2 : index
    %c0_76 = arith.constant 0 : index
    %c0_77 = arith.constant 0 : index
    %92 = vector.load %arg4[%c2_75, %c0_76, %c0_77] : memref<16x32x64xbf16, #tpu.memory_space<vmem>>, vector<1x32x64xbf16>
    %93 = vector.shape_cast %92 : vector<1x32x64xbf16> to vector<32x64xbf16>
    %cst_78 = arith.constant dense<0.000000e+00> : vector<224x64xf32>
    %94 = tpu.matmul %91, %93, %cst_78 {dimension_numbers = #tpu.dot_dimension_numbers<[1], [0], [0], [1], [0, 0, 1, 1], [], []>} : vector<224x32xbf16>, vector<32x64xbf16>, vector<224x64xf32> -> vector<224x64xf32>
    %95 = arith.addf %88, %94 : vector<224x64xf32>
    %c0_79 = arith.constant 0 : index
    %c3 = arith.constant 3 : index
    %c0_80 = arith.constant 0 : index
    %96 = tpu.strided_load %arg11[%c0_79, %c3, %c0_80] {strides = array<i32: 2, 2, 1>} : memref<31x40x32xf32, #tpu.memory_space<vmem>>, vector<14x16x32xf32>
    %97 = vector.shape_cast %96 : vector<14x16x32xf32> to vector<224x32xf32>
    %98 = arith.truncf %97 : vector<224x32xf32> to vector<224x32xbf16>
    %c3_81 = arith.constant 3 : index
    %c0_82 = arith.constant 0 : index
    %c0_83 = arith.constant 0 : index
    %99 = vector.load %arg4[%c3_81, %c0_82, %c0_83] : memref<16x32x64xbf16, #tpu.memory_space<vmem>>, vector<1x32x64xbf16>
    %100 = vector.shape_cast %99 : vector<1x32x64xbf16> to vector<32x64xbf16>
    %cst_84 = arith.constant dense<0.000000e+00> : vector<224x64xf32>
    %101 = tpu.matmul %98, %100, %cst_84 {dimension_numbers = #tpu.dot_dimension_numbers<[1], [0], [0], [1], [0, 0, 1, 1], [], []>} : vector<224x32xbf16>, vector<32x64xbf16>, vector<224x64xf32> -> vector<224x64xf32>
    %102 = arith.addf %95, %101 : vector<224x64xf32>
    %c1_85 = arith.constant 1 : index
    %c0_86 = arith.constant 0 : index
    %c0_87 = arith.constant 0 : index
    %103 = tpu.strided_load %arg11[%c1_85, %c0_86, %c0_87] {strides = array<i32: 2, 2, 1>} : memref<31x40x32xf32, #tpu.memory_space<vmem>>, vector<14x16x32xf32>
    %104 = vector.shape_cast %103 : vector<14x16x32xf32> to vector<224x32xf32>
    %105 = arith.truncf %104 : vector<224x32xf32> to vector<224x32xbf16>
    %c4 = arith.constant 4 : index
    %c0_88 = arith.constant 0 : index
    %c0_89 = arith.constant 0 : index
    %106 = vector.load %arg4[%c4, %c0_88, %c0_89] : memref<16x32x64xbf16, #tpu.memory_space<vmem>>, vector<1x32x64xbf16>
    %107 = vector.shape_cast %106 : vector<1x32x64xbf16> to vector<32x64xbf16>
    %cst_90 = arith.constant dense<0.000000e+00> : vector<224x64xf32>
    %108 = tpu.matmul %105, %107, %cst_90 {dimension_numbers = #tpu.dot_dimension_numbers<[1], [0], [0], [1], [0, 0, 1, 1], [], []>} : vector<224x32xbf16>, vector<32x64xbf16>, vector<224x64xf32> -> vector<224x64xf32>
    %109 = arith.addf %102, %108 : vector<224x64xf32>
    %c1_91 = arith.constant 1 : index
    %c1_92 = arith.constant 1 : index
    %c0_93 = arith.constant 0 : index
    %110 = tpu.strided_load %arg11[%c1_91, %c1_92, %c0_93] {strides = array<i32: 2, 2, 1>} : memref<31x40x32xf32, #tpu.memory_space<vmem>>, vector<14x16x32xf32>
    %111 = vector.shape_cast %110 : vector<14x16x32xf32> to vector<224x32xf32>
    %112 = arith.truncf %111 : vector<224x32xf32> to vector<224x32xbf16>
    %c5 = arith.constant 5 : index
    %c0_94 = arith.constant 0 : index
    %c0_95 = arith.constant 0 : index
    %113 = vector.load %arg4[%c5, %c0_94, %c0_95] : memref<16x32x64xbf16, #tpu.memory_space<vmem>>, vector<1x32x64xbf16>
    %114 = vector.shape_cast %113 : vector<1x32x64xbf16> to vector<32x64xbf16>
    %cst_96 = arith.constant dense<0.000000e+00> : vector<224x64xf32>
    %115 = tpu.matmul %112, %114, %cst_96 {dimension_numbers = #tpu.dot_dimension_numbers<[1], [0], [0], [1], [0, 0, 1, 1], [], []>} : vector<224x32xbf16>, vector<32x64xbf16>, vector<224x64xf32> -> vector<224x64xf32>
    %116 = arith.addf %109, %115 : vector<224x64xf32>
    %c1_97 = arith.constant 1 : index
    %c2_98 = arith.constant 2 : index
    %c0_99 = arith.constant 0 : index
    %117 = tpu.strided_load %arg11[%c1_97, %c2_98, %c0_99] {strides = array<i32: 2, 2, 1>} : memref<31x40x32xf32, #tpu.memory_space<vmem>>, vector<14x16x32xf32>
    %118 = vector.shape_cast %117 : vector<14x16x32xf32> to vector<224x32xf32>
    %119 = arith.truncf %118 : vector<224x32xf32> to vector<224x32xbf16>
    %c6 = arith.constant 6 : index
    %c0_100 = arith.constant 0 : index
    %c0_101 = arith.constant 0 : index
    %120 = vector.load %arg4[%c6, %c0_100, %c0_101] : memref<16x32x64xbf16, #tpu.memory_space<vmem>>, vector<1x32x64xbf16>
    %121 = vector.shape_cast %120 : vector<1x32x64xbf16> to vector<32x64xbf16>
    %cst_102 = arith.constant dense<0.000000e+00> : vector<224x64xf32>
    %122 = tpu.matmul %119, %121, %cst_102 {dimension_numbers = #tpu.dot_dimension_numbers<[1], [0], [0], [1], [0, 0, 1, 1], [], []>} : vector<224x32xbf16>, vector<32x64xbf16>, vector<224x64xf32> -> vector<224x64xf32>
    %123 = arith.addf %116, %122 : vector<224x64xf32>
    %c1_103 = arith.constant 1 : index
    %c3_104 = arith.constant 3 : index
    %c0_105 = arith.constant 0 : index
    %124 = tpu.strided_load %arg11[%c1_103, %c3_104, %c0_105] {strides = array<i32: 2, 2, 1>} : memref<31x40x32xf32, #tpu.memory_space<vmem>>, vector<14x16x32xf32>
    %125 = vector.shape_cast %124 : vector<14x16x32xf32> to vector<224x32xf32>
    %126 = arith.truncf %125 : vector<224x32xf32> to vector<224x32xbf16>
    %c7 = arith.constant 7 : index
    %c0_106 = arith.constant 0 : index
    %c0_107 = arith.constant 0 : index
    %127 = vector.load %arg4[%c7, %c0_106, %c0_107] : memref<16x32x64xbf16, #tpu.memory_space<vmem>>, vector<1x32x64xbf16>
    %128 = vector.shape_cast %127 : vector<1x32x64xbf16> to vector<32x64xbf16>
    %cst_108 = arith.constant dense<0.000000e+00> : vector<224x64xf32>
    %129 = tpu.matmul %126, %128, %cst_108 {dimension_numbers = #tpu.dot_dimension_numbers<[1], [0], [0], [1], [0, 0, 1, 1], [], []>} : vector<224x32xbf16>, vector<32x64xbf16>, vector<224x64xf32> -> vector<224x64xf32>
    %130 = arith.addf %123, %129 : vector<224x64xf32>
    %c2_109 = arith.constant 2 : index
    %c0_110 = arith.constant 0 : index
    %c0_111 = arith.constant 0 : index
    %131 = tpu.strided_load %arg11[%c2_109, %c0_110, %c0_111] {strides = array<i32: 2, 2, 1>} : memref<31x40x32xf32, #tpu.memory_space<vmem>>, vector<14x16x32xf32>
    %132 = vector.shape_cast %131 : vector<14x16x32xf32> to vector<224x32xf32>
    %133 = arith.truncf %132 : vector<224x32xf32> to vector<224x32xbf16>
    %c8_112 = arith.constant 8 : index
    %c0_113 = arith.constant 0 : index
    %c0_114 = arith.constant 0 : index
    %134 = vector.load %arg4[%c8_112, %c0_113, %c0_114] : memref<16x32x64xbf16, #tpu.memory_space<vmem>>, vector<1x32x64xbf16>
    %135 = vector.shape_cast %134 : vector<1x32x64xbf16> to vector<32x64xbf16>
    %cst_115 = arith.constant dense<0.000000e+00> : vector<224x64xf32>
    %136 = tpu.matmul %133, %135, %cst_115 {dimension_numbers = #tpu.dot_dimension_numbers<[1], [0], [0], [1], [0, 0, 1, 1], [], []>} : vector<224x32xbf16>, vector<32x64xbf16>, vector<224x64xf32> -> vector<224x64xf32>
    %137 = arith.addf %130, %136 : vector<224x64xf32>
    %c2_116 = arith.constant 2 : index
    %c1_117 = arith.constant 1 : index
    %c0_118 = arith.constant 0 : index
    %138 = tpu.strided_load %arg11[%c2_116, %c1_117, %c0_118] {strides = array<i32: 2, 2, 1>} : memref<31x40x32xf32, #tpu.memory_space<vmem>>, vector<14x16x32xf32>
    %139 = vector.shape_cast %138 : vector<14x16x32xf32> to vector<224x32xf32>
    %140 = arith.truncf %139 : vector<224x32xf32> to vector<224x32xbf16>
    %c9 = arith.constant 9 : index
    %c0_119 = arith.constant 0 : index
    %c0_120 = arith.constant 0 : index
    %141 = vector.load %arg4[%c9, %c0_119, %c0_120] : memref<16x32x64xbf16, #tpu.memory_space<vmem>>, vector<1x32x64xbf16>
    %142 = vector.shape_cast %141 : vector<1x32x64xbf16> to vector<32x64xbf16>
    %cst_121 = arith.constant dense<0.000000e+00> : vector<224x64xf32>
    %143 = tpu.matmul %140, %142, %cst_121 {dimension_numbers = #tpu.dot_dimension_numbers<[1], [0], [0], [1], [0, 0, 1, 1], [], []>} : vector<224x32xbf16>, vector<32x64xbf16>, vector<224x64xf32> -> vector<224x64xf32>
    %144 = arith.addf %137, %143 : vector<224x64xf32>
    %c2_122 = arith.constant 2 : index
    %c2_123 = arith.constant 2 : index
    %c0_124 = arith.constant 0 : index
    %145 = tpu.strided_load %arg11[%c2_122, %c2_123, %c0_124] {strides = array<i32: 2, 2, 1>} : memref<31x40x32xf32, #tpu.memory_space<vmem>>, vector<14x16x32xf32>
    %146 = vector.shape_cast %145 : vector<14x16x32xf32> to vector<224x32xf32>
    %147 = arith.truncf %146 : vector<224x32xf32> to vector<224x32xbf16>
    %c10 = arith.constant 10 : index
    %c0_125 = arith.constant 0 : index
    %c0_126 = arith.constant 0 : index
    %148 = vector.load %arg4[%c10, %c0_125, %c0_126] : memref<16x32x64xbf16, #tpu.memory_space<vmem>>, vector<1x32x64xbf16>
    %149 = vector.shape_cast %148 : vector<1x32x64xbf16> to vector<32x64xbf16>
    %cst_127 = arith.constant dense<0.000000e+00> : vector<224x64xf32>
    %150 = tpu.matmul %147, %149, %cst_127 {dimension_numbers = #tpu.dot_dimension_numbers<[1], [0], [0], [1], [0, 0, 1, 1], [], []>} : vector<224x32xbf16>, vector<32x64xbf16>, vector<224x64xf32> -> vector<224x64xf32>
    %151 = arith.addf %144, %150 : vector<224x64xf32>
    %c2_128 = arith.constant 2 : index
    %c3_129 = arith.constant 3 : index
    %c0_130 = arith.constant 0 : index
    %152 = tpu.strided_load %arg11[%c2_128, %c3_129, %c0_130] {strides = array<i32: 2, 2, 1>} : memref<31x40x32xf32, #tpu.memory_space<vmem>>, vector<14x16x32xf32>
    %153 = vector.shape_cast %152 : vector<14x16x32xf32> to vector<224x32xf32>
    %154 = arith.truncf %153 : vector<224x32xf32> to vector<224x32xbf16>
    %c11 = arith.constant 11 : index
    %c0_131 = arith.constant 0 : index
    %c0_132 = arith.constant 0 : index
    %155 = vector.load %arg4[%c11, %c0_131, %c0_132] : memref<16x32x64xbf16, #tpu.memory_space<vmem>>, vector<1x32x64xbf16>
    %156 = vector.shape_cast %155 : vector<1x32x64xbf16> to vector<32x64xbf16>
    %cst_133 = arith.constant dense<0.000000e+00> : vector<224x64xf32>
    %157 = tpu.matmul %154, %156, %cst_133 {dimension_numbers = #tpu.dot_dimension_numbers<[1], [0], [0], [1], [0, 0, 1, 1], [], []>} : vector<224x32xbf16>, vector<32x64xbf16>, vector<224x64xf32> -> vector<224x64xf32>
    %158 = arith.addf %151, %157 : vector<224x64xf32>
    %c3_134 = arith.constant 3 : index
    %c0_135 = arith.constant 0 : index
    %c0_136 = arith.constant 0 : index
    %159 = tpu.strided_load %arg11[%c3_134, %c0_135, %c0_136] {strides = array<i32: 2, 2, 1>} : memref<31x40x32xf32, #tpu.memory_space<vmem>>, vector<14x16x32xf32>
    %160 = vector.shape_cast %159 : vector<14x16x32xf32> to vector<224x32xf32>
    %161 = arith.truncf %160 : vector<224x32xf32> to vector<224x32xbf16>
    %c12 = arith.constant 12 : index
    %c0_137 = arith.constant 0 : index
    %c0_138 = arith.constant 0 : index
    %162 = vector.load %arg4[%c12, %c0_137, %c0_138] : memref<16x32x64xbf16, #tpu.memory_space<vmem>>, vector<1x32x64xbf16>
    %163 = vector.shape_cast %162 : vector<1x32x64xbf16> to vector<32x64xbf16>
    %cst_139 = arith.constant dense<0.000000e+00> : vector<224x64xf32>
    %164 = tpu.matmul %161, %163, %cst_139 {dimension_numbers = #tpu.dot_dimension_numbers<[1], [0], [0], [1], [0, 0, 1, 1], [], []>} : vector<224x32xbf16>, vector<32x64xbf16>, vector<224x64xf32> -> vector<224x64xf32>
    %165 = arith.addf %158, %164 : vector<224x64xf32>
    %c3_140 = arith.constant 3 : index
    %c1_141 = arith.constant 1 : index
    %c0_142 = arith.constant 0 : index
    %166 = tpu.strided_load %arg11[%c3_140, %c1_141, %c0_142] {strides = array<i32: 2, 2, 1>} : memref<31x40x32xf32, #tpu.memory_space<vmem>>, vector<14x16x32xf32>
    %167 = vector.shape_cast %166 : vector<14x16x32xf32> to vector<224x32xf32>
    %168 = arith.truncf %167 : vector<224x32xf32> to vector<224x32xbf16>
    %c13 = arith.constant 13 : index
    %c0_143 = arith.constant 0 : index
    %c0_144 = arith.constant 0 : index
    %169 = vector.load %arg4[%c13, %c0_143, %c0_144] : memref<16x32x64xbf16, #tpu.memory_space<vmem>>, vector<1x32x64xbf16>
    %170 = vector.shape_cast %169 : vector<1x32x64xbf16> to vector<32x64xbf16>
    %cst_145 = arith.constant dense<0.000000e+00> : vector<224x64xf32>
    %171 = tpu.matmul %168, %170, %cst_145 {dimension_numbers = #tpu.dot_dimension_numbers<[1], [0], [0], [1], [0, 0, 1, 1], [], []>} : vector<224x32xbf16>, vector<32x64xbf16>, vector<224x64xf32> -> vector<224x64xf32>
    %172 = arith.addf %165, %171 : vector<224x64xf32>
    %c3_146 = arith.constant 3 : index
    %c2_147 = arith.constant 2 : index
    %c0_148 = arith.constant 0 : index
    %173 = tpu.strided_load %arg11[%c3_146, %c2_147, %c0_148] {strides = array<i32: 2, 2, 1>} : memref<31x40x32xf32, #tpu.memory_space<vmem>>, vector<14x16x32xf32>
    %174 = vector.shape_cast %173 : vector<14x16x32xf32> to vector<224x32xf32>
    %175 = arith.truncf %174 : vector<224x32xf32> to vector<224x32xbf16>
    %c14 = arith.constant 14 : index
    %c0_149 = arith.constant 0 : index
    %c0_150 = arith.constant 0 : index
    %176 = vector.load %arg4[%c14, %c0_149, %c0_150] : memref<16x32x64xbf16, #tpu.memory_space<vmem>>, vector<1x32x64xbf16>
    %177 = vector.shape_cast %176 : vector<1x32x64xbf16> to vector<32x64xbf16>
    %cst_151 = arith.constant dense<0.000000e+00> : vector<224x64xf32>
    %178 = tpu.matmul %175, %177, %cst_151 {dimension_numbers = #tpu.dot_dimension_numbers<[1], [0], [0], [1], [0, 0, 1, 1], [], []>} : vector<224x32xbf16>, vector<32x64xbf16>, vector<224x64xf32> -> vector<224x64xf32>
    %179 = arith.addf %172, %178 : vector<224x64xf32>
    %c3_152 = arith.constant 3 : index
    %c3_153 = arith.constant 3 : index
    %c0_154 = arith.constant 0 : index
    %180 = tpu.strided_load %arg11[%c3_152, %c3_153, %c0_154] {strides = array<i32: 2, 2, 1>} : memref<31x40x32xf32, #tpu.memory_space<vmem>>, vector<14x16x32xf32>
    %181 = vector.shape_cast %180 : vector<14x16x32xf32> to vector<224x32xf32>
    %182 = arith.truncf %181 : vector<224x32xf32> to vector<224x32xbf16>
    %c15 = arith.constant 15 : index
    %c0_155 = arith.constant 0 : index
    %c0_156 = arith.constant 0 : index
    %183 = vector.load %arg4[%c15, %c0_155, %c0_156] : memref<16x32x64xbf16, #tpu.memory_space<vmem>>, vector<1x32x64xbf16>
    %184 = vector.shape_cast %183 : vector<1x32x64xbf16> to vector<32x64xbf16>
    %cst_157 = arith.constant dense<0.000000e+00> : vector<224x64xf32>
    %185 = tpu.matmul %182, %184, %cst_157 {dimension_numbers = #tpu.dot_dimension_numbers<[1], [0], [0], [1], [0, 0, 1, 1], [], []>} : vector<224x32xbf16>, vector<32x64xbf16>, vector<224x64xf32> -> vector<224x64xf32>
    %186 = arith.addf %179, %185 : vector<224x64xf32>
    %c0_158 = arith.constant 0 : index
    %c0_159 = arith.constant 0 : index
    %187 = vector.load %arg5[%c0_158, %c0_159] : memref<1x64xf32, #tpu.memory_space<vmem>>, vector<1x64xf32>
    %188 = vector.broadcast %187 : vector<1x64xf32> to vector<224x64xf32>
    %189 = arith.addf %186, %188 : vector<224x64xf32>
    %cst_160 = arith.constant 0.000000e+00 : f32
    %190 = vector.broadcast %cst_160 : f32 to vector<224x64xf32>
    %191 = arith.cmpf ogt, %189, %190 : vector<224x64xf32>
    %cst_161 = arith.constant 0.000000e+00 : f32
    %192 = vector.broadcast %cst_161 : f32 to vector<224x64xf32>
    %193 = arith.minimumf %189, %192 : vector<224x64xf32>
    %194 = math.exp %193 : vector<224x64xf32>
    %cst_162 = arith.constant 1.000000e+00 : f32
    %195 = vector.broadcast %cst_162 : f32 to vector<224x64xf32>
    %196 = arith.subf %194, %195 : vector<224x64xf32>
    %197 = arith.select %191, %189, %196 : vector<224x64xi1>, vector<224x64xf32>
    %198 = vector.shape_cast %197 : vector<224x64xf32> to vector<14x16x64xf32>
    %c0_163 = arith.constant 0 : index
    %c0_164 = arith.constant 0 : index
    %c0_165 = arith.constant 0 : index
    %199 = vector.load %arg12[%c0_163, %c0_164, %c0_165] : memref<14x24x64xf32, #tpu.memory_space<vmem>>, vector<14x16x64xf32>
    tpu.vector_store %arg12[%c0_163, %c0_164, %c0_165], %198 {strides = array<i32>} : memref<14x24x64xf32, #tpu.memory_space<vmem>>, vector<14x16x64xf32>,
    %cst_166 = arith.constant 0.000000e+00 : f32
    %200 = vector.broadcast %cst_166 : f32 to vector<48x128xf32>
    %c0_167 = arith.constant 0 : index
    %c0_168 = arith.constant 0 : index
    %c0_169 = arith.constant 0 : index
    %201 = tpu.strided_load %arg12[%c0_167, %c0_168, %c0_169] {strides = array<i32: 2, 2, 1>} : memref<14x24x64xf32, #tpu.memory_space<vmem>>, vector<6x8x64xf32>
    %202 = vector.shape_cast %201 : vector<6x8x64xf32> to vector<48x64xf32>
    %203 = arith.truncf %202 : vector<48x64xf32> to vector<48x64xbf16>
    %c0_170 = arith.constant 0 : index
    %c0_171 = arith.constant 0 : index
    %c0_172 = arith.constant 0 : index
    %204 = vector.load %arg6[%c0_170, %c0_171, %c0_172] : memref<16x64x128xbf16, #tpu.memory_space<vmem>>, vector<1x64x128xbf16>
    %205 = vector.shape_cast %204 : vector<1x64x128xbf16> to vector<64x128xbf16>
    %cst_173 = arith.constant dense<0.000000e+00> : vector<48x128xf32>
    %206 = tpu.matmul %203, %205, %cst_173 {dimension_numbers = #tpu.dot_dimension_numbers<[1], [0], [0], [1], [0, 0, 1, 1], [], []>} : vector<48x64xbf16>, vector<64x128xbf16>, vector<48x128xf32> -> vector<48x128xf32>
    %207 = arith.addf %200, %206 : vector<48x128xf32>
    %c0_174 = arith.constant 0 : index
    %c1_175 = arith.constant 1 : index
    %c0_176 = arith.constant 0 : index
    %208 = tpu.strided_load %arg12[%c0_174, %c1_175, %c0_176] {strides = array<i32: 2, 2, 1>} : memref<14x24x64xf32, #tpu.memory_space<vmem>>, vector<6x8x64xf32>
    %209 = vector.shape_cast %208 : vector<6x8x64xf32> to vector<48x64xf32>
    %210 = arith.truncf %209 : vector<48x64xf32> to vector<48x64xbf16>
    %c1_177 = arith.constant 1 : index
    %c0_178 = arith.constant 0 : index
    %c0_179 = arith.constant 0 : index
    %211 = vector.load %arg6[%c1_177, %c0_178, %c0_179] : memref<16x64x128xbf16, #tpu.memory_space<vmem>>, vector<1x64x128xbf16>
    %212 = vector.shape_cast %211 : vector<1x64x128xbf16> to vector<64x128xbf16>
    %cst_180 = arith.constant dense<0.000000e+00> : vector<48x128xf32>
    %213 = tpu.matmul %210, %212, %cst_180 {dimension_numbers = #tpu.dot_dimension_numbers<[1], [0], [0], [1], [0, 0, 1, 1], [], []>} : vector<48x64xbf16>, vector<64x128xbf16>, vector<48x128xf32> -> vector<48x128xf32>
    %214 = arith.addf %207, %213 : vector<48x128xf32>
    %c0_181 = arith.constant 0 : index
    %c2_182 = arith.constant 2 : index
    %c0_183 = arith.constant 0 : index
    %215 = tpu.strided_load %arg12[%c0_181, %c2_182, %c0_183] {strides = array<i32: 2, 2, 1>} : memref<14x24x64xf32, #tpu.memory_space<vmem>>, vector<6x8x64xf32>
    %216 = vector.shape_cast %215 : vector<6x8x64xf32> to vector<48x64xf32>
    %217 = arith.truncf %216 : vector<48x64xf32> to vector<48x64xbf16>
    %c2_184 = arith.constant 2 : index
    %c0_185 = arith.constant 0 : index
    %c0_186 = arith.constant 0 : index
    %218 = vector.load %arg6[%c2_184, %c0_185, %c0_186] : memref<16x64x128xbf16, #tpu.memory_space<vmem>>, vector<1x64x128xbf16>
    %219 = vector.shape_cast %218 : vector<1x64x128xbf16> to vector<64x128xbf16>
    %cst_187 = arith.constant dense<0.000000e+00> : vector<48x128xf32>
    %220 = tpu.matmul %217, %219, %cst_187 {dimension_numbers = #tpu.dot_dimension_numbers<[1], [0], [0], [1], [0, 0, 1, 1], [], []>} : vector<48x64xbf16>, vector<64x128xbf16>, vector<48x128xf32> -> vector<48x128xf32>
    %221 = arith.addf %214, %220 : vector<48x128xf32>
    %c0_188 = arith.constant 0 : index
    %c3_189 = arith.constant 3 : index
    %c0_190 = arith.constant 0 : index
    %222 = tpu.strided_load %arg12[%c0_188, %c3_189, %c0_190] {strides = array<i32: 2, 2, 1>} : memref<14x24x64xf32, #tpu.memory_space<vmem>>, vector<6x8x64xf32>
    %223 = vector.shape_cast %222 : vector<6x8x64xf32> to vector<48x64xf32>
    %224 = arith.truncf %223 : vector<48x64xf32> to vector<48x64xbf16>
    %c3_191 = arith.constant 3 : index
    %c0_192 = arith.constant 0 : index
    %c0_193 = arith.constant 0 : index
    %225 = vector.load %arg6[%c3_191, %c0_192, %c0_193] : memref<16x64x128xbf16, #tpu.memory_space<vmem>>, vector<1x64x128xbf16>
    %226 = vector.shape_cast %225 : vector<1x64x128xbf16> to vector<64x128xbf16>
    %cst_194 = arith.constant dense<0.000000e+00> : vector<48x128xf32>
    %227 = tpu.matmul %224, %226, %cst_194 {dimension_numbers = #tpu.dot_dimension_numbers<[1], [0], [0], [1], [0, 0, 1, 1], [], []>} : vector<48x64xbf16>, vector<64x128xbf16>, vector<48x128xf32> -> vector<48x128xf32>
    %228 = arith.addf %221, %227 : vector<48x128xf32>
    %c1_195 = arith.constant 1 : index
    %c0_196 = arith.constant 0 : index
    %c0_197 = arith.constant 0 : index
    %229 = tpu.strided_load %arg12[%c1_195, %c0_196, %c0_197] {strides = array<i32: 2, 2, 1>} : memref<14x24x64xf32, #tpu.memory_space<vmem>>, vector<6x8x64xf32>
    %230 = vector.shape_cast %229 : vector<6x8x64xf32> to vector<48x64xf32>
    %231 = arith.truncf %230 : vector<48x64xf32> to vector<48x64xbf16>
    %c4_198 = arith.constant 4 : index
    %c0_199 = arith.constant 0 : index
    %c0_200 = arith.constant 0 : index
    %232 = vector.load %arg6[%c4_198, %c0_199, %c0_200] : memref<16x64x128xbf16, #tpu.memory_space<vmem>>, vector<1x64x128xbf16>
    %233 = vector.shape_cast %232 : vector<1x64x128xbf16> to vector<64x128xbf16>
    %cst_201 = arith.constant dense<0.000000e+00> : vector<48x128xf32>
    %234 = tpu.matmul %231, %233, %cst_201 {dimension_numbers = #tpu.dot_dimension_numbers<[1], [0], [0], [1], [0, 0, 1, 1], [], []>} : vector<48x64xbf16>, vector<64x128xbf16>, vector<48x128xf32> -> vector<48x128xf32>
    %235 = arith.addf %228, %234 : vector<48x128xf32>
    %c1_202 = arith.constant 1 : index
    %c1_203 = arith.constant 1 : index
    %c0_204 = arith.constant 0 : index
    %236 = tpu.strided_load %arg12[%c1_202, %c1_203, %c0_204] {strides = array<i32: 2, 2, 1>} : memref<14x24x64xf32, #tpu.memory_space<vmem>>, vector<6x8x64xf32>
    %237 = vector.shape_cast %236 : vector<6x8x64xf32> to vector<48x64xf32>
    %238 = arith.truncf %237 : vector<48x64xf32> to vector<48x64xbf16>
    %c5_205 = arith.constant 5 : index
    %c0_206 = arith.constant 0 : index
    %c0_207 = arith.constant 0 : index
    %239 = vector.load %arg6[%c5_205, %c0_206, %c0_207] : memref<16x64x128xbf16, #tpu.memory_space<vmem>>, vector<1x64x128xbf16>
    %240 = vector.shape_cast %239 : vector<1x64x128xbf16> to vector<64x128xbf16>
    %cst_208 = arith.constant dense<0.000000e+00> : vector<48x128xf32>
    %241 = tpu.matmul %238, %240, %cst_208 {dimension_numbers = #tpu.dot_dimension_numbers<[1], [0], [0], [1], [0, 0, 1, 1], [], []>} : vector<48x64xbf16>, vector<64x128xbf16>, vector<48x128xf32> -> vector<48x128xf32>
    %242 = arith.addf %235, %241 : vector<48x128xf32>
    %c1_209 = arith.constant 1 : index
    %c2_210 = arith.constant 2 : index
    %c0_211 = arith.constant 0 : index
    %243 = tpu.strided_load %arg12[%c1_209, %c2_210, %c0_211] {strides = array<i32: 2, 2, 1>} : memref<14x24x64xf32, #tpu.memory_space<vmem>>, vector<6x8x64xf32>
    %244 = vector.shape_cast %243 : vector<6x8x64xf32> to vector<48x64xf32>
    %245 = arith.truncf %244 : vector<48x64xf32> to vector<48x64xbf16>
    %c6_212 = arith.constant 6 : index
    %c0_213 = arith.constant 0 : index
    %c0_214 = arith.constant 0 : index
    %246 = vector.load %arg6[%c6_212, %c0_213, %c0_214] : memref<16x64x128xbf16, #tpu.memory_space<vmem>>, vector<1x64x128xbf16>
    %247 = vector.shape_cast %246 : vector<1x64x128xbf16> to vector<64x128xbf16>
    %cst_215 = arith.constant dense<0.000000e+00> : vector<48x128xf32>
    %248 = tpu.matmul %245, %247, %cst_215 {dimension_numbers = #tpu.dot_dimension_numbers<[1], [0], [0], [1], [0, 0, 1, 1], [], []>} : vector<48x64xbf16>, vector<64x128xbf16>, vector<48x128xf32> -> vector<48x128xf32>
    %249 = arith.addf %242, %248 : vector<48x128xf32>
    %c1_216 = arith.constant 1 : index
    %c3_217 = arith.constant 3 : index
    %c0_218 = arith.constant 0 : index
    %250 = tpu.strided_load %arg12[%c1_216, %c3_217, %c0_218] {strides = array<i32: 2, 2, 1>} : memref<14x24x64xf32, #tpu.memory_space<vmem>>, vector<6x8x64xf32>
    %251 = vector.shape_cast %250 : vector<6x8x64xf32> to vector<48x64xf32>
    %252 = arith.truncf %251 : vector<48x64xf32> to vector<48x64xbf16>
    %c7_219 = arith.constant 7 : index
    %c0_220 = arith.constant 0 : index
    %c0_221 = arith.constant 0 : index
    %253 = vector.load %arg6[%c7_219, %c0_220, %c0_221] : memref<16x64x128xbf16, #tpu.memory_space<vmem>>, vector<1x64x128xbf16>
    %254 = vector.shape_cast %253 : vector<1x64x128xbf16> to vector<64x128xbf16>
    %cst_222 = arith.constant dense<0.000000e+00> : vector<48x128xf32>
    %255 = tpu.matmul %252, %254, %cst_222 {dimension_numbers = #tpu.dot_dimension_numbers<[1], [0], [0], [1], [0, 0, 1, 1], [], []>} : vector<48x64xbf16>, vector<64x128xbf16>, vector<48x128xf32> -> vector<48x128xf32>
    %256 = arith.addf %249, %255 : vector<48x128xf32>
    %c2_223 = arith.constant 2 : index
    %c0_224 = arith.constant 0 : index
    %c0_225 = arith.constant 0 : index
    %257 = tpu.strided_load %arg12[%c2_223, %c0_224, %c0_225] {strides = array<i32: 2, 2, 1>} : memref<14x24x64xf32, #tpu.memory_space<vmem>>, vector<6x8x64xf32>
    %258 = vector.shape_cast %257 : vector<6x8x64xf32> to vector<48x64xf32>
    %259 = arith.truncf %258 : vector<48x64xf32> to vector<48x64xbf16>
    %c8_226 = arith.constant 8 : index
    %c0_227 = arith.constant 0 : index
    %c0_228 = arith.constant 0 : index
    %260 = vector.load %arg6[%c8_226, %c0_227, %c0_228] : memref<16x64x128xbf16, #tpu.memory_space<vmem>>, vector<1x64x128xbf16>
    %261 = vector.shape_cast %260 : vector<1x64x128xbf16> to vector<64x128xbf16>
    %cst_229 = arith.constant dense<0.000000e+00> : vector<48x128xf32>
    %262 = tpu.matmul %259, %261, %cst_229 {dimension_numbers = #tpu.dot_dimension_numbers<[1], [0], [0], [1], [0, 0, 1, 1], [], []>} : vector<48x64xbf16>, vector<64x128xbf16>, vector<48x128xf32> -> vector<48x128xf32>
    %263 = arith.addf %256, %262 : vector<48x128xf32>
    %c2_230 = arith.constant 2 : index
    %c1_231 = arith.constant 1 : index
    %c0_232 = arith.constant 0 : index
    %264 = tpu.strided_load %arg12[%c2_230, %c1_231, %c0_232] {strides = array<i32: 2, 2, 1>} : memref<14x24x64xf32, #tpu.memory_space<vmem>>, vector<6x8x64xf32>
    %265 = vector.shape_cast %264 : vector<6x8x64xf32> to vector<48x64xf32>
    %266 = arith.truncf %265 : vector<48x64xf32> to vector<48x64xbf16>
    %c9_233 = arith.constant 9 : index
    %c0_234 = arith.constant 0 : index
    %c0_235 = arith.constant 0 : index
    %267 = vector.load %arg6[%c9_233, %c0_234, %c0_235] : memref<16x64x128xbf16, #tpu.memory_space<vmem>>, vector<1x64x128xbf16>
    %268 = vector.shape_cast %267 : vector<1x64x128xbf16> to vector<64x128xbf16>
    %cst_236 = arith.constant dense<0.000000e+00> : vector<48x128xf32>
    %269 = tpu.matmul %266, %268, %cst_236 {dimension_numbers = #tpu.dot_dimension_numbers<[1], [0], [0], [1], [0, 0, 1, 1], [], []>} : vector<48x64xbf16>, vector<64x128xbf16>, vector<48x128xf32> -> vector<48x128xf32>
    %270 = arith.addf %263, %269 : vector<48x128xf32>
    %c2_237 = arith.constant 2 : index
    %c2_238 = arith.constant 2 : index
    %c0_239 = arith.constant 0 : index
    %271 = tpu.strided_load %arg12[%c2_237, %c2_238, %c0_239] {strides = array<i32: 2, 2, 1>} : memref<14x24x64xf32, #tpu.memory_space<vmem>>, vector<6x8x64xf32>
    %272 = vector.shape_cast %271 : vector<6x8x64xf32> to vector<48x64xf32>
    %273 = arith.truncf %272 : vector<48x64xf32> to vector<48x64xbf16>
    %c10_240 = arith.constant 10 : index
    %c0_241 = arith.constant 0 : index
    %c0_242 = arith.constant 0 : index
    %274 = vector.load %arg6[%c10_240, %c0_241, %c0_242] : memref<16x64x128xbf16, #tpu.memory_space<vmem>>, vector<1x64x128xbf16>
    %275 = vector.shape_cast %274 : vector<1x64x128xbf16> to vector<64x128xbf16>
    %cst_243 = arith.constant dense<0.000000e+00> : vector<48x128xf32>
    %276 = tpu.matmul %273, %275, %cst_243 {dimension_numbers = #tpu.dot_dimension_numbers<[1], [0], [0], [1], [0, 0, 1, 1], [], []>} : vector<48x64xbf16>, vector<64x128xbf16>, vector<48x128xf32> -> vector<48x128xf32>
    %277 = arith.addf %270, %276 : vector<48x128xf32>
    %c2_244 = arith.constant 2 : index
    %c3_245 = arith.constant 3 : index
    %c0_246 = arith.constant 0 : index
    %278 = tpu.strided_load %arg12[%c2_244, %c3_245, %c0_246] {strides = array<i32: 2, 2, 1>} : memref<14x24x64xf32, #tpu.memory_space<vmem>>, vector<6x8x64xf32>
    %279 = vector.shape_cast %278 : vector<6x8x64xf32> to vector<48x64xf32>
    %280 = arith.truncf %279 : vector<48x64xf32> to vector<48x64xbf16>
    %c11_247 = arith.constant 11 : index
    %c0_248 = arith.constant 0 : index
    %c0_249 = arith.constant 0 : index
    %281 = vector.load %arg6[%c11_247, %c0_248, %c0_249] : memref<16x64x128xbf16, #tpu.memory_space<vmem>>, vector<1x64x128xbf16>
    %282 = vector.shape_cast %281 : vector<1x64x128xbf16> to vector<64x128xbf16>
    %cst_250 = arith.constant dense<0.000000e+00> : vector<48x128xf32>
    %283 = tpu.matmul %280, %282, %cst_250 {dimension_numbers = #tpu.dot_dimension_numbers<[1], [0], [0], [1], [0, 0, 1, 1], [], []>} : vector<48x64xbf16>, vector<64x128xbf16>, vector<48x128xf32> -> vector<48x128xf32>
    %284 = arith.addf %277, %283 : vector<48x128xf32>
    %c3_251 = arith.constant 3 : index
    %c0_252 = arith.constant 0 : index
    %c0_253 = arith.constant 0 : index
    %285 = tpu.strided_load %arg12[%c3_251, %c0_252, %c0_253] {strides = array<i32: 2, 2, 1>} : memref<14x24x64xf32, #tpu.memory_space<vmem>>, vector<6x8x64xf32>
    %286 = vector.shape_cast %285 : vector<6x8x64xf32> to vector<48x64xf32>
    %287 = arith.truncf %286 : vector<48x64xf32> to vector<48x64xbf16>
    %c12_254 = arith.constant 12 : index
    %c0_255 = arith.constant 0 : index
    %c0_256 = arith.constant 0 : index
    %288 = vector.load %arg6[%c12_254, %c0_255, %c0_256] : memref<16x64x128xbf16, #tpu.memory_space<vmem>>, vector<1x64x128xbf16>
    %289 = vector.shape_cast %288 : vector<1x64x128xbf16> to vector<64x128xbf16>
    %cst_257 = arith.constant dense<0.000000e+00> : vector<48x128xf32>
    %290 = tpu.matmul %287, %289, %cst_257 {dimension_numbers = #tpu.dot_dimension_numbers<[1], [0], [0], [1], [0, 0, 1, 1], [], []>} : vector<48x64xbf16>, vector<64x128xbf16>, vector<48x128xf32> -> vector<48x128xf32>
    %291 = arith.addf %284, %290 : vector<48x128xf32>
    %c3_258 = arith.constant 3 : index
    %c1_259 = arith.constant 1 : index
    %c0_260 = arith.constant 0 : index
    %292 = tpu.strided_load %arg12[%c3_258, %c1_259, %c0_260] {strides = array<i32: 2, 2, 1>} : memref<14x24x64xf32, #tpu.memory_space<vmem>>, vector<6x8x64xf32>
    %293 = vector.shape_cast %292 : vector<6x8x64xf32> to vector<48x64xf32>
    %294 = arith.truncf %293 : vector<48x64xf32> to vector<48x64xbf16>
    %c13_261 = arith.constant 13 : index
    %c0_262 = arith.constant 0 : index
    %c0_263 = arith.constant 0 : index
    %295 = vector.load %arg6[%c13_261, %c0_262, %c0_263] : memref<16x64x128xbf16, #tpu.memory_space<vmem>>, vector<1x64x128xbf16>
    %296 = vector.shape_cast %295 : vector<1x64x128xbf16> to vector<64x128xbf16>
    %cst_264 = arith.constant dense<0.000000e+00> : vector<48x128xf32>
    %297 = tpu.matmul %294, %296, %cst_264 {dimension_numbers = #tpu.dot_dimension_numbers<[1], [0], [0], [1], [0, 0, 1, 1], [], []>} : vector<48x64xbf16>, vector<64x128xbf16>, vector<48x128xf32> -> vector<48x128xf32>
    %298 = arith.addf %291, %297 : vector<48x128xf32>
    %c3_265 = arith.constant 3 : index
    %c2_266 = arith.constant 2 : index
    %c0_267 = arith.constant 0 : index
    %299 = tpu.strided_load %arg12[%c3_265, %c2_266, %c0_267] {strides = array<i32: 2, 2, 1>} : memref<14x24x64xf32, #tpu.memory_space<vmem>>, vector<6x8x64xf32>
    %300 = vector.shape_cast %299 : vector<6x8x64xf32> to vector<48x64xf32>
    %301 = arith.truncf %300 : vector<48x64xf32> to vector<48x64xbf16>
    %c14_268 = arith.constant 14 : index
    %c0_269 = arith.constant 0 : index
    %c0_270 = arith.constant 0 : index
    %302 = vector.load %arg6[%c14_268, %c0_269, %c0_270] : memref<16x64x128xbf16, #tpu.memory_space<vmem>>, vector<1x64x128xbf16>
    %303 = vector.shape_cast %302 : vector<1x64x128xbf16> to vector<64x128xbf16>
    %cst_271 = arith.constant dense<0.000000e+00> : vector<48x128xf32>
    %304 = tpu.matmul %301, %303, %cst_271 {dimension_numbers = #tpu.dot_dimension_numbers<[1], [0], [0], [1], [0, 0, 1, 1], [], []>} : vector<48x64xbf16>, vector<64x128xbf16>, vector<48x128xf32> -> vector<48x128xf32>
    %305 = arith.addf %298, %304 : vector<48x128xf32>
    %c3_272 = arith.constant 3 : index
    %c3_273 = arith.constant 3 : index
    %c0_274 = arith.constant 0 : index
    %306 = tpu.strided_load %arg12[%c3_272, %c3_273, %c0_274] {strides = array<i32: 2, 2, 1>} : memref<14x24x64xf32, #tpu.memory_space<vmem>>, vector<6x8x64xf32>
    %307 = vector.shape_cast %306 : vector<6x8x64xf32> to vector<48x64xf32>
    %308 = arith.truncf %307 : vector<48x64xf32> to vector<48x64xbf16>
    %c15_275 = arith.constant 15 : index
    %c0_276 = arith.constant 0 : index
    %c0_277 = arith.constant 0 : index
    %309 = vector.load %arg6[%c15_275, %c0_276, %c0_277] : memref<16x64x128xbf16, #tpu.memory_space<vmem>>, vector<1x64x128xbf16>
    %310 = vector.shape_cast %309 : vector<1x64x128xbf16> to vector<64x128xbf16>
    %cst_278 = arith.constant dense<0.000000e+00> : vector<48x128xf32>
    %311 = tpu.matmul %308, %310, %cst_278 {dimension_numbers = #tpu.dot_dimension_numbers<[1], [0], [0], [1], [0, 0, 1, 1], [], []>} : vector<48x64xbf16>, vector<64x128xbf16>, vector<48x128xf32> -> vector<48x128xf32>
    %312 = arith.addf %305, %311 : vector<48x128xf32>
    %c0_279 = arith.constant 0 : index
    %c0_280 = arith.constant 0 : index
    %313 = vector.load %arg7[%c0_279, %c0_280] : memref<1x128xf32, #tpu.memory_space<vmem>>, vector<1x128xf32>
    %314 = vector.broadcast %313 : vector<1x128xf32> to vector<48x128xf32>
    %315 = arith.addf %312, %314 : vector<48x128xf32>
    %cst_281 = arith.constant 0.000000e+00 : f32
    %316 = vector.broadcast %cst_281 : f32 to vector<48x128xf32>
    %317 = arith.cmpf ogt, %315, %316 : vector<48x128xf32>
    %cst_282 = arith.constant 0.000000e+00 : f32
    %318 = vector.broadcast %cst_282 : f32 to vector<48x128xf32>
    %319 = arith.minimumf %315, %318 : vector<48x128xf32>
    %320 = math.exp %319 : vector<48x128xf32>
    %cst_283 = arith.constant 1.000000e+00 : f32
    %321 = vector.broadcast %cst_283 : f32 to vector<48x128xf32>
    %322 = arith.subf %320, %321 : vector<48x128xf32>
    %323 = arith.select %317, %315, %322 : vector<48x128xi1>, vector<48x128xf32>
    %324 = vector.shape_cast %323 : vector<48x128xf32> to vector<6x8x128xf32>
    %c0_284 = arith.constant 0 : index
    %c0_285 = arith.constant 0 : index
    %c0_286 = arith.constant 0 : index
    %325 = vector.load %arg13[%c0_284, %c0_285, %c0_286] : memref<6x24x128xf32, #tpu.memory_space<vmem>>, vector<6x8x128xf32>
    tpu.vector_store %arg13[%c0_284, %c0_285, %c0_286], %324 {strides = array<i32>} : memref<6x24x128xf32, #tpu.memory_space<vmem>>, vector<6x8x128xf32>,
    %cst_287 = arith.constant 0.000000e+00 : f32
    %326 = vector.broadcast %cst_287 : f32 to vector<16x256xf32>
    %c0_288 = arith.constant 0 : index
    %c0_289 = arith.constant 0 : index
    %c0_290 = arith.constant 0 : index
    %327 = tpu.strided_load %arg13[%c0_288, %c0_289, %c0_290] {strides = array<i32: 2, 2, 1>} : memref<6x24x128xf32, #tpu.memory_space<vmem>>, vector<2x8x128xf32>
    %328 = vector.shape_cast %327 : vector<2x8x128xf32> to vector<16x128xf32>
    %329 = arith.truncf %328 : vector<16x128xf32> to vector<16x128xbf16>
    %c0_291 = arith.constant 0 : index
    %c0_292 = arith.constant 0 : index
    %c0_293 = arith.constant 0 : index
    %330 = vector.load %arg8[%c0_291, %c0_292, %c0_293] : memref<16x128x256xbf16, #tpu.memory_space<vmem>>, vector<1x128x256xbf16>
    %331 = vector.shape_cast %330 : vector<1x128x256xbf16> to vector<128x256xbf16>
    %cst_294 = arith.constant dense<0.000000e+00> : vector<16x256xf32>
    %332 = tpu.matmul %329, %331, %cst_294 {dimension_numbers = #tpu.dot_dimension_numbers<[1], [0], [0], [1], [0, 0, 1, 1], [], []>} : vector<16x128xbf16>, vector<128x256xbf16>, vector<16x256xf32> -> vector<16x256xf32>
    %333 = arith.addf %326, %332 : vector<16x256xf32>
    %c0_295 = arith.constant 0 : index
    %c1_296 = arith.constant 1 : index
    %c0_297 = arith.constant 0 : index
    %334 = tpu.strided_load %arg13[%c0_295, %c1_296, %c0_297] {strides = array<i32: 2, 2, 1>} : memref<6x24x128xf32, #tpu.memory_space<vmem>>, vector<2x8x128xf32>
    %335 = vector.shape_cast %334 : vector<2x8x128xf32> to vector<16x128xf32>
    %336 = arith.truncf %335 : vector<16x128xf32> to vector<16x128xbf16>
    %c1_298 = arith.constant 1 : index
    %c0_299 = arith.constant 0 : index
    %c0_300 = arith.constant 0 : index
    %337 = vector.load %arg8[%c1_298, %c0_299, %c0_300] : memref<16x128x256xbf16, #tpu.memory_space<vmem>>, vector<1x128x256xbf16>
    %338 = vector.shape_cast %337 : vector<1x128x256xbf16> to vector<128x256xbf16>
    %cst_301 = arith.constant dense<0.000000e+00> : vector<16x256xf32>
    %339 = tpu.matmul %336, %338, %cst_301 {dimension_numbers = #tpu.dot_dimension_numbers<[1], [0], [0], [1], [0, 0, 1, 1], [], []>} : vector<16x128xbf16>, vector<128x256xbf16>, vector<16x256xf32> -> vector<16x256xf32>
    %340 = arith.addf %333, %339 : vector<16x256xf32>
    %c0_302 = arith.constant 0 : index
    %c2_303 = arith.constant 2 : index
    %c0_304 = arith.constant 0 : index
    %341 = tpu.strided_load %arg13[%c0_302, %c2_303, %c0_304] {strides = array<i32: 2, 2, 1>} : memref<6x24x128xf32, #tpu.memory_space<vmem>>, vector<2x8x128xf32>
    %342 = vector.shape_cast %341 : vector<2x8x128xf32> to vector<16x128xf32>
    %343 = arith.truncf %342 : vector<16x128xf32> to vector<16x128xbf16>
    %c2_305 = arith.constant 2 : index
    %c0_306 = arith.constant 0 : index
    %c0_307 = arith.constant 0 : index
    %344 = vector.load %arg8[%c2_305, %c0_306, %c0_307] : memref<16x128x256xbf16, #tpu.memory_space<vmem>>, vector<1x128x256xbf16>
    %345 = vector.shape_cast %344 : vector<1x128x256xbf16> to vector<128x256xbf16>
    %cst_308 = arith.constant dense<0.000000e+00> : vector<16x256xf32>
    %346 = tpu.matmul %343, %345, %cst_308 {dimension_numbers = #tpu.dot_dimension_numbers<[1], [0], [0], [1], [0, 0, 1, 1], [], []>} : vector<16x128xbf16>, vector<128x256xbf16>, vector<16x256xf32> -> vector<16x256xf32>
    %347 = arith.addf %340, %346 : vector<16x256xf32>
    %c0_309 = arith.constant 0 : index
    %c3_310 = arith.constant 3 : index
    %c0_311 = arith.constant 0 : index
    %348 = tpu.strided_load %arg13[%c0_309, %c3_310, %c0_311] {strides = array<i32: 2, 2, 1>} : memref<6x24x128xf32, #tpu.memory_space<vmem>>, vector<2x8x128xf32>
    %349 = vector.shape_cast %348 : vector<2x8x128xf32> to vector<16x128xf32>
    %350 = arith.truncf %349 : vector<16x128xf32> to vector<16x128xbf16>
    %c3_312 = arith.constant 3 : index
    %c0_313 = arith.constant 0 : index
    %c0_314 = arith.constant 0 : index
    %351 = vector.load %arg8[%c3_312, %c0_313, %c0_314] : memref<16x128x256xbf16, #tpu.memory_space<vmem>>, vector<1x128x256xbf16>
    %352 = vector.shape_cast %351 : vector<1x128x256xbf16> to vector<128x256xbf16>
    %cst_315 = arith.constant dense<0.000000e+00> : vector<16x256xf32>
    %353 = tpu.matmul %350, %352, %cst_315 {dimension_numbers = #tpu.dot_dimension_numbers<[1], [0], [0], [1], [0, 0, 1, 1], [], []>} : vector<16x128xbf16>, vector<128x256xbf16>, vector<16x256xf32> -> vector<16x256xf32>
    %354 = arith.addf %347, %353 : vector<16x256xf32>
    %c1_316 = arith.constant 1 : index
    %c0_317 = arith.constant 0 : index
    %c0_318 = arith.constant 0 : index
    %355 = tpu.strided_load %arg13[%c1_316, %c0_317, %c0_318] {strides = array<i32: 2, 2, 1>} : memref<6x24x128xf32, #tpu.memory_space<vmem>>, vector<2x8x128xf32>
    %356 = vector.shape_cast %355 : vector<2x8x128xf32> to vector<16x128xf32>
    %357 = arith.truncf %356 : vector<16x128xf32> to vector<16x128xbf16>
    %c4_319 = arith.constant 4 : index
    %c0_320 = arith.constant 0 : index
    %c0_321 = arith.constant 0 : index
    %358 = vector.load %arg8[%c4_319, %c0_320, %c0_321] : memref<16x128x256xbf16, #tpu.memory_space<vmem>>, vector<1x128x256xbf16>
    %359 = vector.shape_cast %358 : vector<1x128x256xbf16> to vector<128x256xbf16>
    %cst_322 = arith.constant dense<0.000000e+00> : vector<16x256xf32>
    %360 = tpu.matmul %357, %359, %cst_322 {dimension_numbers = #tpu.dot_dimension_numbers<[1], [0], [0], [1], [0, 0, 1, 1], [], []>} : vector<16x128xbf16>, vector<128x256xbf16>, vector<16x256xf32> -> vector<16x256xf32>
    %361 = arith.addf %354, %360 : vector<16x256xf32>
    %c1_323 = arith.constant 1 : index
    %c1_324 = arith.constant 1 : index
    %c0_325 = arith.constant 0 : index
    %362 = tpu.strided_load %arg13[%c1_323, %c1_324, %c0_325] {strides = array<i32: 2, 2, 1>} : memref<6x24x128xf32, #tpu.memory_space<vmem>>, vector<2x8x128xf32>
    %363 = vector.shape_cast %362 : vector<2x8x128xf32> to vector<16x128xf32>
    %364 = arith.truncf %363 : vector<16x128xf32> to vector<16x128xbf16>
    %c5_326 = arith.constant 5 : index
    %c0_327 = arith.constant 0 : index
    %c0_328 = arith.constant 0 : index
    %365 = vector.load %arg8[%c5_326, %c0_327, %c0_328] : memref<16x128x256xbf16, #tpu.memory_space<vmem>>, vector<1x128x256xbf16>
    %366 = vector.shape_cast %365 : vector<1x128x256xbf16> to vector<128x256xbf16>
    %cst_329 = arith.constant dense<0.000000e+00> : vector<16x256xf32>
    %367 = tpu.matmul %364, %366, %cst_329 {dimension_numbers = #tpu.dot_dimension_numbers<[1], [0], [0], [1], [0, 0, 1, 1], [], []>} : vector<16x128xbf16>, vector<128x256xbf16>, vector<16x256xf32> -> vector<16x256xf32>
    %368 = arith.addf %361, %367 : vector<16x256xf32>
    %c1_330 = arith.constant 1 : index
    %c2_331 = arith.constant 2 : index
    %c0_332 = arith.constant 0 : index
    %369 = tpu.strided_load %arg13[%c1_330, %c2_331, %c0_332] {strides = array<i32: 2, 2, 1>} : memref<6x24x128xf32, #tpu.memory_space<vmem>>, vector<2x8x128xf32>
    %370 = vector.shape_cast %369 : vector<2x8x128xf32> to vector<16x128xf32>
    %371 = arith.truncf %370 : vector<16x128xf32> to vector<16x128xbf16>
    %c6_333 = arith.constant 6 : index
    %c0_334 = arith.constant 0 : index
    %c0_335 = arith.constant 0 : index
    %372 = vector.load %arg8[%c6_333, %c0_334, %c0_335] : memref<16x128x256xbf16, #tpu.memory_space<vmem>>, vector<1x128x256xbf16>
    %373 = vector.shape_cast %372 : vector<1x128x256xbf16> to vector<128x256xbf16>
    %cst_336 = arith.constant dense<0.000000e+00> : vector<16x256xf32>
    %374 = tpu.matmul %371, %373, %cst_336 {dimension_numbers = #tpu.dot_dimension_numbers<[1], [0], [0], [1], [0, 0, 1, 1], [], []>} : vector<16x128xbf16>, vector<128x256xbf16>, vector<16x256xf32> -> vector<16x256xf32>
    %375 = arith.addf %368, %374 : vector<16x256xf32>
    %c1_337 = arith.constant 1 : index
    %c3_338 = arith.constant 3 : index
    %c0_339 = arith.constant 0 : index
    %376 = tpu.strided_load %arg13[%c1_337, %c3_338, %c0_339] {strides = array<i32: 2, 2, 1>} : memref<6x24x128xf32, #tpu.memory_space<vmem>>, vector<2x8x128xf32>
    %377 = vector.shape_cast %376 : vector<2x8x128xf32> to vector<16x128xf32>
    %378 = arith.truncf %377 : vector<16x128xf32> to vector<16x128xbf16>
    %c7_340 = arith.constant 7 : index
    %c0_341 = arith.constant 0 : index
    %c0_342 = arith.constant 0 : index
    %379 = vector.load %arg8[%c7_340, %c0_341, %c0_342] : memref<16x128x256xbf16, #tpu.memory_space<vmem>>, vector<1x128x256xbf16>
    %380 = vector.shape_cast %379 : vector<1x128x256xbf16> to vector<128x256xbf16>
    %cst_343 = arith.constant dense<0.000000e+00> : vector<16x256xf32>
    %381 = tpu.matmul %378, %380, %cst_343 {dimension_numbers = #tpu.dot_dimension_numbers<[1], [0], [0], [1], [0, 0, 1, 1], [], []>} : vector<16x128xbf16>, vector<128x256xbf16>, vector<16x256xf32> -> vector<16x256xf32>
    %382 = arith.addf %375, %381 : vector<16x256xf32>
    %c2_344 = arith.constant 2 : index
    %c0_345 = arith.constant 0 : index
    %c0_346 = arith.constant 0 : index
    %383 = tpu.strided_load %arg13[%c2_344, %c0_345, %c0_346] {strides = array<i32: 2, 2, 1>} : memref<6x24x128xf32, #tpu.memory_space<vmem>>, vector<2x8x128xf32>
    %384 = vector.shape_cast %383 : vector<2x8x128xf32> to vector<16x128xf32>
    %385 = arith.truncf %384 : vector<16x128xf32> to vector<16x128xbf16>
    %c8_347 = arith.constant 8 : index
    %c0_348 = arith.constant 0 : index
    %c0_349 = arith.constant 0 : index
    %386 = vector.load %arg8[%c8_347, %c0_348, %c0_349] : memref<16x128x256xbf16, #tpu.memory_space<vmem>>, vector<1x128x256xbf16>
    %387 = vector.shape_cast %386 : vector<1x128x256xbf16> to vector<128x256xbf16>
    %cst_350 = arith.constant dense<0.000000e+00> : vector<16x256xf32>
    %388 = tpu.matmul %385, %387, %cst_350 {dimension_numbers = #tpu.dot_dimension_numbers<[1], [0], [0], [1], [0, 0, 1, 1], [], []>} : vector<16x128xbf16>, vector<128x256xbf16>, vector<16x256xf32> -> vector<16x256xf32>
    %389 = arith.addf %382, %388 : vector<16x256xf32>
    %c2_351 = arith.constant 2 : index
    %c1_352 = arith.constant 1 : index
    %c0_353 = arith.constant 0 : index
    %390 = tpu.strided_load %arg13[%c2_351, %c1_352, %c0_353] {strides = array<i32: 2, 2, 1>} : memref<6x24x128xf32, #tpu.memory_space<vmem>>, vector<2x8x128xf32>
    %391 = vector.shape_cast %390 : vector<2x8x128xf32> to vector<16x128xf32>
    %392 = arith.truncf %391 : vector<16x128xf32> to vector<16x128xbf16>
    %c9_354 = arith.constant 9 : index
    %c0_355 = arith.constant 0 : index
    %c0_356 = arith.constant 0 : index
    %393 = vector.load %arg8[%c9_354, %c0_355, %c0_356] : memref<16x128x256xbf16, #tpu.memory_space<vmem>>, vector<1x128x256xbf16>
    %394 = vector.shape_cast %393 : vector<1x128x256xbf16> to vector<128x256xbf16>
    %cst_357 = arith.constant dense<0.000000e+00> : vector<16x256xf32>
    %395 = tpu.matmul %392, %394, %cst_357 {dimension_numbers = #tpu.dot_dimension_numbers<[1], [0], [0], [1], [0, 0, 1, 1], [], []>} : vector<16x128xbf16>, vector<128x256xbf16>, vector<16x256xf32> -> vector<16x256xf32>
    %396 = arith.addf %389, %395 : vector<16x256xf32>
    %c2_358 = arith.constant 2 : index
    %c2_359 = arith.constant 2 : index
    %c0_360 = arith.constant 0 : index
    %397 = tpu.strided_load %arg13[%c2_358, %c2_359, %c0_360] {strides = array<i32: 2, 2, 1>} : memref<6x24x128xf32, #tpu.memory_space<vmem>>, vector<2x8x128xf32>
    %398 = vector.shape_cast %397 : vector<2x8x128xf32> to vector<16x128xf32>
    %399 = arith.truncf %398 : vector<16x128xf32> to vector<16x128xbf16>
    %c10_361 = arith.constant 10 : index
    %c0_362 = arith.constant 0 : index
    %c0_363 = arith.constant 0 : index
    %400 = vector.load %arg8[%c10_361, %c0_362, %c0_363] : memref<16x128x256xbf16, #tpu.memory_space<vmem>>, vector<1x128x256xbf16>
    %401 = vector.shape_cast %400 : vector<1x128x256xbf16> to vector<128x256xbf16>
    %cst_364 = arith.constant dense<0.000000e+00> : vector<16x256xf32>
    %402 = tpu.matmul %399, %401, %cst_364 {dimension_numbers = #tpu.dot_dimension_numbers<[1], [0], [0], [1], [0, 0, 1, 1], [], []>} : vector<16x128xbf16>, vector<128x256xbf16>, vector<16x256xf32> -> vector<16x256xf32>
    %403 = arith.addf %396, %402 : vector<16x256xf32>
    %c2_365 = arith.constant 2 : index
    %c3_366 = arith.constant 3 : index
    %c0_367 = arith.constant 0 : index
    %404 = tpu.strided_load %arg13[%c2_365, %c3_366, %c0_367] {strides = array<i32: 2, 2, 1>} : memref<6x24x128xf32, #tpu.memory_space<vmem>>, vector<2x8x128xf32>
    %405 = vector.shape_cast %404 : vector<2x8x128xf32> to vector<16x128xf32>
    %406 = arith.truncf %405 : vector<16x128xf32> to vector<16x128xbf16>
    %c11_368 = arith.constant 11 : index
    %c0_369 = arith.constant 0 : index
    %c0_370 = arith.constant 0 : index
    %407 = vector.load %arg8[%c11_368, %c0_369, %c0_370] : memref<16x128x256xbf16, #tpu.memory_space<vmem>>, vector<1x128x256xbf16>
    %408 = vector.shape_cast %407 : vector<1x128x256xbf16> to vector<128x256xbf16>
    %cst_371 = arith.constant dense<0.000000e+00> : vector<16x256xf32>
    %409 = tpu.matmul %406, %408, %cst_371 {dimension_numbers = #tpu.dot_dimension_numbers<[1], [0], [0], [1], [0, 0, 1, 1], [], []>} : vector<16x128xbf16>, vector<128x256xbf16>, vector<16x256xf32> -> vector<16x256xf32>
    %410 = arith.addf %403, %409 : vector<16x256xf32>
    %c3_372 = arith.constant 3 : index
    %c0_373 = arith.constant 0 : index
    %c0_374 = arith.constant 0 : index
    %411 = tpu.strided_load %arg13[%c3_372, %c0_373, %c0_374] {strides = array<i32: 2, 2, 1>} : memref<6x24x128xf32, #tpu.memory_space<vmem>>, vector<2x8x128xf32>
    %412 = vector.shape_cast %411 : vector<2x8x128xf32> to vector<16x128xf32>
    %413 = arith.truncf %412 : vector<16x128xf32> to vector<16x128xbf16>
    %c12_375 = arith.constant 12 : index
    %c0_376 = arith.constant 0 : index
    %c0_377 = arith.constant 0 : index
    %414 = vector.load %arg8[%c12_375, %c0_376, %c0_377] : memref<16x128x256xbf16, #tpu.memory_space<vmem>>, vector<1x128x256xbf16>
    %415 = vector.shape_cast %414 : vector<1x128x256xbf16> to vector<128x256xbf16>
    %cst_378 = arith.constant dense<0.000000e+00> : vector<16x256xf32>
    %416 = tpu.matmul %413, %415, %cst_378 {dimension_numbers = #tpu.dot_dimension_numbers<[1], [0], [0], [1], [0, 0, 1, 1], [], []>} : vector<16x128xbf16>, vector<128x256xbf16>, vector<16x256xf32> -> vector<16x256xf32>
    %417 = arith.addf %410, %416 : vector<16x256xf32>
    %c3_379 = arith.constant 3 : index
    %c1_380 = arith.constant 1 : index
    %c0_381 = arith.constant 0 : index
    %418 = tpu.strided_load %arg13[%c3_379, %c1_380, %c0_381] {strides = array<i32: 2, 2, 1>} : memref<6x24x128xf32, #tpu.memory_space<vmem>>, vector<2x8x128xf32>
    %419 = vector.shape_cast %418 : vector<2x8x128xf32> to vector<16x128xf32>
    %420 = arith.truncf %419 : vector<16x128xf32> to vector<16x128xbf16>
    %c13_382 = arith.constant 13 : index
    %c0_383 = arith.constant 0 : index
    %c0_384 = arith.constant 0 : index
    %421 = vector.load %arg8[%c13_382, %c0_383, %c0_384] : memref<16x128x256xbf16, #tpu.memory_space<vmem>>, vector<1x128x256xbf16>
    %422 = vector.shape_cast %421 : vector<1x128x256xbf16> to vector<128x256xbf16>
    %cst_385 = arith.constant dense<0.000000e+00> : vector<16x256xf32>
    %423 = tpu.matmul %420, %422, %cst_385 {dimension_numbers = #tpu.dot_dimension_numbers<[1], [0], [0], [1], [0, 0, 1, 1], [], []>} : vector<16x128xbf16>, vector<128x256xbf16>, vector<16x256xf32> -> vector<16x256xf32>
    %424 = arith.addf %417, %423 : vector<16x256xf32>
    %c3_386 = arith.constant 3 : index
    %c2_387 = arith.constant 2 : index
    %c0_388 = arith.constant 0 : index
    %425 = tpu.strided_load %arg13[%c3_386, %c2_387, %c0_388] {strides = array<i32: 2, 2, 1>} : memref<6x24x128xf32, #tpu.memory_space<vmem>>, vector<2x8x128xf32>
    %426 = vector.shape_cast %425 : vector<2x8x128xf32> to vector<16x128xf32>
    %427 = arith.truncf %426 : vector<16x128xf32> to vector<16x128xbf16>
    %c14_389 = arith.constant 14 : index
    %c0_390 = arith.constant 0 : index
    %c0_391 = arith.constant 0 : index
    %428 = vector.load %arg8[%c14_389, %c0_390, %c0_391] : memref<16x128x256xbf16, #tpu.memory_space<vmem>>, vector<1x128x256xbf16>
    %429 = vector.shape_cast %428 : vector<1x128x256xbf16> to vector<128x256xbf16>
    %cst_392 = arith.constant dense<0.000000e+00> : vector<16x256xf32>
    %430 = tpu.matmul %427, %429, %cst_392 {dimension_numbers = #tpu.dot_dimension_numbers<[1], [0], [0], [1], [0, 0, 1, 1], [], []>} : vector<16x128xbf16>, vector<128x256xbf16>, vector<16x256xf32> -> vector<16x256xf32>
    %431 = arith.addf %424, %430 : vector<16x256xf32>
    %c3_393 = arith.constant 3 : index
    %c3_394 = arith.constant 3 : index
    %c0_395 = arith.constant 0 : index
    %432 = tpu.strided_load %arg13[%c3_393, %c3_394, %c0_395] {strides = array<i32: 2, 2, 1>} : memref<6x24x128xf32, #tpu.memory_space<vmem>>, vector<2x8x128xf32>
    %433 = vector.shape_cast %432 : vector<2x8x128xf32> to vector<16x128xf32>
    %434 = arith.truncf %433 : vector<16x128xf32> to vector<16x128xbf16>
    %c15_396 = arith.constant 15 : index
    %c0_397 = arith.constant 0 : index
    %c0_398 = arith.constant 0 : index
    %435 = vector.load %arg8[%c15_396, %c0_397, %c0_398] : memref<16x128x256xbf16, #tpu.memory_space<vmem>>, vector<1x128x256xbf16>
    %436 = vector.shape_cast %435 : vector<1x128x256xbf16> to vector<128x256xbf16>
    %cst_399 = arith.constant dense<0.000000e+00> : vector<16x256xf32>
    %437 = tpu.matmul %434, %436, %cst_399 {dimension_numbers = #tpu.dot_dimension_numbers<[1], [0], [0], [1], [0, 0, 1, 1], [], []>} : vector<16x128xbf16>, vector<128x256xbf16>, vector<16x256xf32> -> vector<16x256xf32>
    %438 = arith.addf %431, %437 : vector<16x256xf32>
    %c0_400 = arith.constant 0 : index
    %c0_401 = arith.constant 0 : index
    %439 = vector.load %arg9[%c0_400, %c0_401] : memref<1x256xf32, #tpu.memory_space<vmem>>, vector<1x256xf32>
    %440 = vector.broadcast %439 : vector<1x256xf32> to vector<16x256xf32>
    %441 = arith.addf %438, %440 : vector<16x256xf32>
    %cst_402 = arith.constant 0.000000e+00 : f32
    %442 = vector.broadcast %cst_402 : f32 to vector<16x256xf32>
    %443 = arith.cmpf ogt, %441, %442 : vector<16x256xf32>
    %cst_403 = arith.constant 0.000000e+00 : f32
    %444 = vector.broadcast %cst_403 : f32 to vector<16x256xf32>
    %445 = arith.minimumf %441, %444 : vector<16x256xf32>
    %446 = math.exp %445 : vector<16x256xf32>
    %cst_404 = arith.constant 1.000000e+00 : f32
    %447 = vector.broadcast %cst_404 : f32 to vector<16x256xf32>
    %448 = arith.subf %446, %447 : vector<16x256xf32>
    %449 = arith.select %443, %441, %448 : vector<16x256xi1>, vector<16x256xf32>
    %450 = vector.extract_strided_slice %449 {offsets = [0, 0], sizes = [2, 256], strides = [1, 1]} : vector<16x256xf32> to vector<2x256xf32>
    %c0_405 = arith.constant 0 : index
    %c0_406 = arith.constant 0 : index
    %c0_407 = arith.constant 0 : index
    %451 = vector.load %arg10[%c0_405, %c0_406, %c0_407] : memref<1x4x256xf32, #tpu.memory_space<vmem>>, vector<1x2x256xf32>
    %452 = vector.shape_cast %451 : vector<1x2x256xf32> to vector<2x256xf32>
    %453 = vector.shape_cast %450 : vector<2x256xf32> to vector<1x2x256xf32>
    tpu.vector_store %arg10[%c0_405, %c0_406, %c0_407], %453 {strides = array<i32>} : memref<1x4x256xf32, #tpu.memory_space<vmem>>, vector<1x2x256xf32>,
    %454 = vector.extract_strided_slice %449 {offsets = [8, 0], sizes = [2, 256], strides = [1, 1]} : vector<16x256xf32> to vector<2x256xf32>
    %c0_408 = arith.constant 0 : index
    %c2_409 = arith.constant 2 : index
    %c0_410 = arith.constant 0 : index
    %455 = vector.load %arg10[%c0_408, %c2_409, %c0_410] : memref<1x4x256xf32, #tpu.memory_space<vmem>>, vector<1x2x256xf32>
    %456 = vector.shape_cast %455 : vector<1x2x256xf32> to vector<2x256xf32>
    %457 = vector.shape_cast %454 : vector<2x256xf32> to vector<1x2x256xf32>
    tpu.vector_store %arg10[%c0_408, %c2_409, %c0_410], %457 {strides = array<i32>} : memref<1x4x256xf32, #tpu.memory_space<vmem>>, vector<1x2x256xf32>,
    return
  }
  func.func @transform_0(%arg0: i32) -> (i32, i32, i32) {
    %c0_i32 = arith.constant 0 : i32
    %c0_i32_0 = arith.constant 0 : i32
    %c0_i32_1 = arith.constant 0 : i32
    return %arg0, %c0_i32, %c0_i32_0 : i32, i32, i32
  }
  func.func @transform_1(%arg0: i32) -> (i32, i32) {
    %c0_i32 = arith.constant 0 : i32
    %c0_i32_0 = arith.constant 0 : i32
    %c0_i32_1 = arith.constant 0 : i32
    return %c0_i32, %c0_i32_0 : i32, i32
  }
  func.func @transform_2(%arg0: i32) -> (i32, i32) {
    %c0_i32 = arith.constant 0 : i32
    %c0_i32_0 = arith.constant 0 : i32
    %c0_i32_1 = arith.constant 0 : i32
    return %c0_i32, %c0_i32_0 : i32, i32
  }
  func.func @transform_3(%arg0: i32) -> (i32, i32, i32) {
    %c0_i32 = arith.constant 0 : i32
    %c0_i32_0 = arith.constant 0 : i32
    %c0_i32_1 = arith.constant 0 : i32
    %c0_i32_2 = arith.constant 0 : i32
    return %c0_i32, %c0_i32_0, %c0_i32_1 : i32, i32, i32
  }
  func.func @transform_4(%arg0: i32) -> (i32, i32) {
    %c0_i32 = arith.constant 0 : i32
    %c0_i32_0 = arith.constant 0 : i32
    %c0_i32_1 = arith.constant 0 : i32
    return %c0_i32, %c0_i32_0 : i32, i32
  }
  func.func @transform_5(%arg0: i32) -> (i32, i32, i32) {
    %c0_i32 = arith.constant 0 : i32
    %c0_i32_0 = arith.constant 0 : i32
    %c0_i32_1 = arith.constant 0 : i32
    %c0_i32_2 = arith.constant 0 : i32
    return %c0_i32, %c0_i32_0, %c0_i32_1 : i32, i32, i32
  }
  func.func @transform_6(%arg0: i32) -> (i32, i32) {
    %c0_i32 = arith.constant 0 : i32
    %c0_i32_0 = arith.constant 0 : i32
    %c0_i32_1 = arith.constant 0 : i32
    return %c0_i32, %c0_i32_0 : i32, i32
  }
  func.func @transform_7(%arg0: i32) -> (i32, i32, i32) {
    %c0_i32 = arith.constant 0 : i32
    %c0_i32_0 = arith.constant 0 : i32
    %c0_i32_1 = arith.constant 0 : i32
    %c0_i32_2 = arith.constant 0 : i32
    return %c0_i32, %c0_i32_0, %c0_i32_1 : i32, i32, i32
  }
  func.func @transform_8(%arg0: i32) -> (i32, i32) {
    %c0_i32 = arith.constant 0 : i32
    %c0_i32_0 = arith.constant 0 : i32
    %c0_i32_1 = arith.constant 0 : i32
    return %c0_i32, %c0_i32_0 : i32, i32
  }
  func.func @transform_9(%arg0: i32) -> (i32, i32, i32) {
    %c0_i32 = arith.constant 0 : i32
    %c0_i32_0 = arith.constant 0 : i32
    %c0_i32_1 = arith.constant 0 : i32
    return %arg0, %c0_i32, %c0_i32_0 : i32, i32, i32
  }
}

</mosaic_0001>

<bundles_post_ra>
// kernel: observation_encoder.1
= control target key start
LH: loop header
LB: loop body
LE: loop exit
PB: predicated region body
PF: predicated region fallthrough
CT: control target
= control target key end

     0   :  { %s16723_s30 = smov 0   ;;  %s19957_s0 = inlined_call_operand.vmem [shape: bf16[2,992,48], index: 0, kind: input, shape index: {}]   ;;  %s19958_s1 = inlined_call_operand.vmem [shape: bf16[48,32], index: 1, kind: input, shape index: {}]   ;;  %s19959_s2 = inlined_call_operand.vmem [shape: f32[1,32], index: 2, kind: input, shape index: {}]   ;;  %s19960_s3 = inlined_call_operand.vmem [shape: bf16[16,32,64], index: 3, kind: input, shape index: {}]   ;;  %s19961_s4 = inlined_call_operand.vmem [shape: f32[1,64], index: 4, kind: input, shape index: {}]   ;;  %s19962_s5 = inlined_call_operand.vmem [shape: bf16[16,64,128], index: 5, kind: input, shape index: {}]   ;;  %s19963_s6 = inlined_call_operand.vmem [shape: f32[1,128], index: 6, kind: input, shape index: {}]   ;;  %s19964_s7 = inlined_call_operand.vmem [shape: bf16[16,128,256], index: 7, kind: input, shape index: {}]   ;;  %s19965_s8 = inlined_call_operand.vmem [shape: f32[1,256], index: 8, kind: input, shape index: {}]   ;;  %s19966_s9 = inlined_call_operand.vmem [shape: f32[2,4,256], index: 9, kind: output, shape index: {}]  }
   0x1 LB: > { %s12506_s10 = sadd.s32 4294967295, %s16668_s30   ;;  %p12510_p0 = scmp.ge.s32.totalorder %s16668_s30, 1  ;;  %s16668_s30 = sphi %s16723_s30, %s19_s30  }
   0x2   : > { %p287_p1 = scmp.lt.s32.totalorder %s16668_s30, 3 }
   0x4   : > { %p288_p2 = pnand %p12510_p0, %p287_p1 }
   0x6   : > { %291 = sbr.rel (%p288_p2) target bundleno = 2856 (0xb28), region = 56 }
   0xd   : > { %v15779_v0 = vld [vmem:[%s19958_s1] sm:$0xff]   ;;  %p323_p3 = scmp.lt.s32.totalorder %s12506_s10, 1  ;;  %v15780_v1 = vld [vmem:[%s19958_s1 + $0x8] sm:$0xff]   ;;  %v15781_v2 = vld [vmem:[%s19958_s1 + $0x10] sm:$0xff]   ;;  %vm536_vm0 = vcmask 392192   ;;  %vm334_vm1 = vcmask 261120  }
   0xe   : > { %14307 = vmatprep.subr.bf16.mxu0 %v15779_v0  ;;  %v15785_v3 = vld [vmem:[%s19958_s1] sm:$0xff]   ;;  %v15788_v4 = vld [vmem:[%s19958_s1 + $0x8] sm:$0xff]   ;;  %v15789_v7 = vld [vmem:[%s19958_s1 + $0x10] sm:$0xff]  }
   0xf   : > { %s19970_s10 = smov (!%p323_p3, %s12506_s10), 1  ;;  %14308 = vmatpush3.bf16.msra.mxu0 %v15779_v0  ;;  %v15784_v5 = vld [vmem:[%s19958_s1] sm:$0xff]   ;;  %14345 = vmatprep.subr.bf16.mxu1 %v15785_v3  ;;  %v15794_v12 = vld [vmem:[%s19958_s1 + $0x8] sm:$0xff]   ;;  %v15808_v21 = vld [vmem:[%s19958_s1 + $0x10] sm:$0xff]  }
  0x10   : > { %14309 = vmatprep.subr.bf16.mxu0 %v15780_v1  ;;  %s15767_s17 = smul.u32 496, %s19970_s10  ;;  %14346 = vmatpush3.bf16.msra.mxu1 %v15785_v3  ;;  %v15807_v20 = vld [vmem:[%s19958_s1] sm:$0xff]   ;;  %v15817_v26 = vld [vmem:[%s19958_s1 + $0x8] sm:$0xff]   ;;  %v15828_v33 = vld [vmem:[%s19958_s1 + $0x10] sm:$0xff]   ;;  %s13864_s18 = sshll.u32 %s19970_s10, 3 }
  0x11   : > { %14347 = vmatprep.subr.bf16.mxu1 %v15788_v4  ;;  %s332_s21 = scalar_lea.vmem %s19966_s9, %s13864_s18 }
  0x12   : > { %s16752_s24 = scalar_lea.vmem %s19957_s0, %s15767_s17 }
  0x13   : > { %14310 = vmatpush3.bf16.msra.mxu0 %v15780_v1  ;;  %v15782_v6 = vld [vmem:[%s16752_s24] sm:$0xff]   ;;  %v15783_v8 = vld [vmem:[%s16752_s24 + $0x8] sm:$0xff]   ;;  %v15786_v9 = vld [vmem:[%s16752_s24 + $0x10] sm:$0xff]  }
  0x14   : > { %14311 = vmatprep.subr.bf16.mxu0 %v15781_v2  ;;  %14313 = vmatprep.mubr.msk.bf16.mxu0 %vm536_vm0, %v15782_v6  ;;  %v15791_v10 = vld [vmem:[%s16752_s24 + $0x80] sm:$0xff]   ;;  %v15793_v11 = vld [vmem:[%s16752_s24 + $0x88] sm:$0xff]   ;;  %v15796_v13 = vld [vmem:[%s16752_s24 + $0x90] sm:$0xff]  }
  0x15   : > { %14348 = vmatpush3.bf16.msra.mxu1 %v15788_v4  ;;  %14351 = vmatprep.mubr.msk.bf16.mxu1 %vm536_vm0, %v15791_v10  ;;  %v15787_v14 = vld [vmem:[%s16752_s24 + $0x18] sm:$0xff]   ;;  %v15790_v15 = vld [vmem:[%s16752_s24 + $0x20] sm:$0xff]   ;;  %v15792_v18 = vld [vmem:[%s16752_s24 + $0x28] sm:$0xff]  }
  0x16   : > { %14349 = vmatprep.subr.bf16.mxu1 %v15789_v7  ;;  %v15798_v16 = vld [vmem:[%s16752_s24 + $0x98] sm:$0xff]   ;;  %v15800_v17 = vld [vmem:[%s16752_s24 + $0xa0] sm:$0xff]   ;;  %v15795_v19 = vld [vmem:[%s16752_s24 + $0x30] sm:$0xff]  }
  0x17   : > { %14312 = vmatpush3.bf16.msra.mxu0 %v15781_v2  ;;  %v15802_v22 = vld [vmem:[%s16752_s24 + $0xa8] sm:$0xff]   ;;  %v15804_v23 = vld [vmem:[%s16752_s24 + $0xb0] sm:$0xff]   ;;  %v15797_v24 = vld [vmem:[%s16752_s24 + $0x38] sm:$0xff]  }
  0x18   : > { %14383 = vmatprep.subr.bf16.mxu0 %v15784_v5  ;;  %v15799_v25 = vld [vmem:[%s16752_s24 + $0x40] sm:$0xff]   ;;  %v15806_v27 = vld [vmem:[%s16752_s24 + $0xb8] sm:$0xff]   ;;  %v15801_v29 = vld [vmem:[%s16752_s24 + $0x48] sm:$0xff]  }
  0x19   : > { %14350 = vmatpush3.bf16.msra.mxu1 %v15789_v7  ;;  %v15810_v28 = vld [vmem:[%s16752_s24 + $0xc0] sm:$0xff]   ;;  %v15803_v30 = vld [vmem:[%s16752_s24 + $0x50] sm:$0xff]   ;;  %v15812_v31 = vld [vmem:[%s16752_s24 + $0xc8] sm:$0xff]  }
  0x1a   : > { %14314 = vmatmul.mubr.msk.bf16.vlgmr.msra.gmra.mrb[0].mxu0 %vm536_vm0, %v15783_v8  ;;  %14421 = vmatprep.subr.bf16.mxu1 %v15807_v20  ;;  %v15814_v32 = vld [vmem:[%s16752_s24 + $0xd0] sm:$0xff]   ;;  %v15805_v34 = vld [vmem:[%s16752_s24 + $0x58] sm:$0xff]   ;;  %v15809_v35 = vld [vmem:[%s16752_s24 + $0x60] sm:$0xff]  }
  0x1b   : > { %14384 = vmatpush3.bf16.msra.mxu0 %v15784_v5  ;;  %14317 = vmatprep.mubr.msk.bf16.mxu0 %vm536_vm0, %v15786_v9  ;;  %v15816_v36 = vld [vmem:[%s16752_s24 + $0xd8] sm:$0xff]   ;;  %v15818_v37 = vld [vmem:[%s16752_s24 + $0xe0] sm:$0xff]   ;;  %v15811_v38 = vld [vmem:[%s16752_s24 + $0x68] sm:$0xff]  }
  0x1c   : > { %14385 = vmatprep.subr.bf16.mxu0 %v15794_v12  ;;  %14352 = vmatmul.mubr.msk.bf16.vlgmr.msra.gmra.mrb[0].mxu1 %vm536_vm0, %v15793_v11  ;;  %v15813_v39 = vld [vmem:[%s16752_s24 + $0x70] sm:$0xff]   ;;  %v15820_v40 = vld [vmem:[%s16752_s24 + $0xe8] sm:$0xff]   ;;  %v15815_v42 = vld [vmem:[%s16752_s24 + $0x78] sm:$0xff]  }
  0x1d   : > { %14355 = vmatprep.mubr.msk.bf16.mxu1 %vm536_vm0, %v15796_v13  ;;  %14422 = vmatpush3.bf16.msra.mxu1 %v15807_v20  ;;  %v15824_v41 = vld [vmem:[%s16752_s24 + $0xf0] sm:$0xff]   ;;  %v15819_v43 = vld [vmem:[%s16752_s24 + $0x100] sm:$0xff]   ;;  %v15825_v44 = vld [vmem:[%s16752_s24 + $0xf8] sm:$0xff]  }
  0x1e   : > { %14423 = vmatprep.subr.bf16.mxu1 %v15817_v26  ;;  %v15829_v45 = vld [vmem:[%s16752_s24 + $0x180] sm:$0xff]   ;;  %v15821_v46 = vld [vmem:[%s16752_s24 + $0x108] sm:$0xff]   ;;  %v15822_v47 = vld [vmem:[%s16752_s24 + $0x110] sm:$0xff]  }
  0x1f   : > { %14386 = vmatpush3.bf16.msra.mxu0 %v15794_v12  ;;  %v15830_v48 = vld [vmem:[%s16752_s24 + $0x188] sm:$0xff]   ;;  %v15833_v49 = vld [vmem:[%s16752_s24 + $0x190] sm:$0xff]   ;;  %v15823_v50 = vld [vmem:[%s16752_s24 + $0x118] sm:$0xff]  }
  0x20   : > { %14387 = vmatprep.subr.bf16.mxu0 %v15808_v21  ;;  %v15826_v51 = vld [vmem:[%s16752_s24 + $0x120] sm:$0xff]   ;;  %v15834_v52 = vld [vmem:[%s16752_s24 + $0x198] sm:$0xff]   ;;  %v15827_v54 = vld [vmem:[%s16752_s24 + $0x128] sm:$0xff]  }
  0x21   : > { %14424 = vmatpush3.bf16.msra.mxu1 %v15817_v26  ;;  %v15837_v53 = vld [vmem:[%s16752_s24 + $0x1a0] sm:$0xff]   ;;  %v15831_v55 = vld [vmem:[%s16752_s24 + $0x130] sm:$0xff]   ;;  %v15838_v56 = vld [vmem:[%s16752_s24 + $0x1a8] sm:$0xff]  }
  0x22   : > { %14318 = vmatmul.mubr.msk.bf16.gmra.mrb[4].mxu0 %vm536_vm0, %v15787_v14  ;;  %14425 = vmatprep.subr.bf16.mxu1 %v15828_v33  ;;  %v15832_v57 = vld [vmem:[%s16752_s24 + $0x138] sm:$0xff]   ;;  %v15835_v58 = vld [vmem:[%s16752_s24 + $0x140] sm:$0xff]   ;;  %v15843_v59 = vld [vmem:[%s16752_s24 + $0x1b0] sm:$0xff]  }
  0x23   : > { %14321 = vmatprep.mubr.msk.bf16.mxu0 %vm536_vm0, %v15790_v15  ;;  %14388 = vmatpush3.bf16.msra.mxu0 %v15808_v21  ;;  %v15836_v60 = vld [vmem:[%s16752_s24 + $0x148] sm:$0xff]   ;;  %v15844_v61 = vld [vmem:[%s16752_s24 + $0x1b8] sm:$0xff]   ;;  %v15839_v62 = vld [vmem:[%s16752_s24 + $0x150] sm:$0xff]  }
  0x24   : > { %14356 = vmatmul.mubr.msk.bf16.gmra.mrb[4].mxu1 %vm536_vm0, %v15798_v16  ;;  %v15845_v63 = vld [vmem:[%s16752_s24 + $0x1c0] sm:$0xff]   ;;  %v15840_v0 = vld [vmem:[%s16752_s24 + $0x158] sm:$0xff]   ;;  %v15846_v1 = vld [vmem:[%s16752_s24 + $0x1c8] sm:$0xff]  }
  0x25   : > { %14359 = vmatprep.mubr.msk.bf16.mxu1 %vm536_vm0, %v15800_v17  ;;  %14426 = vmatpush3.bf16.msra.mxu1 %v15828_v33  ;;  %v15841_v2 = vld [vmem:[%s16752_s24 + $0x160] sm:$0xff]   ;;  %v15847_v3 = vld [vmem:[%s16752_s24 + $0x1d0] sm:$0xff]   ;;  %v15842_v4 = vld [vmem:[%s16752_s24 + $0x168] sm:$0xff]  }
  0x26   : > { %v15848_v5 = vld [vmem:[%s16752_s24 + $0x1d8] sm:$0xff]   ;;  %v15849_v6 = vld [vmem:[%s16752_s24 + $0x1e0] sm:$0xff]   ;;  %v15850_v7 = vld [vmem:[%s16752_s24 + $0x1e8] sm:$0xff]  }
  0x27   : > { %v15851_v8 = vld [vmem:[%s19960_s3 + $0x10] sm:$0xff]   ;;  %v15852_v9 = vld [vmem:[%s19960_s3 + $0x18] sm:$0xff]   ;;  %v16904_v10 = vld [vmem:[%s19959_s2] ss:$0 sm:$0xff] }
  0x28   : > { %14455 = vmatprep.subr.bf16.mxu1 %v15851_v8 }
  0x2a   : > { %14322 = vmatmul.mubr.msk.bf16.gmra.mrb[8].mxu0 %vm536_vm0, %v15792_v18 }
  0x2b   : > { %14325 = vmatprep.mubr.msk.bf16.mxu0 %vm536_vm0, %v15795_v19 }
  0x2c   : > { %14360 = vmatmul.mubr.msk.bf16.gmra.mrb[8].mxu1 %vm536_vm0, %v15802_v22 }
  0x2d   : > { %14363 = vmatprep.mubr.msk.bf16.mxu1 %vm536_vm0, %v15804_v23 }
  0x32   : > { %14326 = vmatmul.mubr.msk.bf16.gmra.mrb[12].mxu0 %vm536_vm0, %v15797_v24 }
  0x33   : > { %14329 = vmatprep.mubr.msk.bf16.mxu0 %vm536_vm0, %v15799_v25 }
  0x34   : > { %14364 = vmatmul.mubr.msk.bf16.gmra.mrb[12].mxu1 %vm536_vm0, %v15806_v27 }
  0x35   : > { %14367 = vmatprep.mubr.msk.bf16.mxu1 %vm536_vm0, %v15810_v28 }
  0x3a   : > { %14330 = vmatmul.mubr.msk.bf16.gmra.mrb[16].mxu0 %vm536_vm0, %v15801_v29 }
  0x3b   : > { %14333 = vmatprep.mubr.msk.bf16.mxu0 %vm536_vm0, %v15803_v30 }
  0x3c   : > { %14368 = vmatmul.mubr.msk.bf16.gmra.mrb[16].mxu1 %vm536_vm0, %v15812_v31 }
  0x3d   : > { %14371 = vmatprep.mubr.msk.bf16.mxu1 %vm536_vm0, %v15814_v32 }
  0x42   : > { %14334 = vmatmul.mubr.msk.bf16.gmra.mrb[20].mxu0 %vm536_vm0, %v15805_v34 }
  0x43   : > { %14337 = vmatprep.mubr.msk.bf16.mxu0 %vm536_vm0, %v15809_v35 }
  0x44   : > { %14372 = vmatmul.mubr.msk.bf16.gmra.mrb[20].mxu1 %vm536_vm0, %v15816_v36 }
  0x45   : > { %14375 = vmatprep.mubr.msk.bf16.mxu1 %vm536_vm0, %v15818_v37 }
  0x4a   : > { %14338 = vmatmul.mubr.msk.bf16.gmra.mrb[24].mxu0 %vm536_vm0, %v15811_v38 }
  0x4b   : > { %14341 = vmatprep.mubr.msk.bf16.mxu0 %vm536_vm0, %v15813_v39 }
  0x4c   : > { %14376 = vmatmul.mubr.msk.bf16.gmra.mrb[24].mxu1 %vm536_vm0, %v15820_v40 }
  0x4d   : > { %14379 = vmatprep.mubr.msk.bf16.mxu1 %vm536_vm0, %v15824_v41 }
  0x52   : > { %14342 = vmatmul.mubr.msk.bf16.gmra.mrb[28].mxu0 %vm536_vm0, %v15815_v42 }
  0x53   : > { %14389 = vmatprep.mubr.msk.bf16.mxu0 %vm536_vm0, %v15819_v43 }
  0x54   : > { %14380 = vmatmul.mubr.msk.bf16.gmra.mrb[28].mxu1 %vm536_vm0, %v15825_v44 }
  0x55   : > { %14427 = vmatprep.mubr.msk.bf16.mxu1 %vm536_vm0, %v15829_v45 }
  0x5a   : > { %14390 = vmatmul.mubr.msk.bf16.vlgmr.msra.gmra.mrb[32].mxu0 %vm536_vm0, %v15821_v46 }
  0x5b   : > { %14393 = vmatprep.mubr.msk.bf16.mxu0 %vm536_vm0, %v15822_v47 }
  0x5c   : > { %14428 = vmatmul.mubr.msk.bf16.vlgmr.msra.gmra.mrb[32].mxu1 %vm536_vm0, %v15830_v48 }
  0x5d   : > { %14431 = vmatprep.mubr.msk.bf16.mxu1 %vm536_vm0, %v15833_v49  ;;  %14456 = vmatpush3.bf16.msra.mxu1 %v15851_v8 }
  0x5e   : > { %14457 = vmatprep.subr.bf16.mxu1 %v15852_v9 }
  0x61   : > { %14458 = vmatpush3.bf16.msra.mxu1 %v15852_v9 }
  0x62   : > { %14394 = vmatmul.mubr.msk.bf16.gmra.mrb[36].mxu0 %vm536_vm0, %v15823_v50 }
  0x63   : > { %14397 = vmatprep.mubr.msk.bf16.mxu0 %vm536_vm0, %v15826_v51 }
  0x64   : > { %14432 = vmatmul.mubr.msk.bf16.gmra.mrb[36].mxu1 %vm536_vm0, %v15834_v52 }
  0x65   : > { %14435 = vmatprep.mubr.msk.bf16.mxu1 %vm536_vm0, %v15837_v53 }
  0x6a   : > { %14398 = vmatmul.mubr.msk.bf16.gmra.mrb[40].mxu0 %vm536_vm0, %v15827_v54 }
  0x6b   : > { %14401 = vmatprep.mubr.msk.bf16.mxu0 %vm536_vm0, %v15831_v55 }
  0x6c   : > { %14436 = vmatmul.mubr.msk.bf16.gmra.mrb[40].mxu1 %vm536_vm0, %v15838_v56 }
  0x6d   : > { %14439 = vmatprep.mubr.msk.bf16.mxu1 %vm536_vm0, %v15843_v59 }
  0x72   : > { %14402 = vmatmul.mubr.msk.bf16.gmra.mrb[44].mxu0 %vm536_vm0, %v15832_v57 }
  0x73   : > { %14405 = vmatprep.mubr.msk.bf16.mxu0 %vm536_vm0, %v15835_v58 }
  0x74   : > { %14440 = vmatmul.mubr.msk.bf16.gmra.mrb[44].mxu1 %vm536_vm0, %v15844_v61 }
  0x75   : > { %14443 = vmatprep.mubr.msk.bf16.mxu1 %vm536_vm0, %v15845_v63 }
  0x7a   : > { %14406 = vmatmul.mubr.msk.bf16.gmra.mrb[48].mxu0 %vm536_vm0, %v15836_v60 }
  0x7b   : > { %14409 = vmatprep.mubr.msk.bf16.mxu0 %vm536_vm0, %v15839_v62 }
  0x7c   : > { %14444 = vmatmul.mubr.msk.bf16.gmra.mrb[48].mxu1 %vm536_vm0, %v15846_v1 }
  0x7d   : > { %14447 = vmatprep.mubr.msk.bf16.mxu1 %vm536_vm0, %v15847_v3 }
  0x82   : > { %14410 = vmatmul.mubr.msk.bf16.gmra.mrb[52].mxu0 %vm536_vm0, %v15840_v0 }
  0x83   : > { %14413 = vmatprep.mubr.msk.bf16.mxu0 %vm536_vm0, %v15841_v2 }
  0x84   : > { %14448 = vmatmul.mubr.msk.bf16.gmra.mrb[52].mxu1 %vm536_vm0, %v15848_v5 }
  0x85   : > { %14451 = vmatprep.mubr.msk.bf16.mxu1 %vm536_vm0, %v15849_v6 }
  0x8a   : > { %14414 = vmatmul.mubr.msk.bf16.gmra.mrb[56].mxu0 %vm536_vm0, %v15842_v4 }
  0x8c   : > { %14452 = vmatmul.mubr.msk.bf16.gmra.mrb[56].mxu1 %vm536_vm0, %v15850_v7 }
  0xed   : > { %v14315_v11 = vpop.f32.mrb[0].mxu0 }
  0xee   : > { %v619_v12 = vpop.f32.mrb[1].mxu0  ;;  %v16907_v13 = vadd.f32 %v14315_v11, %v16904_v10 }
  0xef   : > { %v14316_v14 = vpop.f32.mrb[2].mxu0  ;;  %v16910_v15 = vadd.f32 %v16904_v10, %v619_v12  ;;  %v14353_v18 = vpop.f32.mrb[0].mxu1 }
  0xf0   : > { %v622_v16 = vpop.f32.mrb[3].mxu0  ;;  %v780_v17 = vmin.f32 %v16907_v13, 0.0  ;;  %v16915_v20 = vadd.f32 %v14353_v18, %v16904_v10  ;;  %v1195_v21 = vpop.f32.mrb[1].mxu1  ;;  %v16929_v32 = vadd.f32 %v14316_v14, %v16904_v10  ;;  %vm748_vm15 = vcmp.gt.f32.partialorder %v16907_v13, 0.0 }
  0xf1   : > { %v778_v19 = vmin.f32 %v16910_v15, 0.0  ;;  %v16918_v23 = vadd.f32 %v16904_v10, %v1195_v21  ;;  %v14354_v24 = vpop.f32.mrb[2].mxu1  ;;  %v16947_v45 = vadd.f32 %v16904_v10, %v622_v16  ;;  %vm746_vm13 = vcmp.gt.f32.partialorder %v16910_v15, 0.0 }
  0xf2   : > { %v814_v22 = vmul.f32 1.442695, %v780_v17  ;;  %v1356_v26 = vmin.f32 %v16915_v20, 0.0  ;;  %v16922_v27 = vadd.f32 %v14354_v24, %v16904_v10  ;;  %v1198_v28 = vpop.f32.mrb[3].mxu1  ;;  %v781_v49 = vmin.f32 %v16929_v32, 0.0 }
  0xf3   : > { %v1354_v31 = vmin.f32 %v16918_v23, 0.0  ;;  %v810_v33 = vmul.f32 1.442695, %v778_v19  ;;  %v16935_v37 = vadd.f32 %v16904_v10, %v1198_v28  ;;  %v779_v59 = vmin.f32 %v16947_v45, 0.0 }
  0xf4   : > { %v1390_v36 = vmul.f32 1.442695, %v1356_v26  ;;  %16333 = vpow2.f32 %v814_v22  ;;  %v1357_v42 = vmin.f32 %v16922_v27, 0.0  ;;  %v16959_v0 = vmul.f32 1.442695, %v781_v49 }
  0xf5   : > { %v14319_v25 = vpop.f32.mrb[4].mxu0  ;;  %v1386_v41 = vmul.f32 1.442695, %v1354_v31  ;;  %v1355_v54 = vmin.f32 %v16935_v37, 0.0  ;;  %vm1324_vm2 = vcmp.gt.f32.partialorder %v16915_v20, 0.0  ;;  %vm1322_vm3 = vcmp.gt.f32.partialorder %v16918_v23, 0.0 }
  0xf6   : > { %v16925_v29 = vadd.f32 %v14319_v25, %v16904_v10  ;;  %v635_v30 = vpop.f32.mrb[5].mxu0  ;;  %16335 = vpow2.f32 %v1390_v36  ;;  %v1392_v53 = vmul.f32 1.442695, %v1357_v42  ;;  %vm1325_vm7 = vcmp.gt.f32.partialorder %v16922_v27, 0.0 }
  0xf7   : > { %v16932_v34 = vadd.f32 %v16904_v10, %v635_v30  ;;  %v14320_v35 = vpop.f32.mrb[6].mxu0  ;;  %16337 = vpow2.f32 %v1386_v41  ;;  %v14357_v48 = vpop.f32.mrb[4].mxu1  ;;  %v1388_v62 = vmul.f32 1.442695, %v1355_v54  ;;  %vm1323_vm9 = vcmp.gt.f32.partialorder %v16935_v37, 0.0 }
  0xf8   : > { %v784_v38 = vmin.f32 %v16925_v29, 0.0  ;;  %v16939_v39 = vadd.f32 %v14320_v35, %v16904_v10  ;;  %v638_v40 = vpop.f32.mrb[7].mxu0  ;;  %16339 = vpow2.f32 %v810_v33  ;;  %v1211_v55 = vpop.f32.mrb[5].mxu1  ;;  %vm752_vm4 = vcmp.gt.f32.partialorder %v16925_v29, 0.0 }
  0xf9   : > { %v782_v43 = vmin.f32 %v16932_v34, 0.0  ;;  %v16944_v44 = vadd.f32 %v16904_v10, %v638_v40  ;;  %v14358_v58 = vpop.f32.mrb[6].mxu1  ;;  %vm750_vm5 = vcmp.gt.f32.partialorder %v16932_v34, 0.0  ;;  %v16979_v9 = vadd.f32 %v14357_v48, %v16904_v10 }
  0xfa   : > { %v822_v46 = vmul.f32 1.442695, %v784_v38  ;;  %v785_v47 = vmin.f32 %v16939_v39, 0.0  ;;  %v16957_v63 = vpop.f32.mrb[7].mxu1  ;;  %vm753_vm6 = vcmp.gt.f32.partialorder %v16939_v39, 0.0  ;;  %v16985_v14 = vadd.f32 %v16904_v10, %v1211_v55 }
  0xfb   : > { %v818_v50 = vmul.f32 1.442695, %v782_v43  ;;  %v783_v51 = vmin.f32 %v16944_v44, 0.0  ;;  %vm751_vm8 = vcmp.gt.f32.partialorder %v16944_v44, 0.0  ;;  %v16993_v25 = vadd.f32 %v14358_v58, %v16904_v10 }
  0xfc   : > { %16341 = vpow2.f32 %v822_v46  ;;  %v824_v52 = vmul.f32 1.442695, %v785_v47  ;;  %v1360_v35 = vmin.f32 %v16979_v9, 0.0  ;;  %v1358_v43 = vmin.f32 %v16985_v14, 0.0 }
  0xfd   : > { %16343 = vpow2.f32 %v818_v50  ;;  %v820_v56 = vmul.f32 1.442695, %v783_v51  ;;  %v14323_v57 = vpop.f32.mrb[8].mxu0  ;;  %vm1328_vm14 = vcmp.gt.f32.partialorder %v16979_v9, 0.0 }
  0xfe   : > { %16345 = vpow2.f32 %v824_v52  ;;  %v16955_v60 = vadd.f32 %v14323_v57, %v16904_v10  ;;  %v651_v61 = vpop.f32.mrb[9].mxu0  ;;  %v16971_v6 = vpop.eup %16333 }
  0xff   : > { %16347 = vpow2.f32 %v820_v56  ;;  %v16962_v1 = vadd.f32 %v16904_v10, %v651_v61  ;;  %v14324_v2 = vpop.f32.mrb[10].mxu0  ;;  %v16990_v19 = vpop.f32.mrb[8].mxu1  ;;  %v1398_v61 = vmul.f32 1.442695, %v1360_v35 }
 0x100   : > { %v788_v3 = vmin.f32 %v16955_v60, 0.0  ;;  %v16969_v4 = vadd.f32 %v14324_v2, %v16904_v10  ;;  %v654_v5 = vpop.f32.mrb[11].mxu0  ;;  %16349 = vpow2.f32 %v1392_v53  ;;  %v16336_v16 = vpop.eup %16335  ;;  %vm756_vm10 = vcmp.gt.f32.partialorder %v16955_v60, 0.0 }
 0x101   : > { %v786_v7 = vmin.f32 %v16962_v1, 0.0  ;;  %v16976_v8 = vadd.f32 %v16904_v10, %v654_v5  ;;  %16351 = vpow2.f32 %v1388_v62  ;;  %v16338_v21 = vpop.eup %16337  ;;  %v12620_v24 = vadd.f32 -1.0, %v16336_v16  ;;  %v16995_v26 = vpop.f32.mrb[9].mxu1 }
 0x102   : > { %v830_v11 = vmul.f32 1.442695, %v788_v3  ;;  %v789_v12 = vmin.f32 %v16969_v4, 0.0  ;;  %v16997_v28 = vpop.eup %16339  ;;  %v12618_v31 = vadd.f32 -1.0, %v16338_v21  ;;  %v17000_v36 = vpop.f32.mrb[10].mxu1  ;;  %vm754_vm11 = vcmp.gt.f32.partialorder %v16962_v1, 0.0 }
 0x103   : > { %v826_v17 = vmul.f32 1.442695, %v786_v7  ;;  %v787_v18 = vmin.f32 %v16976_v8, 0.0  ;;  %v1484_v40 = vsel %vm1324_vm2, %v16915_v20, %v12620_v24  ;;  %v17009_v46 = vpop.f32.mrb[11].mxu1  ;;  %v1394_v7 = vmul.f32 1.442695, %v1358_v43 }
 0x104   : > { %16353 = vpow2.f32 %v830_v11  ;;  %v832_v22 = vmul.f32 1.442695, %v789_v12  ;;  %1517 = vst.msk [vmem:[#allocation2 + $0x150] sm:$0xff] %vm334_vm1, %v1484_v40  ;;  %v1482_v49 = vsel %vm1322_vm3, %v16918_v23, %v12618_v31  ;;  %vm757_vm12 = vcmp.gt.f32.partialorder %v16969_v4, 0.0 }
 0x105   : > { %16355 = vpow2.f32 %v826_v17  ;;  %v828_v30 = vmul.f32 1.442695, %v787_v18  ;;  %v14327_v33 = vpop.f32.mrb[12].mxu0  ;;  %1515 = vst.msk [vmem:[#allocation2 + $0x140] sm:$0xff] %vm334_vm1, %v1482_v49  ;;  %vm755_vm2 = vcmp.gt.f32.partialorder %v16976_v8, 0.0  ;;  %vm1326_vm3 = vcmp.gt.f32.partialorder %v16985_v14, 0.0 }
 0x106   : > { %v16342_v38 = vpop.eup %16341  ;;  %16357 = vpow2.f32 %v832_v22  ;;  %v17006_v41 = vadd.f32 %v14327_v33, %v16904_v10  ;;  %v667_v42 = vpop.f32.mrb[13].mxu0  ;;  %v1361_v33 = vmin.f32 %v16993_v25, 0.0 }
 0x107   : > { %v16344_v47 = vpop.eup %16343  ;;  %v12556_v48 = vadd.f32 -1.0, %v16342_v38  ;;  %16359 = vpow2.f32 %v828_v30  ;;  %v17016_v50 = vadd.f32 %v16904_v10, %v667_v42  ;;  %v14328_v20 = vpop.f32.mrb[14].mxu0 }
 0x108   : > { %v16346_v51 = vpop.eup %16345  ;;  %v12554_v52 = vadd.f32 -1.0, %v16344_v47  ;;  %v792_v53 = vmin.f32 %v17006_v41, 0.0  ;;  %v17022_v54 = vadd.f32 %v14328_v20, %v16904_v10  ;;  %v670_v55 = vpop.f32.mrb[15].mxu0 }
 0x109   : > { %v16348_v56 = vpop.eup %16347  ;;  %v912_v23 = vsel %vm752_vm4, %v16925_v29, %v12556_v48  ;;  %v12557_v57 = vadd.f32 -1.0, %v16346_v51  ;;  %v790_v58 = vmin.f32 %v17016_v50, 0.0  ;;  %v17033_v11 = vpop.f32.mrb[12].mxu1  ;;  %v17047_v24 = vadd.f32 %v16904_v10, %v670_v55 }
 0x10a   : > { %v16350_v62 = vpop.eup %16349  ;;  %944 = vst.msk [vmem:[#allocation2 + $0x38] sm:$0xff] %vm334_vm1, %v912_v23  ;;  %v910_v2 = vsel %vm750_vm5, %v16932_v34, %v12554_v52  ;;  %v12555_v3 = vadd.f32 -1.0, %v16348_v56  ;;  %v838_v5 = vmul.f32 1.442695, %v792_v53  ;;  %v793_v18 = vmin.f32 %v17022_v54, 0.0  ;;  %v17040_v21 = vpop.f32.mrb[13].mxu1 }
 0x10b   : > { %v16352_v12 = vpop.eup %16351  ;;  %942 = vst.msk [vmem:[#allocation2 + $0x28] sm:$0xff] %vm334_vm1, %v910_v2  ;;  %v913_v29 = vsel %vm753_vm6, %v16939_v39, %v12557_v57  ;;  %v12621_v16 = vadd.f32 -1.0, %v16350_v62  ;;  %v834_v17 = vmul.f32 1.442695, %v790_v58  ;;  %v17049_v30 = vpop.f32.mrb[14].mxu1  ;;  %v791_v42 = vmin.f32 %v17047_v24, 0.0 }
 0x10c   : > { %945 = vst.msk [vmem:[#allocation2 + $0x40] sm:$0xff] %vm334_vm1, %v913_v29  ;;  %v911_v34 = vsel %vm751_vm8, %v16944_v44, %v12555_v3  ;;  %16361 = vpow2.f32 %v838_v5  ;;  %v12619_v22 = vadd.f32 -1.0, %v16352_v12  ;;  %v840_v31 = vmul.f32 1.442695, %v793_v18  ;;  %v17056_v38 = vpop.f32.mrb[15].mxu1 }
 0x10d   : > { %943 = vst.msk [vmem:[#allocation2 + $0x30] sm:$0xff] %vm334_vm1, %v911_v34  ;;  %v1485_v39 = vsel %vm1325_vm7, %v16922_v27, %v12621_v16  ;;  %16363 = vpow2.f32 %v834_v17  ;;  %v14331_v35 = vpop.f32.mrb[16].mxu0  ;;  %v1400_v48 = vmul.f32 1.442695, %v1361_v33  ;;  %v836_v53 = vmul.f32 1.442695, %v791_v42 }
 0x10e   : > { %v16354_v44 = vpop.eup %16353  ;;  %1518 = vst.msk [vmem:[#allocation2 + $0x158] sm:$0xff] %vm334_vm1, %v1485_v39  ;;  %v1483_v40 = vsel %vm1323_vm9, %v16935_v37, %v12619_v22  ;;  %16365 = vpow2.f32 %v1398_v61  ;;  %v683_v27 = vpop.f32.mrb[17].mxu0  ;;  %v17066_v49 = vadd.f32 %v14331_v35, %v16904_v10  ;;  %v17072_v37 = vadd.f32 %v16904_v10, %v16957_v63 }
 0x10f   : > { %v16356_v43 = vpop.eup %16355  ;;  %v12560_v47 = vadd.f32 -1.0, %v16354_v44  ;;  %1516 = vst.msk [vmem:[#allocation2 + $0x148] sm:$0xff] %vm334_vm1, %v1483_v40  ;;  %16367 = vpow2.f32 %v840_v31  ;;  %v14332_v20 = vpop.f32.mrb[18].mxu0  ;;  %vm760_vm4 = vcmp.gt.f32.partialorder %v17006_v41, 0.0  ;;  %vm1329_vm5 = vcmp.gt.f32.partialorder %v16993_v25, 0.0 }
 0x110   : > { %v16358_v51 = vpop.eup %16357  ;;  %v12558_v52 = vadd.f32 -1.0, %v16356_v43  ;;  %16369 = vpow2.f32 %v1394_v7  ;;  %v17075_v55 = vpop.f32.mrb[19].mxu0  ;;  %v796_v61 = vmin.f32 %v17066_v49, 0.0  ;;  %v17097_v2 = vadd.f32 %v16904_v10, %v683_v27 }
 0x111   : > { %v16360_v56 = vpop.eup %16359  ;;  %v916_v23 = vsel %vm756_vm10, %v16955_v60, %v12560_v47  ;;  %v12561_v57 = vadd.f32 -1.0, %v16358_v51  ;;  %16371 = vpow2.f32 %v1400_v48  ;;  %v17087_v62 = vpop.f32.mrb[16].mxu1  ;;  %v812_v12 = vmul.f32 1.442695, %v779_v59 }
 0x112   : > { %948 = vst.msk [vmem:[#allocation2 + $0x60] sm:$0xff] %vm334_vm1, %v916_v23  ;;  %v914_v63 = vsel %vm754_vm11, %v16962_v1, %v12558_v52  ;;  %v12559_v58 = vadd.f32 -1.0, %v16360_v56  ;;  %16373 = vpow2.f32 %v836_v53  ;;  %v1359_v1 = vmin.f32 %v17072_v37, 0.0  ;;  %v17099_v3 = vpop.f32.mrb[17].mxu1 }
 0x113   : > { %946 = vst.msk [vmem:[#allocation2 + $0x50] sm:$0xff] %vm334_vm1, %v914_v63  ;;  %v917_v60 = vsel %vm757_vm12, %v16969_v4, %v12561_v57  ;;  %v846_v7 = vmul.f32 1.442695, %v796_v61  ;;  %v17106_v4 = vadd.f32 %v14332_v20, %v16904_v10  ;;  %v17110_v29 = vpop.f32.mrb[18].mxu1  ;;  %vm758_vm6 = vcmp.gt.f32.partialorder %v17016_v50, 0.0 }
 0x114   : > { %949 = vst.msk [vmem:[#allocation2 + $0x68] sm:$0xff] %vm334_vm1, %v917_v60  ;;  %v915_v5 = vsel %vm755_vm2, %v16976_v8, %v12559_v58  ;;  %v1396_v16 = vmul.f32 1.442695, %v1359_v1  ;;  %v794_v17 = vmin.f32 %v17097_v2, 0.0  ;;  %16375 = vpow2.f32 %v16959_v0  ;;  %v17118_v8 = vpop.f32.mrb[19].mxu1 }
 0x115   : > { %947 = vst.msk [vmem:[#allocation2 + $0x58] sm:$0xff] %vm334_vm1, %v915_v5  ;;  %v17116_v18 = vpop.f32.mrb[20].mxu0  ;;  %vm761_vm7 = vcmp.gt.f32.partialorder %v17022_v54, 0.0  ;;  %16377 = vpow2.f32 %v846_v7  ;;  %v797_v59 = vmin.f32 %v17106_v4, 0.0  ;;  %v12550_v22 = vadd.f32 -1.0, %v16997_v28 }
 0x116   : > { %v16362_v34 = vpop.eup %16361  ;;  %v17123_v39 = vpop.f32.mrb[21].mxu0  ;;  %16379 = vpow2.f32 %v1396_v16  ;;  %v842_v35 = vmul.f32 1.442695, %v794_v17  ;;  %v12552_v0 = vadd.f32 -1.0, %v16971_v6  ;;  %vm749_vm8 = vcmp.gt.f32.partialorder %v16929_v32, 0.0 }
 0x117   : > { %v16364_v31 = vpop.eup %16363  ;;  %v12564_v33 = vadd.f32 -1.0, %v16362_v34  ;;  %v17126_v44 = vpop.f32.mrb[22].mxu0  ;;  %v848_v27 = vmul.f32 1.442695, %v797_v59  ;;  %16381 = vpow2.f32 %v812_v12  ;;  %v906_v43 = vsel %vm746_vm13, %v16910_v15, %v12550_v22 }
 0x118   : > { %v16366_v40 = vpop.eup %16365  ;;  %v12562_v42 = vadd.f32 -1.0, %v16364_v31  ;;  %v17131_v47 = vpop.f32.mrb[23].mxu0  ;;  %16383 = vpow2.f32 %v842_v35  ;;  %v908_v6 = vsel %vm748_vm15, %v16907_v13, %v12552_v0  ;;  %938 = vst.msk [vmem:[#allocation2] sm:$0xff] %vm334_vm1, %v906_v43  ;;  %v17162_v57 = vadd.f32 %v16904_v10, %v16995_v26  ;;  %v15854_v43 = vld [vmem:[%s16752_s24 + $0x178] sm:$0xff]  }
 0x119   : > { %v16368_v28 = vpop.eup %16367  ;;  %v920_v48 = vsel %vm760_vm4, %v17006_v41, %v12564_v33  ;;  %v12624_v20 = vadd.f32 -1.0, %v16366_v40  ;;  %16385 = vpow2.f32 %v848_v27  ;;  %940 = vst.msk [vmem:[#allocation2 + $0x10] sm:$0xff] %vm334_vm1, %v908_v6  ;;  %v17148_v41 = vadd.f32 %v16904_v10, %v17075_v55  ;;  %v17150_v53 = vpop.f32.mrb[20].mxu1 }
 0x11a   : > { %v16370_v51 = vpop.eup %16369  ;;  %952 = vst.msk [vmem:[#allocation2 + $0x88] sm:$0xff] %vm334_vm1, %v920_v48  ;;  %v918_v15 = vsel %vm758_vm6, %v17016_v50, %v12562_v42  ;;  %v12565_v52 = vadd.f32 -1.0, %v16368_v28  ;;  %v17158_v50 = vadd.f32 %v16990_v19, %v16904_v10  ;;  %v17164_v55 = vpop.f32.mrb[21].mxu1  ;;  %vm747_vm9 = vcmp.gt.f32.partialorder %v16947_v45, 0.0 }
 0x11b   : > { %v16372_v13 = vpop.eup %16371  ;;  %950 = vst.msk [vmem:[#allocation2 + $0x78] sm:$0xff] %vm334_vm1, %v918_v15  ;;  %v1488_v56 = vsel %vm1328_vm14, %v16979_v9, %v12624_v20  ;;  %v12622_v23 = vadd.f32 -1.0, %v16370_v51  ;;  %v795_v9 = vmin.f32 %v17148_v41, 0.0  ;;  %v17172_v19 = vpop.f32.mrb[22].mxu1  ;;  %vm759_vm10 = vcmp.gt.f32.partialorder %v17047_v24, 0.0 }
 0x11c   : > { %v16374_v63 = vpop.eup %16373  ;;  %v921_v58 = vsel %vm761_vm7, %v17022_v54, %v12565_v52  ;;  %1521 = vst.msk [vmem:[#allocation2 + $0x178] sm:$0xff] %vm334_vm1, %v1488_v56  ;;  %v12625_v61 = vadd.f32 -1.0, %v16372_v13  ;;  %v1364_v54 = vmin.f32 %v17158_v50, 0.0  ;;  %v17182_v5 = vpop.f32.mrb[23].mxu1  ;;  %vm764_vm11 = vcmp.gt.f32.partialorder %v17066_v49, 0.0 }
 0x11d   : > { %953 = vst.msk [vmem:[#allocation2 + $0x90] sm:$0xff] %vm334_vm1, %v921_v58  ;;  %v12563_v26 = vadd.f32 -1.0, %v16374_v63  ;;  %v1486_v60 = vsel %vm1326_vm3, %v16985_v14, %v12622_v23  ;;  %v17180_v1 = vpop.f32.mrb[24].mxu0  ;;  %v844_v12 = vmul.f32 1.442695, %v795_v9  ;;  %v1362_v16 = vmin.f32 %v17162_v57, 0.0 }
 0x11e   : > { %1519 = vst.msk [vmem:[#allocation2 + $0x168] sm:$0xff] %vm334_vm1, %v1486_v60  ;;  %v1489_v7 = vsel %vm1329_vm5, %v16993_v25, %v12625_v61  ;;  %v17190_v17 = vpop.f32.mrb[25].mxu0  ;;  %v16376_v14 = vpop.eup %16375  ;;  %v1406_v59 = vmul.f32 1.442695, %v1364_v54  ;;  %v17196_v22 = vadd.f32 %v17000_v36, %v16904_v10  ;;  %v17200_v25 = vadd.f32 %v17116_v18, %v16904_v10  ;;  %v15853_v36 = vld [vmem:[%s16752_s24 + $0x170] sm:$0xff]  }
 0x11f   : > { %v919_v34 = vsel %vm759_vm10, %v17047_v24, %v12563_v26  ;;  %1522 = vst.msk [vmem:[#allocation2 + $0x180] sm:$0xff] %vm334_vm1, %v1489_v7  ;;  %v17202_v31 = vpop.f32.mrb[26].mxu0  ;;  %v16378_v33 = vpop.eup %16377  ;;  %v12553_v35 = vadd.f32 -1.0, %v16376_v14  ;;  %16387 = vpow2.f32 %v844_v12  ;;  %v1402_v24 = vmul.f32 1.442695, %v1362_v16  ;;  %14417 = vmatprep.mubr.msk.bf16.mxu0 %vm536_vm0, %v15853_v36 }
 0x120   : > { %951 = vst.msk [vmem:[#allocation2 + $0x80] sm:$0xff] %vm334_vm1, %v919_v34  ;;  %v17207_v0 = vadd.f32 %v16904_v10, %v17009_v46  ;;  %v17209_v40 = vpop.f32.mrb[27].mxu0  ;;  %v16380_v42 = vpop.eup %16379  ;;  %v12568_v27 = vadd.f32 -1.0, %v16378_v33  ;;  %vm1327_vm12 = vcmp.gt.f32.partialorder %v17072_v37, 0.0  ;;  %16389 = vpow2.f32 %v1406_v59  ;;  %14418 = vmatmul.mubr.msk.bf16.gmra.mrb[60].mxu0 %vm536_vm0, %v15854_v43 }
 0x121   : > { %v1365_v18 = vmin.f32 %v17196_v22, 0.0  ;;  %v16382_v28 = vpop.eup %16381  ;;  %v12623_v48 = vadd.f32 -1.0, %v16380_v42  ;;  %vm762_vm13 = vcmp.gt.f32.partialorder %v17097_v2, 0.0  ;;  %v909_v46 = vsel %vm749_vm8, %v16929_v32, %v12553_v35  ;;  %v17219_v20 = vpop.f32.mrb[24].mxu1 }
 0x122   : > { %16391 = vpow2.f32 %v1402_v24  ;;  %v16384_v6 = vpop.eup %16383  ;;  %v924_v51 = vsel %vm764_vm11, %v17066_v49, %v12568_v27  ;;  %v12551_v15 = vadd.f32 -1.0, %v16382_v28  ;;  %941 = vst.msk [vmem:[#allocation2 + $0x18] sm:$0xff] %vm334_vm1, %v909_v46  ;;  %v800_v13 = vmin.f32 %v17200_v25, 0.0  ;;  %v17227_v56 = vpop.f32.mrb[25].mxu1 }
 0x123   : > { %v1408_v52 = vmul.f32 1.442695, %v1365_v18  ;;  %v16386_v32 = vpop.eup %16385  ;;  %956 = vst.msk [vmem:[#allocation2 + $0xb0] sm:$0xff] %vm334_vm1, %v924_v51  ;;  %v1487_v23 = vsel %vm1327_vm12, %v17072_v37, %v12623_v48  ;;  %v12566_v63 = vadd.f32 -1.0, %v16384_v6  ;;  %vm765_vm14 = vcmp.gt.f32.partialorder %v17106_v4, 0.0  ;;  %v17236_v58 = vpop.f32.mrb[26].mxu1 }
 0x124   : > { %v1363_v49 = vmin.f32 %v17207_v0, 0.0  ;;  %1520 = vst.msk [vmem:[#allocation2 + $0x170] sm:$0xff] %vm334_vm1, %v1487_v23  ;;  %v12569_v61 = vadd.f32 -1.0, %v16386_v32  ;;  %v907_v9 = vsel %vm747_vm9, %v16947_v45, %v12551_v15  ;;  %v854_v26 = vmul.f32 1.442695, %v800_v13  ;;  %v17244_v54 = vpop.f32.mrb[27].mxu1 }
 0x125   : > { %16393 = vpow2.f32 %v1408_v52  ;;  %v17242_v60 = vpop.f32.mrb[28].mxu0  ;;  %v922_v37 = vsel %vm762_vm13, %v17097_v2, %v12566_v63  ;;  %939 = vst.msk [vmem:[#allocation2 + $0x8] sm:$0xff] %vm334_vm1, %v907_v9  ;;  %v17252_v12 = vadd.f32 %v16904_v10, %v17123_v39  ;;  %v17256_v45 = vadd.f32 %v17126_v44, %v16904_v10  ;;  %v17306_v13 = vld [vmem:[%s19960_s3] sm:$0xff]  }
 0x126   : > { %v1404_v7 = vmul.f32 1.442695, %v1363_v49  ;;  %v17258_v16 = vpop.f32.mrb[29].mxu0  ;;  %954 = vst.msk [vmem:[#allocation2 + $0xa0] sm:$0xff] %vm334_vm1, %v922_v37  ;;  %v925_v14 = vsel %vm765_vm14, %v17106_v4, %v12569_v61  ;;  %16395 = vpow2.f32 %v854_v26  ;;  %v17266_v2 = vadd.f32 %v16904_v10, %v17131_v47  ;;  %14487 = vmatprep.subr.bf16.mxu1 %v17306_v13 }
 0x127   : > { %v17270_v39 = vadd.f32 %v17033_v11, %v16904_v10  ;;  %v17272_v34 = vpop.f32.mrb[30].mxu0  ;;  %957 = vst.msk [vmem:[#allocation2 + $0xb8] sm:$0xff] %vm334_vm1, %v925_v14  ;;  %vm763_vm0 = vcmp.gt.f32.partialorder %v17148_v41, 0.0  ;;  %vm1332_vm15 = vcmp.gt.f32.partialorder %v17158_v50, 0.0  ;;  %v798_v4 = vmin.f32 %v17252_v12, 0.0  ;;  %v17289_v42 = vpop.f32.mrb[28].mxu1 }
 0x128   : > { %16397 = vpow2.f32 %v1404_v7  ;;  %v17278_v44 = vpop.f32.mrb[31].mxu0  ;;  %vm1330_vm2 = vcmp.gt.f32.partialorder %v17162_v57, 0.0  ;;  %vm1333_vm3 = vcmp.gt.f32.partialorder %v17196_v22, 0.0  ;;  %v801_v11 = vmin.f32 %v17256_v45, 0.0  ;;  %v17295_v46 = vpop.f32.mrb[29].mxu1 }
 0x129   : > { %v799_v47 = vmin.f32 %v17266_v2, 0.0  ;;  %v16388_v59 = vpop.eup %16387  ;;  %v2713_v33 = vld [vmem:[#allocation2 + $0x11] ss:$2 sm:$0xff]  ;;  %v850_v35 = vmul.f32 1.442695, %v798_v4  ;;  %v1368_v24 = vmin.f32 %v17270_v39, 0.0  ;;  %v17287_v36 = vadd.f32 %v16904_v10, %v17040_v21 }
 0x12a   : > { %v16390_v27 = vpop.eup %16389  ;;  %v12567_v18 = vadd.f32 -1.0, %v16388_v59  ;;  %v856_v43 = vmul.f32 1.442695, %v801_v11  ;;  %v17293_v48 = vadd.f32 %v17049_v30, %v16904_v10  ;;  %v17299_v21 = vadd.f32 %v17180_v1, %v16904_v10  ;;  %v17301_v52 = vpop.f32.mrb[30].mxu1 }
 0x12b   : > { %v852_v28 = vmul.f32 1.442695, %v799_v47  ;;  %v12628_v51 = vadd.f32 -1.0, %v16390_v27  ;;  %16399 = vpow2.f32 %v850_v35  ;;  %v1414_v15 = vmul.f32 1.442695, %v1368_v24  ;;  %v17314_v1 = vpop.f32.mrb[31].mxu1 }
 0x12c   : > { %v16392_v6 = vpop.eup %16391  ;;  %v2711_v32 = vld [vmem:[#allocation2 + $0x1] ss:$2 sm:$0xff]  ;;  %v923_v30 = vsel %vm763_vm0, %v17148_v41, %v12567_v18  ;;  %16401 = vpow2.f32 %v856_v43  ;;  %v1366_v63 = vmin.f32 %v17287_v36, 0.0  ;;  %vm768_vm4 = vcmp.gt.f32.partialorder %v17200_v25, 0.0  ;;  %v2715_v27 = vld [vmem:[#allocation2 + $0x51] ss:$2 sm:$0xff] }
 0x12d   : > { %v12626_v23 = vadd.f32 -1.0, %v16392_v6  ;;  %v17312_v49 = vpop.f32.mrb[32].mxu0  ;;  %v2766_v61 = vpack.c.bf16 %v2713_v33, %v2711_v32  ;;  %955 = vst.msk [vmem:[#allocation2 + $0xa8] sm:$0xff] %vm334_vm1, %v923_v30  ;;  %v1492_v9 = vsel %vm1332_vm15, %v17158_v50, %v12628_v51  ;;  %16403 = vpow2.f32 %v852_v28  ;;  %v2717_v18 = vld [vmem:[#allocation2 + $0x61] ss:$2 sm:$0xff] }
 0x12e   : > { %v17321_v26 = vpop.f32.mrb[33].mxu0  ;;  %1525 = vst.msk [vmem:[#allocation2 + $0x1a0] sm:$0xff] %vm334_vm1, %v1492_v9  ;;  %16405 = vpow2.f32 %v1414_v15  ;;  %v1410_v7 = vmul.f32 1.442695, %v1366_v63  ;;  %v1369_v14 = vmin.f32 %v17293_v48, 0.0  ;;  %vm1331_vm5 = vcmp.gt.f32.partialorder %v17207_v0, 0.0 }
 0x12f   : > { %v16394_v41 = vpop.eup %16393  ;;  %v1490_v37 = vsel %vm1330_vm2, %v17162_v57, %v12626_v23  ;;  %v17329_v4 = vpop.f32.mrb[34].mxu0  ;;  %14459 = vmatprep.mubr.msk.bf16.mxu1 %vm334_vm1, %v2766_v61  ;;  %v804_v11 = vmin.f32 %v17299_v21, 0.0  ;;  %v17337_v47 = vadd.f32 %v16904_v10, %v17056_v38  ;;  %v17343_v35 = vadd.f32 %v16904_v10, %v17190_v17 }
 0x130   : > { %1523 = vst.msk [vmem:[#allocation2 + $0x190] sm:$0xff] %vm334_vm1, %v1490_v37  ;;  %v12629_v50 = vadd.f32 -1.0, %v16394_v41  ;;  %v17339_v57 = vpop.f32.mrb[35].mxu0  ;;  %v16396_v59 = vpop.eup %16395  ;;  %16407 = vpow2.f32 %v1410_v7  ;;  %v1416_v33 = vmul.f32 1.442695, %v1369_v14  ;;  %v17347_v24 = vadd.f32 %v17202_v31, %v16904_v10 }
 0x131   : > { %v12572_v28 = vadd.f32 -1.0, %v16396_v59  ;;  %vm766_vm6 = vcmp.gt.f32.partialorder %v17252_v12, 0.0  ;;  %v862_v6 = vmul.f32 1.442695, %v804_v11  ;;  %v17353_v51 = vpop.f32.mrb[32].mxu1  ;;  %vm769_vm7 = vcmp.gt.f32.partialorder %v17256_v45, 0.0 }
 0x132   : > { %v16398_v43 = vpop.eup %16397  ;;  %v1493_v38 = vsel %vm1333_vm3, %v17196_v22, %v12629_v50  ;;  %16409 = vpow2.f32 %v1416_v33  ;;  %v1367_v31 = vmin.f32 %v17337_v47, 0.0  ;;  %v17358_v15 = vpop.f32.mrb[33].mxu1  ;;  %vm767_vm8 = vcmp.gt.f32.partialorder %v17266_v2, 0.0  ;;  %v15856_v11 = vld [vmem:[%s19960_s3 + $0x8] sm:$0xff]  }
 0x133   : > { %1526 = vst.msk [vmem:[#allocation2 + $0x1a8] sm:$0xff] %vm334_vm1, %v1493_v38  ;;  %v12627_v17 = vadd.f32 -1.0, %v16398_v43  ;;  %v928_v22 = vsel %vm768_vm4, %v17200_v25, %v12572_v28  ;;  %16411 = vpow2.f32 %v862_v6  ;;  %v802_v32 = vmin.f32 %v17343_v35, 0.0  ;;  %v17365_v30 = vpop.f32.mrb[34].mxu1 }
 0x134   : > { %960 = vst.msk [vmem:[#allocation2 + $0xd8] sm:$0xff] %vm334_vm1, %v928_v22  ;;  %v1412_v63 = vmul.f32 1.442695, %v1367_v31  ;;  %v805_v61 = vmin.f32 %v17347_v24, 0.0  ;;  %v2767_v9 = vpack.c.bf16 %v2717_v18, %v2715_v27  ;;  %vm1336_vm9 = vcmp.gt.f32.partialorder %v17270_v39, 0.0  ;;  %v17386_v50 = vpop.f32.mrb[35].mxu1 }
 0x135   : > { %v1491_v23 = vsel %vm1331_vm5, %v17207_v0, %v12627_v17  ;;  %v17372_v41 = vpop.f32.mrb[36].mxu0  ;;  %v16400_v25 = vpop.eup %16399  ;;  %v858_v37 = vmul.f32 1.442695, %v802_v32  ;;  %v17378_v7 = vadd.f32 %v16904_v10, %v17209_v40  ;;  %v17382_v14 = vadd.f32 %v17087_v62, %v16904_v10 }
 0x136   : > { %1524 = vst.msk [vmem:[#allocation2 + $0x198] sm:$0xff] %vm334_vm1, %v1491_v23  ;;  %v17384_v0 = vpop.f32.mrb[37].mxu0  ;;  %v16402_v59 = vpop.eup %16401  ;;  %v12570_v33 = vadd.f32 -1.0, %v16400_v25  ;;  %16413 = vpow2.f32 %v1412_v63  ;;  %v864_v27 = vmul.f32 1.442695, %v805_v61  ;;  %14460 = vmatmul.mubr.msk.bf16.vlgmr.msra.gmra.mrb[60].mxu1 %vm334_vm1, %v2767_v9  ;;  %v17394_v40 = vadd.f32 %v16904_v10, %v17099_v3 }
 0x137   : > { %v17396_v62 = vpop.f32.mrb[38].mxu0  ;;  %v16404_v18 = vpop.eup %16403  ;;  %v12573_v43 = vadd.f32 -1.0, %v16402_v59  ;;  %vm1334_vm10 = vcmp.gt.f32.partialorder %v17287_v36, 0.0  ;;  %16415 = vpow2.f32 %v858_v37  ;;  %v803_v38 = vmin.f32 %v17378_v7, 0.0  ;;  %14488 = vmatpush3.bf16.msra.mxu1 %v17306_v13 }
 0x138   : > { %v17400_v28 = vpop.f32.mrb[39].mxu0  ;;  %v16406_v6 = vpop.eup %16405  ;;  %v926_v17 = vsel %vm766_vm6, %v17252_v12, %v12570_v33  ;;  %v12571_v3 = vadd.f32 -1.0, %v16404_v18  ;;  %16417 = vpow2.f32 %v864_v27  ;;  %v17408_v31 = vadd.f32 %v17110_v29, %v16904_v10  ;;  %14489 = vmatprep.subr.bf16.mxu1 %v15856_v11 }
 0x139   : > { %958 = vst.msk [vmem:[#allocation2 + $0xc8] sm:$0xff] %vm334_vm1, %v926_v17  ;;  %v929_v22 = vsel %vm769_vm7, %v17256_v45, %v12573_v43  ;;  %v12632_v32 = vadd.f32 -1.0, %v16406_v6  ;;  %v860_v13 = vmul.f32 1.442695, %v803_v38  ;;  %v1372_v23 = vmin.f32 %v17382_v14, 0.0  ;;  %v17422_v61 = vpop.f32.mrb[36].mxu1 }
 0x13a   : > { %v16408_v63 = vpop.eup %16407  ;;  %961 = vst.msk [vmem:[#allocation2 + $0xe0] sm:$0xff] %vm334_vm1, %v929_v22  ;;  %v927_v12 = vsel %vm767_vm8, %v17266_v2, %v12571_v3  ;;  %vm1337_vm11 = vcmp.gt.f32.partialorder %v17293_v48, 0.0  ;;  %vm772_vm12 = vcmp.gt.f32.partialorder %v17299_v21, 0.0  ;;  %v1370_v29 = vmin.f32 %v17394_v40, 0.0  ;;  %v17428_v37 = vpop.f32.mrb[37].mxu1 }
 0x13b   : > { %959 = vst.msk [vmem:[#allocation2 + $0xd0] sm:$0xff] %vm334_vm1, %v927_v12  ;;  %v1496_v45 = vsel %vm1336_vm9, %v17270_v39, %v12632_v32  ;;  %v12630_v9 = vadd.f32 -1.0, %v16408_v63  ;;  %16419 = vpow2.f32 %v860_v13  ;;  %v1422_v25 = vmul.f32 1.442695, %v1372_v23  ;;  %14490 = vmatpush3.bf16.msra.mxu1 %v15856_v11 }
 0x13c   : > { %v16410_v2 = vpop.eup %16409  ;;  %1529 = vst.msk [vmem:[#allocation2 + $0x1c8] sm:$0xff] %vm334_vm1, %v1496_v45  ;;  %v1418_v59 = vmul.f32 1.442695, %v1370_v29  ;;  %v1373_v33 = vmin.f32 %v17408_v31, 0.0  ;;  %v17434_v27 = vadd.f32 %v17242_v60, %v16904_v10  ;;  %v17438_v18 = vadd.f32 %v16904_v10, %v17118_v8  ;;  %v17451_v60 = vpop.f32.mrb[38].mxu1 }
 0x13d   : > { %v17440_v39 = vpop.f32.mrb[40].mxu0  ;;  %v16412_v43 = vpop.eup %16411  ;;  %v1494_v11 = vsel %vm1334_vm10, %v17287_v36, %v12630_v9  ;;  %v12633_v38 = vadd.f32 -1.0, %v16410_v2  ;;  %16421 = vpow2.f32 %v1422_v25  ;;  %v17447_v6 = vadd.f32 %v16904_v10, %v17258_v16  ;;  %v17477_v25 = vld [vmem:[%s19959_s2] ss:$0 sm:$0xff] }
 0x13e   : > { %v17449_v17 = vpop.f32.mrb[41].mxu0  ;;  %1527 = vst.msk [vmem:[#allocation2 + $0x1b8] sm:$0xff] %vm334_vm1, %v1494_v11  ;;  %v12576_v8 = vadd.f32 -1.0, %v16412_v43  ;;  %vm1335_vm13 = vcmp.gt.f32.partialorder %v17337_v47, 0.0  ;;  %16423 = vpow2.f32 %v1418_v59  ;;  %v1424_v3 = vmul.f32 1.442695, %v1373_v33 }
 0x13f   : > { %v17455_v22 = vpop.f32.mrb[42].mxu0  ;;  %v17457_v36 = vpop.f32.mrb[39].mxu1  ;;  %v1497_v10 = vsel %vm1337_vm11, %v17293_v48, %v12633_v38  ;;  %vm770_vm14 = vcmp.gt.f32.partialorder %v17343_v35, 0.0  ;;  %v808_v16 = vmin.f32 %v17434_v27, 0.0  ;;  %v1371_v32 = vmin.f32 %v17438_v18, 0.0 }
 0x140   : > { %v17465_v13 = vpop.f32.mrb[43].mxu0  ;;  %v16414_v23 = vpop.eup %16413  ;;  %1530 = vst.msk [vmem:[#allocation2 + $0x1d0] sm:$0xff] %vm334_vm1, %v1497_v10  ;;  %v932_v63 = vsel %vm772_vm12, %v17299_v21, %v12576_v8  ;;  %vm773_vm0 = vcmp.gt.f32.partialorder %v17347_v24, 0.0  ;;  %16425 = vpow2.f32 %v1424_v3  ;;  %v806_v48 = vmin.f32 %v17447_v6, 0.0 }
 0x141   : > { %v16416_v12 = vpop.eup %16415  ;;  %964 = vst.msk [vmem:[#allocation2 + $0x100] sm:$0xff] %vm334_vm1, %v932_v63  ;;  %v12631_v29 = vadd.f32 -1.0, %v16414_v23  ;;  %v870_v45 = vmul.f32 1.442695, %v808_v16  ;;  %v1420_v9 = vmul.f32 1.442695, %v1371_v32  ;;  %v17481_v2 = vadd.f32 %v17477_v25, %v17272_v34 }
 0x142   : > { %v17483_v21 = vpop.f32.mrb[40].mxu1  ;;  %v16418_v59 = vpop.eup %16417  ;;  %v12574_v33 = vadd.f32 -1.0, %v16416_v12  ;;  %v866_v43 = vmul.f32 1.442695, %v806_v48  ;;  %v17487_v11 = vadd.f32 %v17477_v25, %v17278_v44  ;;  %v17491_v38 = vadd.f32 %v17477_v25, %v17150_v53 }
 0x143   : > { %v17493_v8 = vpop.f32.mrb[41].mxu1  ;;  %v1495_v34 = vsel %vm1335_vm13, %v17337_v47, %v12631_v29  ;;  %v12577_v3 = vadd.f32 -1.0, %v16418_v59  ;;  %vm771_vm15 = vcmp.gt.f32.partialorder %v17378_v7, 0.0  ;;  %16427 = vpow2.f32 %v870_v45 }
 0x144   : > { %v17499_v10 = vpop.f32.mrb[42].mxu1  ;;  %1528 = vst.msk [vmem:[#allocation2 + $0x1c0] sm:$0xff] %vm334_vm1, %v1495_v34  ;;  %v930_v44 = vsel %vm770_vm14, %v17343_v35, %v12574_v33  ;;  %vm1340_vm2 = vcmp.gt.f32.partialorder %v17382_v14, 0.0  ;;  %16429 = vpow2.f32 %v1420_v9  ;;  %v809_v53 = vmin.f32 %v17481_v2, 0.0 }
 0x145   : > { %v17507_v16 = vpop.f32.mrb[44].mxu0  ;;  %v17509_v47 = vpop.f32.mrb[43].mxu1  ;;  %962 = vst.msk [vmem:[#allocation2 + $0xf0] sm:$0xff] %vm334_vm1, %v930_v44  ;;  %v933_v23 = vsel %vm773_vm0, %v17347_v24, %v12577_v3  ;;  %vm1338_vm3 = vcmp.gt.f32.partialorder %v17394_v40, 0.0  ;;  %16431 = vpow2.f32 %v866_v43  ;;  %v807_v35 = vmin.f32 %v17487_v11, 0.0 }
 0x146   : > { %19967 = vst [vmem:[#allocation5_spill] sm:$0xff] %v17509_v47  ;;  %v16420_v32 = vpop.eup %16419  ;;  %v17517_v63 = vpop.f32.mrb[45].mxu0  ;;  %965 = vst.msk [vmem:[#allocation2 + $0x108] sm:$0xff] %vm334_vm1, %v933_v23  ;;  %v872_v12 = vmul.f32 1.442695, %v809_v53  ;;  %v1376_v29 = vmin.f32 %v17491_v38, 0.0  ;;  %v17523_v45 = vadd.f32 %v17477_v25, %v17164_v55  ;;  %v17529_v33 = vadd.f32 %v17477_v25, %v17172_v19 }
 0x147   : > { %v12575_v48 = vadd.f32 -1.0, %v16420_v32  ;;  %v17525_v9 = vpop.f32.mrb[46].mxu0  ;;  %v16422_v24 = vpop.eup %16421  ;;  %v868_v59 = vmul.f32 1.442695, %v807_v35  ;;  %v17533_v43 = vadd.f32 %v17477_v25, %v17182_v5  ;;  %v17537_v34 = vadd.f32 %v17477_v25, %v17219_v20  ;;  %v17555_v35 = vld [vmem:[%s19959_s2] ss:$0 sm:$0xff] }
 0x148   : > { %v17539_v3 = vpop.f32.mrb[47].mxu0  ;;  %v16424_v55 = vpop.eup %16423  ;;  %v12636_v53 = vadd.f32 -1.0, %v16422_v24  ;;  %16433 = vpow2.f32 %v872_v12  ;;  %v1430_v32 = vmul.f32 1.442695, %v1376_v29  ;;  %vm1341_vm4 = vcmp.gt.f32.partialorder %v17408_v31, 0.0 }
 0x149   : > { %v931_v44 = vsel %vm771_vm15, %v17378_v7, %v12575_v48  ;;  %v12634_v19 = vadd.f32 -1.0, %v16424_v55  ;;  %16435 = vpow2.f32 %v868_v59  ;;  %v1374_v5 = vmin.f32 %v17523_v45, 0.0 }
 0x14a   : > { %963 = vst.msk [vmem:[#allocation2 + $0xf8] sm:$0xff] %vm334_vm1, %v931_v44  ;;  %v16426_v20 = vpop.eup %16425  ;;  %v1500_v23 = vsel %vm1340_vm2, %v17382_v14, %v12636_v53  ;;  %vm776_vm5 = vcmp.gt.f32.partialorder %v17434_v27, 0.0  ;;  %16437 = vpow2.f32 %v1430_v32  ;;  %v1377_v7 = vmin.f32 %v17529_v33, 0.0 }
 0x14b   : > { %1533 = vst.msk [vmem:[#allocation2 + $0x1f0] sm:$0xff] %vm334_vm1, %v1500_v23  ;;  %v1498_v48 = vsel %vm1338_vm3, %v17394_v40, %v12634_v19  ;;  %v12637_v12 = vadd.f32 -1.0, %v16426_v20  ;;  %vm1339_vm6 = vcmp.gt.f32.partialorder %v17438_v18, 0.0  ;;  %v1426_v14 = vmul.f32 1.442695, %v1374_v5 }
 0x14c   : > { %1531 = vst.msk [vmem:[#allocation2 + $0x1e0] sm:$0xff] %vm334_vm1, %v1498_v48  ;;  %vm774_vm7 = vcmp.gt.f32.partialorder %v17447_v6, 0.0  ;;  %v1432_v29 = vmul.f32 1.442695, %v1377_v7  ;;  %v1375_v24 = vmin.f32 %v17533_v43, 0.0  ;;  %v1380_v59 = vmin.f32 %v17537_v34, 0.0 }
 0x14d   : > { %v17566_v55 = vpop.f32.mrb[48].mxu0  ;;  %v16428_v44 = vpop.eup %16427  ;;  %v1501_v40 = vsel %vm1341_vm4, %v17408_v31, %v12637_v12  ;;  %16439 = vpow2.f32 %v1426_v14  ;;  %v17573_v53 = vadd.f32 %v17312_v49, %v17555_v35  ;;  %v17577_v32 = vadd.f32 %v17477_v25, %v17227_v56  ;;  %v15857_v14 = vld [vmem:[%s19960_s3 + $0x20] sm:$0xff]  }
 0x14e   : > { %v17579_v19 = vpop.f32.mrb[49].mxu0  ;;  %v16430_v5 = vpop.eup %16429  ;;  %1534 = vst.msk [vmem:[#allocation2 + $0x1f8] sm:$0xff] %vm334_vm1, %v1501_v40  ;;  %v12580_v20 = vadd.f32 -1.0, %v16428_v44  ;;  %16441 = vpow2.f32 %v1432_v29  ;;  %v1428_v23 = vmul.f32 1.442695, %v1375_v24  ;;  %vm777_vm8 = vcmp.gt.f32.partialorder %v17481_v2, 0.0  ;;  %14519 = vmatprep.subr.bf16.mxu1 %v15857_v14 }
 0x14f   : > { %v1438_v7 = vmul.f32 1.442695, %v1380_v59  ;;  %v17582_v48 = vpop.f32.mrb[50].mxu0  ;;  %v16432_v31 = vpop.eup %16431  ;;  %v12635_v12 = vadd.f32 -1.0, %v16430_v5  ;;  %vm775_vm9 = vcmp.gt.f32.partialorder %v17487_v11, 0.0  ;;  %v1933_v56 = vmin.f32 %v17573_v53, 0.0 }
 0x150   : > { %v17587_v49 = vpop.f32.mrb[51].mxu0  ;;  %v936_v29 = vsel %vm776_vm5, %v17434_v27, %v12580_v20  ;;  %v12578_v24 = vadd.f32 -1.0, %v16432_v31  ;;  %16443 = vpow2.f32 %v1428_v23  ;;  %v1378_v59 = vmin.f32 %v17577_v32, 0.0 }
 0x151   : > { %968 = vst.msk [vmem:[#allocation2 + $0x128] sm:$0xff] %vm334_vm1, %v936_v29  ;;  %v1499_v44 = vsel %vm1339_vm6, %v17438_v18, %v12635_v12  ;;  %16445 = vpow2.f32 %v1438_v7  ;;  %v1967_v40 = vmul.f32 1.442695, %v1933_v56  ;;  %v17602_v5 = vadd.f32 %v17555_v35, %v17321_v26  ;;  %v2721_v7 = vld [vmem:[#allocation2 + $0xb1] ss:$2 sm:$0xff] }
 0x152   : > { %v16434_v47 = vpop.eup %16433  ;;  %1532 = vst.msk [vmem:[#allocation2 + $0x1e8] sm:$0xff] %vm334_vm1, %v1499_v44  ;;  %v934_v27 = vsel %vm774_vm7, %v17447_v6, %v12578_v24  ;;  %v1434_v20 = vmul.f32 1.442695, %v1378_v59  ;;  %v17610_v23 = vadd.f32 %v17477_v25, %v17236_v58  ;;  %v17614_v18 = vadd.f32 %v17329_v4, %v17555_v35  ;;  %v2719_v6 = vld [vmem:[#allocation2 + $0xa1] ss:$2 sm:$0xff] }
 0x153   : > { %v16436_v26 = vpop.eup %16435  ;;  %966 = vst.msk [vmem:[#allocation2 + $0x118] sm:$0xff] %vm334_vm1, %v934_v27  ;;  %v12581_v31 = vadd.f32 -1.0, %v16434_v47  ;;  %vm1344_vm10 = vcmp.gt.f32.partialorder %v17491_v38, 0.0  ;;  %16447 = vpow2.f32 %v1967_v40  ;;  %v1931_v12 = vmin.f32 %v17602_v5, 0.0 }
 0x154   : > { %v16438_v56 = vpop.eup %16437  ;;  %v12579_v14 = vadd.f32 -1.0, %v16436_v26  ;;  %vm1342_vm11 = vcmp.gt.f32.partialorder %v17523_v45, 0.0  ;;  %16449 = vpow2.f32 %v1434_v20  ;;  %v1381_v58 = vmin.f32 %v17610_v23, 0.0 }
 0x155   : > { %v17621_v4 = vpop.f32.mrb[52].mxu0  ;;  %v937_v29 = vsel %vm777_vm8, %v17481_v2, %v12581_v31  ;;  %v12640_v47 = vadd.f32 -1.0, %v16438_v56  ;;  %vm1345_vm12 = vcmp.gt.f32.partialorder %v17529_v33, 0.0  ;;  %v1963_v24 = vmul.f32 1.442695, %v1931_v12 }
 0x156   : > { %969 = vst.msk [vmem:[#allocation2 + $0x130] sm:$0xff] %vm334_vm1, %v937_v29  ;;  %v935_v59 = vsel %vm775_vm9, %v17487_v11, %v12579_v14  ;;  %v1440_v44 = vmul.f32 1.442695, %v1381_v58  ;;  %v1934_v40 = vmin.f32 %v17614_v18, 0.0  ;;  %v2768_v27 = vpack.c.bf16 %v2721_v7, %v2719_v6  ;;  %v17632_v20 = vpop.f32.mrb[53].mxu0 }
 0x157   : > { %v16440_v26 = vpop.eup %16439  ;;  %967 = vst.msk [vmem:[#allocation2 + $0x120] sm:$0xff] %vm334_vm1, %v935_v59  ;;  %v1504_v2 = vsel %vm1344_vm10, %v17491_v38, %v12640_v47  ;;  %16451 = vpow2.f32 %v1963_v24  ;;  %v17640_v31 = vadd.f32 %v17477_v25, %v17244_v54  ;;  %v17644_v11 = vadd.f32 %v17555_v35, %v17339_v57  ;;  %v17646_v12 = vpop.f32.mrb[54].mxu0 }
 0x158   : > { %v16442_v7 = vpop.eup %16441  ;;  %1537 = vst.msk [vmem:[#allocation2 + $0x218] sm:$0xff] %vm334_vm1, %v1504_v2  ;;  %v12638_v6 = vadd.f32 -1.0, %v16440_v26  ;;  %16453 = vpow2.f32 %v1440_v44  ;;  %v1969_v56 = vmul.f32 1.442695, %v1934_v40  ;;  %14463 = vmatprep.mubr.msk.bf16.mxu1 %vm334_vm1, %v2768_v27  ;;  %v17652_v38 = vadd.f32 %v17372_v41, %v17555_v35  ;;  %v17654_v54 = vpop.f32.mrb[55].mxu0 }
 0x159   : > { %v12641_v14 = vadd.f32 -1.0, %v16442_v7  ;;  %vm1343_vm13 = vcmp.gt.f32.partialorder %v17533_v43, 0.0  ;;  %vm1348_vm14 = vcmp.gt.f32.partialorder %v17537_v34, 0.0  ;;  %v1379_v57 = vmin.f32 %v17640_v31, 0.0 }
 0x15a   : > { %v16444_v58 = vpop.eup %16443  ;;  %v1502_v29 = vsel %vm1342_vm11, %v17523_v45, %v12638_v6  ;;  %vm1901_vm0 = vcmp.gt.f32.partialorder %v17573_v53, 0.0  ;;  %16455 = vpow2.f32 %v1969_v56  ;;  %v1932_v41 = vmin.f32 %v17644_v11, 0.0 }
 0x15b   : > { %v16446_v47 = vpop.eup %16445  ;;  %1535 = vst.msk [vmem:[#allocation2 + $0x208] sm:$0xff] %vm334_vm1, %v1502_v29  ;;  %v1505_v24 = vsel %vm1345_vm12, %v17529_v33, %v12641_v14  ;;  %v12639_v59 = vadd.f32 -1.0, %v16444_v58  ;;  %v1436_v44 = vmul.f32 1.442695, %v1379_v57  ;;  %v1937_v40 = vmin.f32 %v17652_v38, 0.0 }
 0x15c   : > { %1538 = vst.msk [vmem:[#allocation2 + $0x220] sm:$0xff] %vm334_vm1, %v1505_v24  ;;  %v12644_v27 = vadd.f32 -1.0, %v16446_v47  ;;  %v1965_v45 = vmul.f32 1.442695, %v1932_v41  ;;  %v17672_v26 = vadd.f32 %v17555_v35, %v17384_v0  ;;  %v17676_v2 = vadd.f32 %v17396_v62, %v17555_v35 }
 0x15d   : > { %v17678_v7 = vpop.f32.mrb[56].mxu0  ;;  %v16448_v6 = vpop.eup %16447  ;;  %v1503_v33 = vsel %vm1343_vm13, %v17533_v43, %v12639_v59  ;;  %16457 = vpow2.f32 %v1436_v44  ;;  %v1975_v56 = vmul.f32 1.442695, %v1937_v40  ;;  %v17685_v14 = vadd.f32 %v17555_v35, %v17400_v28 }
 0x15e   : > { %v17687_v57 = vpop.f32.mrb[57].mxu0  ;;  %v16450_v0 = vpop.eup %16449  ;;  %1536 = vst.msk [vmem:[#allocation2 + $0x210] sm:$0xff] %vm334_vm1, %v1503_v33  ;;  %v1508_v62 = vsel %vm1348_vm14, %v17537_v34, %v12644_v27  ;;  %v12688_v58 = vadd.f32 -1.0, %v16448_v6  ;;  %vm1346_vm15 = vcmp.gt.f32.partialorder %v17577_v32, 0.0  ;;  %16459 = vpow2.f32 %v1965_v45 }
 0x15f   : > { %v17694_v43 = vpop.f32.mrb[58].mxu0  ;;  %1541 = vst.msk [vmem:[#allocation2 + $0x240] sm:$0xff] %vm334_vm1, %v1508_v62  ;;  %v12642_v29 = vadd.f32 -1.0, %v16450_v0  ;;  %vm1899_vm2 = vcmp.gt.f32.partialorder %v17602_v5, 0.0  ;;  %16461 = vpow2.f32 %v1975_v56  ;;  %v1935_v28 = vmin.f32 %v17672_v26, 0.0 }
 0x160   : > { %v17699_v41 = vpop.f32.mrb[59].mxu0  ;;  %v2061_v34 = vsel %vm1901_vm0, %v17573_v53, %v12688_v58  ;;  %vm1349_vm3 = vcmp.gt.f32.partialorder %v17610_v23, 0.0  ;;  %v1938_v47 = vmin.f32 %v17676_v2, 0.0  ;;  %v1936_v24 = vmin.f32 %v17685_v14, 0.0 }
 0x161   : > { %v16452_v59 = vpop.eup %16451  ;;  %2094 = vst.msk [vmem:[#allocation2 + $0x290] sm:$0xff] %vm334_vm1, %v2061_v34  ;;  %v1506_v44 = vsel %vm1346_vm15, %v17577_v32, %v12642_v29  ;;  %v1971_v40 = vmul.f32 1.442695, %v1935_v28  ;;  %v17711_v27 = vadd.f32 %v17477_v25, %v17289_v42  ;;  %v17715_v45 = vadd.f32 %v17477_v25, %v17295_v46 }
 0x162   : > { %v16454_v53 = vpop.eup %16453  ;;  %1539 = vst.msk [vmem:[#allocation2 + $0x230] sm:$0xff] %vm334_vm1, %v1506_v44  ;;  %v12686_v6 = vadd.f32 -1.0, %v16452_v59  ;;  %v1977_v33 = vmul.f32 1.442695, %v1938_v47  ;;  %v1973_v56 = vmul.f32 1.442695, %v1936_v24  ;;  %v17720_v0 = vadd.f32 %v17477_v25, %v17301_v52 }
 0x163   : > { %v12645_v32 = vadd.f32 -1.0, %v16454_v53  ;;  %vm1902_vm4 = vcmp.gt.f32.partialorder %v17614_v18, 0.0  ;;  %16463 = vpow2.f32 %v1971_v40  ;;  %v1384_v42 = vmin.f32 %v17711_v27, 0.0 }
 0x164   : > { %v16456_v62 = vpop.eup %16455  ;;  %v2059_v46 = vsel %vm1899_vm2, %v17602_v5, %v12686_v6  ;;  %vm1347_vm5 = vcmp.gt.f32.partialorder %v17640_v31, 0.0  ;;  %16465 = vpow2.f32 %v1977_v33  ;;  %v1382_v58 = vmin.f32 %v17715_v45, 0.0 }
 0x165   : > { %2092 = vst.msk [vmem:[#allocation2 + $0x280] sm:$0xff] %vm334_vm1, %v2059_v46  ;;  %v1509_v52 = vsel %vm1349_vm3, %v17610_v23, %v12645_v32  ;;  %v12689_v29 = vadd.f32 -1.0, %v16456_v62  ;;  %16467 = vpow2.f32 %v1973_v56  ;;  %v1446_v28 = vmul.f32 1.442695, %v1384_v42  ;;  %v2723_v56 = vld [vmem:[#allocation2 + $0xf1] ss:$2 sm:$0xff] }
 0x166   : > { %1542 = vst.msk [vmem:[#allocation2 + $0x248] sm:$0xff] %vm334_vm1, %v1509_v52  ;;  %vm1900_vm6 = vcmp.gt.f32.partialorder %v17644_v11, 0.0  ;;  %v1442_v34 = vmul.f32 1.442695, %v1382_v58  ;;  %v1385_v5 = vmin.f32 %v17720_v0, 0.0  ;;  %v17738_v47 = vadd.f32 %v17477_v25, %v17314_v1 }
 0x167   : > { %v16458_v24 = vpop.eup %16457  ;;  %v2062_v59 = vsel %vm1902_vm4, %v17614_v18, %v12689_v29  ;;  %16469 = vpow2.f32 %v1446_v28  ;;  %v17745_v23 = vadd.f32 %v17440_v39, %v17555_v35  ;;  %v17749_v44 = vadd.f32 %v17555_v35, %v17449_v17  ;;  %v2725_v25 = vld [vmem:[#allocation2 + $0x101] ss:$2 sm:$0xff]  ;;  %v2729_v62 = vld [vmem:[#allocation2 + $0x151] ss:$2 sm:$0xff] }
 0x168   : > { %v16460_v40 = vpop.eup %16459  ;;  %2095 = vst.msk [vmem:[#allocation2 + $0x298] sm:$0xff] %vm334_vm1, %v2062_v59  ;;  %v12643_v53 = vadd.f32 -1.0, %v16458_v24  ;;  %vm1905_vm7 = vcmp.gt.f32.partialorder %v17652_v38, 0.0  ;;  %16471 = vpow2.f32 %v1442_v34  ;;  %v1448_v1 = vmul.f32 1.442695, %v1385_v5 }
 0x169   : > { %v16462_v6 = vpop.eup %16461  ;;  %v12687_v18 = vadd.f32 -1.0, %v16460_v40  ;;  %vm1903_vm8 = vcmp.gt.f32.partialorder %v17672_v26, 0.0  ;;  %v1383_v39 = vmin.f32 %v17738_v47, 0.0  ;;  %v1941_v33 = vmin.f32 %v17745_v23, 0.0  ;;  %v2727_v42 = vld [vmem:[#allocation2 + $0x141] ss:$2 sm:$0xff] }
 0x16a   : > { %v1507_v17 = vsel %vm1347_vm5, %v17640_v31, %v12643_v53  ;;  %v12692_v32 = vadd.f32 -1.0, %v16462_v6  ;;  %vm1906_vm9 = vcmp.gt.f32.partialorder %v17676_v2, 0.0  ;;  %16473 = vpow2.f32 %v1448_v1 }
 0x16b   : > { %1540 = vst.msk [vmem:[#allocation2 + $0x238] sm:$0xff] %vm334_vm1, %v1507_v17  ;;  %v2060_v46 = vsel %vm1900_vm6, %v17644_v11, %v12687_v18  ;;  %v1444_v58 = vmul.f32 1.442695, %v1383_v39  ;;  %v1983_v52 = vmul.f32 1.442695, %v1941_v33  ;;  %v1939_v29 = vmin.f32 %v17749_v44, 0.0 }
 0x16c   : > { %2093 = vst.msk [vmem:[#allocation2 + $0x288] sm:$0xff] %vm334_vm1, %v2060_v46  ;;  %v2065_v31 = vsel %vm1905_vm7, %v17652_v38, %v12692_v32  ;;  %v17771_v28 = vadd.f32 %v17455_v22, %v17555_v35  ;;  %v2769_v34 = vpack.c.bf16 %v2725_v25, %v2723_v56  ;;  %v17775_v5 = vadd.f32 %v17555_v35, %v17465_v13 }
 0x16d   : > { %v16464_v11 = vpop.eup %16463  ;;  %2098 = vst.msk [vmem:[#allocation2 + $0x2b8] sm:$0xff] %vm334_vm1, %v2065_v31  ;;  %16475 = vpow2.f32 %v1444_v58  ;;  %v1979_v24 = vmul.f32 1.442695, %v1939_v29  ;;  %v2770_v59 = vpack.c.bf16 %v2729_v62, %v2727_v42  ;;  %v17780_v40 = vadd.f32 %v17353_v51, %v17555_v35 }
 0x16e   : > { %v16466_v38 = vpop.eup %16465  ;;  %v12690_v53 = vadd.f32 -1.0, %v16464_v11  ;;  %vm1904_vm10 = vcmp.gt.f32.partialorder %v17685_v14, 0.0  ;;  %16477 = vpow2.f32 %v1983_v52  ;;  %v1942_v22 = vmin.f32 %v17771_v28, 0.0  ;;  %14464 = vmatmul.mubr.msk.bf16.gmra.mrb[64].mxu1 %vm334_vm1, %v2769_v34 }
 0x16f   : > { %v16468_v13 = vpop.eup %16467  ;;  %v12693_v1 = vadd.f32 -1.0, %v16466_v38  ;;  %vm1352_vm11 = vcmp.gt.f32.partialorder %v17711_v27, 0.0  ;;  %16479 = vpow2.f32 %v1979_v24  ;;  %v1940_v25 = vmin.f32 %v17775_v5, 0.0  ;;  %14467 = vmatprep.mubr.msk.bf16.mxu1 %vm334_vm1, %v2770_v59 }
 0x170   : > { %v2063_v51 = vsel %vm1903_vm8, %v17672_v26, %v12690_v53  ;;  %v12691_v6 = vadd.f32 -1.0, %v16468_v13  ;;  %vm1350_vm12 = vcmp.gt.f32.partialorder %v17715_v45, 0.0  ;;  %v1985_v18 = vmul.f32 1.442695, %v1942_v22  ;;  %v2733_v22 = vld [vmem:[#allocation2 + $0x1a1] ss:$2 sm:$0xff] }
 0x171   : > { %v16470_v39 = vpop.eup %16469  ;;  %2096 = vst.msk [vmem:[#allocation2 + $0x2a8] sm:$0xff] %vm334_vm1, %v2063_v51  ;;  %v2066_v33 = vsel %vm1906_vm9, %v17676_v2, %v12693_v1  ;;  %v1981_v56 = vmul.f32 1.442695, %v1940_v25  ;;  %v2470_v17 = vmin.f32 %v17780_v40, 0.0  ;;  %v17799_v32 = vadd.f32 %v17555_v35, %v17358_v15  ;;  %v2731_v1 = vld [vmem:[#allocation2 + $0x191] ss:$2 sm:$0xff] }
 0x172   : > { %v16472_v42 = vpop.eup %16471  ;;  %2099 = vst.msk [vmem:[#allocation2 + $0x2c0] sm:$0xff] %vm334_vm1, %v2066_v33  ;;  %v2064_v26 = vsel %vm1904_vm10, %v17685_v14, %v12691_v6  ;;  %v12648_v62 = vadd.f32 -1.0, %v16470_v39  ;;  %16481 = vpow2.f32 %v1985_v18  ;;  %v17807_v46 = vadd.f32 %v17365_v30, %v17555_v35  ;;  %v2737_v6 = vld [vmem:[#allocation2 + $0x1f1] ss:$2 sm:$0xff] }
 0x173   : > { %2097 = vst.msk [vmem:[#allocation2 + $0x2b0] sm:$0xff] %vm334_vm1, %v2064_v26  ;;  %v12646_v2 = vadd.f32 -1.0, %v16472_v42  ;;  %vm1353_vm13 = vcmp.gt.f32.partialorder %v17720_v0, 0.0  ;;  %16483 = vpow2.f32 %v1981_v56  ;;  %v2500_v15 = vmul.f32 1.442695, %v2470_v17 }
 0x174   : > { %v16474_v58 = vpop.eup %16473  ;;  %v1512_v52 = vsel %vm1352_vm11, %v17711_v27, %v12648_v62  ;;  %vm1351_vm14 = vcmp.gt.f32.partialorder %v17738_v47, 0.0  ;;  %v2468_v14 = vmin.f32 %v17799_v32, 0.0  ;;  %v2471_v29 = vmin.f32 %v17807_v46, 0.0  ;;  %v2735_v56 = vld [vmem:[#allocation2 + $0x1e1] ss:$2 sm:$0xff] }
 0x175   : > { %1545 = vst.msk [vmem:[#allocation2 + $0x268] sm:$0xff] %vm334_vm1, %v1512_v52  ;;  %v1510_v30 = vsel %vm1350_vm12, %v17715_v45, %v12646_v2  ;;  %v12649_v31 = vadd.f32 -1.0, %v16474_v58  ;;  %16485 = vpow2.f32 %v2500_v15  ;;  %v17823_v34 = vadd.f32 %v17507_v16, %v17555_v35 }
 0x176   : > { %1543 = vst.msk [vmem:[#allocation2 + $0x258] sm:$0xff] %vm334_vm1, %v1510_v30  ;;  %v2496_v27 = vmul.f32 1.442695, %v2468_v14  ;;  %v2502_v11 = vmul.f32 1.442695, %v2471_v29  ;;  %v17828_v24 = vadd.f32 %v17555_v35, %v17386_v50  ;;  %v17832_v59 = vadd.f32 %v17555_v35, %v17517_v63 }
 0x177   : > { %v16476_v38 = vpop.eup %16475  ;;  %v1513_v45 = vsel %vm1353_vm13, %v17720_v0, %v12649_v31  ;;  %vm1909_vm0 = vcmp.gt.f32.partialorder %v17745_v23, 0.0  ;;  %v1945_v16 = vmin.f32 %v17823_v34, 0.0  ;;  %v17841_v53 = vadd.f32 %v17525_v9, %v17555_v35 }
 0x178   : > { %v16478_v50 = vpop.eup %16477  ;;  %1546 = vst.msk [vmem:[#allocation2 + $0x270] sm:$0xff] %vm334_vm1, %v1513_v45  ;;  %v12647_v13 = vadd.f32 -1.0, %v16476_v38  ;;  %vm1907_vm15 = vcmp.gt.f32.partialorder %v17749_v44, 0.0  ;;  %16487 = vpow2.f32 %v2496_v27  ;;  %v2469_v63 = vmin.f32 %v17828_v24, 0.0 }
 0x179   : > { %v16480_v0 = vpop.eup %16479  ;;  %v12696_v25 = vadd.f32 -1.0, %v16478_v50  ;;  %vm1910_vm2 = vcmp.gt.f32.partialorder %v17771_v28, 0.0  ;;  %16489 = vpow2.f32 %v2502_v11  ;;  %v1991_v51 = vmul.f32 1.442695, %v1945_v16 }
 0x17a   : > { %v1511_v9 = vsel %vm1351_vm14, %v17738_v47, %v12647_v13  ;;  %v12694_v18 = vadd.f32 -1.0, %v16480_v0  ;;  %v2498_v39 = vmul.f32 1.442695, %v2469_v63  ;;  %v1943_v33 = vmin.f32 %v17832_v59, 0.0 }
 0x17b   : > { %1544 = vst.msk [vmem:[#allocation2 + $0x260] sm:$0xff] %vm334_vm1, %v1511_v9  ;;  %v2069_v17 = vsel %vm1909_vm0, %v17745_v23, %v12696_v25  ;;  %vm1908_vm3 = vcmp.gt.f32.partialorder %v17775_v5, 0.0  ;;  %16491 = vpow2.f32 %v1991_v51  ;;  %v1946_v42 = vmin.f32 %v17841_v53, 0.0  ;;  %v2739_v51 = vld [vmem:[#allocation2 + $0x231] ss:$2 sm:$0xff] }
 0x17c   : > { %v16482_v26 = vpop.eup %16481  ;;  %2102 = vst.msk [vmem:[#allocation2 + $0x2e0] sm:$0xff] %vm334_vm1, %v2069_v17  ;;  %v2067_v47 = vsel %vm1907_vm15, %v17749_v44, %v12694_v18  ;;  %16493 = vpow2.f32 %v2498_v39  ;;  %v1987_v62 = vmul.f32 1.442695, %v1943_v33  ;;  %v2771_v2 = vpack.c.bf16 %v2733_v22, %v2731_v1 }
 0x17d   : > { %v16484_v15 = vpop.eup %16483  ;;  %2100 = vst.msk [vmem:[#allocation2 + $0x2d0] sm:$0xff] %vm334_vm1, %v2067_v47  ;;  %v12697_v58 = vadd.f32 -1.0, %v16482_v26  ;;  %v1993_v23 = vmul.f32 1.442695, %v1946_v42  ;;  %v17864_v52 = vadd.f32 %v17555_v35, %v17539_v3  ;;  %v2772_v14 = vpack.c.bf16 %v2737_v6, %v2735_v56  ;;  %v2741_v6 = vld [vmem:[#allocation2 + $0x241] ss:$2 sm:$0xff] }
 0x17e   : > { %v12695_v29 = vadd.f32 -1.0, %v16484_v15  ;;  %16495 = vpow2.f32 %v1987_v62  ;;  %14468 = vmatmul.mubr.msk.bf16.gmra.mrb[68].mxu1 %vm334_vm1, %v2771_v2  ;;  %v17869_v44 = vadd.f32 %v17422_v61, %v17555_v35  ;;  %v17873_v30 = vadd.f32 %v17555_v35, %v17428_v37  ;;  %v2743_v15 = vld [vmem:[#allocation2 + $0x281] ss:$2 sm:$0xff] }
 0x17f   : > { %v16486_v31 = vpop.eup %16485  ;;  %v2070_v27 = vsel %vm1910_vm2, %v17771_v28, %v12697_v58  ;;  %vm2442_vm4 = vcmp.gt.f32.partialorder %v17780_v40, 0.0  ;;  %16497 = vpow2.f32 %v1993_v23  ;;  %v1944_v3 = vmin.f32 %v17864_v52, 0.0  ;;  %14471 = vmatprep.mubr.msk.bf16.mxu1 %vm334_vm1, %v2772_v14  ;;  %v2745_v58 = vld [vmem:[#allocation2 + $0x291] ss:$2 sm:$0xff] }
 0x180   : > { %2103 = vst.msk [vmem:[#allocation2 + $0x2e8] sm:$0xff] %vm334_vm1, %v2070_v27  ;;  %v2068_v61 = vsel %vm1908_vm3, %v17775_v5, %v12695_v29  ;;  %v12752_v37 = vadd.f32 -1.0, %v16486_v31  ;;  %vm2440_vm5 = vcmp.gt.f32.partialorder %v17799_v32, 0.0  ;;  %v2474_v11 = vmin.f32 %v17869_v44, 0.0 }
 0x181   : > { %2101 = vst.msk [vmem:[#allocation2 + $0x2d8] sm:$0xff] %vm334_vm1, %v2068_v61  ;;  %vm2443_vm6 = vcmp.gt.f32.partialorder %v17807_v46, 0.0  ;;  %v1989_v28 = vmul.f32 1.442695, %v1944_v3  ;;  %v2472_v38 = vmin.f32 %v17873_v30, 0.0  ;;  %v17892_v45 = vadd.f32 %v17451_v60, %v17555_v35 }
 0x182   : > { %v16488_v16 = vpop.eup %16487  ;;  %v2582_v22 = vsel %vm2442_vm4, %v17780_v40, %v12752_v37  ;;  %v2508_v5 = vmul.f32 1.442695, %v2474_v11  ;;  %v17897_v50 = vadd.f32 %v17566_v55, %v17555_v35  ;;  %v17901_v13 = vadd.f32 %v17555_v35, %v17457_v36 }
 0x183   : > { %v16490_v63 = vpop.eup %16489  ;;  %2611 = vst.msk [vmem:[#allocation2 + $0x3d0] sm:$0xff] %vm334_vm1, %v2582_v22  ;;  %v12750_v1 = vadd.f32 -1.0, %v16488_v16  ;;  %vm1913_vm7 = vcmp.gt.f32.partialorder %v17823_v34, 0.0  ;;  %16499 = vpow2.f32 %v1989_v28  ;;  %v2504_v60 = vmul.f32 1.442695, %v2472_v38 }
 0x184   : > { %v12753_v0 = vadd.f32 -1.0, %v16490_v63  ;;  %vm2441_vm8 = vcmp.gt.f32.partialorder %v17828_v24, 0.0  ;;  %16501 = vpow2.f32 %v2508_v5  ;;  %v2475_v40 = vmin.f32 %v17892_v45, 0.0 }
 0x185   : > { %v16492_v55 = vpop.eup %16491  ;;  %v2580_v36 = vsel %vm2440_vm5, %v17799_v32, %v12750_v1  ;;  %vm1911_vm9 = vcmp.gt.f32.partialorder %v17832_v59, 0.0  ;;  %16503 = vpow2.f32 %v2504_v60  ;;  %v1949_v25 = vmin.f32 %v17897_v50, 0.0 }
 0x186   : > { %v16494_v9 = vpop.eup %16493  ;;  %2609 = vst.msk [vmem:[#allocation2 + $0x3c0] sm:$0xff] %vm334_vm1, %v2580_v36  ;;  %v2583_v18 = vsel %vm2443_vm6, %v17807_v46, %v12753_v0  ;;  %v12700_v39 = vadd.f32 -1.0, %v16492_v55  ;;  %v2510_v33 = vmul.f32 1.442695, %v2475_v40  ;;  %v2473_v56 = vmin.f32 %v17901_v13, 0.0 }
 0x187   : > { %2612 = vst.msk [vmem:[#allocation2 + $0x3d8] sm:$0xff] %vm334_vm1, %v2583_v18  ;;  %v12751_v32 = vadd.f32 -1.0, %v16494_v9  ;;  %v1999_v17 = vmul.f32 1.442695, %v1949_v25  ;;  %v17920_v42 = vadd.f32 %v17555_v35, %v17579_v19  ;;  %v17924_v26 = vadd.f32 %v17582_v48, %v17555_v35  ;;  %v19968_v9 = vld [vmem:[#allocation5_spill] sm:$0xff] }
 0x188   : > { %v16496_v47 = vpop.eup %16495  ;;  %v2073_v46 = vsel %vm1913_vm7, %v17823_v34, %v12700_v39  ;;  %16505 = vpow2.f32 %v2510_v33  ;;  %v2506_v62 = vmul.f32 1.442695, %v2473_v56  ;;  %v2773_v2 = vpack.c.bf16 %v2741_v6, %v2739_v51 }
 0x189   : > { %v16498_v23 = vpop.eup %16497  ;;  %2106 = vst.msk [vmem:[#allocation2 + $0x308] sm:$0xff] %vm334_vm1, %v2073_v46  ;;  %v2581_v19 = vsel %vm2441_vm8, %v17828_v24, %v12751_v32  ;;  %v12698_v14 = vadd.f32 -1.0, %v16496_v47  ;;  %vm1914_vm10 = vcmp.gt.f32.partialorder %v17841_v53, 0.0  ;;  %16507 = vpow2.f32 %v1999_v17 }
 0x18a   : > { %2610 = vst.msk [vmem:[#allocation2 + $0x3c8] sm:$0xff] %vm334_vm1, %v2581_v19  ;;  %v12701_v48 = vadd.f32 -1.0, %v16498_v23  ;;  %vm1912_vm11 = vcmp.gt.f32.partialorder %v17864_v52, 0.0  ;;  %16509 = vpow2.f32 %v2506_v62  ;;  %v1947_v34 = vmin.f32 %v17920_v42, 0.0  ;;  %14472 = vmatmul.mubr.msk.bf16.gmra.mrb[72].mxu1 %vm334_vm1, %v2773_v2 }
 0x18b   : > { %v2071_v29 = vsel %vm1911_vm9, %v17832_v59, %v12698_v14  ;;  %v1950_v24 = vmin.f32 %v17924_v26, 0.0  ;;  %v17944_v31 = vadd.f32 %v17555_v35, %v17587_v49  ;;  %v2774_v27 = vpack.c.bf16 %v2745_v58, %v2743_v15 }
 0x18c   : > { %2104 = vst.msk [vmem:[#allocation2 + $0x2f8] sm:$0xff] %vm334_vm1, %v2071_v29  ;;  %v2074_v3 = vsel %vm1914_vm10, %v17841_v53, %v12701_v48  ;;  %v1995_v61 = vmul.f32 1.442695, %v1947_v34  ;;  %v17950_v37 = vadd.f32 %v17483_v21, %v17555_v35  ;;  %v17954_v11 = vadd.f32 %v17555_v35, %v17493_v8 }
 0x18d   : > { %v16500_v59 = vpop.eup %16499  ;;  %2107 = vst.msk [vmem:[#allocation2 + $0x310] sm:$0xff] %vm334_vm1, %v2074_v3  ;;  %vm2446_vm12 = vcmp.gt.f32.partialorder %v17869_v44, 0.0  ;;  %v2001_v49 = vmul.f32 1.442695, %v1950_v24  ;;  %v1948_v28 = vmin.f32 %v17944_v31, 0.0  ;;  %14475 = vmatprep.mubr.msk.bf16.mxu1 %vm334_vm1, %v2774_v27  ;;  %v17962_v53 = vadd.f32 %v17499_v10, %v17555_v35 }
 0x18e   : > { %v16502_v21 = vpop.eup %16501  ;;  %v12699_v38 = vadd.f32 -1.0, %v16500_v59  ;;  %vm2444_vm13 = vcmp.gt.f32.partialorder %v17873_v30, 0.0  ;;  %16511 = vpow2.f32 %v1995_v61  ;;  %v2478_v8 = vmin.f32 %v17950_v37, 0.0  ;;  %v2749_v24 = vld [vmem:[#allocation2 + $0x2e1] ss:$2 sm:$0xff] }
 0x18f   : > { %v16504_v16 = vpop.eup %16503  ;;  %v12756_v22 = vadd.f32 -1.0, %v16502_v21  ;;  %vm2447_vm14 = vcmp.gt.f32.partialorder %v17892_v45, 0.0  ;;  %16513 = vpow2.f32 %v2001_v49  ;;  %v1997_v5 = vmul.f32 1.442695, %v1948_v28  ;;  %v2747_v49 = vld [vmem:[#allocation2 + $0x2d1] ss:$2 sm:$0xff] }
 0x190   : > { %v2072_v63 = vsel %vm1912_vm11, %v17864_v52, %v12699_v38  ;;  %v12754_v1 = vadd.f32 -1.0, %v16504_v16  ;;  %v2516_v10 = vmul.f32 1.442695, %v2478_v8  ;;  %v2476_v60 = vmin.f32 %v17954_v11, 0.0 }
 0x191   : > { %2105 = vst.msk [vmem:[#allocation2 + $0x300] sm:$0xff] %vm334_vm1, %v2072_v63  ;;  %v2586_v0 = vsel %vm2446_vm12, %v17869_v44, %v12756_v22  ;;  %vm1917_vm0 = vcmp.gt.f32.partialorder %v17897_v50, 0.0  ;;  %16515 = vpow2.f32 %v1997_v5  ;;  %v2479_v40 = vmin.f32 %v17962_v53, 0.0 }
 0x192   : > { %v16506_v55 = vpop.eup %16505  ;;  %2615 = vst.msk [vmem:[#allocation2 + $0x3f8] sm:$0xff] %vm334_vm1, %v2586_v0  ;;  %v2584_v52 = vsel %vm2444_vm13, %v17873_v30, %v12754_v1  ;;  %16517 = vpow2.f32 %v2516_v10  ;;  %v2512_v36 = vmul.f32 1.442695, %v2476_v60  ;;  %v17983_v25 = vadd.f32 %v17621_v4, %v17555_v35 }
 0x193   : > { %v16508_v51 = vpop.eup %16507  ;;  %2613 = vst.msk [vmem:[#allocation2 + $0x3e8] sm:$0xff] %vm334_vm1, %v2584_v52  ;;  %v12757_v44 = vadd.f32 -1.0, %v16506_v55  ;;  %v2518_v6 = vmul.f32 1.442695, %v2479_v40  ;;  %v17988_v18 = vadd.f32 %v17555_v35, %v19968_v9  ;;  %v17992_v39 = vadd.f32 %v17555_v35, %v17632_v20 }
 0x194   : > { %v16510_v30 = vpop.eup %16509  ;;  %v12704_v33 = vadd.f32 -1.0, %v16508_v51  ;;  %vm2445_vm15 = vcmp.gt.f32.partialorder %v17901_v13, 0.0  ;;  %16519 = vpow2.f32 %v2512_v36  ;;  %v1953_v4 = vmin.f32 %v17983_v25, 0.0 }
 0x195   : > { %v2587_v56 = vsel %vm2447_vm14, %v17892_v45, %v12757_v44  ;;  %v12755_v32 = vadd.f32 -1.0, %v16510_v30  ;;  %vm1915_vm2 = vcmp.gt.f32.partialorder %v17920_v42, 0.0  ;;  %16521 = vpow2.f32 %v2518_v6 }
 0x196   : > { %2616 = vst.msk [vmem:[#allocation2 + $0x400] sm:$0xff] %vm334_vm1, %v2587_v56  ;;  %v2077_v20 = vsel %vm1917_vm0, %v17897_v50, %v12704_v33  ;;  %vm1918_vm3 = vcmp.gt.f32.partialorder %v17924_v26, 0.0  ;;  %v2007_v17 = vmul.f32 1.442695, %v1953_v4  ;;  %v2477_v47 = vmin.f32 %v17988_v18, 0.0 }
 0x197   : > { %2110 = vst.msk [vmem:[#allocation2 + $0x330] sm:$0xff] %vm334_vm1, %v2077_v20  ;;  %v2585_v46 = vsel %vm2445_vm15, %v17901_v13, %v12755_v32  ;;  %v1951_v45 = vmin.f32 %v17992_v39, 0.0  ;;  %v18011_v62 = vadd.f32 %v17646_v12, %v17555_v35  ;;  %v18015_v2 = vadd.f32 %v17555_v35, %v17654_v54 }
 0x198   : > { %v16512_v50 = vpop.eup %16511  ;;  %2614 = vst.msk [vmem:[#allocation2 + $0x3f0] sm:$0xff] %vm334_vm1, %v2585_v46  ;;  %vm1916_vm4 = vcmp.gt.f32.partialorder %v17944_v31, 0.0  ;;  %16523 = vpow2.f32 %v2007_v17  ;;  %v2514_v15 = vmul.f32 1.442695, %v2477_v47  ;;  %v18021_v13 = vadd.f32 %v17678_v7, %v17555_v35 }
 0x199   : > { %v16514_v58 = vpop.eup %16513  ;;  %v12702_v23 = vadd.f32 -1.0, %v16512_v50  ;;  %v2003_v19 = vmul.f32 1.442695, %v1951_v45  ;;  %v1954_v12 = vmin.f32 %v18011_v62, 0.0  ;;  %v18026_v54 = vadd.f32 %v17555_v35, %v17687_v57 }
 0x19a   : > { %v12705_v14 = vadd.f32 -1.0, %v16514_v58  ;;  %vm2450_vm5 = vcmp.gt.f32.partialorder %v17950_v37, 0.0  ;;  %16525 = vpow2.f32 %v2514_v15  ;;  %v1952_v48 = vmin.f32 %v18015_v2, 0.0 }
 0x19b   : > { %v16516_v34 = vpop.eup %16515  ;;  %v2075_v7 = vsel %vm1915_vm2, %v17920_v42, %v12702_v23  ;;  %vm2448_vm6 = vcmp.gt.f32.partialorder %v17954_v11, 0.0  ;;  %16527 = vpow2.f32 %v2003_v19  ;;  %v2009_v29 = vmul.f32 1.442695, %v1954_v12  ;;  %v14441_v12 = vpop.f32.mrb[44].mxu1 }
 0x19c   : > { %v16518_v27 = vpop.eup %16517  ;;  %2108 = vst.msk [vmem:[#allocation2 + $0x320] sm:$0xff] %vm334_vm1, %v2075_v7  ;;  %v2078_v57 = vsel %vm1918_vm3, %v17924_v26, %v12705_v14  ;;  %v12703_v3 = vadd.f32 -1.0, %v16516_v34  ;;  %v2005_v61 = vmul.f32 1.442695, %v1952_v48  ;;  %v1957_v59 = vmin.f32 %v18021_v13, 0.0  ;;  %v2377_v7 = vpop.f32.mrb[45].mxu1 }
 0x19d   : > { %2111 = vst.msk [vmem:[#allocation2 + $0x338] sm:$0xff] %vm334_vm1, %v2078_v57  ;;  %v12760_v42 = vadd.f32 -1.0, %v16518_v27  ;;  %vm2451_vm7 = vcmp.gt.f32.partialorder %v17962_v53, 0.0  ;;  %16529 = vpow2.f32 %v2009_v29  ;;  %v1955_v28 = vmin.f32 %v18026_v54, 0.0 }
 0x19e   : > { %v16520_v21 = vpop.eup %16519  ;;  %v2076_v38 = vsel %vm1916_vm4, %v17944_v31, %v12703_v3  ;;  %16531 = vpow2.f32 %v2005_v61  ;;  %v2015_v26 = vmul.f32 1.442695, %v1957_v59  ;;  %v18047_v8 = vadd.f32 %v17694_v43, %v17555_v35  ;;  %v2759_v59 = vld [vmem:[#allocation2 + $0x3c1] ss:$2 sm:$0xff] }
 0x19f   : > { %v16522_v16 = vpop.eup %16521  ;;  %2109 = vst.msk [vmem:[#allocation2 + $0x328] sm:$0xff] %vm334_vm1, %v2076_v38  ;;  %v2590_v22 = vsel %vm2450_vm5, %v17950_v37, %v12760_v42  ;;  %v12758_v5 = vadd.f32 -1.0, %v16520_v21  ;;  %v2011_v63 = vmul.f32 1.442695, %v1955_v28  ;;  %v2775_v1 = vpack.c.bf16 %v2749_v24, %v2747_v49  ;;  %v14442_v24 = vpop.f32.mrb[46].mxu1 }
 0x1a0   : > { %2619 = vst.msk [vmem:[#allocation2 + $0x420] sm:$0xff] %vm334_vm1, %v2590_v22  ;;  %v12761_v10 = vadd.f32 -1.0, %v16522_v16  ;;  %16533 = vpow2.f32 %v2015_v26  ;;  %v1958_v31 = vmin.f32 %v18047_v8, 0.0  ;;  %v18061_v60 = vadd.f32 %v17555_v35, %v17699_v41  ;;  %v2380_v61 = vpop.f32.mrb[47].mxu1  ;;  %v2761_v49 = vld [vmem:[#allocation2 + $0x3d1] ss:$2 sm:$0xff] }
 0x1a1   : > { %v2588_v43 = vsel %vm2448_vm6, %v17954_v11, %v12758_v5  ;;  %16535 = vpow2.f32 %v2011_v63  ;;  %14476 = vmatmul.mubr.msk.bf16.gmra.mrb[76].mxu1 %vm334_vm1, %v2775_v1  ;;  %vm1921_vm8 = vcmp.gt.f32.partialorder %v17983_v25, 0.0  ;;  %vm2449_vm9 = vcmp.gt.f32.partialorder %v17988_v18, 0.0  ;;  %v14445_v21 = vpop.f32.mrb[48].mxu1 }
 0x1a2   : > { %v16524_v37 = vpop.eup %16523  ;;  %2617 = vst.msk [vmem:[#allocation2 + $0x410] sm:$0xff] %vm334_vm1, %v2588_v43  ;;  %v2591_v0 = vsel %vm2451_vm7, %v17962_v53, %v12761_v10  ;;  %v2017_v40 = vmul.f32 1.442695, %v1958_v31  ;;  %v1956_v11 = vmin.f32 %v18061_v60, 0.0  ;;  %vm1919_vm10 = vcmp.gt.f32.partialorder %v17992_v39, 0.0  ;;  %v2393_v10 = vpop.f32.mrb[49].mxu1 }
 0x1a3   : > { %2620 = vst.msk [vmem:[#allocation2 + $0x428] sm:$0xff] %vm334_vm1, %v2591_v0  ;;  %v12708_v55 = vadd.f32 -1.0, %v16524_v37  ;;  %vm1922_vm11 = vcmp.gt.f32.partialorder %v18011_v62, 0.0  ;;  %v16670_v20 = vmov 0.0   ;;  %vm1920_vm12 = vcmp.gt.f32.partialorder %v18015_v2, 0.0 }
 0x1a4   : > { %v16526_v52 = vpop.eup %16525  ;;  %16537 = vpow2.f32 %v2017_v40  ;;  %v2753_v35 = vld [vmem:[#allocation2 + $0x331] ss:$2 sm:$0xff]  ;;  %v2013_v44 = vmul.f32 1.442695, %v1956_v11  ;;  %335 = vst.msk [vmem:[#allocation2 + $0x20] sm:$0xff] %vm334_vm1, %v16670_v20  ;;  %336 = vst.msk [vmem:[#allocation2 + $0x48] sm:$0xff] %vm334_vm1, %v16670_v20  ;;  %14967 = vmatprep.subr.bf16.mxu0 %v16670_v20  ;;  %v2778_v22 = vpack.c.bf16 %v2761_v49, %v2759_v59 }
 0x1a5   : > { %v16528_v41 = vpop.eup %16527  ;;  %v2081_v36 = vsel %vm1921_vm8, %v17983_v25, %v12708_v55  ;;  %v12759_v51 = vadd.f32 -1.0, %v16526_v52  ;;  %337 = vst.msk [vmem:[#allocation2 + $0x70] sm:$0xff] %vm334_vm1, %v16670_v20  ;;  %338 = vst.msk [vmem:[#allocation2 + $0x98] sm:$0xff] %vm334_vm1, %v16670_v20  ;;  %vm1925_vm13 = vcmp.gt.f32.partialorder %v18021_v13, 0.0  ;;  %vm1923_vm14 = vcmp.gt.f32.partialorder %v18026_v54, 0.0 }
 0x1a6   : > { %2114 = vst.msk [vmem:[#allocation2 + $0x358] sm:$0xff] %vm334_vm1, %v2081_v36  ;;  %v12706_v53 = vadd.f32 -1.0, %v16528_v41  ;;  %v2751_v6 = vld [vmem:[#allocation2 + $0x321] ss:$2 sm:$0xff]  ;;  %16539 = vpow2.f32 %v2013_v44  ;;  %339 = vst.msk [vmem:[#allocation2 + $0xc0] sm:$0xff] %vm334_vm1, %v16670_v20  ;;  %vm1926_vm0 = vcmp.gt.f32.partialorder %v18047_v8, 0.0 }
 0x1a7   : > { %v16530_v9 = vpop.eup %16529  ;;  %v2589_v30 = vsel %vm2449_vm9, %v17988_v18, %v12759_v51  ;;  %v2776_v33 = vpack.c.bf16 %v2753_v35, %v2751_v6  ;;  %340 = vst.msk [vmem:[#allocation2 + $0xe8] sm:$0xff] %vm334_vm1, %v16670_v20  ;;  %341 = vst.msk [vmem:[#allocation2 + $0x110] sm:$0xff] %vm334_vm1, %v16670_v20  ;;  %vm1924_vm15 = vcmp.gt.f32.partialorder %v18061_v60, 0.0  ;;  %v2637_v51 = vld [vmem:[#allocation2] ss:$2 sm:$0xff] }
 0x1a8   : > { %v16532_v4 = vpop.eup %16531  ;;  %2618 = vst.msk [vmem:[#allocation2 + $0x418] sm:$0xff] %vm334_vm1, %v2589_v30  ;;  %v2079_v56 = vsel %vm1919_vm10, %v17992_v39, %v12706_v53  ;;  %v12709_v32 = vadd.f32 -1.0, %v16530_v9  ;;  %342 = vst.msk [vmem:[#allocation2 + $0x138] sm:$0xff] %vm334_vm1, %v16670_v20  ;;  %v2639_v44 = vld [vmem:[#allocation2 + $0x10] ss:$2 sm:$0xff] }
 0x1a9   : > { %2112 = vst.msk [vmem:[#allocation2 + $0x348] sm:$0xff] %vm334_vm1, %v2079_v56  ;;  %v12707_v25 = vadd.f32 -1.0, %v16532_v4  ;;  %14479 = vmatprep.mubr.msk.bf16.mxu1 %vm334_vm1, %v2776_v33  ;;  %343 = vst.msk [vmem:[#allocation2 + $0x160] sm:$0xff] %vm334_vm1, %v16670_v20 }
 0x1aa   : > { %344 = vst.msk [vmem:[#allocation2 + $0x188] sm:$0xff] %vm334_vm1, %v16670_v20  ;;  %345 = vst.msk [vmem:[#allocation2 + $0x1b0] sm:$0xff] %vm334_vm1, %v16670_v20  ;;  %v16534_v18 = vpop.eup %16533  ;;  %v2082_v39 = vsel %vm1922_vm11, %v18011_v62, %v12709_v32  ;;  %v2765_v11 = vld [vmem:[#allocation2 + $0x421] ss:$2 sm:$0xff] }
 0x1ab   : > { %346 = vst.msk [vmem:[#allocation2 + $0x1d8] sm:$0xff] %vm334_vm1, %v16670_v20  ;;  %347 = vst.msk [vmem:[#allocation2 + $0x200] sm:$0xff] %vm334_vm1, %v16670_v20  ;;  %v16536_v17 = vpop.eup %16535  ;;  %v2080_v47 = vsel %vm1920_vm12, %v18015_v2, %v12707_v25  ;;  %v12712_v46 = vadd.f32 -1.0, %v16534_v18  ;;  %v2692_v25 = vpack.c.bf16 %v2639_v44, %v2637_v51  ;;  %v2643_v18 = vld [vmem:[#allocation2 + $0x60] ss:$2 sm:$0xff] }
 0x1ac   : > { %348 = vst.msk [vmem:[#allocation2 + $0x228] sm:$0xff] %vm334_vm1, %v16670_v20  ;;  %349 = vst.msk [vmem:[#allocation2 + $0x250] sm:$0xff] %vm334_vm1, %v16670_v20  ;;  %v12710_v45 = vadd.f32 -1.0, %v16536_v17 }
 0x1ad   : > { %350 = vst.msk [vmem:[#allocation2 + $0x278] sm:$0xff] %vm334_vm1, %v16670_v20  ;;  %351 = vst.msk [vmem:[#allocation2 + $0x2a0] sm:$0xff] %vm334_vm1, %v16670_v20  ;;  %v2085_v50 = vsel %vm1925_vm13, %v18021_v13, %v12712_v46  ;;  %v18130_v13 = vld [vmem:[%s19959_s2] ss:$0 sm:$0xff] }
 0x1ae   : > { %352 = vst.msk [vmem:[#allocation2 + $0x2c8] sm:$0xff] %vm334_vm1, %v16670_v20  ;;  %353 = vst.msk [vmem:[#allocation2 + $0x2f0] sm:$0xff] %vm334_vm1, %v16670_v20  ;;  %v16538_v15 = vpop.eup %16537  ;;  %v2083_v62 = vsel %vm1923_vm14, %v18026_v54, %v12710_v45  ;;  %v2386_v54 = vadd.f32 %v18130_v13, %v14441_v12  ;;  %v18136_v29 = vadd.f32 %v18130_v13, %v2377_v7  ;;  %v2645_v45 = vld [vmem:[#allocation2 + $0xa0] ss:$2 sm:$0xff] }
 0x1af   : > { %354 = vst.msk [vmem:[#allocation2 + $0x318] sm:$0xff] %vm334_vm1, %v16670_v20  ;;  %355 = vst.msk [vmem:[#allocation2 + $0x340] sm:$0xff] %vm334_vm1, %v16670_v20  ;;  %v12713_v58 = vadd.f32 -1.0, %v16538_v15  ;;  %v18139_v27 = vadd.f32 %v18130_v13, %v14442_v24  ;;  %v18144_v28 = vadd.f32 %v18130_v13, %v2380_v61  ;;  %v18147_v26 = vadd.f32 %v18130_v13, %v14445_v21  ;;  %v2763_v55 = vld [vmem:[#allocation2 + $0x411] ss:$2 sm:$0xff] }
 0x1b0   : > { %356 = vst.msk [vmem:[#allocation2 + $0x368] sm:$0xff] %vm334_vm1, %v16670_v20  ;;  %357 = vst.msk [vmem:[#allocation2 + $0x390] sm:$0xff] %vm334_vm1, %v16670_v20  ;;  %v16540_v2 = vpop.eup %16539  ;;  %v2482_v48 = vmin.f32 %v2386_v54, 0.0  ;;  %v2480_v3 = vmin.f32 %v18136_v29, 0.0  ;;  %v18154_v43 = vadd.f32 %v18130_v13, %v2393_v10  ;;  %vm2454_vm2 = vcmp.gt.f32.partialorder %v2386_v54, 0.0 }
 0x1b1   : > { %358 = vst.msk [vmem:[#allocation2 + $0x3b8] sm:$0xff] %vm334_vm1, %v16670_v20  ;;  %359 = vst.msk [vmem:[#allocation2 + $0x3e0] sm:$0xff] %vm334_vm1, %v16670_v20  ;;  %v2086_v23 = vsel %vm1926_vm0, %v18047_v8, %v12713_v58  ;;  %v12711_v19 = vadd.f32 -1.0, %v16540_v2  ;;  %v2483_v42 = vmin.f32 %v18139_v27, 0.0  ;;  %v2481_v63 = vmin.f32 %v18144_v28, 0.0 }
 0x1b2   : > { %360 = vst.msk [vmem:[#allocation2 + $0x408] sm:$0xff] %vm334_vm1, %v16670_v20  ;;  %361 = vst.msk [vmem:[#allocation2 + $0x430] sm:$0xff] %vm334_vm1, %v16670_v20  ;;  %v2524_v34 = vmul.f32 1.442695, %v2482_v48  ;;  %v2520_v16 = vmul.f32 1.442695, %v2480_v3  ;;  %v2779_v4 = vpack.c.bf16 %v2765_v11, %v2763_v55 }
 0x1b3   : > { %362 = vst.msk [vmem:[#allocation2 + $0x458] sm:$0xff] %vm334_vm1, %v16670_v20  ;;  %363 = vst.msk [vmem:[#allocation2 + $0x480] sm:$0xff] %vm334_vm1, %v16670_v20  ;;  %v2084_v14 = vsel %vm1924_vm15, %v18061_v60, %v12711_v19  ;;  %v2526_v5 = vmul.f32 1.442695, %v2483_v42  ;;  %v2486_v1 = vmin.f32 %v18147_v26, 0.0  ;;  %v14446_v60 = vpop.f32.mrb[50].mxu1 }
 0x1b4   : > { %364 = vst.msk [vmem:[#allocation2 + $0x4a8] sm:$0xff] %vm334_vm1, %v16670_v20  ;;  %381 = vst [vmem:[#allocation4 + $0x8] sm:$0xff] %v16670_v20  ;;  %16541 = vpow2.f32 %v2524_v34  ;;  %v2522_v31 = vmul.f32 1.442695, %v2481_v63  ;;  %v18157_v0 = vadd.f32 %v18130_v13, %v14446_v60  ;;  %v2396_v40 = vpop.f32.mrb[51].mxu1  ;;  %v2484_v52 = vmin.f32 %v18154_v43, 0.0 }
 0x1b5   : > { %382 = vst [vmem:[#allocation4 + $0x10] sm:$0xff] %v16670_v20  ;;  %383 = vst [vmem:[#allocation4 + $0x20] sm:$0xff] %v16670_v20  ;;  %16543 = vpow2.f32 %v2520_v16  ;;  %v2532_v37 = vmul.f32 1.442695, %v2486_v1  ;;  %v18161_v35 = vadd.f32 %v18130_v13, %v2396_v40  ;;  %v14449_v41 = vpop.f32.mrb[52].mxu1  ;;  %vm2452_vm3 = vcmp.gt.f32.partialorder %v18136_v29, 0.0 }
 0x1b6   : > { %384 = vst [vmem:[#allocation4 + $0x28] sm:$0xff] %v16670_v20  ;;  %385 = vst [vmem:[#allocation4 + $0x38] sm:$0xff] %v16670_v20  ;;  %16545 = vpow2.f32 %v2526_v5  ;;  %v2487_v53 = vmin.f32 %v18157_v0, 0.0  ;;  %v18165_v6 = vadd.f32 %v18130_v13, %v14449_v41  ;;  %v2528_v30 = vmul.f32 1.442695, %v2484_v52  ;;  %v2409_v46 = vpop.f32.mrb[53].mxu1 }
 0x1b7   : > { %386 = vst [vmem:[#allocation4 + $0x40] sm:$0xff] %v16670_v20  ;;  %387 = vst [vmem:[#allocation4 + $0x50] sm:$0xff] %v16670_v20  ;;  %16547 = vpow2.f32 %v2522_v31  ;;  %v2485_v33 = vmin.f32 %v18161_v35, 0.0  ;;  %v18173_v15 = vadd.f32 %v18130_v13, %v2409_v46  ;;  %vm2455_vm4 = vcmp.gt.f32.partialorder %v18139_v27, 0.0  ;;  %v16659_v31 = vld [vmem:[%s19960_s3 + $0x20] sm:$0xff]   ;;  %v18215_v41 = vld [vmem:[%s19960_s3 + $0x30] sm:$0xff]  }
 0x1b8   : > { %388 = vst [vmem:[#allocation4 + $0x58] sm:$0xff] %v16670_v20  ;;  %389 = vst [vmem:[#allocation4 + $0x68] sm:$0xff] %v16670_v20  ;;  %16549 = vpow2.f32 %v2532_v37  ;;  %v2534_v56 = vmul.f32 1.442695, %v2487_v53  ;;  %v2490_v32 = vmin.f32 %v18165_v6, 0.0  ;;  %vm2453_vm5 = vcmp.gt.f32.partialorder %v18144_v28, 0.0 }
 0x1b9   : > { %390 = vst [vmem:[#allocation4 + $0x70] sm:$0xff] %v16670_v20  ;;  %391 = vst [vmem:[#allocation4 + $0x80] sm:$0xff] %v16670_v20  ;;  %16551 = vpow2.f32 %v2528_v30  ;;  %v2530_v17 = vmul.f32 1.442695, %v2485_v33  ;;  %vm2458_vm6 = vcmp.gt.f32.partialorder %v18147_v26, 0.0  ;;  %vm2456_vm7 = vcmp.gt.f32.partialorder %v18154_v43, 0.0 }
 0x1ba   : > { %392 = vst [vmem:[#allocation4 + $0x88] sm:$0xff] %v16670_v20  ;;  %2115 = vst.msk [vmem:[#allocation2 + $0x360] sm:$0xff] %vm334_vm1, %v2082_v39  ;;  %v2641_v20 = vld [vmem:[#allocation2 + $0x50] ss:$2 sm:$0xff]  ;;  %16553 = vpow2.f32 %v2534_v56  ;;  %v2653_v52 = vld [vmem:[#allocation2 + $0x140] ss:$2 sm:$0xff] }
 0x1bb   : > { %2113 = vst.msk [vmem:[#allocation2 + $0x350] sm:$0xff] %vm334_vm1, %v2080_v47  ;;  %2118 = vst.msk [vmem:[#allocation2 + $0x380] sm:$0xff] %vm334_vm1, %v2085_v50  ;;  %v2540_v47 = vmul.f32 1.442695, %v2490_v32  ;;  %v2647_v50 = vld [vmem:[#allocation2 + $0xb0] ss:$2 sm:$0xff]  ;;  %16555 = vpow2.f32 %v2530_v17  ;;  %v2693_v2 = vpack.c.bf16 %v2643_v18, %v2641_v20 }
 0x1bc   : > { %2116 = vst.msk [vmem:[#allocation2 + $0x370] sm:$0xff] %vm334_vm1, %v2083_v62  ;;  %2119 = vst.msk [vmem:[#allocation2 + $0x388] sm:$0xff] %vm334_vm1, %v2086_v23  ;;  %v14450_v62 = vpop.f32.mrb[54].mxu1  ;;  %v2694_v7 = vpack.c.bf16 %v2647_v50, %v2645_v45  ;;  %v2649_v11 = vld [vmem:[#allocation2 + $0xf0] ss:$2 sm:$0xff]  ;;  %vm2459_vm8 = vcmp.gt.f32.partialorder %v18157_v0, 0.0 }
 0x1bd   : > { %2117 = vst.msk [vmem:[#allocation2 + $0x378] sm:$0xff] %vm334_vm1, %v2084_v14  ;;  %16557 = vpow2.f32 %v2540_v47  ;;  %v18177_v23 = vadd.f32 %v18130_v13, %v14450_v62  ;;  %v2412_v19 = vpop.f32.mrb[55].mxu1  ;;  %v2488_v14 = vmin.f32 %v18173_v15, 0.0  ;;  %v2651_v53 = vld [vmem:[#allocation2 + $0x100] ss:$2 sm:$0xff]  ;;  %vm2457_vm9 = vcmp.gt.f32.partialorder %v18161_v35, 0.0 }
 0x1be   : > { %v16542_v36 = vpop.eup %16541  ;;  %v18182_v48 = vadd.f32 %v18130_v13, %v2412_v19  ;;  %v14453_v34 = vpop.f32.mrb[56].mxu1  ;;  %vm2462_vm10 = vcmp.gt.f32.partialorder %v18165_v6, 0.0  ;;  %v2695_v47 = vpack.c.bf16 %v2651_v53, %v2649_v11  ;;  %vm2460_vm11 = vcmp.gt.f32.partialorder %v18173_v15, 0.0 }
 0x1bf   : > { %v12764_v9 = vadd.f32 -1.0, %v16542_v36  ;;  %v16544_v58 = vpop.eup %16543  ;;  %v2434_v3 = vadd.f32 %v18130_v13, %v14453_v34  ;;  %v2536_v49 = vmul.f32 1.442695, %v2488_v14  ;;  %vm2463_vm12 = vcmp.gt.f32.partialorder %v18177_v23, 0.0  ;;  %v2661_v14 = vld [vmem:[#allocation2 + $0x1e0] ss:$2 sm:$0xff] }
 0x1c0   : > { %v16546_v12 = vpop.eup %16545  ;;  %v2489_v42 = vmin.f32 %v18182_v48, 0.0  ;;  %vm2461_vm13 = vcmp.gt.f32.partialorder %v18182_v48, 0.0  ;;  %v2663_v34 = vld [vmem:[#allocation2 + $0x1f0] ss:$2 sm:$0xff] }
 0x1c1   : > { %v2594_v39 = vsel %vm2454_vm2, %v2386_v54, %v12764_v9  ;;  %v12762_v54 = vadd.f32 -1.0, %v16544_v58  ;;  %v12765_v24 = vadd.f32 -1.0, %v16546_v12  ;;  %v16548_v61 = vpop.eup %16547  ;;  %16559 = vpow2.f32 %v2536_v49  ;;  %v2657_v12 = vld [vmem:[#allocation2 + $0x190] ss:$2 sm:$0xff] }
 0x1c2   : > { %2623 = vst.msk [vmem:[#allocation2 + $0x448] sm:$0xff] %vm334_vm1, %v2594_v39  ;;  %v16550_v21 = vpop.eup %16549  ;;  %v12763_v16 = vadd.f32 -1.0, %v16548_v61  ;;  %v2538_v5 = vmul.f32 1.442695, %v2489_v42  ;;  %v2494_v63 = vmin.f32 %v2434_v3, 0.0  ;;  %v2698_v49 = vpack.c.bf16 %v2663_v34, %v2661_v14 }
 0x1c3   : > { %v2757_v57 = vld [vmem:[#allocation2 + $0x381] ss:$2 sm:$0xff]  ;;  %v2592_v59 = vsel %vm2452_vm3, %v18136_v29, %v12762_v54  ;;  %v16552_v10 = vpop.eup %16551  ;;  %vm366_vm3 = vcmask 523264  }
 0x1c4   : > { %v2755_v38 = vld [vmem:[#allocation2 + $0x371] ss:$2 sm:$0xff]  ;;  %2621 = vst.msk [vmem:[#allocation2 + $0x438] sm:$0xff] %vm334_vm1, %v2592_v59  ;;  %v2593_v1 = vsel %vm2453_vm5, %v18144_v28, %v12763_v16  ;;  %v2548_v28 = vmul.f32 1.442695, %v2494_v63  ;;  %v16554_v55 = vpop.eup %16553  ;;  %v12766_v36 = vadd.f32 -1.0, %v16552_v10 }
 0x1c5   : > { %v2777_v8 = vpack.c.bf16 %v2757_v57, %v2755_v38  ;;  %v2491_v57 = vmin.f32 %v18177_v23, 0.0  ;;  %v15858_v38 = vld [vmem:[%s19960_s3 + $0x28] sm:$0xff]   ;;  %2622 = vst.msk [vmem:[#allocation2 + $0x440] sm:$0xff] %vm334_vm1, %v2593_v1  ;;  %v16556_v44 = vpop.eup %16555  ;;  %v12769_v9 = vadd.f32 -1.0, %v16554_v55  ;;  %v2671_v16 = vld [vmem:[#allocation2 + $0x290] ss:$2 sm:$0xff] }
 0x1c6   : > { %v2596_v56 = vsel %vm2456_vm7, %v18154_v43, %v12766_v36  ;;  %v12767_v32 = vadd.f32 -1.0, %v16556_v44  ;;  %v2677_v63 = vld [vmem:[#allocation2 + $0x320] ss:$2 sm:$0xff]  ;;  %v2679_v1 = vld [vmem:[#allocation2 + $0x330] ss:$2 sm:$0xff] }
 0x1c7   : > { %14480 = vmatmul.mubr.msk.bf16.gmra.mrb[80].mxu1 %vm334_vm1, %v2777_v8  ;;  %v2595_v8 = vsel %vm2455_vm4, %v18139_v27, %v12765_v24  ;;  %v2542_v29 = vmul.f32 1.442695, %v2491_v57  ;;  %v2425_v27 = vpop.f32.mrb[57].mxu1  ;;  %v16558_v33 = vpop.eup %16557  ;;  %2625 = vst.msk [vmem:[#allocation2 + $0x460] sm:$0xff] %vm334_vm1, %v2596_v56  ;;  %v2599_v20 = vsel %vm2459_vm8, %v18157_v0, %v12769_v9  ;;  %v2702_v10 = vpack.c.bf16 %v2679_v1, %v2677_v63  ;;  %v3212_v63 = vld [vmem:[#allocation2 + $0x232] ss:$2 sm:$0xff] }
 0x1c8   : > { %14483 = vmatprep.mubr.msk.bf16.mxu1 %vm334_vm1, %v2778_v22  ;;  %2624 = vst.msk [vmem:[#allocation2 + $0x450] sm:$0xff] %vm334_vm1, %v2595_v8  ;;  %v12768_v22 = vadd.f32 -1.0, %v16550_v21  ;;  %v2426_v37 = vadd.f32 %v18130_v13, %v2425_v27  ;;  %v14454_v40 = vpop.f32.mrb[58].mxu1  ;;  %v12772_v18 = vadd.f32 -1.0, %v16558_v33  ;;  %2628 = vst.msk [vmem:[#allocation2 + $0x478] sm:$0xff] %vm334_vm1, %v2599_v20  ;;  %v2597_v43 = vsel %vm2457_vm9, %v18161_v35, %v12767_v32 }
 0x1c9   : > { %16561 = vpow2.f32 %v2542_v29  ;;  %v2428_v51 = vpop.f32.mrb[59].mxu1  ;;  %2626 = vst.msk [vmem:[#allocation2 + $0x468] sm:$0xff] %vm334_vm1, %v2597_v43  ;;  %v2665_v21 = vld [vmem:[#allocation2 + $0x230] ss:$2 sm:$0xff]  ;;  %v2669_v8 = vld [vmem:[#allocation2 + $0x280] ss:$2 sm:$0xff] }
 0x1ca   : > { %v2598_v60 = vsel %vm2458_vm6, %v18147_v26, %v12768_v22  ;;  %16563 = vpow2.f32 %v2538_v5  ;;  %v2437_v26 = vadd.f32 %v18130_v13, %v14454_v40  ;;  %v2492_v30 = vmin.f32 %v2426_v37, 0.0  ;;  %v2675_v5 = vld [vmem:[#allocation2 + $0x2e0] ss:$2 sm:$0xff]  ;;  %v2687_v37 = vld [vmem:[#allocation2 + $0x3d0] ss:$2 sm:$0xff] }
 0x1cb   : > { %2627 = vst.msk [vmem:[#allocation2 + $0x470] sm:$0xff] %vm334_vm1, %v2598_v60  ;;  %16565 = vpow2.f32 %v2548_v28  ;;  %v2429_v17 = vadd.f32 %v18130_v13, %v2428_v51  ;;  %v2602_v50 = vsel %vm2462_vm10, %v18165_v6, %v12772_v18  ;;  %v16560_v62 = vpop.eup %16559  ;;  %v2659_v6 = vld [vmem:[#allocation2 + $0x1a0] ss:$2 sm:$0xff]  ;;  %v2700_v22 = vpack.c.bf16 %v2671_v16, %v2669_v8  ;;  %v2689_v32 = vld [vmem:[#allocation2 + $0x410] ss:$2 sm:$0xff] }
 0x1cc   : > { %v2544_v39 = vmul.f32 1.442695, %v2492_v30  ;;  %2631 = vst.msk [vmem:[#allocation2 + $0x498] sm:$0xff] %vm334_vm1, %v2602_v50  ;;  %v2697_v61 = vpack.c.bf16 %v2659_v6, %v2657_v12  ;;  %v2683_v60 = vld [vmem:[#allocation2 + $0x380] ss:$2 sm:$0xff] }
 0x1cd   : > { %v2493_v0 = vmin.f32 %v2429_v17, 0.0  ;;  %v2685_v28 = vld [vmem:[#allocation2 + $0x3c0] ss:$2 sm:$0xff] }
 0x1ce   : > { %16567 = vpow2.f32 %v2544_v39  ;;  %v2704_v11 = vpack.c.bf16 %v2687_v37, %v2685_v28  ;;  %v2691_v30 = vld [vmem:[#allocation2 + $0x420] ss:$2 sm:$0xff] }
 0x1cf   : > { %14484 = vmatmul.mubr.msk.bf16.gmra.mrb[84].mxu1 %vm334_vm1, %v2779_v4  ;;  %v2655_v4 = vld [vmem:[#allocation2 + $0x150] ss:$2 sm:$0xff]  ;;  %v2546_v58 = vmul.f32 1.442695, %v2493_v0  ;;  %v2705_v43 = vpack.c.bf16 %v2691_v30, %v2689_v32 }
 0x1d0   : > { %14491 = vmatprep.mubr.msk.bf16.mxu1 %vm334_vm1, %v2692_v25  ;;  %v2495_v25 = vmin.f32 %v2437_v26, 0.0  ;;  %v2696_v45 = vpack.c.bf16 %v2655_v4, %v2653_v52  ;;  %v3184_v33 = vld [vmem:[#allocation2 + $0x2] ss:$2 sm:$0xff]  ;;  %v3186_v18 = vld [vmem:[#allocation2 + $0x12] ss:$2 sm:$0xff] }
 0x1d1   : > { %v3188_v50 = vld [vmem:[#allocation2 + $0x52] ss:$2 sm:$0xff]  ;;  %v3192_v0 = vld [vmem:[#allocation2 + $0xa2] ss:$2 sm:$0xff] }
 0x1d2   : > { %v2550_v46 = vmul.f32 1.442695, %v2495_v25  ;;  %v3204_v16 = vld [vmem:[#allocation2 + $0x192] ss:$2 sm:$0xff]  ;;  %v3214_v1 = vld [vmem:[#allocation2 + $0x242] ss:$2 sm:$0xff] }
 0x1d3   : > { %v16562_v35 = vpop.eup %16561  ;;  %v3220_v28 = vld [vmem:[#allocation2 + $0x2d2] ss:$2 sm:$0xff]  ;;  %v3222_v37 = vld [vmem:[#allocation2 + $0x2e2] ss:$2 sm:$0xff] }
 0x1d4   : > { %16569 = vpow2.f32 %v2550_v46  ;;  %v16564_v19 = vpop.eup %16563  ;;  %v12773_v54 = vadd.f32 -1.0, %v16562_v35  ;;  %v15860_v35 = vld [vmem:[%s19960_s3 + $0x38] sm:$0xff]  }
 0x1d5   : > { %16571 = vpow2.f32 %v2546_v58  ;;  %v12771_v24 = vadd.f32 -1.0, %v16564_v19  ;;  %v16566_v57 = vpop.eup %16565  ;;  %v3236_v30 = vld [vmem:[#allocation2 + $0x412] ss:$2 sm:$0xff] }
 0x1d6   : > { %v2603_v3 = vsel %vm2463_vm12, %v18177_v23, %v12773_v54 }
 0x1d7   : > { %14492 = vmatmul.mubr.msk.bf16.vlgmr.msra.gmra.mrb[60].mxu1 %vm334_vm1, %v2693_v2  ;;  %v12770_v2 = vadd.f32 -1.0, %v16560_v62  ;;  %2632 = vst.msk [vmem:[#allocation2 + $0x4a0] sm:$0xff] %vm334_vm1, %v2603_v3  ;;  %v2601_v59 = vsel %vm2461_vm13, %v18182_v48, %v12771_v24  ;;  %v2673_v48 = vld [vmem:[#allocation2 + $0x2d0] ss:$2 sm:$0xff] }
 0x1d8   : > { %14495 = vmatprep.mubr.msk.bf16.mxu1 %vm334_vm1, %v2694_v7  ;;  %14520 = vmatpush3.bf16.msra.mxu1 %v16659_v31  ;;  %2630 = vst.msk [vmem:[#allocation2 + $0x490] sm:$0xff] %vm334_vm1, %v2601_v59  ;;  %v16568_v42 = vpop.eup %16567  ;;  %v2701_v27 = vpack.c.bf16 %v2675_v5, %v2673_v48  ;;  %v2681_v31 = vld [vmem:[#allocation2 + $0x370] ss:$2 sm:$0xff] }
 0x1d9   : > { %14521 = vmatprep.subr.bf16.mxu1 %v15858_v38  ;;  %v2600_v7 = vsel %vm2460_vm11, %v18173_v15, %v12770_v2  ;;  %v2703_v40 = vpack.c.bf16 %v2683_v60, %v2681_v31  ;;  %v3194_v62 = vld [vmem:[#allocation2 + $0xb2] ss:$2 sm:$0xff]  ;;  %v3200_v42 = vld [vmem:[#allocation2 + $0x142] ss:$2 sm:$0xff]  ;;  %v3246_v31 = vpack.c.bf16 %v3214_v1, %v3212_v63 }
 0x1da   : > { %2629 = vst.msk [vmem:[#allocation2 + $0x488] sm:$0xff] %vm334_vm1, %v2600_v7  ;;  %v3241_v19 = vpack.c.bf16 %v3194_v62, %v3192_v0  ;;  %v18272_v7 = vld [vmem:[%s19960_s3 + $0x40] sm:$0xff]   ;;  %v3788_v63 = vld [vmem:[#allocation2 + $0x28] ss:$2 sm:$0xff] }
 0x1db   : > { %v3196_v3 = vld [vmem:[#allocation2 + $0xf2] ss:$2 sm:$0xff]  ;;  %v3502_v0 = vld [vmem:[#allocation2 + $0x143] ss:$2 sm:$0xff]  ;;  %v3504_v62 = vld [vmem:[#allocation2 + $0x153] ss:$2 sm:$0xff] }
 0x1dc   : > { %14522 = vmatpush3.bf16.msra.mxu1 %v15858_v38  ;;  %v2667_v38 = vld [vmem:[#allocation2 + $0x240] ss:$2 sm:$0xff] }
 0x1dd   : > { %14551 = vmatprep.subr.bf16.mxu1 %v18215_v41  ;;  %v2699_v23 = vpack.c.bf16 %v2667_v38, %v2665_v21  ;;  %v3790_v1 = vld [vmem:[#allocation2 + $0x38] ss:$2 sm:$0xff] }
 0x1de   : > { %v16570_v15 = vpop.eup %16569 }
 0x1df   : > { %14496 = vmatmul.mubr.msk.bf16.gmra.mrb[64].mxu1 %vm334_vm1, %v2695_v47  ;;  %v16572_v29 = vpop.eup %16571 }
 0x1e0   : > { %14499 = vmatprep.mubr.msk.bf16.mxu1 %vm334_vm1, %v2696_v45  ;;  %v3239_v45 = vpack.c.bf16 %v3186_v18, %v3184_v33  ;;  %v3206_v29 = vld [vmem:[#allocation2 + $0x1a2] ss:$2 sm:$0xff]  ;;  %v3492_v18 = vld [vmem:[#allocation2 + $0x63] ss:$2 sm:$0xff] }
 0x1e1   : > { %v3244_v48 = vpack.c.bf16 %v3206_v29, %v3204_v16  ;;  %v3238_v33 = vld [vmem:[#allocation2 + $0x422] ss:$2 sm:$0xff]  ;;  %v3534_v16 = vld [vmem:[#allocation2 + $0x3c3] ss:$2 sm:$0xff]  ;;  %v3536_v29 = vld [vmem:[#allocation2 + $0x3d3] ss:$2 sm:$0xff] }
 0x1e2   : > { %v3252_v32 = vpack.c.bf16 %v3238_v33, %v3236_v30  ;;  %v3808_v30 = vld [vmem:[#allocation2 + $0x1b8] ss:$2 sm:$0xff]  ;;  %v3810_v33 = vld [vmem:[#allocation2 + $0x1c8] ss:$2 sm:$0xff] }
 0x1e7   : > { %14500 = vmatmul.mubr.msk.bf16.gmra.mrb[68].mxu1 %vm334_vm1, %v2697_v61  ;;  %v3198_v61 = vld [vmem:[#allocation2 + $0x102] ss:$2 sm:$0xff] }
 0x1e8   : > { %14503 = vmatprep.mubr.msk.bf16.mxu1 %vm334_vm1, %v2698_v49  ;;  %v3242_v38 = vpack.c.bf16 %v3198_v61, %v3196_v3 }
 0x1ef   : > { %14504 = vmatmul.mubr.msk.bf16.gmra.mrb[72].mxu1 %vm334_vm1, %v2699_v23  ;;  %v3208_v23 = vld [vmem:[#allocation2 + $0x1e2] ss:$2 sm:$0xff] }
 0x1f0   : > { %14507 = vmatprep.mubr.msk.bf16.mxu1 %vm334_vm1, %v2700_v22  ;;  %v3210_v22 = vld [vmem:[#allocation2 + $0x1f2] ss:$2 sm:$0xff] }
 0x1f1   : > { %v3245_v5 = vpack.c.bf16 %v3210_v22, %v3208_v23  ;;  %v3553_v22 = vpack.c.bf16 %v3536_v29, %v3534_v16  ;;  %v4106_v16 = vld [vmem:[#allocation2 + $0x169] ss:$2 sm:$0xff]  ;;  %v4108_v29 = vld [vmem:[#allocation2 + $0x179] ss:$2 sm:$0xff] }
 0x1f3   : > { %v14419_v55 = vpop.f32.mrb[60].mxu0 }
 0x1f4   : > { %v1893_v52 = vadd.f32 %v18130_v13, %v14419_v55  ;;  %v1884_v36 = vpop.f32.mrb[61].mxu0  ;;  %v3226_v55 = vld [vmem:[#allocation2 + $0x332] ss:$2 sm:$0xff] }
 0x1f5   : > { %v1885_v26 = vadd.f32 %v18130_v13, %v1884_v36  ;;  %v14420_v51 = vpop.f32.mrb[62].mxu0  ;;  %v3228_v36 = vld [vmem:[#allocation2 + $0x372] ss:$2 sm:$0xff] }
 0x1f6   : > { %v1961_v44 = vmin.f32 %v1893_v52, 0.0  ;;  %v1896_v53 = vadd.f32 %v18130_v13, %v14420_v51  ;;  %v1887_v9 = vpop.f32.mrb[63].mxu0  ;;  %vm1929_vm14 = vcmp.gt.f32.partialorder %v1893_v52, 0.0  ;;  %v3232_v51 = vld [vmem:[#allocation2 + $0x3c2] ss:$2 sm:$0xff] }
 0x1f7   : > { %14508 = vmatmul.mubr.msk.bf16.gmra.mrb[76].mxu1 %vm334_vm1, %v2701_v27  ;;  %v1959_v4 = vmin.f32 %v1885_v26, 0.0  ;;  %v1888_v56 = vadd.f32 %v18130_v13, %v1887_v9  ;;  %v3190_v13 = vld [vmem:[#allocation2 + $0x62] ss:$2 sm:$0xff]  ;;  %vm1927_vm0 = vcmp.gt.f32.partialorder %v1885_v26, 0.0 }
 0x1f8   : > { %14511 = vmatprep.mubr.msk.bf16.mxu1 %vm334_vm1, %v2702_v10  ;;  %v2023_v25 = vmul.f32 1.442695, %v1961_v44  ;;  %v1962_v20 = vmin.f32 %v1896_v53, 0.0  ;;  %v3240_v58 = vpack.c.bf16 %v3190_v13, %v3188_v50  ;;  %vm1930_vm15 = vcmp.gt.f32.partialorder %v1896_v53, 0.0  ;;  %v3216_v27 = vld [vmem:[#allocation2 + $0x282] ss:$2 sm:$0xff] }
 0x1f9   : > { %v2019_v39 = vmul.f32 1.442695, %v1959_v4  ;;  %v1960_v17 = vmin.f32 %v1888_v56, 0.0  ;;  %vm1928_vm2 = vcmp.gt.f32.partialorder %v1888_v56, 0.0  ;;  %v3218_v10 = vld [vmem:[#allocation2 + $0x292] ss:$2 sm:$0xff] }
 0x1fa   : > { %16573 = vpow2.f32 %v2023_v25  ;;  %v2025_v47 = vmul.f32 1.442695, %v1962_v20  ;;  %v3247_v60 = vpack.c.bf16 %v3218_v10, %v3216_v27  ;;  %v3234_v44 = vld [vmem:[#allocation2 + $0x3d2] ss:$2 sm:$0xff]  ;;  %v3486_v4 = vld [vmem:[#allocation2 + $0x3] ss:$2 sm:$0xff]  ;;  %v3843_v10 = vpack.c.bf16 %v3790_v1, %v3788_v63 }
 0x1fb   : > { %16575 = vpow2.f32 %v2019_v39  ;;  %v2021_v46 = vmul.f32 1.442695, %v1960_v17  ;;  %v3251_v9 = vpack.c.bf16 %v3234_v44, %v3232_v51  ;;  %v3490_v20 = vld [vmem:[#allocation2 + $0x53] ss:$2 sm:$0xff]  ;;  %v3494_v39 = vld [vmem:[#allocation2 + $0xa3] ss:$2 sm:$0xff] }
 0x1fc   : > { %16577 = vpow2.f32 %v2025_v47  ;;  %v3496_v17 = vld [vmem:[#allocation2 + $0xb3] ss:$2 sm:$0xff]  ;;  %v3542_v47 = vpack.c.bf16 %v3492_v18, %v3490_v20  ;;  %v3500_v13 = vld [vmem:[#allocation2 + $0x103] ss:$2 sm:$0xff]  ;;  %v3804_v51 = vld [vmem:[#allocation2 + $0x168] ss:$2 sm:$0xff] }
 0x1fd   : > { %16579 = vpow2.f32 %v2021_v46  ;;  %v3543_v46 = vpack.c.bf16 %v3496_v17, %v3494_v39  ;;  %v3498_v50 = vld [vmem:[#allocation2 + $0xf3] ss:$2 sm:$0xff]  ;;  %v3806_v44 = vld [vmem:[#allocation2 + $0x178] ss:$2 sm:$0xff]  ;;  %v3818_v18 = vld [vmem:[#allocation2 + $0x268] ss:$2 sm:$0xff] }
 0x1fe   : > { %v3816_v20 = vld [vmem:[#allocation2 + $0x258] ss:$2 sm:$0xff]  ;;  %v3820_v39 = vld [vmem:[#allocation2 + $0x2a8] ss:$2 sm:$0xff]  ;;  %v4114_v63 = vld [vmem:[#allocation2 + $0x209] ss:$2 sm:$0xff] }
 0x1ff   : > { %14512 = vmatmul.mubr.msk.bf16.gmra.mrb[80].mxu1 %vm334_vm1, %v2703_v40  ;;  %v3224_v40 = vld [vmem:[#allocation2 + $0x322] ss:$2 sm:$0xff]  ;;  %v4116_v1 = vld [vmem:[#allocation2 + $0x219] ss:$2 sm:$0xff] }
 0x200   : > { %14515 = vmatprep.mubr.msk.bf16.mxu1 %vm334_vm1, %v2704_v11  ;;  %v3248_v11 = vpack.c.bf16 %v3222_v37, %v3220_v28  ;;  %v3796_v28 = vld [vmem:[#allocation2 + $0xc8] ss:$2 sm:$0xff]  ;;  %v3798_v37 = vld [vmem:[#allocation2 + $0xd8] ss:$2 sm:$0xff] }
 0x201   : > { %v3822_v17 = vld [vmem:[#allocation2 + $0x2b8] ss:$2 sm:$0xff] }
 0x204   : > { %v16574_v2 = vpop.eup %16573 }
 0x205   : > { %v16576_v12 = vpop.eup %16575  ;;  %v12716_v6 = vadd.f32 -1.0, %v16574_v2  ;;  %v3506_v2 = vld [vmem:[#allocation2 + $0x193] ss:$2 sm:$0xff] }
 0x206   : > { %v16578_v54 = vpop.eup %16577  ;;  %v12714_v14 = vadd.f32 -1.0, %v16576_v12  ;;  %v3510_v12 = vld [vmem:[#allocation2 + $0x1e3] ss:$2 sm:$0xff] }
 0x207   : > { %14516 = vmatmul.mubr.msk.bf16.gmra.mrb[84].mxu1 %vm334_vm1, %v2705_v43  ;;  %v16580_v34 = vpop.eup %16579  ;;  %v2089_v24 = vsel %vm1929_vm14, %v1893_v52, %v12716_v6  ;;  %v12717_v57 = vadd.f32 -1.0, %v16578_v54  ;;  %v3249_v52 = vpack.c.bf16 %v3226_v55, %v3224_v40  ;;  %v15862_v43 = vld [vmem:[%s19960_s3 + $0x48] sm:$0xff]   ;;  %v3512_v6 = vld [vmem:[#allocation2 + $0x1f3] ss:$2 sm:$0xff] }
 0x208   : > { %14523 = vmatprep.mubr.msk.bf16.mxu1 %vm334_vm1, %v3239_v45  ;;  %2122 = vst.msk [vmem:[#allocation2 + $0x3a8] sm:$0xff] %vm334_vm1, %v2089_v24  ;;  %v2087_v59 = vsel %vm1927_vm0, %v1885_v26, %v12714_v14  ;;  %v12715_v49 = vadd.f32 -1.0, %v16580_v34  ;;  %v3230_v26 = vld [vmem:[#allocation2 + $0x382] ss:$2 sm:$0xff]  ;;  %v3547_v14 = vpack.c.bf16 %v3512_v6, %v3510_v12  ;;  %v3514_v34 = vld [vmem:[#allocation2 + $0x233] ss:$2 sm:$0xff] }
 0x209   : > { %2120 = vst.msk [vmem:[#allocation2 + $0x398] sm:$0xff] %vm334_vm1, %v2087_v59  ;;  %v2090_v15 = vsel %vm1930_vm15, %v1896_v53, %v12717_v57  ;;  %v3250_v53 = vpack.c.bf16 %v3230_v26, %v3228_v36  ;;  %v15863_v45 = vld [vmem:[%s19960_s3 + $0x50] sm:$0xff]   ;;  %v15864_v55 = vld [vmem:[%s19960_s3 + $0x58] sm:$0xff]  }
 0x20a   : > { %2123 = vst.msk [vmem:[#allocation2 + $0x3b0] sm:$0xff] %vm334_vm1, %v2090_v15  ;;  %v2088_v21 = vsel %vm1928_vm2, %v1888_v56, %v12715_v49  ;;  %v3488_v56 = vld [vmem:[#allocation2 + $0x13] ss:$2 sm:$0xff]  ;;  %v3518_v24 = vld [vmem:[#allocation2 + $0x283] ss:$2 sm:$0xff] }
 0x20b   : > { %2121 = vst.msk [vmem:[#allocation2 + $0x3a0] sm:$0xff] %vm334_vm1, %v2088_v21  ;;  %v3541_v25 = vpack.c.bf16 %v3488_v56, %v3486_v4  ;;  %v3520_v57 = vld [vmem:[#allocation2 + $0x293] ss:$2 sm:$0xff]  ;;  %v3524_v49 = vld [vmem:[#allocation2 + $0x2e3] ss:$2 sm:$0xff] }
 0x20c   : > { %v3549_v61 = vpack.c.bf16 %v3520_v57, %v3518_v24  ;;  %v3522_v59 = vld [vmem:[#allocation2 + $0x2d3] ss:$2 sm:$0xff]  ;;  %v3800_v36 = vld [vmem:[#allocation2 + $0x118] ss:$2 sm:$0xff]  ;;  %v3802_v26 = vld [vmem:[#allocation2 + $0x128] ss:$2 sm:$0xff] }
 0x20d   : > { %v3550_v15 = vpack.c.bf16 %v3524_v49, %v3522_v59  ;;  %v3812_v4 = vld [vmem:[#allocation2 + $0x208] ss:$2 sm:$0xff]  ;;  %v3814_v56 = vld [vmem:[#allocation2 + $0x218] ss:$2 sm:$0xff]  ;;  %v4098_v59 = vld [vmem:[#allocation2 + $0xc9] ss:$2 sm:$0xff] }
 0x20e   : > { %v4100_v49 = vld [vmem:[#allocation2 + $0xd9] ss:$2 sm:$0xff] }
 0x20f   : > { %14524 = vmatmul.mubr.msk.bf16.vlgmr.msra.gmra.mrb[60].mxu1 %vm334_vm1, %v3240_v58  ;;  %v3544_v58 = vpack.c.bf16 %v3500_v13, %v3498_v50  ;;  %v3828_v50 = vld [vmem:[#allocation2 + $0x348] ss:$2 sm:$0xff]  ;;  %v3830_v13 = vld [vmem:[#allocation2 + $0x358] ss:$2 sm:$0xff] }
 0x210   : > { %14527 = vmatprep.mubr.msk.bf16.mxu1 %vm334_vm1, %v3241_v19  ;;  %14552 = vmatpush3.bf16.msra.mxu1 %v18215_v41  ;;  %v3202_v41 = vld [vmem:[#allocation2 + $0x152] ss:$2 sm:$0xff]  ;;  %v3508_v19 = vld [vmem:[#allocation2 + $0x1a3] ss:$2 sm:$0xff] }
 0x211   : > { %14553 = vmatprep.subr.bf16.mxu1 %v15860_v35  ;;  %v3243_v8 = vpack.c.bf16 %v3202_v41, %v3200_v42  ;;  %v3546_v54 = vpack.c.bf16 %v3508_v19, %v3506_v2  ;;  %v3526_v42 = vld [vmem:[#allocation2 + $0x323] ss:$2 sm:$0xff]  ;;  %v3528_v41 = vld [vmem:[#allocation2 + $0x333] ss:$2 sm:$0xff]  ;;  %v3836_v2 = vld [vmem:[#allocation2 + $0x3e8] ss:$2 sm:$0xff] }
 0x212   : > { %v3551_v21 = vpack.c.bf16 %v3528_v41, %v3526_v42  ;;  %v3838_v19 = vld [vmem:[#allocation2 + $0x3f8] ss:$2 sm:$0xff]  ;;  %v15866_v41 = vld [vmem:[%s19960_s3 + $0x68] sm:$0xff]  }
 0x213   : > { %v3855_v6 = vpack.c.bf16 %v3838_v19, %v3836_v2  ;;  %v4408_v2 = vld [vmem:[#allocation2 + $0x16a] ss:$2 sm:$0xff]  ;;  %v4410_v19 = vld [vmem:[#allocation2 + $0x17a] ss:$2 sm:$0xff] }
 0x214   : > { %14554 = vmatpush3.bf16.msra.mxu1 %v15860_v35  ;;  %v3545_v35 = vpack.c.bf16 %v3504_v62, %v3502_v0  ;;  %v3853_v62 = vpack.c.bf16 %v3830_v13, %v3828_v50  ;;  %v15868_v13 = vld [vmem:[%s19960_s3 + $0x78] sm:$0xff]  }
 0x215   : > { %14583 = vmatprep.subr.bf16.mxu1 %v18272_v7 }
 0x217   : > { %14528 = vmatmul.mubr.msk.bf16.gmra.mrb[64].mxu1 %vm334_vm1, %v3242_v38  ;;  %v3530_v38 = vld [vmem:[#allocation2 + $0x373] ss:$2 sm:$0xff] }
 0x218   : > { %14531 = vmatprep.mubr.msk.bf16.mxu1 %vm334_vm1, %v3243_v8  ;;  %v3532_v8 = vld [vmem:[#allocation2 + $0x383] ss:$2 sm:$0xff] }
 0x219   : > { %v3552_v23 = vpack.c.bf16 %v3532_v8, %v3530_v38  ;;  %v4102_v38 = vld [vmem:[#allocation2 + $0x119] ss:$2 sm:$0xff]  ;;  %v4104_v8 = vld [vmem:[#allocation2 + $0x129] ss:$2 sm:$0xff] }
 0x21f   : > { %14532 = vmatmul.mubr.msk.bf16.gmra.mrb[68].mxu1 %vm334_vm1, %v3244_v48  ;;  %v3538_v48 = vld [vmem:[#allocation2 + $0x413] ss:$2 sm:$0xff] }
 0x220   : > { %14535 = vmatprep.mubr.msk.bf16.mxu1 %vm334_vm1, %v3245_v5  ;;  %v3540_v5 = vld [vmem:[#allocation2 + $0x423] ss:$2 sm:$0xff] }
 0x221   : > { %v3554_v27 = vpack.c.bf16 %v3540_v5, %v3538_v48  ;;  %v4110_v48 = vld [vmem:[#allocation2 + $0x1b9] ss:$2 sm:$0xff]  ;;  %v4112_v5 = vld [vmem:[#allocation2 + $0x1c9] ss:$2 sm:$0xff] }
 0x227   : > { %14536 = vmatmul.mubr.msk.bf16.gmra.mrb[72].mxu1 %vm334_vm1, %v3246_v31  ;;  %v3792_v31 = vld [vmem:[#allocation2 + $0x78] ss:$2 sm:$0xff] }
 0x228   : > { %14539 = vmatprep.mubr.msk.bf16.mxu1 %vm334_vm1, %v3247_v60  ;;  %v3794_v60 = vld [vmem:[#allocation2 + $0x88] ss:$2 sm:$0xff] }
 0x229   : > { %v3844_v40 = vpack.c.bf16 %v3794_v60, %v3792_v31  ;;  %v4118_v31 = vld [vmem:[#allocation2 + $0x259] ss:$2 sm:$0xff]  ;;  %v4120_v60 = vld [vmem:[#allocation2 + $0x269] ss:$2 sm:$0xff] }
 0x22f   : > { %14540 = vmatmul.mubr.msk.bf16.gmra.mrb[76].mxu1 %vm334_vm1, %v3248_v11  ;;  %v3845_v11 = vpack.c.bf16 %v3798_v37, %v3796_v28  ;;  %v4122_v28 = vld [vmem:[#allocation2 + $0x2a9] ss:$2 sm:$0xff]  ;;  %v4124_v37 = vld [vmem:[#allocation2 + $0x2b9] ss:$2 sm:$0xff] }
 0x230   : > { %14543 = vmatprep.mubr.msk.bf16.mxu1 %vm334_vm1, %v3249_v52  ;;  %v15865_v52 = vld [vmem:[%s19960_s3 + $0x60] sm:$0xff]  }
 0x237   : > { %14544 = vmatmul.mubr.msk.bf16.gmra.mrb[80].mxu1 %vm334_vm1, %v3250_v53  ;;  %v3846_v53 = vpack.c.bf16 %v3802_v26, %v3800_v36  ;;  %v4130_v36 = vld [vmem:[#allocation2 + $0x349] ss:$2 sm:$0xff]  ;;  %v4132_v26 = vld [vmem:[#allocation2 + $0x359] ss:$2 sm:$0xff] }
 0x238   : > { %14547 = vmatprep.mubr.msk.bf16.mxu1 %vm334_vm1, %v3251_v9  ;;  %v3847_v9 = vpack.c.bf16 %v3806_v44, %v3804_v51  ;;  %v4155_v44 = vpack.c.bf16 %v4132_v26, %v4130_v36  ;;  %v15870_v26 = vld [vmem:[%s19960_s3 + $0x88] sm:$0xff]  }
 0x23f   : > { %14548 = vmatmul.mubr.msk.bf16.gmra.mrb[84].mxu1 %vm334_vm1, %v3252_v32  ;;  %v3848_v32 = vpack.c.bf16 %v3810_v33, %v3808_v30  ;;  %v4138_v30 = vld [vmem:[#allocation2 + $0x3e9] ss:$2 sm:$0xff]  ;;  %v4140_v33 = vld [vmem:[#allocation2 + $0x3f9] ss:$2 sm:$0xff] }
 0x240   : > { %14555 = vmatprep.mubr.msk.bf16.mxu1 %vm334_vm1, %v3541_v25  ;;  %v3849_v25 = vpack.c.bf16 %v3814_v56, %v3812_v4  ;;  %v4157_v56 = vpack.c.bf16 %v4140_v33, %v4138_v30  ;;  %v4710_v30 = vld [vmem:[#allocation2 + $0x16b] ss:$2 sm:$0xff]  ;;  %v4712_v33 = vld [vmem:[#allocation2 + $0x17b] ss:$2 sm:$0xff] }
 0x247   : > { %14556 = vmatmul.mubr.msk.bf16.vlgmr.msra.gmra.mrb[60].mxu1 %vm334_vm1, %v3542_v47  ;;  %v3850_v47 = vpack.c.bf16 %v3818_v18, %v3816_v20  ;;  %v4392_v20 = vld [vmem:[#allocation2 + $0x2a] ss:$2 sm:$0xff]  ;;  %v4394_v18 = vld [vmem:[#allocation2 + $0x3a] ss:$2 sm:$0xff] }
 0x248   : > { %14559 = vmatprep.mubr.msk.bf16.mxu1 %vm334_vm1, %v3543_v46  ;;  %14584 = vmatpush3.bf16.msra.mxu1 %v18272_v7  ;;  %v3516_v7 = vld [vmem:[#allocation2 + $0x243] ss:$2 sm:$0xff]  ;;  %v3824_v46 = vld [vmem:[#allocation2 + $0x2f8] ss:$2 sm:$0xff] }
 0x249   : > { %14585 = vmatprep.subr.bf16.mxu1 %v15862_v43  ;;  %v3548_v3 = vpack.c.bf16 %v3516_v7, %v3514_v34  ;;  %v4090_v34 = vld [vmem:[#allocation2 + $0x29] ss:$2 sm:$0xff]  ;;  %v4092_v7 = vld [vmem:[#allocation2 + $0x39] ss:$2 sm:$0xff] }
 0x24a   : > { %v4145_v57 = vpack.c.bf16 %v4092_v7, %v4090_v34  ;;  %v4416_v34 = vld [vmem:[#allocation2 + $0x20a] ss:$2 sm:$0xff]  ;;  %v4418_v7 = vld [vmem:[#allocation2 + $0x21a] ss:$2 sm:$0xff] }
 0x24c   : > { %14586 = vmatpush3.bf16.msra.mxu1 %v15862_v43  ;;  %v3851_v43 = vpack.c.bf16 %v3822_v17, %v3820_v39  ;;  %v4447_v17 = vpack.c.bf16 %v4394_v18, %v4392_v20  ;;  %v4718_v20 = vld [vmem:[#allocation2 + $0x20b] ss:$2 sm:$0xff]  ;;  %v4720_v18 = vld [vmem:[#allocation2 + $0x21b] ss:$2 sm:$0xff] }
 0x24d   : > { %14615 = vmatprep.subr.bf16.mxu1 %v15863_v45 }
 0x24f   : > { %14560 = vmatmul.mubr.msk.bf16.gmra.mrb[64].mxu1 %vm334_vm1, %v3544_v58  ;;  %v3832_v58 = vld [vmem:[#allocation2 + $0x398] ss:$2 sm:$0xff] }
 0x250   : > { %14563 = vmatprep.mubr.msk.bf16.mxu1 %vm334_vm1, %v3545_v35  ;;  %v3834_v35 = vld [vmem:[#allocation2 + $0x3a8] ss:$2 sm:$0xff] }
 0x251   : > { %v3854_v12 = vpack.c.bf16 %v3834_v35, %v3832_v58  ;;  %v4404_v58 = vld [vmem:[#allocation2 + $0x11a] ss:$2 sm:$0xff]  ;;  %v4406_v35 = vld [vmem:[#allocation2 + $0x12a] ss:$2 sm:$0xff] }
 0x257   : > { %14564 = vmatmul.mubr.msk.bf16.gmra.mrb[68].mxu1 %vm334_vm1, %v3546_v54  ;;  %v3840_v54 = vld [vmem:[#allocation2 + $0x438] ss:$2 sm:$0xff] }
 0x258   : > { %14567 = vmatprep.mubr.msk.bf16.mxu1 %vm334_vm1, %v3547_v14  ;;  %v3842_v14 = vld [vmem:[#allocation2 + $0x448] ss:$2 sm:$0xff] }
 0x259   : > { %v3856_v24 = vpack.c.bf16 %v3842_v14, %v3840_v54  ;;  %v4412_v54 = vld [vmem:[#allocation2 + $0x1ba] ss:$2 sm:$0xff]  ;;  %v4414_v14 = vld [vmem:[#allocation2 + $0x1ca] ss:$2 sm:$0xff] }
 0x25f   : > { %14568 = vmatmul.mubr.msk.bf16.gmra.mrb[72].mxu1 %vm334_vm1, %v3548_v3  ;;  %v4094_v3 = vld [vmem:[#allocation2 + $0x79] ss:$2 sm:$0xff] }
 0x260   : > { %14571 = vmatprep.mubr.msk.bf16.mxu1 %vm334_vm1, %v3549_v61  ;;  %v4096_v61 = vld [vmem:[#allocation2 + $0x89] ss:$2 sm:$0xff] }
 0x261   : > { %v4146_v42 = vpack.c.bf16 %v4096_v61, %v4094_v3  ;;  %v4420_v3 = vld [vmem:[#allocation2 + $0x25a] ss:$2 sm:$0xff]  ;;  %v4422_v61 = vld [vmem:[#allocation2 + $0x26a] ss:$2 sm:$0xff] }
 0x267   : > { %14572 = vmatmul.mubr.msk.bf16.gmra.mrb[76].mxu1 %vm334_vm1, %v3550_v15  ;;  %v4147_v15 = vpack.c.bf16 %v4100_v49, %v4098_v59  ;;  %v4424_v59 = vld [vmem:[#allocation2 + $0x2aa] ss:$2 sm:$0xff]  ;;  %v4426_v49 = vld [vmem:[#allocation2 + $0x2ba] ss:$2 sm:$0xff] }
 0x268   : > { %14575 = vmatprep.mubr.msk.bf16.mxu1 %vm334_vm1, %v3551_v21  ;;  %v15867_v21 = vld [vmem:[%s19960_s3 + $0x70] sm:$0xff]  }
 0x26f   : > { %14576 = vmatmul.mubr.msk.bf16.gmra.mrb[80].mxu1 %vm334_vm1, %v3552_v23  ;;  %v4148_v23 = vpack.c.bf16 %v4104_v8, %v4102_v38  ;;  %v4432_v38 = vld [vmem:[#allocation2 + $0x34a] ss:$2 sm:$0xff]  ;;  %v4434_v8 = vld [vmem:[#allocation2 + $0x35a] ss:$2 sm:$0xff] }
 0x270   : > { %14579 = vmatprep.mubr.msk.bf16.mxu1 %vm334_vm1, %v3553_v22  ;;  %v4149_v22 = vpack.c.bf16 %v4108_v29, %v4106_v16  ;;  %v4457_v29 = vpack.c.bf16 %v4434_v8, %v4432_v38  ;;  %v15872_v8 = vld [vmem:[%s19960_s3 + $0x98] sm:$0xff]  }
 0x277   : > { %14580 = vmatmul.mubr.msk.bf16.gmra.mrb[84].mxu1 %vm334_vm1, %v3554_v27  ;;  %v4150_v27 = vpack.c.bf16 %v4112_v5, %v4110_v48  ;;  %v4440_v48 = vld [vmem:[#allocation2 + $0x3ea] ss:$2 sm:$0xff]  ;;  %v4442_v5 = vld [vmem:[#allocation2 + $0x3fa] ss:$2 sm:$0xff] }
 0x278   : > { %14587 = vmatprep.mubr.msk.bf16.mxu1 %vm334_vm1, %v3843_v10  ;;  %v4151_v10 = vpack.c.bf16 %v4116_v1, %v4114_v63  ;;  %v4459_v1 = vpack.c.bf16 %v4442_v5, %v4440_v48  ;;  %v5012_v48 = vld [vmem:[#allocation2 + $0x190] ss:$2 sm:$0xff]  ;;  %v5014_v5 = vld [vmem:[#allocation2 + $0x1a0] ss:$2 sm:$0xff] }
 0x27f   : > { %14588 = vmatmul.mubr.msk.bf16.vlgmr.msra.gmra.mrb[60].mxu1 %vm334_vm1, %v3844_v40  ;;  %v4152_v40 = vpack.c.bf16 %v4120_v60, %v4118_v31  ;;  %v4694_v31 = vld [vmem:[#allocation2 + $0x2b] ss:$2 sm:$0xff]  ;;  %v4696_v60 = vld [vmem:[#allocation2 + $0x3b] ss:$2 sm:$0xff] }
 0x280   : > { %14591 = vmatprep.mubr.msk.bf16.mxu1 %vm334_vm1, %v3845_v11  ;;  %14616 = vmatpush3.bf16.msra.mxu1 %v15863_v45  ;;  %v3826_v45 = vld [vmem:[#allocation2 + $0x308] ss:$2 sm:$0xff]  ;;  %v4126_v11 = vld [vmem:[#allocation2 + $0x2f9] ss:$2 sm:$0xff] }
 0x281   : > { %14617 = vmatprep.subr.bf16.mxu1 %v15864_v55  ;;  %v3852_v0 = vpack.c.bf16 %v3826_v45, %v3824_v46  ;;  %v4400_v46 = vld [vmem:[#allocation2 + $0xca] ss:$2 sm:$0xff]  ;;  %v4402_v45 = vld [vmem:[#allocation2 + $0xda] ss:$2 sm:$0xff] }
 0x284   : > { %14618 = vmatpush3.bf16.msra.mxu1 %v15864_v55  ;;  %v4153_v55 = vpack.c.bf16 %v4124_v37, %v4122_v28  ;;  %v4749_v37 = vpack.c.bf16 %v4696_v60, %v4694_v31  ;;  %v5020_v31 = vld [vmem:[#allocation2 + $0x230] ss:$2 sm:$0xff]  ;;  %v5022_v60 = vld [vmem:[#allocation2 + $0x240] ss:$2 sm:$0xff] }
 0x285   : > { %14647 = vmatprep.subr.bf16.mxu1 %v15865_v52 }
 0x287   : > { %14592 = vmatmul.mubr.msk.bf16.gmra.mrb[64].mxu1 %vm334_vm1, %v3846_v53  ;;  %v4134_v53 = vld [vmem:[#allocation2 + $0x399] ss:$2 sm:$0xff] }
 0x288   : > { %14595 = vmatprep.mubr.msk.bf16.mxu1 %vm334_vm1, %v3847_v9  ;;  %v4136_v9 = vld [vmem:[#allocation2 + $0x3a9] ss:$2 sm:$0xff] }
 0x289   : > { %v4156_v4 = vpack.c.bf16 %v4136_v9, %v4134_v53  ;;  %v4706_v53 = vld [vmem:[#allocation2 + $0x11b] ss:$2 sm:$0xff]  ;;  %v4708_v9 = vld [vmem:[#allocation2 + $0x12b] ss:$2 sm:$0xff] }
 0x28f   : > { %14596 = vmatmul.mubr.msk.bf16.gmra.mrb[68].mxu1 %vm334_vm1, %v3848_v32  ;;  %v4142_v32 = vld [vmem:[#allocation2 + $0x439] ss:$2 sm:$0xff] }
 0x290   : > { %14599 = vmatprep.mubr.msk.bf16.mxu1 %vm334_vm1, %v3849_v25  ;;  %v4144_v25 = vld [vmem:[#allocation2 + $0x449] ss:$2 sm:$0xff] }
 0x291   : > { %v4158_v39 = vpack.c.bf16 %v4144_v25, %v4142_v32  ;;  %v4714_v32 = vld [vmem:[#allocation2 + $0x1bb] ss:$2 sm:$0xff]  ;;  %v4716_v25 = vld [vmem:[#allocation2 + $0x1cb] ss:$2 sm:$0xff] }
 0x297   : > { %14600 = vmatmul.mubr.msk.bf16.gmra.mrb[72].mxu1 %vm334_vm1, %v3850_v47  ;;  %v4396_v47 = vld [vmem:[#allocation2 + $0x7a] ss:$2 sm:$0xff] }
 0x298   : > { %14603 = vmatprep.mubr.msk.bf16.mxu1 %vm334_vm1, %v3851_v43  ;;  %v4398_v43 = vld [vmem:[#allocation2 + $0x8a] ss:$2 sm:$0xff] }
 0x299   : > { %v4448_v50 = vpack.c.bf16 %v4398_v43, %v4396_v47  ;;  %v4722_v47 = vld [vmem:[#allocation2 + $0x25b] ss:$2 sm:$0xff]  ;;  %v4724_v43 = vld [vmem:[#allocation2 + $0x26b] ss:$2 sm:$0xff] }
 0x29f   : > { %14604 = vmatmul.mubr.msk.bf16.gmra.mrb[76].mxu1 %vm334_vm1, %v3852_v0  ;;  %v4449_v0 = vpack.c.bf16 %v4402_v45, %v4400_v46  ;;  %v4726_v46 = vld [vmem:[#allocation2 + $0x2ab] ss:$2 sm:$0xff]  ;;  %v4728_v45 = vld [vmem:[#allocation2 + $0x2bb] ss:$2 sm:$0xff] }
 0x2a0   : > { %14607 = vmatprep.mubr.msk.bf16.mxu1 %vm334_vm1, %v3853_v62  ;;  %v15869_v62 = vld [vmem:[%s19960_s3 + $0x80] sm:$0xff]  }
 0x2a7   : > { %14608 = vmatmul.mubr.msk.bf16.gmra.mrb[80].mxu1 %vm334_vm1, %v3854_v12  ;;  %v4450_v12 = vpack.c.bf16 %v4406_v35, %v4404_v58  ;;  %v4734_v58 = vld [vmem:[#allocation2 + $0x34b] ss:$2 sm:$0xff]  ;;  %v4736_v35 = vld [vmem:[#allocation2 + $0x35b] ss:$2 sm:$0xff] }
 0x2a8   : > { %14611 = vmatprep.mubr.msk.bf16.mxu1 %vm334_vm1, %v3855_v6  ;;  %v4451_v6 = vpack.c.bf16 %v4410_v19, %v4408_v2  ;;  %v4759_v19 = vpack.c.bf16 %v4736_v35, %v4734_v58  ;;  %v15874_v35 = vld [vmem:[%s19960_s3 + $0xa8] sm:$0xff]  }
 0x2af   : > { %14612 = vmatmul.mubr.msk.bf16.gmra.mrb[84].mxu1 %vm334_vm1, %v3856_v24  ;;  %v4452_v24 = vpack.c.bf16 %v4414_v14, %v4412_v54  ;;  %v4742_v54 = vld [vmem:[#allocation2 + $0x3eb] ss:$2 sm:$0xff]  ;;  %v4744_v14 = vld [vmem:[#allocation2 + $0x3fb] ss:$2 sm:$0xff] }
 0x2b0   : > { %14619 = vmatprep.mubr.msk.bf16.mxu1 %vm334_vm1, %v4145_v57  ;;  %v4453_v57 = vpack.c.bf16 %v4418_v7, %v4416_v34  ;;  %v4761_v7 = vpack.c.bf16 %v4744_v14, %v4742_v54  ;;  %v5314_v54 = vld [vmem:[#allocation2 + $0x191] ss:$2 sm:$0xff]  ;;  %v5316_v14 = vld [vmem:[#allocation2 + $0x1a1] ss:$2 sm:$0xff] }
 0x2b7   : > { %14620 = vmatmul.mubr.msk.bf16.vlgmr.msra.gmra.mrb[60].mxu1 %vm334_vm1, %v4146_v42  ;;  %v4454_v42 = vpack.c.bf16 %v4422_v61, %v4420_v3  ;;  %v4996_v3 = vld [vmem:[#allocation2 + $0x50] ss:$2 sm:$0xff]  ;;  %v4998_v61 = vld [vmem:[#allocation2 + $0x60] ss:$2 sm:$0xff] }
 0x2b8   : > { %14623 = vmatprep.mubr.msk.bf16.mxu1 %vm334_vm1, %v4147_v15  ;;  %14648 = vmatpush3.bf16.msra.mxu1 %v15865_v52  ;;  %v4128_v52 = vld [vmem:[#allocation2 + $0x309] ss:$2 sm:$0xff]  ;;  %v4428_v15 = vld [vmem:[#allocation2 + $0x2fa] ss:$2 sm:$0xff] }
 0x2b9   : > { %14649 = vmatprep.subr.bf16.mxu1 %v15866_v41  ;;  %v4154_v51 = vpack.c.bf16 %v4128_v52, %v4126_v11  ;;  %v4702_v11 = vld [vmem:[#allocation2 + $0xcb] ss:$2 sm:$0xff]  ;;  %v4704_v52 = vld [vmem:[#allocation2 + $0xdb] ss:$2 sm:$0xff] }
 0x2bc   : > { %14650 = vmatpush3.bf16.msra.mxu1 %v15866_v41  ;;  %v4455_v41 = vpack.c.bf16 %v4426_v49, %v4424_v59  ;;  %v5051_v49 = vpack.c.bf16 %v4998_v61, %v4996_v3  ;;  %v5322_v3 = vld [vmem:[#allocation2 + $0x231] ss:$2 sm:$0xff]  ;;  %v5324_v61 = vld [vmem:[#allocation2 + $0x241] ss:$2 sm:$0xff] }
 0x2bd   : > { %14679 = vmatprep.subr.bf16.mxu1 %v15867_v21 }
 0x2bf   : > { %14624 = vmatmul.mubr.msk.bf16.gmra.mrb[64].mxu1 %vm334_vm1, %v4148_v23  ;;  %v4436_v23 = vld [vmem:[#allocation2 + $0x39a] ss:$2 sm:$0xff] }
 0x2c0   : > { %14627 = vmatprep.mubr.msk.bf16.mxu1 %vm334_vm1, %v4149_v22  ;;  %v4438_v22 = vld [vmem:[#allocation2 + $0x3aa] ss:$2 sm:$0xff] }
 0x2c1   : > { %v4458_v63 = vpack.c.bf16 %v4438_v22, %v4436_v23  ;;  %v5008_v23 = vld [vmem:[#allocation2 + $0x140] ss:$2 sm:$0xff]  ;;  %v5010_v22 = vld [vmem:[#allocation2 + $0x150] ss:$2 sm:$0xff] }
 0x2c7   : > { %14628 = vmatmul.mubr.msk.bf16.gmra.mrb[68].mxu1 %vm334_vm1, %v4150_v27  ;;  %v4444_v27 = vld [vmem:[#allocation2 + $0x43a] ss:$2 sm:$0xff] }
 0x2c8   : > { %14631 = vmatprep.mubr.msk.bf16.mxu1 %vm334_vm1, %v4151_v10  ;;  %v4446_v10 = vld [vmem:[#allocation2 + $0x44a] ss:$2 sm:$0xff] }
 0x2c9   : > { %v4460_v28 = vpack.c.bf16 %v4446_v10, %v4444_v27  ;;  %v5016_v27 = vld [vmem:[#allocation2 + $0x1e0] ss:$2 sm:$0xff]  ;;  %v5018_v10 = vld [vmem:[#allocation2 + $0x1f0] ss:$2 sm:$0xff] }
 0x2cf   : > { %14632 = vmatmul.mubr.msk.bf16.gmra.mrb[72].mxu1 %vm334_vm1, %v4152_v40  ;;  %v4698_v40 = vld [vmem:[#allocation2 + $0x7b] ss:$2 sm:$0xff] }
 0x2d0   : > { %14635 = vmatprep.mubr.msk.bf16.mxu1 %vm334_vm1, %v4153_v55  ;;  %v4700_v55 = vld [vmem:[#allocation2 + $0x8b] ss:$2 sm:$0xff] }
 0x2d1   : > { %v4750_v36 = vpack.c.bf16 %v4700_v55, %v4698_v40  ;;  %v5024_v40 = vld [vmem:[#allocation2 + $0x280] ss:$2 sm:$0xff]  ;;  %v5026_v55 = vld [vmem:[#allocation2 + $0x290] ss:$2 sm:$0xff] }
 0x2d7   : > { %14636 = vmatmul.mubr.msk.bf16.gmra.mrb[76].mxu1 %vm334_vm1, %v4154_v51  ;;  %v4751_v51 = vpack.c.bf16 %v4704_v52, %v4702_v11  ;;  %v5028_v11 = vld [vmem:[#allocation2 + $0x2d0] ss:$2 sm:$0xff]  ;;  %v5030_v52 = vld [vmem:[#allocation2 + $0x2e0] ss:$2 sm:$0xff] }
 0x2d8   : > { %14639 = vmatprep.mubr.msk.bf16.mxu1 %vm334_vm1, %v4155_v44  ;;  %v15871_v44 = vld [vmem:[%s19960_s3 + $0x90] sm:$0xff]  }
 0x2df   : > { %14640 = vmatmul.mubr.msk.bf16.gmra.mrb[80].mxu1 %vm334_vm1, %v4156_v4  ;;  %v4752_v4 = vpack.c.bf16 %v4708_v9, %v4706_v53  ;;  %v5036_v53 = vld [vmem:[#allocation2 + $0x370] ss:$2 sm:$0xff]  ;;  %v5038_v9 = vld [vmem:[#allocation2 + $0x380] ss:$2 sm:$0xff] }
 0x2e0   : > { %14643 = vmatprep.mubr.msk.bf16.mxu1 %vm334_vm1, %v4157_v56  ;;  %v4753_v56 = vpack.c.bf16 %v4712_v33, %v4710_v30  ;;  %v5061_v33 = vpack.c.bf16 %v5038_v9, %v5036_v53  ;;  %v15876_v9 = vld [vmem:[%s19960_s3 + $0xb8] sm:$0xff]  }
 0x2e7   : > { %14644 = vmatmul.mubr.msk.bf16.gmra.mrb[84].mxu1 %vm334_vm1, %v4158_v39  ;;  %v4754_v39 = vpack.c.bf16 %v4716_v25, %v4714_v32  ;;  %v5044_v32 = vld [vmem:[#allocation2 + $0x410] ss:$2 sm:$0xff]  ;;  %v5046_v25 = vld [vmem:[#allocation2 + $0x420] ss:$2 sm:$0xff] }
 0x2e8   : > { %14651 = vmatprep.mubr.msk.bf16.mxu1 %vm334_vm1, %v4447_v17  ;;  %v4755_v17 = vpack.c.bf16 %v4720_v18, %v4718_v20  ;;  %v5063_v18 = vpack.c.bf16 %v5046_v25, %v5044_v32  ;;  %v5616_v32 = vld [vmem:[#allocation2 + $0x192] ss:$2 sm:$0xff]  ;;  %v5618_v25 = vld [vmem:[#allocation2 + $0x1a2] ss:$2 sm:$0xff] }
 0x2ef   : > { %14652 = vmatmul.mubr.msk.bf16.vlgmr.msra.gmra.mrb[60].mxu1 %vm334_vm1, %v4448_v50  ;;  %v4756_v50 = vpack.c.bf16 %v4724_v43, %v4722_v47  ;;  %v5298_v47 = vld [vmem:[#allocation2 + $0x51] ss:$2 sm:$0xff]  ;;  %v5300_v43 = vld [vmem:[#allocation2 + $0x61] ss:$2 sm:$0xff] }
 0x2f0   : > { %14655 = vmatprep.mubr.msk.bf16.mxu1 %vm334_vm1, %v4449_v0  ;;  %14680 = vmatpush3.bf16.msra.mxu1 %v15867_v21  ;;  %v4430_v21 = vld [vmem:[#allocation2 + $0x30a] ss:$2 sm:$0xff]  ;;  %v4730_v0 = vld [vmem:[#allocation2 + $0x2fb] ss:$2 sm:$0xff] }
 0x2f1   : > { %14681 = vmatprep.subr.bf16.mxu1 %v15868_v13  ;;  %v4456_v16 = vpack.c.bf16 %v4430_v21, %v4428_v15  ;;  %v5004_v15 = vld [vmem:[#allocation2 + $0xf0] ss:$2 sm:$0xff]  ;;  %v5006_v21 = vld [vmem:[#allocation2 + $0x100] ss:$2 sm:$0xff] }
 0x2f4   : > { %14682 = vmatpush3.bf16.msra.mxu1 %v15868_v13  ;;  %v4757_v13 = vpack.c.bf16 %v4728_v45, %v4726_v46  ;;  %v5353_v45 = vpack.c.bf16 %v5300_v43, %v5298_v47  ;;  %v5624_v47 = vld [vmem:[#allocation2 + $0x232] ss:$2 sm:$0xff]  ;;  %v5626_v43 = vld [vmem:[#allocation2 + $0x242] ss:$2 sm:$0xff] }
 0x2f5   : > { %14711 = vmatprep.subr.bf16.mxu1 %v15869_v62 }
 0x2f7   : > { %14656 = vmatmul.mubr.msk.bf16.gmra.mrb[64].mxu1 %vm334_vm1, %v4450_v12  ;;  %v4738_v12 = vld [vmem:[#allocation2 + $0x39b] ss:$2 sm:$0xff] }
 0x2f8   : > { %14659 = vmatprep.mubr.msk.bf16.mxu1 %vm334_vm1, %v4451_v6  ;;  %v4740_v6 = vld [vmem:[#allocation2 + $0x3ab] ss:$2 sm:$0xff] }
 0x2f9   : > { %v4760_v34 = vpack.c.bf16 %v4740_v6, %v4738_v12  ;;  %v5310_v12 = vld [vmem:[#allocation2 + $0x141] ss:$2 sm:$0xff]  ;;  %v5312_v6 = vld [vmem:[#allocation2 + $0x151] ss:$2 sm:$0xff] }
 0x2ff   : > { %14660 = vmatmul.mubr.msk.bf16.gmra.mrb[68].mxu1 %vm334_vm1, %v4452_v24  ;;  %v4746_v24 = vld [vmem:[#allocation2 + $0x43b] ss:$2 sm:$0xff] }
 0x300   : > { %14663 = vmatprep.mubr.msk.bf16.mxu1 %vm334_vm1, %v4453_v57  ;;  %v4748_v57 = vld [vmem:[#allocation2 + $0x44b] ss:$2 sm:$0xff] }
 0x301   : > { %v4762_v59 = vpack.c.bf16 %v4748_v57, %v4746_v24  ;;  %v5318_v24 = vld [vmem:[#allocation2 + $0x1e1] ss:$2 sm:$0xff]  ;;  %v5320_v57 = vld [vmem:[#allocation2 + $0x1f1] ss:$2 sm:$0xff] }
 0x307   : > { %14664 = vmatmul.mubr.msk.bf16.gmra.mrb[72].mxu1 %vm334_vm1, %v4454_v42  ;;  %v5000_v42 = vld [vmem:[#allocation2 + $0xa0] ss:$2 sm:$0xff] }
 0x308   : > { %14667 = vmatprep.mubr.msk.bf16.mxu1 %vm334_vm1, %v4455_v41  ;;  %v5002_v41 = vld [vmem:[#allocation2 + $0xb0] ss:$2 sm:$0xff] }
 0x309   : > { %v5052_v38 = vpack.c.bf16 %v5002_v41, %v5000_v42  ;;  %v5326_v42 = vld [vmem:[#allocation2 + $0x281] ss:$2 sm:$0xff]  ;;  %v5328_v41 = vld [vmem:[#allocation2 + $0x291] ss:$2 sm:$0xff] }
 0x30f   : > { %14668 = vmatmul.mubr.msk.bf16.gmra.mrb[76].mxu1 %vm334_vm1, %v4456_v16  ;;  %v5053_v16 = vpack.c.bf16 %v5006_v21, %v5004_v15  ;;  %v5330_v15 = vld [vmem:[#allocation2 + $0x2d1] ss:$2 sm:$0xff]  ;;  %v5332_v21 = vld [vmem:[#allocation2 + $0x2e1] ss:$2 sm:$0xff] }
 0x310   : > { %14671 = vmatprep.mubr.msk.bf16.mxu1 %vm334_vm1, %v4457_v29  ;;  %v15873_v29 = vld [vmem:[%s19960_s3 + $0xa0] sm:$0xff]  }
 0x317   : > { %14672 = vmatmul.mubr.msk.bf16.gmra.mrb[80].mxu1 %vm334_vm1, %v4458_v63  ;;  %v5054_v63 = vpack.c.bf16 %v5010_v22, %v5008_v23  ;;  %v5338_v23 = vld [vmem:[#allocation2 + $0x371] ss:$2 sm:$0xff]  ;;  %v5340_v22 = vld [vmem:[#allocation2 + $0x381] ss:$2 sm:$0xff] }
 0x318   : > { %14675 = vmatprep.mubr.msk.bf16.mxu1 %vm334_vm1, %v4459_v1  ;;  %v5055_v1 = vpack.c.bf16 %v5014_v5, %v5012_v48  ;;  %v5363_v5 = vpack.c.bf16 %v5340_v22, %v5338_v23  ;;  %v15878_v22 = vld [vmem:[%s19960_s3 + $0xc8] sm:$0xff]  }
 0x31f   : > { %14676 = vmatmul.mubr.msk.bf16.gmra.mrb[84].mxu1 %vm334_vm1, %v4460_v28  ;;  %v5056_v28 = vpack.c.bf16 %v5018_v10, %v5016_v27  ;;  %v5346_v27 = vld [vmem:[#allocation2 + $0x411] ss:$2 sm:$0xff]  ;;  %v5348_v10 = vld [vmem:[#allocation2 + $0x421] ss:$2 sm:$0xff] }
 0x320   : > { %14683 = vmatprep.mubr.msk.bf16.mxu1 %vm334_vm1, %v4749_v37  ;;  %v5057_v37 = vpack.c.bf16 %v5022_v60, %v5020_v31  ;;  %v5365_v60 = vpack.c.bf16 %v5348_v10, %v5346_v27  ;;  %v5918_v27 = vld [vmem:[#allocation2 + $0x193] ss:$2 sm:$0xff]  ;;  %v5920_v10 = vld [vmem:[#allocation2 + $0x1a3] ss:$2 sm:$0xff] }
 0x327   : > { %14684 = vmatmul.mubr.msk.bf16.vlgmr.msra.gmra.mrb[60].mxu1 %vm334_vm1, %v4750_v36  ;;  %v5058_v36 = vpack.c.bf16 %v5026_v55, %v5024_v40  ;;  %v5600_v40 = vld [vmem:[#allocation2 + $0x52] ss:$2 sm:$0xff]  ;;  %v5602_v55 = vld [vmem:[#allocation2 + $0x62] ss:$2 sm:$0xff] }
 0x328   : > { %14687 = vmatprep.mubr.msk.bf16.mxu1 %vm334_vm1, %v4751_v51  ;;  %14712 = vmatpush3.bf16.msra.mxu1 %v15869_v62  ;;  %v4732_v62 = vld [vmem:[#allocation2 + $0x30b] ss:$2 sm:$0xff]  ;;  %v5032_v51 = vld [vmem:[#allocation2 + $0x320] ss:$2 sm:$0xff] }
 0x329   : > { %14713 = vmatprep.subr.bf16.mxu1 %v15870_v26  ;;  %v4758_v2 = vpack.c.bf16 %v4732_v62, %v4730_v0  ;;  %v5306_v0 = vld [vmem:[#allocation2 + $0xf1] ss:$2 sm:$0xff]  ;;  %v5308_v62 = vld [vmem:[#allocation2 + $0x101] ss:$2 sm:$0xff] }
 0x32c   : > { %14714 = vmatpush3.bf16.msra.mxu1 %v15870_v26  ;;  %v5059_v26 = vpack.c.bf16 %v5030_v52, %v5028_v11  ;;  %v5655_v52 = vpack.c.bf16 %v5602_v55, %v5600_v40  ;;  %v5926_v40 = vld [vmem:[#allocation2 + $0x233] ss:$2 sm:$0xff]  ;;  %v5928_v55 = vld [vmem:[#allocation2 + $0x243] ss:$2 sm:$0xff] }
 0x32d   : > { %14743 = vmatprep.subr.bf16.mxu1 %v15871_v44 }
 0x32f   : > { %14688 = vmatmul.mubr.msk.bf16.gmra.mrb[64].mxu1 %vm334_vm1, %v4752_v4  ;;  %v5040_v4 = vld [vmem:[#allocation2 + $0x3c0] ss:$2 sm:$0xff] }
 0x330   : > { %14691 = vmatprep.mubr.msk.bf16.mxu1 %vm334_vm1, %v4753_v56  ;;  %v5042_v56 = vld [vmem:[#allocation2 + $0x3d0] ss:$2 sm:$0xff] }
 0x331   : > { %v5062_v20 = vpack.c.bf16 %v5042_v56, %v5040_v4  ;;  %v5612_v4 = vld [vmem:[#allocation2 + $0x142] ss:$2 sm:$0xff]  ;;  %v5614_v56 = vld [vmem:[#allocation2 + $0x152] ss:$2 sm:$0xff] }
 0x337   : > { %14692 = vmatmul.mubr.msk.bf16.gmra.mrb[68].mxu1 %vm334_vm1, %v4754_v39  ;;  %v5048_v39 = vld [vmem:[#allocation2 + $0x460] ss:$2 sm:$0xff] }
 0x338   : > { %14695 = vmatprep.mubr.msk.bf16.mxu1 %vm334_vm1, %v4755_v17  ;;  %v5050_v17 = vld [vmem:[#allocation2 + $0x470] ss:$2 sm:$0xff] }
 0x339   : > { %v5064_v46 = vpack.c.bf16 %v5050_v17, %v5048_v39  ;;  %v5620_v39 = vld [vmem:[#allocation2 + $0x1e2] ss:$2 sm:$0xff]  ;;  %v5622_v17 = vld [vmem:[#allocation2 + $0x1f2] ss:$2 sm:$0xff] }
 0x33f   : > { %14696 = vmatmul.mubr.msk.bf16.gmra.mrb[72].mxu1 %vm334_vm1, %v4756_v50  ;;  %v5302_v50 = vld [vmem:[#allocation2 + $0xa1] ss:$2 sm:$0xff] }
 0x340   : > { %14699 = vmatprep.mubr.msk.bf16.mxu1 %vm334_vm1, %v4757_v13  ;;  %v5304_v13 = vld [vmem:[#allocation2 + $0xb1] ss:$2 sm:$0xff] }
 0x341   : > { %v5354_v58 = vpack.c.bf16 %v5304_v13, %v5302_v50  ;;  %v5628_v50 = vld [vmem:[#allocation2 + $0x282] ss:$2 sm:$0xff]  ;;  %v5630_v13 = vld [vmem:[#allocation2 + $0x292] ss:$2 sm:$0xff] }
 0x347   : > { %14700 = vmatmul.mubr.msk.bf16.gmra.mrb[76].mxu1 %vm334_vm1, %v4758_v2  ;;  %v5355_v2 = vpack.c.bf16 %v5308_v62, %v5306_v0  ;;  %v5632_v0 = vld [vmem:[#allocation2 + $0x2d2] ss:$2 sm:$0xff]  ;;  %v5634_v62 = vld [vmem:[#allocation2 + $0x2e2] ss:$2 sm:$0xff] }
 0x348   : > { %14703 = vmatprep.mubr.msk.bf16.mxu1 %vm334_vm1, %v4759_v19  ;;  %v15875_v19 = vld [vmem:[%s19960_s3 + $0xb0] sm:$0xff]  }
 0x34f   : > { %14704 = vmatmul.mubr.msk.bf16.gmra.mrb[80].mxu1 %vm334_vm1, %v4760_v34  ;;  %v5356_v34 = vpack.c.bf16 %v5312_v6, %v5310_v12  ;;  %v5640_v12 = vld [vmem:[#allocation2 + $0x372] ss:$2 sm:$0xff]  ;;  %v5642_v6 = vld [vmem:[#allocation2 + $0x382] ss:$2 sm:$0xff] }
 0x350   : > { %14707 = vmatprep.mubr.msk.bf16.mxu1 %vm334_vm1, %v4761_v7  ;;  %v5357_v7 = vpack.c.bf16 %v5316_v14, %v5314_v54  ;;  %v5665_v14 = vpack.c.bf16 %v5642_v6, %v5640_v12  ;;  %v15880_v6 = vld [vmem:[%s19960_s3 + $0xd8] sm:$0xff]  }
 0x357   : > { %14708 = vmatmul.mubr.msk.bf16.gmra.mrb[84].mxu1 %vm334_vm1, %v4762_v59  ;;  %v5358_v59 = vpack.c.bf16 %v5320_v57, %v5318_v24  ;;  %v5648_v24 = vld [vmem:[#allocation2 + $0x412] ss:$2 sm:$0xff]  ;;  %v5650_v57 = vld [vmem:[#allocation2 + $0x422] ss:$2 sm:$0xff] }
 0x358   : > { %14715 = vmatprep.mubr.msk.bf16.mxu1 %vm334_vm1, %v5051_v49  ;;  %v5359_v49 = vpack.c.bf16 %v5324_v61, %v5322_v3  ;;  %v5667_v61 = vpack.c.bf16 %v5650_v57, %v5648_v24  ;;  %v6220_v24 = vld [vmem:[#allocation2 + $0x1b8] ss:$2 sm:$0xff]  ;;  %v6222_v57 = vld [vmem:[#allocation2 + $0x1c8] ss:$2 sm:$0xff] }
 0x35f   : > { %14716 = vmatmul.mubr.msk.bf16.vlgmr.msra.gmra.mrb[60].mxu1 %vm334_vm1, %v5052_v38  ;;  %v5360_v38 = vpack.c.bf16 %v5328_v41, %v5326_v42  ;;  %v5902_v42 = vld [vmem:[#allocation2 + $0x53] ss:$2 sm:$0xff]  ;;  %v5904_v41 = vld [vmem:[#allocation2 + $0x63] ss:$2 sm:$0xff] }
 0x360   : > { %14719 = vmatprep.mubr.msk.bf16.mxu1 %vm334_vm1, %v5053_v16  ;;  %14744 = vmatpush3.bf16.msra.mxu1 %v15871_v44  ;;  %v5034_v44 = vld [vmem:[#allocation2 + $0x330] ss:$2 sm:$0xff]  ;;  %v5334_v16 = vld [vmem:[#allocation2 + $0x321] ss:$2 sm:$0xff] }
 0x361   : > { %14745 = vmatprep.subr.bf16.mxu1 %v15872_v8  ;;  %v5060_v30 = vpack.c.bf16 %v5034_v44, %v5032_v51  ;;  %v5608_v51 = vld [vmem:[#allocation2 + $0xf2] ss:$2 sm:$0xff]  ;;  %v5610_v44 = vld [vmem:[#allocation2 + $0x102] ss:$2 sm:$0xff] }
 0x364   : > { %14746 = vmatpush3.bf16.msra.mxu1 %v15872_v8  ;;  %v5361_v8 = vpack.c.bf16 %v5332_v21, %v5330_v15  ;;  %v5957_v21 = vpack.c.bf16 %v5904_v41, %v5902_v42  ;;  %v6228_v42 = vld [vmem:[#allocation2 + $0x258] ss:$2 sm:$0xff]  ;;  %v6230_v41 = vld [vmem:[#allocation2 + $0x268] ss:$2 sm:$0xff] }
 0x365   : > { %14775 = vmatprep.subr.bf16.mxu1 %v15873_v29 }
 0x367   : > { %14720 = vmatmul.mubr.msk.bf16.gmra.mrb[64].mxu1 %vm334_vm1, %v5054_v63  ;;  %v5342_v63 = vld [vmem:[#allocation2 + $0x3c1] ss:$2 sm:$0xff] }
 0x368   : > { %14723 = vmatprep.mubr.msk.bf16.mxu1 %vm334_vm1, %v5055_v1  ;;  %v5344_v1 = vld [vmem:[#allocation2 + $0x3d1] ss:$2 sm:$0xff] }
 0x369   : > { %v5364_v31 = vpack.c.bf16 %v5344_v1, %v5342_v63  ;;  %v5914_v63 = vld [vmem:[#allocation2 + $0x143] ss:$2 sm:$0xff]  ;;  %v5916_v1 = vld [vmem:[#allocation2 + $0x153] ss:$2 sm:$0xff] }
 0x36f   : > { %14724 = vmatmul.mubr.msk.bf16.gmra.mrb[68].mxu1 %vm334_vm1, %v5056_v28  ;;  %v5350_v28 = vld [vmem:[#allocation2 + $0x461] ss:$2 sm:$0xff] }
 0x370   : > { %14727 = vmatprep.mubr.msk.bf16.mxu1 %vm334_vm1, %v5057_v37  ;;  %v5352_v37 = vld [vmem:[#allocation2 + $0x471] ss:$2 sm:$0xff] }
 0x371   : > { %v5366_v11 = vpack.c.bf16 %v5352_v37, %v5350_v28  ;;  %v5922_v28 = vld [vmem:[#allocation2 + $0x1e3] ss:$2 sm:$0xff]  ;;  %v5924_v37 = vld [vmem:[#allocation2 + $0x1f3] ss:$2 sm:$0xff] }
 0x377   : > { %14728 = vmatmul.mubr.msk.bf16.gmra.mrb[72].mxu1 %vm334_vm1, %v5058_v36  ;;  %v5604_v36 = vld [vmem:[#allocation2 + $0xa2] ss:$2 sm:$0xff] }
 0x378   : > { %14731 = vmatprep.mubr.msk.bf16.mxu1 %vm334_vm1, %v5059_v26  ;;  %v5606_v26 = vld [vmem:[#allocation2 + $0xb2] ss:$2 sm:$0xff] }
 0x379   : > { %v5656_v53 = vpack.c.bf16 %v5606_v26, %v5604_v36  ;;  %v5930_v36 = vld [vmem:[#allocation2 + $0x283] ss:$2 sm:$0xff]  ;;  %v5932_v26 = vld [vmem:[#allocation2 + $0x293] ss:$2 sm:$0xff] }
 0x37f   : > { %14732 = vmatmul.mubr.msk.bf16.gmra.mrb[76].mxu1 %vm334_vm1, %v5060_v30  ;;  %v5657_v30 = vpack.c.bf16 %v5610_v44, %v5608_v51  ;;  %v5934_v51 = vld [vmem:[#allocation2 + $0x2d3] ss:$2 sm:$0xff]  ;;  %v5936_v44 = vld [vmem:[#allocation2 + $0x2e3] ss:$2 sm:$0xff] }
 0x380   : > { %14735 = vmatprep.mubr.msk.bf16.mxu1 %vm334_vm1, %v5061_v33  ;;  %v15877_v33 = vld [vmem:[%s19960_s3 + $0xc0] sm:$0xff]  }
 0x387   : > { %14736 = vmatmul.mubr.msk.bf16.gmra.mrb[80].mxu1 %vm334_vm1, %v5062_v20  ;;  %v5658_v20 = vpack.c.bf16 %v5614_v56, %v5612_v4  ;;  %v5942_v4 = vld [vmem:[#allocation2 + $0x373] ss:$2 sm:$0xff]  ;;  %v5944_v56 = vld [vmem:[#allocation2 + $0x383] ss:$2 sm:$0xff] }
 0x388   : > { %14739 = vmatprep.mubr.msk.bf16.mxu1 %vm334_vm1, %v5063_v18  ;;  %v5659_v18 = vpack.c.bf16 %v5618_v25, %v5616_v32  ;;  %v5967_v25 = vpack.c.bf16 %v5944_v56, %v5942_v4  ;;  %v15882_v56 = vld [vmem:[%s19960_s3 + $0xe8] sm:$0xff]  }
 0x38f   : > { %14740 = vmatmul.mubr.msk.bf16.gmra.mrb[84].mxu1 %vm334_vm1, %v5064_v46  ;;  %v5660_v46 = vpack.c.bf16 %v5622_v17, %v5620_v39  ;;  %v5950_v39 = vld [vmem:[#allocation2 + $0x413] ss:$2 sm:$0xff]  ;;  %v5952_v17 = vld [vmem:[#allocation2 + $0x423] ss:$2 sm:$0xff] }
 0x390   : > { %14747 = vmatprep.mubr.msk.bf16.mxu1 %vm334_vm1, %v5353_v45  ;;  %v5661_v45 = vpack.c.bf16 %v5626_v43, %v5624_v47  ;;  %v5969_v43 = vpack.c.bf16 %v5952_v17, %v5950_v39  ;;  %v6522_v39 = vld [vmem:[#allocation2 + $0x1b9] ss:$2 sm:$0xff]  ;;  %v6524_v17 = vld [vmem:[#allocation2 + $0x1c9] ss:$2 sm:$0xff] }
 0x397   : > { %14748 = vmatmul.mubr.msk.bf16.vlgmr.msra.gmra.mrb[60].mxu1 %vm334_vm1, %v5354_v58  ;;  %v5662_v58 = vpack.c.bf16 %v5630_v13, %v5628_v50  ;;  %v6204_v50 = vld [vmem:[#allocation2 + $0x78] ss:$2 sm:$0xff]  ;;  %v6206_v13 = vld [vmem:[#allocation2 + $0x88] ss:$2 sm:$0xff] }
 0x398   : > { %14751 = vmatprep.mubr.msk.bf16.mxu1 %vm334_vm1, %v5355_v2  ;;  %14776 = vmatpush3.bf16.msra.mxu1 %v15873_v29  ;;  %v5336_v29 = vld [vmem:[#allocation2 + $0x331] ss:$2 sm:$0xff]  ;;  %v5636_v2 = vld [vmem:[#allocation2 + $0x322] ss:$2 sm:$0xff] }
 0x399   : > { %14777 = vmatprep.subr.bf16.mxu1 %v15874_v35  ;;  %v5362_v48 = vpack.c.bf16 %v5336_v29, %v5334_v16  ;;  %v5910_v16 = vld [vmem:[#allocation2 + $0xf3] ss:$2 sm:$0xff]  ;;  %v5912_v29 = vld [vmem:[#allocation2 + $0x103] ss:$2 sm:$0xff] }
 0x39c   : > { %14778 = vmatpush3.bf16.msra.mxu1 %v15874_v35  ;;  %v5663_v35 = vpack.c.bf16 %v5634_v62, %v5632_v0  ;;  %v6259_v62 = vpack.c.bf16 %v6206_v13, %v6204_v50  ;;  %v6530_v50 = vld [vmem:[#allocation2 + $0x259] ss:$2 sm:$0xff]  ;;  %v6532_v13 = vld [vmem:[#allocation2 + $0x269] ss:$2 sm:$0xff] }
 0x39d   : > { %14807 = vmatprep.subr.bf16.mxu1 %v15875_v19 }
 0x39f   : > { %14752 = vmatmul.mubr.msk.bf16.gmra.mrb[64].mxu1 %vm334_vm1, %v5356_v34  ;;  %v5644_v34 = vld [vmem:[#allocation2 + $0x3c2] ss:$2 sm:$0xff] }
 0x3a0   : > { %14755 = vmatprep.mubr.msk.bf16.mxu1 %vm334_vm1, %v5357_v7  ;;  %v5646_v7 = vld [vmem:[#allocation2 + $0x3d2] ss:$2 sm:$0xff] }
 0x3a1   : > { %v5666_v3 = vpack.c.bf16 %v5646_v7, %v5644_v34  ;;  %v6216_v34 = vld [vmem:[#allocation2 + $0x168] ss:$2 sm:$0xff]  ;;  %v6218_v7 = vld [vmem:[#allocation2 + $0x178] ss:$2 sm:$0xff] }
 0x3a7   : > { %14756 = vmatmul.mubr.msk.bf16.gmra.mrb[68].mxu1 %vm334_vm1, %v5358_v59  ;;  %v5652_v59 = vld [vmem:[#allocation2 + $0x462] ss:$2 sm:$0xff] }
 0x3a8   : > { %14759 = vmatprep.mubr.msk.bf16.mxu1 %vm334_vm1, %v5359_v49  ;;  %v5654_v49 = vld [vmem:[#allocation2 + $0x472] ss:$2 sm:$0xff] }
 0x3a9   : > { %v5668_v15 = vpack.c.bf16 %v5654_v49, %v5652_v59  ;;  %v6224_v59 = vld [vmem:[#allocation2 + $0x208] ss:$2 sm:$0xff]  ;;  %v6226_v49 = vld [vmem:[#allocation2 + $0x218] ss:$2 sm:$0xff] }
 0x3af   : > { %14760 = vmatmul.mubr.msk.bf16.gmra.mrb[72].mxu1 %vm334_vm1, %v5360_v38  ;;  %v5906_v38 = vld [vmem:[#allocation2 + $0xa3] ss:$2 sm:$0xff] }
 0x3b0   : > { %14763 = vmatprep.mubr.msk.bf16.mxu1 %vm334_vm1, %v5361_v8  ;;  %v5908_v8 = vld [vmem:[#allocation2 + $0xb3] ss:$2 sm:$0xff] }
 0x3b1   : > { %v5958_v23 = vpack.c.bf16 %v5908_v8, %v5906_v38  ;;  %v6232_v38 = vld [vmem:[#allocation2 + $0x2a8] ss:$2 sm:$0xff]  ;;  %v6234_v8 = vld [vmem:[#allocation2 + $0x2b8] ss:$2 sm:$0xff] }
 0x3b7   : > { %14764 = vmatmul.mubr.msk.bf16.gmra.mrb[76].mxu1 %vm334_vm1, %v5362_v48  ;;  %v5959_v48 = vpack.c.bf16 %v5912_v29, %v5910_v16  ;;  %v6236_v16 = vld [vmem:[#allocation2 + $0x2f8] ss:$2 sm:$0xff]  ;;  %v6238_v29 = vld [vmem:[#allocation2 + $0x308] ss:$2 sm:$0xff] }
 0x3b8   : > { %14767 = vmatprep.mubr.msk.bf16.mxu1 %vm334_vm1, %v5363_v5  ;;  %v15879_v5 = vld [vmem:[%s19960_s3 + $0xd0] sm:$0xff]  }
 0x3bf   : > { %14768 = vmatmul.mubr.msk.bf16.gmra.mrb[80].mxu1 %vm334_vm1, %v5364_v31  ;;  %v5960_v31 = vpack.c.bf16 %v5916_v1, %v5914_v63  ;;  %v6244_v63 = vld [vmem:[#allocation2 + $0x398] ss:$2 sm:$0xff]  ;;  %v6246_v1 = vld [vmem:[#allocation2 + $0x3a8] ss:$2 sm:$0xff] }
 0x3c0   : > { %14771 = vmatprep.mubr.msk.bf16.mxu1 %vm334_vm1, %v5365_v60  ;;  %v5961_v60 = vpack.c.bf16 %v5920_v10, %v5918_v27  ;;  %v6269_v10 = vpack.c.bf16 %v6246_v1, %v6244_v63  ;;  %v6816_v63 = vld [vmem:[#allocation2 + $0x11a] ss:$2 sm:$0xff]  ;;  %v6818_v1 = vld [vmem:[#allocation2 + $0x12a] ss:$2 sm:$0xff] }
 0x3c7   : > { %14772 = vmatmul.mubr.msk.bf16.gmra.mrb[84].mxu1 %vm334_vm1, %v5366_v11  ;;  %v5962_v11 = vpack.c.bf16 %v5924_v37, %v5922_v28  ;;  %v6252_v28 = vld [vmem:[#allocation2 + $0x438] ss:$2 sm:$0xff]  ;;  %v6254_v37 = vld [vmem:[#allocation2 + $0x448] ss:$2 sm:$0xff] }
 0x3c8   : > { %14779 = vmatprep.mubr.msk.bf16.mxu1 %vm334_vm1, %v5655_v52  ;;  %v5963_v52 = vpack.c.bf16 %v5928_v55, %v5926_v40  ;;  %v6271_v55 = vpack.c.bf16 %v6254_v37, %v6252_v28  ;;  %v6822_v28 = vld [vmem:[#allocation2 + $0x17a] ss:$2 sm:$0xff] }
 0x3c9   : > { %v6824_v37 = vld [vmem:[#allocation2 + $0x1ba] ss:$2 sm:$0xff] }
 0x3cf   : > { %14780 = vmatmul.mubr.msk.bf16.vlgmr.msra.gmra.mrb[60].mxu1 %vm334_vm1, %v5656_v53  ;;  %v5964_v53 = vpack.c.bf16 %v5932_v26, %v5930_v36  ;;  %v6506_v36 = vld [vmem:[#allocation2 + $0x79] ss:$2 sm:$0xff]  ;;  %v6508_v26 = vld [vmem:[#allocation2 + $0x89] ss:$2 sm:$0xff] }
 0x3d0   : > { %14783 = vmatprep.mubr.msk.bf16.mxu1 %vm334_vm1, %v5657_v30  ;;  %14808 = vmatpush3.bf16.msra.mxu1 %v15875_v19  ;;  %v5638_v19 = vld [vmem:[#allocation2 + $0x332] ss:$2 sm:$0xff]  ;;  %v5938_v30 = vld [vmem:[#allocation2 + $0x323] ss:$2 sm:$0xff] }
 0x3d1   : > { %14809 = vmatprep.subr.bf16.mxu1 %v15876_v9  ;;  %v5664_v54 = vpack.c.bf16 %v5638_v19, %v5636_v2  ;;  %v6212_v2 = vld [vmem:[#allocation2 + $0x118] ss:$2 sm:$0xff]  ;;  %v6214_v19 = vld [vmem:[#allocation2 + $0x128] ss:$2 sm:$0xff] }
 0x3d4   : > { %14810 = vmatpush3.bf16.msra.mxu1 %v15876_v9  ;;  %v5965_v9 = vpack.c.bf16 %v5936_v44, %v5934_v51  ;;  %v6561_v44 = vpack.c.bf16 %v6508_v26, %v6506_v36  ;;  %v6830_v36 = vld [vmem:[#allocation2 + $0x21a] ss:$2 sm:$0xff] }
 0x3d5   : > { %14839 = vmatprep.subr.bf16.mxu1 %v15877_v33  ;;  %v6832_v26 = vld [vmem:[#allocation2 + $0x25a] ss:$2 sm:$0xff] }
 0x3d7   : > { %14784 = vmatmul.mubr.msk.bf16.gmra.mrb[64].mxu1 %vm334_vm1, %v5658_v20  ;;  %v5946_v20 = vld [vmem:[#allocation2 + $0x3c3] ss:$2 sm:$0xff] }
 0x3d8   : > { %14787 = vmatprep.mubr.msk.bf16.mxu1 %vm334_vm1, %v5659_v18  ;;  %v5948_v18 = vld [vmem:[#allocation2 + $0x3d3] ss:$2 sm:$0xff] }
 0x3d9   : > { %v5968_v47 = vpack.c.bf16 %v5948_v18, %v5946_v20  ;;  %v6518_v20 = vld [vmem:[#allocation2 + $0x169] ss:$2 sm:$0xff]  ;;  %v6520_v18 = vld [vmem:[#allocation2 + $0x179] ss:$2 sm:$0xff] }
 0x3df   : > { %14788 = vmatmul.mubr.msk.bf16.gmra.mrb[68].mxu1 %vm334_vm1, %v5660_v46  ;;  %v5954_v46 = vld [vmem:[#allocation2 + $0x463] ss:$2 sm:$0xff] }
 0x3e0   : > { %14791 = vmatprep.mubr.msk.bf16.mxu1 %vm334_vm1, %v5661_v45  ;;  %v5956_v45 = vld [vmem:[#allocation2 + $0x473] ss:$2 sm:$0xff] }
 0x3e1   : > { %v5970_v0 = vpack.c.bf16 %v5956_v45, %v5954_v46  ;;  %v6526_v46 = vld [vmem:[#allocation2 + $0x209] ss:$2 sm:$0xff]  ;;  %v6528_v45 = vld [vmem:[#allocation2 + $0x219] ss:$2 sm:$0xff] }
 0x3e7   : > { %14792 = vmatmul.mubr.msk.bf16.gmra.mrb[72].mxu1 %vm334_vm1, %v5662_v58  ;;  %v6208_v58 = vld [vmem:[#allocation2 + $0xc8] ss:$2 sm:$0xff] }
 0x3e8   : > { %14795 = vmatprep.mubr.msk.bf16.mxu1 %vm334_vm1, %v5663_v35  ;;  %v6210_v35 = vld [vmem:[#allocation2 + $0xd8] ss:$2 sm:$0xff] }
 0x3e9   : > { %v6260_v12 = vpack.c.bf16 %v6210_v35, %v6208_v58  ;;  %v6534_v58 = vld [vmem:[#allocation2 + $0x2a9] ss:$2 sm:$0xff]  ;;  %v6536_v35 = vld [vmem:[#allocation2 + $0x2b9] ss:$2 sm:$0xff] }
 0x3ef   : > { %14796 = vmatmul.mubr.msk.bf16.gmra.mrb[76].mxu1 %vm334_vm1, %v5664_v54  ;;  %v6261_v54 = vpack.c.bf16 %v6214_v19, %v6212_v2  ;;  %v6538_v2 = vld [vmem:[#allocation2 + $0x2f9] ss:$2 sm:$0xff]  ;;  %v6540_v19 = vld [vmem:[#allocation2 + $0x309] ss:$2 sm:$0xff] }
 0x3f0   : > { %14799 = vmatprep.mubr.msk.bf16.mxu1 %vm334_vm1, %v5665_v14  ;;  %v15881_v14 = vld [vmem:[%s19960_s3 + $0xe0] sm:$0xff]  }
 0x3f7   : > { %14800 = vmatmul.mubr.msk.bf16.gmra.mrb[80].mxu1 %vm334_vm1, %v5666_v3  ;;  %v6262_v3 = vpack.c.bf16 %v6218_v7, %v6216_v34  ;;  %v6546_v34 = vld [vmem:[#allocation2 + $0x399] ss:$2 sm:$0xff]  ;;  %v6548_v7 = vld [vmem:[#allocation2 + $0x3a9] ss:$2 sm:$0xff] }
 0x3f8   : > { %14803 = vmatprep.mubr.msk.bf16.mxu1 %vm334_vm1, %v5667_v61  ;;  %v6263_v61 = vpack.c.bf16 %v6222_v57, %v6220_v24  ;;  %v6571_v57 = vpack.c.bf16 %v6548_v7, %v6546_v34  ;;  %v7120_v34 = vld [vmem:[#allocation2 + $0x12b] ss:$2 sm:$0xff] }
 0x3ff   : > { %14804 = vmatmul.mubr.msk.bf16.gmra.mrb[84].mxu1 %vm334_vm1, %v5668_v15  ;;  %v6264_v15 = vpack.c.bf16 %v6226_v49, %v6224_v59  ;;  %v6550_v59 = vld [vmem:[#allocation2 + $0x3e9] ss:$2 sm:$0xff]  ;;  %v6552_v49 = vld [vmem:[#allocation2 + $0x3f9] ss:$2 sm:$0xff] }
 0x400   : > { %14811 = vmatprep.mubr.msk.bf16.mxu1 %vm334_vm1, %v5957_v21  ;;  %v6265_v21 = vpack.c.bf16 %v6230_v41, %v6228_v42  ;;  %v6554_v42 = vld [vmem:[#allocation2 + $0x439] ss:$2 sm:$0xff]  ;;  %v6556_v41 = vld [vmem:[#allocation2 + $0x449] ss:$2 sm:$0xff] }
 0x407   : > { %14812 = vmatmul.mubr.msk.bf16.vlgmr.msra.gmra.mrb[60].mxu1 %vm334_vm1, %v5958_v23  ;;  %v6266_v23 = vpack.c.bf16 %v6234_v8, %v6232_v38  ;;  %v6558_v38 = vld [vmem:[#allocation2 + $0x489] ss:$2 sm:$0xff]  ;;  %v6560_v8 = vld [vmem:[#allocation2 + $0x499] ss:$2 sm:$0xff] }
 0x408   : > { %14815 = vmatprep.mubr.msk.bf16.mxu1 %vm334_vm1, %v5959_v48  ;;  %14840 = vmatpush3.bf16.msra.mxu1 %v15877_v33  ;;  %v5940_v33 = vld [vmem:[#allocation2 + $0x333] ss:$2 sm:$0xff]  ;;  %v6240_v48 = vld [vmem:[#allocation2 + $0x348] ss:$2 sm:$0xff] }
 0x409   : > { %14841 = vmatprep.subr.bf16.mxu1 %v15878_v22  ;;  %v5966_v32 = vpack.c.bf16 %v5940_v33, %v5938_v30  ;;  %v6514_v30 = vld [vmem:[#allocation2 + $0x119] ss:$2 sm:$0xff]  ;;  %v6516_v33 = vld [vmem:[#allocation2 + $0x129] ss:$2 sm:$0xff] }
 0x40c   : > { %14842 = vmatpush3.bf16.msra.mxu1 %v15878_v22  ;;  %v6267_v22 = vpack.c.bf16 %v6238_v29, %v6236_v16  ;;  %v6808_v16 = vld [vmem:[#allocation2 + $0x7a] ss:$2 sm:$0xff]  ;;  %v6810_v29 = vld [vmem:[#allocation2 + $0x8a] ss:$2 sm:$0xff] }
 0x40d   : > { %14871 = vmatprep.subr.bf16.mxu1 %v15879_v5 }
 0x40f   : > { %14816 = vmatmul.mubr.msk.bf16.gmra.mrb[64].mxu1 %vm334_vm1, %v5960_v31  ;;  %v6248_v31 = vld [vmem:[#allocation2 + $0x3e8] ss:$2 sm:$0xff] }
 0x410   : > { %14819 = vmatprep.mubr.msk.bf16.mxu1 %vm334_vm1, %v5961_v60  ;;  %v6250_v60 = vld [vmem:[#allocation2 + $0x3f8] ss:$2 sm:$0xff] }
 0x411   : > { %v6270_v40 = vpack.c.bf16 %v6250_v60, %v6248_v31  ;;  %v6865_v31 = vpack.c.bf16 %v6818_v1, %v6816_v63  ;;  %v6820_v60 = vld [vmem:[#allocation2 + $0x16a] ss:$2 sm:$0xff] }
 0x417   : > { %14820 = vmatmul.mubr.msk.bf16.gmra.mrb[68].mxu1 %vm334_vm1, %v5962_v11  ;;  %v6256_v11 = vld [vmem:[#allocation2 + $0x488] ss:$2 sm:$0xff] }
 0x418   : > { %14823 = vmatprep.mubr.msk.bf16.mxu1 %vm334_vm1, %v5963_v52  ;;  %v6258_v52 = vld [vmem:[#allocation2 + $0x498] ss:$2 sm:$0xff] }
 0x419   : > { %v6272_v51 = vpack.c.bf16 %v6258_v52, %v6256_v11  ;;  %v6828_v52 = vld [vmem:[#allocation2 + $0x20a] ss:$2 sm:$0xff] }
 0x41f   : > { %14824 = vmatmul.mubr.msk.bf16.gmra.mrb[72].mxu1 %vm334_vm1, %v5964_v53  ;;  %v6510_v53 = vld [vmem:[#allocation2 + $0xc9] ss:$2 sm:$0xff] }
 0x420   : > { %14827 = vmatprep.mubr.msk.bf16.mxu1 %vm334_vm1, %v5965_v9  ;;  %v6512_v9 = vld [vmem:[#allocation2 + $0xd9] ss:$2 sm:$0xff] }
 0x421   : > { %v6562_v4 = vpack.c.bf16 %v6512_v9, %v6510_v53  ;;  %v6836_v9 = vld [vmem:[#allocation2 + $0x2aa] ss:$2 sm:$0xff] }
 0x427   : > { %14828 = vmatmul.mubr.msk.bf16.gmra.mrb[76].mxu1 %vm334_vm1, %v5966_v32  ;;  %v6563_v32 = vpack.c.bf16 %v6516_v33, %v6514_v30  ;;  %v6838_v30 = vld [vmem:[#allocation2 + $0x2ba] ss:$2 sm:$0xff] }
 0x428   : > { %14831 = vmatprep.mubr.msk.bf16.mxu1 %vm334_vm1, %v5967_v25  ;;  %v18500_v25 = vld [vmem:[%s19960_s3 + $0xf0] sm:$0xff]   ;;  %v6840_v33 = vld [vmem:[#allocation2 + $0x2fa] ss:$2 sm:$0xff] }
 0x42f   : > { %14832 = vmatmul.mubr.msk.bf16.gmra.mrb[80].mxu1 %vm334_vm1, %v5968_v47  ;;  %v6564_v47 = vpack.c.bf16 %v6520_v18, %v6518_v20  ;;  %v6846_v20 = vld [vmem:[#allocation2 + $0x35a] ss:$2 sm:$0xff] }
 0x430   : > { %14835 = vmatprep.mubr.msk.bf16.mxu1 %vm334_vm1, %v5969_v43  ;;  %v6565_v43 = vpack.c.bf16 %v6524_v17, %v6522_v39  ;;  %v6848_v18 = vld [vmem:[#allocation2 + $0x39a] ss:$2 sm:$0xff]  ;;  %v6850_v39 = vld [vmem:[#allocation2 + $0x3aa] ss:$2 sm:$0xff] }
 0x437   : > { %14836 = vmatmul.mubr.msk.bf16.gmra.mrb[84].mxu1 %vm334_vm1, %v5970_v0  ;;  %v6566_v0 = vpack.c.bf16 %v6528_v45, %v6526_v46  ;;  %v6854_v46 = vld [vmem:[#allocation2 + $0x3fa] ss:$2 sm:$0xff] }
 0x438   : > { %14843 = vmatprep.mubr.msk.bf16.mxu1 %vm334_vm1, %v6259_v62  ;;  %v6567_v62 = vpack.c.bf16 %v6532_v13, %v6530_v50  ;;  %v6856_v45 = vld [vmem:[#allocation2 + $0x43a] ss:$2 sm:$0xff]  ;;  %v6858_v50 = vld [vmem:[#allocation2 + $0x44a] ss:$2 sm:$0xff] }
 0x43f   : > { %14844 = vmatmul.mubr.msk.bf16.vlgmr.msra.gmra.mrb[60].mxu1 %vm334_vm1, %v6260_v12  ;;  %v6568_v12 = vpack.c.bf16 %v6536_v35, %v6534_v58  ;;  %v6862_v58 = vld [vmem:[#allocation2 + $0x49a] ss:$2 sm:$0xff]  ;;  %v7110_v35 = vld [vmem:[#allocation2 + $0x7b] ss:$2 sm:$0xff] }
 0x440   : > { %14847 = vmatprep.mubr.msk.bf16.mxu1 %vm334_vm1, %v6261_v54  ;;  %14872 = vmatpush3.bf16.msra.mxu1 %v15879_v5  ;;  %v6242_v5 = vld [vmem:[#allocation2 + $0x358] ss:$2 sm:$0xff]  ;;  %v6542_v54 = vld [vmem:[#allocation2 + $0x349] ss:$2 sm:$0xff] }
 0x441   : > { %14873 = vmatprep.subr.bf16.mxu1 %v15880_v6  ;;  %v6268_v27 = vpack.c.bf16 %v6242_v5, %v6240_v48  ;;  %v6812_v48 = vld [vmem:[#allocation2 + $0xca] ss:$2 sm:$0xff]  ;;  %v6814_v5 = vld [vmem:[#allocation2 + $0xda] ss:$2 sm:$0xff] }
 0x444   : > { %14874 = vmatpush3.bf16.msra.mxu1 %v15880_v6  ;;  %v6569_v6 = vpack.c.bf16 %v6540_v19, %v6538_v2  ;;  %v7112_v2 = vld [vmem:[#allocation2 + $0x8b] ss:$2 sm:$0xff] }
 0x445   : > { %14903 = vmatprep.subr.bf16.mxu1 %v15881_v14 }
 0x447   : > { %14848 = vmatmul.mubr.msk.bf16.gmra.mrb[64].mxu1 %vm334_vm1, %v6262_v3  ;;  %v15885_v3 = vld [vmem:[%s19962_s5 + $0x20] sm:$0xff]  }
 0x448   : > { %14851 = vmatprep.mubr.msk.bf16.mxu1 %vm334_vm1, %v6263_v61  ;;  %v18514_v61 = vld [vmem:[#allocation4 + $0x8] sm:$0xff]  ;;  %14968 = vmatpush3.bf16.msra.mxu0 %v15885_v3  ;;  %v7124_v3 = vld [vmem:[#allocation2 + $0x17b] ss:$2 sm:$0xff] }
 0x449   : > { %367 = vst.msk [vmem:[#allocation3 + $0x10] sm:$0xff] %vm366_vm3, %v18514_v61  ;;  %368 = vst.msk [vmem:[#allocation3 + $0x28] sm:$0xff] %vm366_vm3, %v18514_v61  ;;  %14969 = vmatprep.subr.bf16.mxu0 %v18514_v61 }
 0x44a   : > { %369 = vst.msk [vmem:[#allocation3 + $0x40] sm:$0xff] %vm366_vm3, %v18514_v61  ;;  %370 = vst.msk [vmem:[#allocation3 + $0x58] sm:$0xff] %vm366_vm3, %v18514_v61 }
 0x44b   : > { %371 = vst.msk [vmem:[#allocation3 + $0x70] sm:$0xff] %vm366_vm3, %v18514_v61  ;;  %372 = vst.msk [vmem:[#allocation3 + $0x88] sm:$0xff] %vm366_vm3, %v18514_v61 }
 0x44c   : > { %373 = vst.msk [vmem:[#allocation3 + $0xa0] sm:$0xff] %vm366_vm3, %v18514_v61  ;;  %374 = vst.msk [vmem:[#allocation3 + $0xb8] sm:$0xff] %vm366_vm3, %v18514_v61 }
 0x44d   : > { %375 = vst.msk [vmem:[#allocation3 + $0xd0] sm:$0xff] %vm366_vm3, %v18514_v61  ;;  %376 = vst.msk [vmem:[#allocation3 + $0xe8] sm:$0xff] %vm366_vm3, %v18514_v61 }
 0x44e   : > { %377 = vst.msk [vmem:[#allocation3 + $0x100] sm:$0xff] %vm366_vm3, %v18514_v61  ;;  %378 = vst.msk [vmem:[#allocation3 + $0x118] sm:$0xff] %vm366_vm3, %v18514_v61 }
 0x44f   : > { %14852 = vmatmul.mubr.msk.bf16.gmra.mrb[68].mxu1 %vm334_vm1, %v6264_v15  ;;  %379 = vst.msk [vmem:[#allocation3 + $0x130] sm:$0xff] %vm366_vm3, %v18514_v61  ;;  %380 = vst.msk [vmem:[#allocation3 + $0x148] sm:$0xff] %vm366_vm3, %v18514_v61  ;;  %v6572_v15 = vpack.c.bf16 %v6552_v49, %v6550_v59  ;;  %v7126_v59 = vld [vmem:[#allocation2 + $0x1bb] ss:$2 sm:$0xff]  ;;  %v7128_v49 = vld [vmem:[#allocation2 + $0x1cb] ss:$2 sm:$0xff] }
 0x450   : > { %14855 = vmatprep.mubr.msk.bf16.mxu1 %vm334_vm1, %v6265_v21  ;;  %v6573_v21 = vpack.c.bf16 %v6556_v41, %v6554_v42  ;;  %v7169_v41 = vpack.c.bf16 %v7128_v49, %v7126_v59 }
 0x457   : > { %14856 = vmatmul.mubr.msk.bf16.gmra.mrb[72].mxu1 %vm334_vm1, %v6266_v23  ;;  %v6574_v23 = vpack.c.bf16 %v6560_v8, %v6558_v38  ;;  %v7134_v38 = vld [vmem:[#allocation2 + $0x25b] ss:$2 sm:$0xff]  ;;  %v7136_v8 = vld [vmem:[#allocation2 + $0x26b] ss:$2 sm:$0xff] }
 0x458   : > { %14859 = vmatprep.mubr.msk.bf16.mxu1 %vm334_vm1, %v6267_v22  ;;  %v6863_v22 = vpack.c.bf16 %v6810_v29, %v6808_v16  ;;  %v7171_v29 = vpack.c.bf16 %v7136_v8, %v7134_v38 }
 0x45f   : > { %14860 = vmatmul.mubr.msk.bf16.gmra.mrb[76].mxu1 %vm334_vm1, %v6268_v27  ;;  %v6864_v27 = vpack.c.bf16 %v6814_v5, %v6812_v48  ;;  %v7142_v48 = vld [vmem:[#allocation2 + $0x2fb] ss:$2 sm:$0xff]  ;;  %v7144_v5 = vld [vmem:[#allocation2 + $0x30b] ss:$2 sm:$0xff] }
 0x460   : > { %14863 = vmatprep.mubr.msk.bf16.mxu1 %vm334_vm1, %v6269_v10  ;;  %v15884_v10 = vld [vmem:[%s19960_s3 + $0xf8] sm:$0xff]   ;;  %v7173_v1 = vpack.c.bf16 %v7144_v5, %v7142_v48 }
 0x467   : > { %14864 = vmatmul.mubr.msk.bf16.gmra.mrb[80].mxu1 %vm334_vm1, %v6270_v40  ;;  %v6826_v40 = vld [vmem:[#allocation2 + $0x1ca] ss:$2 sm:$0xff] }
 0x468   : > { %14867 = vmatprep.mubr.msk.bf16.mxu1 %vm334_vm1, %v6271_v55  ;;  %v6866_v55 = vpack.c.bf16 %v6822_v28, %v6820_v60  ;;  %v6867_v11 = vpack.c.bf16 %v6826_v40, %v6824_v37  ;;  %v7152_v60 = vld [vmem:[#allocation2 + $0x3ab] ss:$2 sm:$0xff] }
 0x469   : > { %v7154_v40 = vld [vmem:[#allocation2 + $0x3eb] ss:$2 sm:$0xff] }
 0x46f   : > { %14868 = vmatmul.mubr.msk.bf16.gmra.mrb[84].mxu1 %vm334_vm1, %v6272_v51  ;;  %v6834_v51 = vld [vmem:[#allocation2 + $0x26a] ss:$2 sm:$0xff] }
 0x470   : > { %14875 = vmatprep.mubr.msk.bf16.mxu1 %vm334_vm1, %v6561_v44  ;;  %v6868_v44 = vpack.c.bf16 %v6830_v36, %v6828_v52  ;;  %v6869_v53 = vpack.c.bf16 %v6834_v51, %v6832_v26  ;;  %v7160_v52 = vld [vmem:[#allocation2 + $0x44b] ss:$2 sm:$0xff] }
 0x471   : > { %v7162_v51 = vld [vmem:[#allocation2 + $0x48b] ss:$2 sm:$0xff] }
 0x477   : > { %14876 = vmatmul.mubr.msk.bf16.vlgmr.msra.gmra.mrb[60].mxu1 %vm334_vm1, %v6562_v4  ;;  %v6842_v4 = vld [vmem:[#allocation2 + $0x30a] ss:$2 sm:$0xff] }
 0x478   : > { %14879 = vmatprep.mubr.msk.bf16.mxu1 %vm334_vm1, %v6563_v32  ;;  %14904 = vmatpush3.bf16.msra.mxu1 %v15881_v14  ;;  %v6544_v14 = vld [vmem:[#allocation2 + $0x359] ss:$2 sm:$0xff]  ;;  %v6871_v32 = vpack.c.bf16 %v6842_v4, %v6840_v33  ;;  %v18597_v4 = vld [vmem:[%s19961_s4] ss:$0 sm:$0xff] }
 0x479   : > { %14905 = vmatprep.subr.bf16.mxu1 %v15882_v56  ;;  %v6570_v24 = vpack.c.bf16 %v6544_v14, %v6542_v54  ;;  %v7116_v54 = vld [vmem:[#allocation2 + $0xdb] ss:$2 sm:$0xff] }
 0x47a   : > { %v7118_v14 = vld [vmem:[#allocation2 + $0x11b] ss:$2 sm:$0xff] }
 0x47b   : > { %v15888_v33 = vld [vmem:[%s19962_s5 + $0x38] sm:$0xff]  }
 0x47c   : > { %14906 = vmatpush3.bf16.msra.mxu1 %v15882_v56  ;;  %v6870_v56 = vpack.c.bf16 %v6838_v30, %v6836_v9  ;;  %v15886_v9 = vld [vmem:[%s19962_s5 + $0x28] sm:$0xff]   ;;  %v15887_v30 = vld [vmem:[%s19962_s5 + $0x30] sm:$0xff]  }
 0x47d   : > { %14935 = vmatprep.subr.bf16.mxu1 %v18500_v25  ;;  %14970 = vmatpush3.bf16.msra.mxu0 %v15886_v9 }
 0x47e   : > { %14971 = vmatprep.subr.bf16.mxu0 %v18514_v61 }
 0x47f   : > { %14880 = vmatmul.mubr.msk.bf16.gmra.mrb[64].mxu1 %vm334_vm1, %v6564_v47  ;;  %v6873_v47 = vpack.c.bf16 %v6850_v39, %v6848_v18 }
 0x480   : > { %14883 = vmatprep.mubr.msk.bf16.mxu1 %vm334_vm1, %v6565_v43  ;;  %v6852_v43 = vld [vmem:[#allocation2 + $0x3ea] ss:$2 sm:$0xff] }
 0x481   : > { %v6874_v13 = vpack.c.bf16 %v6854_v46, %v6852_v43  ;;  %14972 = vmatpush3.bf16.msra.mxu0 %v15887_v30 }
 0x482   : > { %14973 = vmatprep.subr.bf16.mxu0 %v18514_v61 }
 0x485   : > { %14974 = vmatpush3.bf16.msra.mxu0 %v15888_v33 }
 0x486   : > { %14987 = vmatprep.subr.bf16.mxu0 %v18514_v61 }
 0x487   : > { %14884 = vmatmul.mubr.msk.bf16.gmra.mrb[68].mxu1 %vm334_vm1, %v6566_v0  ;;  %v6875_v0 = vpack.c.bf16 %v6858_v50, %v6856_v45 }
 0x488   : > { %14887 = vmatprep.mubr.msk.bf16.mxu1 %vm334_vm1, %v6567_v62  ;;  %v6860_v62 = vld [vmem:[#allocation2 + $0x48a] ss:$2 sm:$0xff] }
 0x489   : > { %v6876_v19 = vpack.c.bf16 %v6862_v58, %v6860_v62 }
 0x48f   : > { %14888 = vmatmul.mubr.msk.bf16.gmra.mrb[72].mxu1 %vm334_vm1, %v6568_v12  ;;  %v7165_v12 = vpack.c.bf16 %v7112_v2, %v7110_v35 }
 0x490   : > { %14891 = vmatprep.mubr.msk.bf16.mxu1 %vm334_vm1, %v6569_v6  ;;  %v7114_v6 = vld [vmem:[#allocation2 + $0xcb] ss:$2 sm:$0xff] }
 0x491   : > { %v7166_v7 = vpack.c.bf16 %v7116_v54, %v7114_v6 }
 0x497   : > { %14892 = vmatmul.mubr.msk.bf16.gmra.mrb[76].mxu1 %vm334_vm1, %v6570_v24  ;;  %v7167_v24 = vpack.c.bf16 %v7120_v34, %v7118_v14 }
 0x498   : > { %14895 = vmatprep.mubr.msk.bf16.mxu1 %vm334_vm1, %v6571_v57  ;;  %v7122_v57 = vld [vmem:[#allocation2 + $0x16b] ss:$2 sm:$0xff] }
 0x499   : > { %v7168_v42 = vpack.c.bf16 %v7124_v3, %v7122_v57 }
 0x49f   : > { %14896 = vmatmul.mubr.msk.bf16.gmra.mrb[80].mxu1 %vm334_vm1, %v6572_v15  ;;  %v7130_v15 = vld [vmem:[#allocation2 + $0x20b] ss:$2 sm:$0xff] }
 0x4a0   : > { %14899 = vmatprep.mubr.msk.bf16.mxu1 %vm334_vm1, %v6573_v21  ;;  %v7132_v21 = vld [vmem:[#allocation2 + $0x21b] ss:$2 sm:$0xff] }
 0x4a1   : > { %v7170_v16 = vpack.c.bf16 %v7132_v21, %v7130_v15 }
 0x4a7   : > { %14900 = vmatmul.mubr.msk.bf16.gmra.mrb[84].mxu1 %vm334_vm1, %v6574_v23  ;;  %v7138_v23 = vld [vmem:[#allocation2 + $0x2ab] ss:$2 sm:$0xff] }
 0x4a8   : > { %14907 = vmatprep.mubr.msk.bf16.mxu1 %vm334_vm1, %v6863_v22  ;;  %v7140_v22 = vld [vmem:[#allocation2 + $0x2bb] ss:$2 sm:$0xff] }
 0x4a9   : > { %v7172_v63 = vpack.c.bf16 %v7140_v22, %v7138_v23 }
 0x4af   : > { %14908 = vmatmul.mubr.msk.bf16.vlgmr.msra.gmra.mrb[60].mxu1 %vm334_vm1, %v6864_v27  ;;  %v7146_v27 = vld [vmem:[#allocation2 + $0x34b] ss:$2 sm:$0xff] }
 0x4b0   : > { %14911 = vmatprep.mubr.msk.bf16.mxu1 %vm334_vm1, %v6865_v31  ;;  %14936 = vmatpush3.bf16.msra.mxu1 %v18500_v25  ;;  %v6844_v25 = vld [vmem:[#allocation2 + $0x34a] ss:$2 sm:$0xff]  ;;  %v7150_v31 = vld [vmem:[#allocation2 + $0x39b] ss:$2 sm:$0xff] }
 0x4b1   : > { %14937 = vmatprep.subr.bf16.mxu1 %v15884_v10  ;;  %v6872_v17 = vpack.c.bf16 %v6846_v20, %v6844_v25  ;;  %v7175_v37 = vpack.c.bf16 %v7152_v60, %v7150_v31 }
 0x4b4   : > { %14938 = vmatpush3.bf16.msra.mxu1 %v15884_v10  ;;  %v7148_v10 = vld [vmem:[#allocation2 + $0x35b] ss:$2 sm:$0xff] }
 0x4b5   : > { %v7174_v28 = vpack.c.bf16 %v7148_v10, %v7146_v27 }
 0x4b7   : > { %14912 = vmatmul.mubr.msk.bf16.gmra.mrb[64].mxu1 %vm334_vm1, %v6866_v55  ;;  %v7156_v55 = vld [vmem:[#allocation2 + $0x3fb] ss:$2 sm:$0xff] }
 0x4b8   : > { %14915 = vmatprep.mubr.msk.bf16.mxu1 %vm334_vm1, %v6867_v11  ;;  %v7158_v11 = vld [vmem:[#allocation2 + $0x43b] ss:$2 sm:$0xff]  ;;  %v7176_v36 = vpack.c.bf16 %v7156_v55, %v7154_v40 }
 0x4b9   : > { %v7177_v26 = vpack.c.bf16 %v7160_v52, %v7158_v11 }
 0x4bf   : > { %14916 = vmatmul.mubr.msk.bf16.gmra.mrb[68].mxu1 %vm334_vm1, %v6868_v44  ;;  %v7164_v44 = vld [vmem:[#allocation2 + $0x49b] ss:$2 sm:$0xff] }
 0x4c0   : > { %14919 = vmatprep.mubr.msk.bf16.mxu1 %vm334_vm1, %v6869_v53  ;;  %v7178_v53 = vpack.c.bf16 %v7164_v44, %v7162_v51 }
 0x4c7   : > { %14920 = vmatmul.mubr.msk.bf16.gmra.mrb[72].mxu1 %vm334_vm1, %v6870_v56 }
 0x4c8   : > { %14923 = vmatprep.mubr.msk.bf16.mxu1 %vm334_vm1, %v6871_v32 }
 0x4cf   : > { %14924 = vmatmul.mubr.msk.bf16.gmra.mrb[76].mxu1 %vm334_vm1, %v6872_v17 }
 0x4d0   : > { %14927 = vmatprep.mubr.msk.bf16.mxu1 %vm334_vm1, %v6873_v47 }
 0x4d7   : > { %14928 = vmatmul.mubr.msk.bf16.gmra.mrb[80].mxu1 %vm334_vm1, %v6874_v13 }
 0x4d8   : > { %14931 = vmatprep.mubr.msk.bf16.mxu1 %vm334_vm1, %v6875_v0 }
 0x4df   : > { %14932 = vmatmul.mubr.msk.bf16.gmra.mrb[84].mxu1 %vm334_vm1, %v6876_v19 }
 0x4e0   : > { %14939 = vmatprep.mubr.msk.bf16.mxu1 %vm334_vm1, %v7165_v12 }
 0x4e7   : > { %14940 = vmatmul.mubr.msk.bf16.vlgmr.msra.gmra.mrb[60].mxu1 %vm334_vm1, %v7166_v7 }
 0x4e8   : > { %14943 = vmatprep.mubr.msk.bf16.mxu1 %vm334_vm1, %v7167_v24 }
 0x4ef   : > { %14944 = vmatmul.mubr.msk.bf16.gmra.mrb[64].mxu1 %vm334_vm1, %v7168_v42 }
 0x4f0   : > { %14947 = vmatprep.mubr.msk.bf16.mxu1 %vm334_vm1, %v7169_v41 }
 0x4f7   : > { %14948 = vmatmul.mubr.msk.bf16.gmra.mrb[68].mxu1 %vm334_vm1, %v7170_v16 }
 0x4f8   : > { %14951 = vmatprep.mubr.msk.bf16.mxu1 %vm334_vm1, %v7171_v29 }
 0x4ff   : > { %14952 = vmatmul.mubr.msk.bf16.gmra.mrb[72].mxu1 %vm334_vm1, %v7172_v63 }
 0x500   : > { %14955 = vmatprep.mubr.msk.bf16.mxu1 %vm334_vm1, %v7173_v1 }
 0x507   : > { %14956 = vmatmul.mubr.msk.bf16.gmra.mrb[76].mxu1 %vm334_vm1, %v7174_v28 }
 0x508   : > { %14959 = vmatprep.mubr.msk.bf16.mxu1 %vm334_vm1, %v7175_v37 }
 0x50f   : > { %14960 = vmatmul.mubr.msk.bf16.gmra.mrb[80].mxu1 %vm334_vm1, %v7176_v36 }
 0x510   : > { %14963 = vmatprep.mubr.msk.bf16.mxu1 %vm334_vm1, %v7177_v26 }
 0x517   : > { %14964 = vmatmul.mubr.msk.bf16.gmra.mrb[84].mxu1 %vm334_vm1, %v7178_v53  ;;  %vm16671_vm1 = vmmov 0  }
 0x518   : > { %14975 = vmatprep.mubr.msk.bf16.mxu0 %vm16671_vm1, %v18514_v61 }
 0x5ba   : > { %v14941_v56 = vpop.f32.mrb[60].mxu1 }
 0x5bb   : > { %v7420_v32 = vadd.f32 %v14941_v56, %v18597_v4  ;;  %v7272_v25 = vpop.f32.mrb[61].mxu1 }
 0x5bc   : > { %v7418_v20 = vadd.f32 %v18597_v4, %v7272_v25  ;;  %v14942_v18 = vpop.f32.mrb[62].mxu1 }
 0x5bd   : > { %v7476_v39 = vmin.f32 %v7420_v32, 0.0  ;;  %v7421_v17 = vadd.f32 %v14942_v18, %v18597_v4  ;;  %v7275_v47 = vpop.f32.mrb[63].mxu1  ;;  %vm7448_vm4 = vcmp.gt.f32.partialorder %v7420_v32, 0.0 }
 0x5be   : > { %v7474_v43 = vmin.f32 %v7418_v20, 0.0  ;;  %v18603_v46 = vadd.f32 %v18597_v4, %v7275_v47  ;;  %vm7446_vm5 = vcmp.gt.f32.partialorder %v7418_v20, 0.0 }
 0x5bf   : > { %v7506_v45 = vmul.f32 1.442695, %v7476_v39  ;;  %v7477_v50 = vmin.f32 %v7421_v17, 0.0  ;;  %vm7449_vm6 = vcmp.gt.f32.partialorder %v7421_v17, 0.0 }
 0x5c0   : > { %v7502_v13 = vmul.f32 1.442695, %v7474_v43  ;;  %v7475_v0 = vmin.f32 %v18603_v46, 0.0  ;;  %vm7447_vm7 = vcmp.gt.f32.partialorder %v18603_v46, 0.0 }
 0x5c1   : > { %16581 = vpow2.f32 %v7506_v45  ;;  %v7508_v62 = vmul.f32 1.442695, %v7477_v50 }
 0x5c2   : > { %16583 = vpow2.f32 %v7502_v13  ;;  %v7504_v58 = vmul.f32 1.442695, %v7475_v0  ;;  %v14945_v35 = vpop.f32.mrb[64].mxu1 }
 0x5c3   : > { %16585 = vpow2.f32 %v7508_v62  ;;  %v18607_v2 = vadd.f32 %v14945_v35, %v18597_v4  ;;  %v7288_v19 = vpop.f32.mrb[65].mxu1 }
 0x5c4   : > { %16587 = vpow2.f32 %v7504_v58  ;;  %v18610_v12 = vadd.f32 %v18597_v4, %v7288_v19  ;;  %v14946_v6 = vpop.f32.mrb[66].mxu1 }
 0x5c5   : > { %v7480_v54 = vmin.f32 %v18607_v2, 0.0  ;;  %v18614_v14 = vadd.f32 %v14946_v6, %v18597_v4  ;;  %v7291_v34 = vpop.f32.mrb[67].mxu1  ;;  %vm7452_vm8 = vcmp.gt.f32.partialorder %v18607_v2, 0.0 }
 0x5c6   : > { %v7478_v7 = vmin.f32 %v18610_v12, 0.0  ;;  %v18618_v24 = vadd.f32 %v18597_v4, %v7291_v34  ;;  %vm7450_vm9 = vcmp.gt.f32.partialorder %v18610_v12, 0.0 }
 0x5c7   : > { %v7514_v57 = vmul.f32 1.442695, %v7480_v54  ;;  %v7481_v3 = vmin.f32 %v18614_v14, 0.0  ;;  %vm7453_vm10 = vcmp.gt.f32.partialorder %v18614_v14, 0.0 }
 0x5c8   : > { %v7510_v59 = vmul.f32 1.442695, %v7478_v7  ;;  %v7479_v49 = vmin.f32 %v18618_v24, 0.0  ;;  %vm7451_vm11 = vcmp.gt.f32.partialorder %v18618_v24, 0.0 }
 0x5c9   : > { %16589 = vpow2.f32 %v7514_v57  ;;  %v7516_v42 = vmul.f32 1.442695, %v7481_v3 }
 0x5ca   : > { %16591 = vpow2.f32 %v7510_v59  ;;  %v7512_v41 = vmul.f32 1.442695, %v7479_v49  ;;  %v14949_v15 = vpop.f32.mrb[68].mxu1 }
 0x5cb   : > { %v16582_v21 = vpop.eup %16581  ;;  %16593 = vpow2.f32 %v7516_v42  ;;  %v18623_v38 = vadd.f32 %v14949_v15, %v18597_v4  ;;  %v7304_v8 = vpop.f32.mrb[69].mxu1 }
 0x5cc   : > { %v16584_v16 = vpop.eup %16583  ;;  %v13097_v29 = vadd.f32 -1.0, %v16582_v21  ;;  %16595 = vpow2.f32 %v7512_v41  ;;  %v18626_v23 = vadd.f32 %v18597_v4, %v7304_v8  ;;  %v14950_v22 = vpop.f32.mrb[70].mxu1 }
 0x5cd   : > { %v16586_v48 = vpop.eup %16585  ;;  %v13095_v5 = vadd.f32 -1.0, %v16584_v16  ;;  %v7484_v63 = vmin.f32 %v18623_v38, 0.0  ;;  %v18630_v1 = vadd.f32 %v14950_v22, %v18597_v4  ;;  %v7307_v27 = vpop.f32.mrb[71].mxu1  ;;  %vm7456_vm12 = vcmp.gt.f32.partialorder %v18623_v38, 0.0 }
 0x5ce   : > { %v16588_v10 = vpop.eup %16587  ;;  %v7588_v31 = vsel %vm7448_vm4, %v7420_v32, %v13097_v29  ;;  %v13098_v60 = vadd.f32 -1.0, %v16586_v48  ;;  %v7482_v28 = vmin.f32 %v18626_v23, 0.0  ;;  %v18638_v26 = vadd.f32 %v18597_v4, %v7307_v27 }
 0x5cf   : > { %7616 = vst.msk [vmem:[#allocation3 + $0x18] sm:$0xff] %vm366_vm3, %v7588_v31  ;;  %v7586_v37 = vsel %vm7446_vm5, %v7418_v20, %v13095_v5  ;;  %v13096_v40 = vadd.f32 -1.0, %v16588_v10  ;;  %v7522_v55 = vmul.f32 1.442695, %v7484_v63  ;;  %v7485_v36 = vmin.f32 %v18630_v1, 0.0 }
 0x5d0   : > { %7614 = vst.msk [vmem:[#allocation3] sm:$0xff] %vm366_vm3, %v7586_v37  ;;  %v7589_v11 = vsel %vm7449_vm6, %v7421_v17, %v13098_v60  ;;  %v7518_v52 = vmul.f32 1.442695, %v7482_v28  ;;  %v7483_v53 = vmin.f32 %v18638_v26, 0.0  ;;  %vm7454_vm13 = vcmp.gt.f32.partialorder %v18626_v23, 0.0 }
 0x5d1   : > { %7617 = vst.msk [vmem:[#allocation3 + $0x20] sm:$0xff] %vm366_vm3, %v7589_v11  ;;  %v7587_v51 = vsel %vm7447_vm7, %v18603_v46, %v13096_v40  ;;  %16597 = vpow2.f32 %v7522_v55  ;;  %v7524_v44 = vmul.f32 1.442695, %v7485_v36  ;;  %vm7457_vm14 = vcmp.gt.f32.partialorder %v18630_v1, 0.0  ;;  %v15889_v11 = vld [vmem:[%s19962_s5] sm:$0xff]  }
 0x5d2   : > { %7615 = vst.msk [vmem:[#allocation3 + $0x8] sm:$0xff] %vm366_vm3, %v7587_v51  ;;  %16599 = vpow2.f32 %v7518_v52  ;;  %v14953_v9 = vpop.f32.mrb[72].mxu1  ;;  %v7520_v20 = vmul.f32 1.442695, %v7483_v53  ;;  %vm7455_vm0 = vcmp.gt.f32.partialorder %v18638_v26, 0.0 }
 0x5d3   : > { %v16590_v30 = vpop.eup %16589  ;;  %v18646_v33 = vadd.f32 %v14953_v9, %v18597_v4  ;;  %v7320_v56 = vpop.f32.mrb[73].mxu1  ;;  %16601 = vpow2.f32 %v7524_v44 }
 0x5d4   : > { %v16592_v32 = vpop.eup %16591  ;;  %v13101_v25 = vadd.f32 -1.0, %v16590_v30  ;;  %v18649_v18 = vadd.f32 %v18597_v4, %v7320_v56  ;;  %v14954_v39 = vpop.f32.mrb[74].mxu1  ;;  %16603 = vpow2.f32 %v7520_v20 }
 0x5d5   : > { %v16594_v17 = vpop.eup %16593  ;;  %v13099_v47 = vadd.f32 -1.0, %v16592_v32  ;;  %v7488_v43 = vmin.f32 %v18646_v33, 0.0  ;;  %v18654_v46 = vadd.f32 %v14954_v39, %v18597_v4  ;;  %v7323_v45 = vpop.f32.mrb[75].mxu1  ;;  %vm7460_vm15 = vcmp.gt.f32.partialorder %v18646_v33, 0.0 }
 0x5d6   : > { %v16596_v50 = vpop.eup %16595  ;;  %v7592_v13 = vsel %vm7452_vm8, %v18607_v2, %v13101_v25  ;;  %v13102_v0 = vadd.f32 -1.0, %v16594_v17  ;;  %v7486_v19 = vmin.f32 %v18649_v18, 0.0  ;;  %v18668_v54 = vadd.f32 %v18597_v4, %v7323_v45 }
 0x5d7   : > { %7620 = vst.msk [vmem:[#allocation3 + $0x48] sm:$0xff] %vm366_vm3, %v7592_v13  ;;  %v7590_v62 = vsel %vm7450_vm9, %v18610_v12, %v13099_v47  ;;  %v13100_v58 = vadd.f32 -1.0, %v16596_v50  ;;  %v7530_v35 = vmul.f32 1.442695, %v7488_v43  ;;  %v7489_v2 = vmin.f32 %v18654_v46, 0.0 }
 0x5d8   : > { %7618 = vst.msk [vmem:[#allocation3 + $0x30] sm:$0xff] %vm366_vm3, %v7590_v62  ;;  %v7593_v6 = vsel %vm7453_vm10, %v18614_v14, %v13102_v0  ;;  %v7526_v12 = vmul.f32 1.442695, %v7486_v19  ;;  %v7487_v57 = vmin.f32 %v18668_v54, 0.0  ;;  %v15890_v0 = vld [vmem:[%s19962_s5 + $0x8] sm:$0xff]   ;;  %vm7458_vm2 = vcmp.gt.f32.partialorder %v18649_v18, 0.0 }
 0x5d9   : > { %7621 = vst.msk [vmem:[#allocation3 + $0x50] sm:$0xff] %vm366_vm3, %v7593_v6  ;;  %v7591_v34 = vsel %vm7451_vm11, %v18618_v24, %v13100_v58  ;;  %16605 = vpow2.f32 %v7530_v35  ;;  %v7532_v7 = vmul.f32 1.442695, %v7489_v2  ;;  %v7665_v44 = vld [vmem:[#allocation3 + $0x1] ss:$2 sm:$0xff]  ;;  %vm7461_vm4 = vcmp.gt.f32.partialorder %v18654_v46, 0.0 }
 0x5da   : > { %7619 = vst.msk [vmem:[#allocation3 + $0x38] sm:$0xff] %vm366_vm3, %v7591_v34  ;;  %v14957_v3 = vpop.f32.mrb[76].mxu1  ;;  %16607 = vpow2.f32 %v7526_v12  ;;  %v7528_v15 = vmul.f32 1.442695, %v7487_v57  ;;  %vm7459_vm5 = vcmp.gt.f32.partialorder %v18668_v54, 0.0 }
 0x5db   : > { %v16598_v14 = vpop.eup %16597  ;;  %v18675_v59 = vadd.f32 %v14957_v3, %v18597_v4  ;;  %v7336_v49 = vpop.f32.mrb[77].mxu1  ;;  %16609 = vpow2.f32 %v7532_v7 }
 0x5dc   : > { %v16600_v42 = vpop.eup %16599  ;;  %v13105_v41 = vadd.f32 -1.0, %v16598_v14  ;;  %v18678_v24 = vadd.f32 %v18597_v4, %v7336_v49  ;;  %v14958_v21 = vpop.f32.mrb[78].mxu1  ;;  %16611 = vpow2.f32 %v7528_v15  ;;  %v15891_v14 = vld [vmem:[%s19962_s5 + $0x10] sm:$0xff]  }
 0x5dd   : > { %v13103_v8 = vadd.f32 -1.0, %v16600_v42  ;;  %v7492_v16 = vmin.f32 %v18675_v59, 0.0  ;;  %v18683_v29 = vadd.f32 %v14958_v21, %v18597_v4  ;;  %v7339_v22 = vpop.f32.mrb[79].mxu1  ;;  %v16602_v48 = vpop.eup %16601  ;;  %vm7464_vm6 = vcmp.gt.f32.partialorder %v18675_v59, 0.0 }
 0x5de   : > { %v7596_v5 = vsel %vm7456_vm12, %v18623_v38, %v13105_v41  ;;  %v7490_v63 = vmin.f32 %v18678_v24, 0.0  ;;  %v13106_v10 = vadd.f32 -1.0, %v16602_v48  ;;  %v16604_v60 = vpop.eup %16603  ;;  %v18694_v38 = vadd.f32 %v18597_v4, %v7339_v22 }
 0x5df   : > { %7624 = vst.msk [vmem:[#allocation3 + $0x78] sm:$0xff] %vm366_vm3, %v7596_v5  ;;  %v7594_v27 = vsel %vm7454_vm13, %v18626_v23, %v13103_v8  ;;  %v7538_v31 = vmul.f32 1.442695, %v7492_v16  ;;  %v7493_v37 = vmin.f32 %v18683_v29, 0.0  ;;  %v13104_v55 = vadd.f32 -1.0, %v16604_v60  ;;  %v15892_v60 = vld [vmem:[%s19962_s5 + $0x18] sm:$0xff]  }
 0x5e0   : > { %7622 = vst.msk [vmem:[#allocation3 + $0x60] sm:$0xff] %vm366_vm3, %v7594_v27  ;;  %v7534_v28 = vmul.f32 1.442695, %v7490_v63  ;;  %v7597_v40 = vsel %vm7457_vm14, %v18630_v1, %v13106_v10  ;;  %v7491_v36 = vmin.f32 %v18694_v38, 0.0  ;;  %vm7462_vm7 = vcmp.gt.f32.partialorder %v18678_v24, 0.0 }
 0x5e1   : > { %16613 = vpow2.f32 %v7538_v31  ;;  %v7667_v23 = vld [vmem:[#allocation3 + $0x31] ss:$2 sm:$0xff]  ;;  %7625 = vst.msk [vmem:[#allocation3 + $0x80] sm:$0xff] %vm366_vm3, %v7597_v40  ;;  %v7540_v52 = vmul.f32 1.442695, %v7493_v37  ;;  %v7595_v1 = vsel %vm7455_vm0, %v18638_v26, %v13104_v55  ;;  %vm7465_vm8 = vcmp.gt.f32.partialorder %v18683_v29, 0.0 }
 0x5e2   : > { %16615 = vpow2.f32 %v7534_v28  ;;  %v14961_v51 = vpop.f32.mrb[80].mxu1  ;;  %v7676_v56 = vpack.c.bf16 %v7667_v23, %v7665_v44  ;;  %7623 = vst.msk [vmem:[#allocation3 + $0x68] sm:$0xff] %vm366_vm3, %v7595_v1  ;;  %v7536_v25 = vmul.f32 1.442695, %v7491_v36  ;;  %vm7463_vm9 = vcmp.gt.f32.partialorder %v18694_v38, 0.0 }
 0x5e3   : > { %v16606_v53 = vpop.eup %16605  ;;  %v18705_v9 = vadd.f32 %v14961_v51, %v18597_v4  ;;  %v7352_v30 = vpop.f32.mrb[81].mxu1  ;;  %16617 = vpow2.f32 %v7540_v52 }
 0x5e4   : > { %v13109_v32 = vadd.f32 -1.0, %v16606_v53  ;;  %v18709_v20 = vadd.f32 %v18597_v4, %v7352_v30  ;;  %v14962_v39 = vpop.f32.mrb[82].mxu1  ;;  %v16608_v17 = vpop.eup %16607  ;;  %14976 = vmatmul.mubr.msk.bf16.vlgmr.msra.gmra.mrb[64].mxu0 %vm366_vm3, %v7676_v56  ;;  %16619 = vpow2.f32 %v7536_v25 }
 0x5e5   : > { %v7496_v47 = vmin.f32 %v18705_v9, 0.0  ;;  %v18714_v26 = vadd.f32 %v14962_v39, %v18597_v4  ;;  %v7355_v43 = vpop.f32.mrb[83].mxu1  ;;  %v16610_v45 = vpop.eup %16609  ;;  %v13107_v13 = vadd.f32 -1.0, %v16608_v17  ;;  %14979 = vmatprep.mubr.msk.bf16.mxu0 %vm16671_vm1, %v18514_v61  ;;  %14988 = vmatpush3.bf16.msra.mxu0 %v15889_v11  ;;  %vm7468_vm10 = vcmp.gt.f32.partialorder %v18705_v9, 0.0 }
 0x5e6   : > { %v7600_v50 = vsel %vm7460_vm15, %v18646_v33, %v13109_v32  ;;  %v13110_v62 = vadd.f32 -1.0, %v16610_v45  ;;  %v7494_v35 = vmin.f32 %v18709_v20, 0.0  ;;  %14989 = vmatprep.subr.bf16.mxu0 %v18514_v61  ;;  %v16612_v33 = vpop.eup %16611  ;;  %v18731_v2 = vadd.f32 %v18597_v4, %v7355_v43 }
 0x5e7   : > { %7628 = vst.msk [vmem:[#allocation3 + $0xa8] sm:$0xff] %vm366_vm3, %v7600_v50  ;;  %v7546_v58 = vmul.f32 1.442695, %v7496_v47  ;;  %v7598_v19 = vsel %vm7458_vm2, %v18649_v18, %v13107_v13  ;;  %v7497_v6 = vmin.f32 %v18714_v26, 0.0  ;;  %v13108_v12 = vadd.f32 -1.0, %v16612_v33 }
 0x5e8   : > { %7626 = vst.msk [vmem:[#allocation3 + $0x90] sm:$0xff] %vm366_vm3, %v7598_v19  ;;  %v7601_v34 = vsel %vm7461_vm4, %v18654_v46, %v13110_v62  ;;  %v7542_v7 = vmul.f32 1.442695, %v7494_v35  ;;  %v7495_v18 = vmin.f32 %v18731_v2, 0.0  ;;  %vm7466_vm11 = vcmp.gt.f32.partialorder %v18709_v20, 0.0 }
 0x5e9   : > { %16621 = vpow2.f32 %v7546_v58  ;;  %7629 = vst.msk [vmem:[#allocation3 + $0xb0] sm:$0xff] %vm366_vm3, %v7601_v34  ;;  %v7548_v57 = vmul.f32 1.442695, %v7497_v6  ;;  %14990 = vmatpush3.bf16.msra.mxu0 %v15890_v0  ;;  %v7599_v42 = vsel %vm7459_vm5, %v18668_v54, %v13108_v12  ;;  %v7669_v1 = vld [vmem:[#allocation3 + $0x61] ss:$2 sm:$0xff]  ;;  %vm7469_vm12 = vcmp.gt.f32.partialorder %v18714_v26, 0.0 }
 0x5ea   : > { %v14965_v3 = vpop.f32.mrb[84].mxu1  ;;  %16623 = vpow2.f32 %v7542_v7  ;;  %14991 = vmatprep.subr.bf16.mxu0 %v18514_v61  ;;  %7627 = vst.msk [vmem:[#allocation3 + $0x98] sm:$0xff] %vm366_vm3, %v7599_v42  ;;  %v7544_v8 = vmul.f32 1.442695, %v7495_v18  ;;  %vm7467_vm13 = vcmp.gt.f32.partialorder %v18731_v2, 0.0  ;;  %v15894_v42 = vld [vmem:[%s19962_s5 + $0x48] sm:$0xff]  }
 0x5eb   : > { %v16614_v49 = vpop.eup %16613  ;;  %v18743_v46 = vadd.f32 %v14965_v3, %v18597_v4  ;;  %v7368_v41 = vpop.f32.mrb[85].mxu1  ;;  %16625 = vpow2.f32 %v7548_v57  ;;  %v7644_v18 = vld [vmem:[#allocation3 + $0x30] ss:$2 sm:$0xff]  ;;  %v7642_v3 = vld [vmem:[#allocation3] ss:$2 sm:$0xff] }
 0x5ec   : > { %v16616_v15 = vpop.eup %16615  ;;  %v13113_v21 = vadd.f32 -1.0, %v16614_v49  ;;  %v18748_v16 = vadd.f32 %v18597_v4, %v7368_v41  ;;  %v14966_v22 = vpop.f32.mrb[86].mxu1  ;;  %16627 = vpow2.f32 %v7544_v8  ;;  %v7653_v49 = vpack.c.bf16 %v7644_v18, %v7642_v3  ;;  %v7646_v41 = vld [vmem:[#allocation3 + $0x60] ss:$2 sm:$0xff] }
 0x5ed   : > { %v13111_v54 = vadd.f32 -1.0, %v16616_v15  ;;  %v7500_v48 = vmin.f32 %v18743_v46, 0.0  ;;  %v18753_v5 = vadd.f32 %v14966_v22, %v18597_v4  ;;  %v7371_v63 = vpop.f32.mrb[87].mxu1  ;;  %v16618_v27 = vpop.eup %16617  ;;  %14992 = vmatpush3.bf16.msra.mxu0 %v15891_v14  ;;  %vm7472_vm14 = vcmp.gt.f32.partialorder %v18743_v46, 0.0  ;;  %v15893_v14 = vld [vmem:[%s19962_s5 + $0x40] sm:$0xff]   ;;  %v15895_v15 = vld [vmem:[%s19962_s5 + $0x50] sm:$0xff]  }
 0x5ee   : > { %v7604_v10 = vsel %vm7464_vm6, %v18675_v59, %v13113_v21  ;;  %v7498_v31 = vmin.f32 %v18748_v16, 0.0  ;;  %v13114_v37 = vadd.f32 -1.0, %v16618_v27  ;;  %14993 = vmatprep.subr.bf16.mxu0 %v18514_v61  ;;  %v16620_v55 = vpop.eup %16619  ;;  %v7443_v11 = vadd.f32 %v18597_v4, %v7371_v63  ;;  %v15896_v8 = vld [vmem:[%s19962_s5 + $0x58] sm:$0xff]   ;;  %v15897_v63 = vld [vmem:[%s19962_s5 + $0x60] sm:$0xff]  }
 0x5ef   : > { %7632 = vst.msk [vmem:[#allocation3 + $0xd8] sm:$0xff] %vm366_vm3, %v7604_v10  ;;  %v7602_v28 = vsel %vm7462_vm7, %v18678_v24, %v13111_v54  ;;  %v7554_v40 = vmul.f32 1.442695, %v7500_v48  ;;  %v7501_v23 = vmin.f32 %v18753_v5, 0.0  ;;  %v13112_v36 = vadd.f32 -1.0, %v16620_v55  ;;  %v15898_v10 = vld [vmem:[%s19962_s5 + $0x68] sm:$0xff]  }
 0x5f0   : > { %7630 = vst.msk [vmem:[#allocation3 + $0xc0] sm:$0xff] %vm366_vm3, %v7602_v28  ;;  %v7550_v59 = vmul.f32 1.442695, %v7498_v31  ;;  %v7605_v52 = vsel %vm7465_vm8, %v18683_v29, %v13114_v37  ;;  %v7499_v51 = vmin.f32 %v7443_v11, 0.0  ;;  %vm7470_vm0 = vcmp.gt.f32.partialorder %v18748_v16, 0.0  ;;  %v15899_v28 = vld [vmem:[%s19962_s5 + $0x70] sm:$0xff]  }
 0x5f1   : > { %16629 = vpow2.f32 %v7554_v40  ;;  %7633 = vst.msk [vmem:[#allocation3 + $0xe0] sm:$0xff] %vm366_vm3, %v7605_v52  ;;  %v7556_v24 = vmul.f32 1.442695, %v7501_v23  ;;  %14994 = vmatpush3.bf16.msra.mxu0 %v15892_v60  ;;  %v7603_v53 = vsel %vm7463_vm9, %v18694_v38, %v13112_v36  ;;  %v7671_v30 = vld [vmem:[#allocation3 + $0x91] ss:$2 sm:$0xff]  ;;  %vm7473_vm15 = vcmp.gt.f32.partialorder %v18753_v5, 0.0 }
 0x5f2   : > { %16631 = vpow2.f32 %v7550_v59  ;;  %15007 = vmatprep.subr.bf16.mxu0 %v18514_v61  ;;  %7631 = vst.msk [vmem:[#allocation3 + $0xc8] sm:$0xff] %vm366_vm3, %v7603_v53  ;;  %v7552_v29 = vmul.f32 1.442695, %v7499_v51  ;;  %v7677_v56 = vpack.c.bf16 %v7671_v30, %v7669_v1  ;;  %vm7471_vm2 = vcmp.gt.f32.partialorder %v7443_v11, 0.0  ;;  %v7871_v48 = vld [vmem:[#allocation3 + $0x32] ss:$2 sm:$0xff] }
 0x5f3   : > { %v16622_v44 = vpop.eup %16621  ;;  %16633 = vpow2.f32 %v7556_v24  ;;  %v7875_v31 = vld [vmem:[#allocation3 + $0x92] ss:$2 sm:$0xff]  ;;  %v7873_v60 = vld [vmem:[#allocation3 + $0x62] ss:$2 sm:$0xff]  ;;  %v7991_v52 = vld [vmem:[#allocation3 + $0x33] ss:$2 sm:$0xff] }
 0x5f4   : > { %v13117_v4 = vadd.f32 -1.0, %v16622_v44  ;;  %v16624_v32 = vpop.eup %16623  ;;  %16635 = vpow2.f32 %v7552_v29  ;;  %14980 = vmatmul.mubr.msk.bf16.gmra.mrb[68].mxu0 %vm366_vm3, %v7677_v56  ;;  %v7881_v37 = vpack.c.bf16 %v7875_v31, %v7873_v60  ;;  %v15900_v40 = vld [vmem:[%s19962_s5 + $0x78] sm:$0xff]   ;;  %v15901_v24 = vld [vmem:[%s19962_s5 + $0x80] sm:$0xff]   ;;  %v15902_v51 = vld [vmem:[%s19962_s5 + $0x88] sm:$0xff]  }
 0x5f5   : > { %v16626_v25 = vpop.eup %16625  ;;  %v13115_v17 = vadd.f32 -1.0, %v16624_v32  ;;  %14983 = vmatprep.mubr.msk.bf16.mxu0 %vm16671_vm1, %v18514_v61  ;;  %v7989_v36 = vld [vmem:[#allocation3 + $0x3] ss:$2 sm:$0xff]  ;;  %v7995_v44 = vld [vmem:[#allocation3 + $0x93] ss:$2 sm:$0xff] }
 0x5f6   : > { %v7608_v39 = vsel %vm7468_vm10, %v18705_v9, %v13117_v4  ;;  %v13118_v38 = vadd.f32 -1.0, %v16626_v25  ;;  %v16628_v47 = vpop.eup %16627  ;;  %v7993_v53 = vld [vmem:[#allocation3 + $0x63] ss:$2 sm:$0xff]  ;;  %v15903_v1 = vld [vmem:[%s19962_s5 + $0x90] sm:$0xff]   ;;  %v8111_v25 = vld [vmem:[#allocation3 + $0x48] ss:$2 sm:$0xff] }
 0x5f7   : > { %7636 = vst.msk [vmem:[#allocation3 + $0x108] sm:$0xff] %vm366_vm3, %v7608_v39  ;;  %v7606_v43 = vsel %vm7466_vm11, %v18709_v20, %v13115_v17  ;;  %v13116_v45 = vadd.f32 -1.0, %v16628_v47  ;;  %v8001_v30 = vpack.c.bf16 %v7995_v44, %v7993_v53  ;;  %v15904_v4 = vld [vmem:[%s19962_s5 + $0x98] sm:$0xff]   ;;  %v15905_v17 = vld [vmem:[%s19962_s5 + $0xa0] sm:$0xff]   ;;  %v15906_v47 = vld [vmem:[%s19962_s5 + $0xa8] sm:$0xff]  }
 0x5f8   : > { %7634 = vst.msk [vmem:[#allocation3 + $0xf0] sm:$0xff] %vm366_vm3, %v7606_v43  ;;  %v7609_v9 = vsel %vm7469_vm12, %v18714_v26, %v13118_v38  ;;  %v8109_v39 = vld [vmem:[#allocation3 + $0x18] ss:$2 sm:$0xff]  ;;  %v8115_v43 = vld [vmem:[#allocation3 + $0xa8] ss:$2 sm:$0xff] }
 0x5f9   : > { %7637 = vst.msk [vmem:[#allocation3 + $0x110] sm:$0xff] %vm366_vm3, %v7609_v9  ;;  %v7607_v13 = vsel %vm7467_vm13, %v18731_v2, %v13116_v45  ;;  %v7673_v12 = vld [vmem:[#allocation3 + $0xc1] ss:$2 sm:$0xff]  ;;  %v7650_v22 = vld [vmem:[#allocation3 + $0xc0] ss:$2 sm:$0xff]  ;;  %v8120_v38 = vpack.c.bf16 %v8111_v25, %v8109_v39  ;;  %v15907_v45 = vld [vmem:[%s19962_s5 + $0xb0] sm:$0xff]  }
 0x5fa   : > { %7635 = vst.msk [vmem:[#allocation3 + $0xf8] sm:$0xff] %vm366_vm3, %v7607_v13  ;;  %v7877_v59 = vld [vmem:[#allocation3 + $0xc2] ss:$2 sm:$0xff]  ;;  %v7997_v56 = vld [vmem:[#allocation3 + $0xc3] ss:$2 sm:$0xff]  ;;  %v15923_v25 = vld [vmem:[%s19962_s5 + $0x130] sm:$0xff]  }
 0x5fb   : > { %v16630_v50 = vpop.eup %16629  ;;  %v8113_v9 = vld [vmem:[#allocation3 + $0x78] ss:$2 sm:$0xff]  ;;  %v8237_v18 = vld [vmem:[#allocation3 + $0xd9] ss:$2 sm:$0xff]  ;;  %v15918_v60 = vld [vmem:[%s19962_s5 + $0x108] sm:$0xff]  }
 0x5fc   : > { %v16632_v0 = vpop.eup %16631  ;;  %v13121_v62 = vadd.f32 -1.0, %v16630_v50  ;;  %v8121_v50 = vpack.c.bf16 %v8115_v43, %v8113_v9  ;;  %v15908_v13 = vld [vmem:[%s19962_s5 + $0xb8] sm:$0xff]   ;;  %v15922_v53 = vld [vmem:[%s19962_s5 + $0x128] sm:$0xff]  }
 0x5fd   : > { %v13119_v20 = vadd.f32 -1.0, %v16632_v0  ;;  %v16634_v58 = vpop.eup %16633 }
 0x5fe   : > { %v7612_v35 = vsel %vm7472_vm14, %v18743_v46, %v13121_v62  ;;  %v13122_v33 = vadd.f32 -1.0, %v16634_v58  ;;  %v16636_v19 = vpop.eup %16635  ;;  %v7648_v46 = vld [vmem:[#allocation3 + $0x90] ss:$2 sm:$0xff]  ;;  %v8231_v58 = vld [vmem:[#allocation3 + $0x49] ss:$2 sm:$0xff] }
 0x5ff   : > { %7640 = vst.msk [vmem:[#allocation3 + $0x138] sm:$0xff] %vm366_vm3, %v7612_v35  ;;  %v7610_v26 = vsel %vm7470_vm0, %v18748_v16, %v13119_v20  ;;  %v13120_v2 = vadd.f32 -1.0, %v16636_v19  ;;  %v7654_v21 = vpack.c.bf16 %v7648_v46, %v7646_v41  ;;  %v8117_v62 = vld [vmem:[#allocation3 + $0xd8] ss:$2 sm:$0xff]  ;;  %v8229_v35 = vld [vmem:[#allocation3 + $0x19] ss:$2 sm:$0xff] }
 0x600   : > { %7638 = vst.msk [vmem:[#allocation3 + $0x120] sm:$0xff] %vm366_vm3, %v7610_v26  ;;  %v7613_v6 = vsel %vm7473_vm15, %v18753_v5, %v13122_v33  ;;  %v7869_v5 = vld [vmem:[#allocation3 + $0x2] ss:$2 sm:$0xff]  ;;  %v8240_v33 = vpack.c.bf16 %v8231_v58, %v8229_v35 }
 0x601   : > { %7641 = vst.msk [vmem:[#allocation3 + $0x140] sm:$0xff] %vm366_vm3, %v7613_v6  ;;  %v7611_v34 = vsel %vm7471_vm2, %v7443_v11, %v13120_v2  ;;  %v7675_v7 = vld [vmem:[#allocation3 + $0xf1] ss:$2 sm:$0xff]  ;;  %v7652_v16 = vld [vmem:[#allocation3 + $0xf0] ss:$2 sm:$0xff]  ;;  %v7880_v27 = vpack.c.bf16 %v7871_v48, %v7869_v5  ;;  %v15909_v26 = vld [vmem:[%s19962_s5 + $0xc0] sm:$0xff]  }
 0x602   : > { %7639 = vst.msk [vmem:[#allocation3 + $0x128] sm:$0xff] %vm366_vm3, %v7611_v34  ;;  %v7678_v57 = vpack.c.bf16 %v7675_v7, %v7673_v12  ;;  %v7655_v54 = vpack.c.bf16 %v7652_v16, %v7650_v22  ;;  %v7879_v55 = vld [vmem:[#allocation3 + $0xf2] ss:$2 sm:$0xff]  ;;  %v7999_v29 = vld [vmem:[#allocation3 + $0xf3] ss:$2 sm:$0xff] }
 0x603   : > { %v7882_v23 = vpack.c.bf16 %v7879_v55, %v7877_v59  ;;  %v18848_v11 = vld [vmem:[#allocation4 + $0x8] sm:$0xff]  ;;  %v8002_v32 = vpack.c.bf16 %v7999_v29, %v7997_v56  ;;  %v8119_v0 = vld [vmem:[#allocation3 + $0x108] ss:$2 sm:$0xff]  ;;  %v8235_v6 = vld [vmem:[#allocation3 + $0xa9] ss:$2 sm:$0xff] }
 0x604   : > { %14984 = vmatmul.mubr.msk.bf16.gmra.mrb[72].mxu0 %vm366_vm3, %v7678_v57  ;;  %v8122_v20 = vpack.c.bf16 %v8119_v0, %v8117_v62  ;;  %v15910_v19 = vld [vmem:[%s19962_s5 + $0xc8] sm:$0xff]   ;;  %v8233_v2 = vld [vmem:[#allocation3 + $0x79] ss:$2 sm:$0xff]  ;;  %v8357_v48 = vld [vmem:[#allocation3 + $0xda] ss:$2 sm:$0xff] }
 0x605   : > { %14995 = vmatprep.mubr.msk.bf16.mxu0 %vm16671_vm1, %v18514_v61  ;;  %v15911_v34 = vld [vmem:[%s19962_s5 + $0xd0] sm:$0xff]   ;;  %v8241_v12 = vpack.c.bf16 %v8235_v6, %v8233_v2  ;;  %v15912_v7 = vld [vmem:[%s19962_s5 + $0xd8] sm:$0xff]   ;;  %v8239_v57 = vld [vmem:[#allocation3 + $0x109] ss:$2 sm:$0xff] }
 0x606   : > { %v8242_v3 = vpack.c.bf16 %v8239_v57, %v8237_v18  ;;  %v15914_v41 = vld [vmem:[%s19962_s5 + $0xe8] sm:$0xff]   ;;  %v15916_v22 = vld [vmem:[%s19962_s5 + $0xf8] sm:$0xff]   ;;  %v15925_v62 = vld [vmem:[%s19962_s5 + $0x140] sm:$0xff]  }
 0x607   : > { %v15920_v59 = vld [vmem:[%s19962_s5 + $0x118] sm:$0xff]   ;;  %v8709_v0 = vld [vmem:[#allocation3 + $0x31] ss:$2 sm:$0xff] }
 0x608   : > { %v15926_v35 = vld [vmem:[%s19962_s5 + $0x148] sm:$0xff]   ;;  %v15928_v2 = vld [vmem:[%s19962_s5 + $0x158] sm:$0xff]  }
 0x609   : > { %v8717_v18 = vld [vmem:[#allocation3 + $0xf1] ss:$2 sm:$0xff] }
 0x60c   : > { %14996 = vmatmul.mubr.msk.bf16.vlgmr.msra.gmra.mrb[76].mxu0 %vm366_vm3, %v7653_v49  ;;  %v8349_v49 = vld [vmem:[#allocation3 + $0x1a] ss:$2 sm:$0xff] }
 0x60d   : > { %15008 = vmatpush3.bf16.msra.mxu0 %v15893_v14  ;;  %14999 = vmatprep.mubr.msk.bf16.mxu0 %vm16671_vm1, %v18514_v61  ;;  %v8351_v14 = vld [vmem:[#allocation3 + $0x4a] ss:$2 sm:$0xff] }
 0x60e   : > { %15009 = vmatprep.subr.bf16.mxu0 %v18514_v61  ;;  %v8360_v46 = vpack.c.bf16 %v8351_v14, %v8349_v49 }
 0x611   : > { %15010 = vmatpush3.bf16.msra.mxu0 %v15894_v42  ;;  %v15913_v42 = vld [vmem:[%s19962_s5 + $0xe0] sm:$0xff]  }
 0x612   : > { %15011 = vmatprep.subr.bf16.mxu0 %v18514_v61 }
 0x614   : > { %15000 = vmatmul.mubr.msk.bf16.gmra.mrb[80].mxu0 %vm366_vm3, %v7654_v21  ;;  %v8353_v21 = vld [vmem:[#allocation3 + $0x7a] ss:$2 sm:$0xff] }
 0x615   : > { %15012 = vmatpush3.bf16.msra.mxu0 %v15895_v15  ;;  %15003 = vmatprep.mubr.msk.bf16.mxu0 %vm16671_vm1, %v18514_v61  ;;  %v8355_v15 = vld [vmem:[#allocation3 + $0xaa] ss:$2 sm:$0xff] }
 0x616   : > { %15013 = vmatprep.subr.bf16.mxu0 %v18514_v61  ;;  %v8361_v16 = vpack.c.bf16 %v8355_v15, %v8353_v21  ;;  %v8829_v21 = vld [vmem:[#allocation3 + $0x32] ss:$2 sm:$0xff] }
 0x619   : > { %15014 = vmatpush3.bf16.msra.mxu0 %v15896_v8  ;;  %v15915_v8 = vld [vmem:[%s19962_s5 + $0xf0] sm:$0xff]  }
 0x61a   : > { %15027 = vmatprep.subr.bf16.mxu0 %v18514_v61 }
 0x61c   : > { %15004 = vmatmul.mubr.msk.bf16.gmra.mrb[84].mxu0 %vm366_vm3, %v7655_v54  ;;  %v8359_v54 = vld [vmem:[#allocation3 + $0x10a] ss:$2 sm:$0xff] }
 0x61d   : > { %15015 = vmatprep.mubr.msk.bf16.mxu0 %vm16671_vm1, %v18514_v61  ;;  %v8362_v5 = vpack.c.bf16 %v8359_v54, %v8357_v48  ;;  %v15930_v48 = vld [vmem:[%s19962_s5 + $0x168] sm:$0xff]  }
 0x624   : > { %15016 = vmatmul.mubr.msk.bf16.vlgmr.msra.gmra.mrb[88].mxu0 %vm366_vm3, %v7880_v27  ;;  %v8469_v27 = vld [vmem:[#allocation3 + $0x1b] ss:$2 sm:$0xff] }
 0x625   : > { %15028 = vmatpush3.bf16.msra.mxu0 %v15897_v63  ;;  %15019 = vmatprep.mubr.msk.bf16.mxu0 %vm16671_vm1, %v18514_v61  ;;  %v8471_v63 = vld [vmem:[#allocation3 + $0x4b] ss:$2 sm:$0xff] }
 0x626   : > { %15029 = vmatprep.subr.bf16.mxu0 %v18514_v61  ;;  %v8480_v31 = vpack.c.bf16 %v8471_v63, %v8469_v27  ;;  %v8835_v63 = vld [vmem:[#allocation3 + $0xc2] ss:$2 sm:$0xff] }
 0x629   : > { %15030 = vmatpush3.bf16.msra.mxu0 %v15898_v10  ;;  %v15917_v10 = vld [vmem:[%s19962_s5 + $0x100] sm:$0xff]  }
 0x62a   : > { %15031 = vmatprep.subr.bf16.mxu0 %v18514_v61 }
 0x62c   : > { %15020 = vmatmul.mubr.msk.bf16.gmra.mrb[92].mxu0 %vm366_vm3, %v7881_v37  ;;  %v8473_v37 = vld [vmem:[#allocation3 + $0x7b] ss:$2 sm:$0xff] }
 0x62d   : > { %15032 = vmatpush3.bf16.msra.mxu0 %v15899_v28  ;;  %15023 = vmatprep.mubr.msk.bf16.mxu0 %vm16671_vm1, %v18514_v61  ;;  %v8475_v28 = vld [vmem:[#allocation3 + $0xab] ss:$2 sm:$0xff] }
 0x62e   : > { %15033 = vmatprep.subr.bf16.mxu0 %v18514_v61  ;;  %v8000_v61 = vpack.c.bf16 %v7991_v52, %v7989_v36  ;;  %v8481_v55 = vpack.c.bf16 %v8475_v28, %v8473_v37  ;;  %v8477_v52 = vld [vmem:[#allocation3 + $0xdb] ss:$2 sm:$0xff] }
 0x62f   : > { %v15931_v28 = vld [vmem:[%s19962_s5 + $0x170] sm:$0xff]  }
 0x631   : > { %15034 = vmatpush3.bf16.msra.mxu0 %v15900_v40  ;;  %v15919_v40 = vld [vmem:[%s19962_s5 + $0x110] sm:$0xff]  }
 0x632   : > { %15047 = vmatprep.subr.bf16.mxu0 %v18848_v11 }
 0x634   : > { %15024 = vmatmul.mubr.msk.bf16.gmra.mrb[96].mxu0 %vm366_vm3, %v7882_v23  ;;  %v8479_v23 = vld [vmem:[#allocation3 + $0x10b] ss:$2 sm:$0xff] }
 0x635   : > { %15035 = vmatprep.mubr.msk.bf16.mxu0 %vm16671_vm1, %v18848_v11  ;;  %v8482_v36 = vpack.c.bf16 %v8479_v23, %v8477_v52  ;;  %v8839_v52 = vld [vmem:[#allocation3 + $0x122] ss:$2 sm:$0xff] }
 0x63c   : > { %15036 = vmatmul.mubr.msk.bf16.vlgmr.msra.gmra.mrb[100].mxu0 %vm366_vm3, %v8000_v61  ;;  %v8589_v61 = vld [vmem:[#allocation3 + $0x30] ss:$2 sm:$0xff] }
 0x63d   : > { %15048 = vmatpush3.bf16.msra.mxu0 %v15901_v24  ;;  %15039 = vmatprep.mubr.msk.bf16.mxu0 %vm16671_vm1, %v18848_v11  ;;  %v8591_v24 = vld [vmem:[#allocation3 + $0x60] ss:$2 sm:$0xff] }
 0x63e   : > { %15049 = vmatprep.subr.bf16.mxu0 %v18848_v11  ;;  %v8600_v44 = vpack.c.bf16 %v8591_v24, %v8589_v61 }
 0x641   : > { %15050 = vmatpush3.bf16.msra.mxu0 %v15902_v51  ;;  %v15921_v51 = vld [vmem:[%s19962_s5 + $0x120] sm:$0xff]  }
 0x642   : > { %15051 = vmatprep.subr.bf16.mxu0 %v18848_v11 }
 0x644   : > { %15040 = vmatmul.mubr.msk.bf16.gmra.mrb[104].mxu0 %vm366_vm3, %v8001_v30 }
 0x645   : > { %15052 = vmatpush3.bf16.msra.mxu0 %v15903_v1  ;;  %15043 = vmatprep.mubr.msk.bf16.mxu0 %vm16671_vm1, %v18848_v11 }
 0x646   : > { %15053 = vmatprep.subr.bf16.mxu0 %v18848_v11 }
 0x649   : > { %15054 = vmatpush3.bf16.msra.mxu0 %v15904_v4  ;;  %v8595_v4 = vld [vmem:[#allocation3 + $0xc0] ss:$2 sm:$0xff] }
 0x64a   : > { %15067 = vmatprep.subr.bf16.mxu0 %v18848_v11 }
 0x64c   : > { %15044 = vmatmul.mubr.msk.bf16.gmra.mrb[108].mxu0 %vm366_vm3, %v8002_v32  ;;  %v8593_v32 = vld [vmem:[#allocation3 + $0x90] ss:$2 sm:$0xff] }
 0x64d   : > { %15055 = vmatprep.mubr.msk.bf16.mxu0 %vm16671_vm1, %v18848_v11  ;;  %v8601_v39 = vpack.c.bf16 %v8595_v4, %v8593_v32  ;;  %v8951_v4 = vld [vmem:[#allocation3 + $0x63] ss:$2 sm:$0xff] }
 0x654   : > { %15056 = vmatmul.mubr.msk.bf16.vlgmr.msra.gmra.mrb[112].mxu0 %vm366_vm3, %v8120_v38  ;;  %v8599_v38 = vld [vmem:[#allocation3 + $0x120] ss:$2 sm:$0xff] }
 0x655   : > { %15068 = vmatpush3.bf16.msra.mxu0 %v15905_v17  ;;  %15059 = vmatprep.mubr.msk.bf16.mxu0 %vm16671_vm1, %v18848_v11  ;;  %v15924_v17 = vld [vmem:[%s19962_s5 + $0x138] sm:$0xff]  }
 0x656   : > { %15069 = vmatprep.subr.bf16.mxu0 %v18848_v11 }
 0x659   : > { %15070 = vmatpush3.bf16.msra.mxu0 %v15906_v47  ;;  %v8597_v47 = vld [vmem:[#allocation3 + $0xf0] ss:$2 sm:$0xff] }
 0x65a   : > { %15071 = vmatprep.subr.bf16.mxu0 %v18848_v11  ;;  %v8602_v43 = vpack.c.bf16 %v8599_v38, %v8597_v47 }
 0x65c   : > { %15060 = vmatmul.mubr.msk.bf16.gmra.mrb[116].mxu0 %vm366_vm3, %v8121_v50 }
 0x65d   : > { %15072 = vmatpush3.bf16.msra.mxu0 %v15907_v45  ;;  %15063 = vmatprep.mubr.msk.bf16.mxu0 %vm16671_vm1, %v18848_v11  ;;  %v8711_v45 = vld [vmem:[#allocation3 + $0x61] ss:$2 sm:$0xff] }
 0x65e   : > { %15073 = vmatprep.subr.bf16.mxu0 %v18848_v11  ;;  %v8720_v58 = vpack.c.bf16 %v8711_v45, %v8709_v0  ;;  %v8955_v45 = vld [vmem:[#allocation3 + $0xc3] ss:$2 sm:$0xff] }
 0x661   : > { %15074 = vmatpush3.bf16.msra.mxu0 %v15908_v13 }
 0x662   : > { %15087 = vmatprep.subr.bf16.mxu0 %v18848_v11 }
 0x664   : > { %15064 = vmatmul.mubr.msk.bf16.gmra.mrb[120].mxu0 %vm366_vm3, %v8122_v20 }
 0x665   : > { %15075 = vmatprep.mubr.msk.bf16.mxu0 %vm16671_vm1, %v18848_v11 }
 0x66c   : > { %15076 = vmatmul.mubr.msk.bf16.vlgmr.msra.gmra.mrb[124].mxu0 %vm366_vm3, %v8240_v33  ;;  %v8713_v33 = vld [vmem:[#allocation3 + $0x91] ss:$2 sm:$0xff] }
 0x66d   : > { %15088 = vmatpush3.bf16.msra.mxu0 %v15909_v26  ;;  %15079 = vmatprep.mubr.msk.bf16.mxu0 %vm16671_vm1, %v18848_v11  ;;  %v8715_v26 = vld [vmem:[#allocation3 + $0xc1] ss:$2 sm:$0xff] }
 0x66e   : > { %15089 = vmatprep.subr.bf16.mxu0 %v18848_v11  ;;  %v8721_v6 = vpack.c.bf16 %v8715_v26, %v8713_v33  ;;  %v15936_v33 = vld [vmem:[%s19962_s5 + $0x198] sm:$0xff]  }
 0x671   : > { %15090 = vmatpush3.bf16.msra.mxu0 %v15910_v19  ;;  %v15927_v19 = vld [vmem:[%s19962_s5 + $0x150] sm:$0xff]  }
 0x672   : > { %15091 = vmatprep.subr.bf16.mxu0 %v18848_v11 }
 0x674   : > { %15080 = vmatmul.mubr.msk.bf16.gmra.mrb[128].mxu0 %vm366_vm3, %v8241_v12  ;;  %v8719_v12 = vld [vmem:[#allocation3 + $0x121] ss:$2 sm:$0xff] }
 0x675   : > { %15092 = vmatpush3.bf16.msra.mxu0 %v15911_v34  ;;  %15083 = vmatprep.mubr.msk.bf16.mxu0 %vm16671_vm1, %v18848_v11  ;;  %v8722_v14 = vpack.c.bf16 %v8719_v12, %v8717_v18 }
 0x676   : > { %15093 = vmatprep.subr.bf16.mxu0 %v18848_v11 }
 0x679   : > { %15094 = vmatpush3.bf16.msra.mxu0 %v15912_v7 }
 0x67a   : > { %15107 = vmatprep.subr.bf16.mxu0 %v18848_v11 }
 0x67c   : > { %15084 = vmatmul.mubr.msk.bf16.gmra.mrb[132].mxu0 %vm366_vm3, %v8242_v3 }
 0x67d   : > { %15095 = vmatprep.mubr.msk.bf16.mxu0 %vm16671_vm1, %v18848_v11 }
 0x684   : > { %15096 = vmatmul.mubr.msk.bf16.vlgmr.msra.gmra.mrb[136].mxu0 %vm366_vm3, %v8360_v46 }
 0x685   : > { %15108 = vmatpush3.bf16.msra.mxu0 %v15913_v42  ;;  %15099 = vmatprep.mubr.msk.bf16.mxu0 %vm16671_vm1, %v18848_v11  ;;  %v8831_v42 = vld [vmem:[#allocation3 + $0x62] ss:$2 sm:$0xff] }
 0x686   : > { %15109 = vmatprep.subr.bf16.mxu0 %v18848_v11  ;;  %v8840_v54 = vpack.c.bf16 %v8831_v42, %v8829_v21  ;;  %v15937_v21 = vld [vmem:[%s19962_s5 + $0x1a0] sm:$0xff]  }
 0x689   : > { %15110 = vmatpush3.bf16.msra.mxu0 %v15914_v41 }
 0x68a   : > { %15111 = vmatprep.subr.bf16.mxu0 %v18848_v11 }
 0x68c   : > { %15100 = vmatmul.mubr.msk.bf16.gmra.mrb[140].mxu0 %vm366_vm3, %v8361_v16 }
 0x68d   : > { %15112 = vmatpush3.bf16.msra.mxu0 %v15915_v8  ;;  %15103 = vmatprep.mubr.msk.bf16.mxu0 %vm16671_vm1, %v18848_v11  ;;  %v15929_v8 = vld [vmem:[%s19962_s5 + $0x160] sm:$0xff]  }
 0x68e   : > { %15113 = vmatprep.subr.bf16.mxu0 %v18848_v11 }
 0x691   : > { %15114 = vmatpush3.bf16.msra.mxu0 %v15916_v22 }
 0x692   : > { %15127 = vmatprep.subr.bf16.mxu0 %v18848_v11 }
 0x694   : > { %15104 = vmatmul.mubr.msk.bf16.gmra.mrb[144].mxu0 %vm366_vm3, %v8362_v5 }
 0x695   : > { %15115 = vmatprep.mubr.msk.bf16.mxu0 %vm16671_vm1, %v18848_v11 }
 0x69c   : > { %15116 = vmatmul.mubr.msk.bf16.vlgmr.msra.gmra.mrb[148].mxu0 %vm366_vm3, %v8480_v31 }
 0x69d   : > { %15128 = vmatpush3.bf16.msra.mxu0 %v15917_v10  ;;  %15119 = vmatprep.mubr.msk.bf16.mxu0 %vm16671_vm1, %v18848_v11 }
 0x69e   : > { %15129 = vmatprep.subr.bf16.mxu0 %v18848_v11 }
 0x6a1   : > { %15130 = vmatpush3.bf16.msra.mxu0 %v15918_v60  ;;  %v8833_v60 = vld [vmem:[#allocation3 + $0x92] ss:$2 sm:$0xff] }
 0x6a2   : > { %15131 = vmatprep.subr.bf16.mxu0 %v18848_v11 }
 0x6a4   : > { %15120 = vmatmul.mubr.msk.bf16.gmra.mrb[152].mxu0 %vm366_vm3, %v8481_v55  ;;  %v8841_v55 = vpack.c.bf16 %v8835_v63, %v8833_v60  ;;  %v15939_v60 = vld [vmem:[%s19962_s5 + $0x1b0] sm:$0xff]  }
 0x6a5   : > { %15132 = vmatpush3.bf16.msra.mxu0 %v15919_v40  ;;  %15123 = vmatprep.mubr.msk.bf16.mxu0 %vm16671_vm1, %v18848_v11 }
 0x6a6   : > { %15133 = vmatprep.subr.bf16.mxu0 %v18848_v11 }
 0x6a9   : > { %15134 = vmatpush3.bf16.msra.mxu0 %v15920_v59  ;;  %v15932_v59 = vld [vmem:[%s19962_s5 + $0x178] sm:$0xff]  }
 0x6aa   : > { %15147 = vmatprep.subr.bf16.mxu0 %v18848_v11 }
 0x6ac   : > { %15124 = vmatmul.mubr.msk.bf16.gmra.mrb[156].mxu0 %vm366_vm3, %v8482_v36 }
 0x6ad   : > { %15135 = vmatprep.mubr.msk.bf16.mxu0 %vm16671_vm1, %v18848_v11 }
 0x6b4   : > { %15136 = vmatmul.mubr.msk.bf16.vlgmr.msra.gmra.mrb[160].mxu0 %vm366_vm3, %v8600_v44 }
 0x6b5   : > { %15148 = vmatpush3.bf16.msra.mxu0 %v15921_v51  ;;  %15139 = vmatprep.mubr.msk.bf16.mxu0 %vm16671_vm1, %v18848_v11  ;;  %v8837_v51 = vld [vmem:[#allocation3 + $0xf2] ss:$2 sm:$0xff] }
 0x6b6   : > { %15149 = vmatprep.subr.bf16.mxu0 %v18848_v11 }
 0x6b7   : > { %v7755_v1 = vpop.f32.mrb[64].mxu0 }
 0x6b8   : > { %v14977_v30 = vpop.f32.mrb[65].mxu0 }
 0x6b9   : > { %v7758_v29 = vpop.f32.mrb[66].mxu0  ;;  %15150 = vmatpush3.bf16.msra.mxu0 %v15922_v53 }
 0x6ba   : > { %v14978_v56 = vpop.f32.mrb[67].mxu0  ;;  %15151 = vmatprep.subr.bf16.mxu0 %v18848_v11 }
 0x6bc   : > { %15140 = vmatmul.mubr.msk.bf16.gmra.mrb[164].mxu0 %vm366_vm3, %v8601_v39  ;;  %v15933_v39 = vld [vmem:[%s19962_s5 + $0x180] sm:$0xff]  }
 0x6bd   : > { %15152 = vmatpush3.bf16.msra.mxu0 %v15923_v25  ;;  %15143 = vmatprep.mubr.msk.bf16.mxu0 %vm16671_vm1, %v18848_v11  ;;  %v8949_v25 = vld [vmem:[#allocation3 + $0x33] ss:$2 sm:$0xff] }
 0x6be   : > { %15153 = vmatprep.subr.bf16.mxu0 %v18848_v11  ;;  %v8960_v47 = vpack.c.bf16 %v8951_v4, %v8949_v25  ;;  %v15941_v25 = vld [vmem:[%s19962_s5 + $0x1c0] sm:$0xff]  }
 0x6c1   : > { %15154 = vmatpush3.bf16.msra.mxu0 %v15924_v17 }
 0x6c2   : > { %15167 = vmatprep.subr.bf16.mxu0 %v18848_v11 }
 0x6c4   : > { %15144 = vmatmul.mubr.msk.bf16.gmra.mrb[168].mxu0 %vm366_vm3, %v8602_v43  ;;  %v15934_v43 = vld [vmem:[%s19962_s5 + $0x188] sm:$0xff]  }
 0x6c5   : > { %15155 = vmatprep.mubr.msk.bf16.mxu0 %vm16671_vm1, %v18848_v11 }
 0x6c7   : > { %v7763_v9 = vpop.f32.mrb[68].mxu0 }
 0x6c8   : > { %v14981_v50 = vpop.f32.mrb[69].mxu0 }
 0x6c9   : > { %v7766_v13 = vpop.f32.mrb[70].mxu0 }
 0x6ca   : > { %v14982_v20 = vpop.f32.mrb[71].mxu0 }
 0x6cb   : > { %v15935_v20 = vld [vmem:[%s19962_s5 + $0x190] sm:$0xff]  }
 0x6cc   : > { %15156 = vmatmul.mubr.msk.bf16.vlgmr.msra.gmra.mrb[172].mxu0 %vm366_vm3, %v8720_v58 }
 0x6cd   : > { %15168 = vmatpush3.bf16.msra.mxu0 %v15925_v62  ;;  %15159 = vmatprep.mubr.msk.bf16.mxu0 %vm16671_vm1, %v18848_v11  ;;  %v8953_v62 = vld [vmem:[#allocation3 + $0x93] ss:$2 sm:$0xff] }
 0x6ce   : > { %15169 = vmatprep.subr.bf16.mxu0 %v18848_v11  ;;  %v8961_v26 = vpack.c.bf16 %v8955_v45, %v8953_v62  ;;  %v15943_v62 = vld [vmem:[%s19962_s5 + $0x1d0] sm:$0xff]  }
 0x6d1   : > { %15170 = vmatpush3.bf16.msra.mxu0 %v15926_v35 }
 0x6d2   : > { %15171 = vmatprep.subr.bf16.mxu0 %v18848_v11 }
 0x6d4   : > { %15160 = vmatmul.mubr.msk.bf16.gmra.mrb[176].mxu0 %vm366_vm3, %v8721_v6  ;;  %v8959_v6 = vld [vmem:[#allocation3 + $0x123] ss:$2 sm:$0xff] }
 0x6d5   : > { %15172 = vmatpush3.bf16.msra.mxu0 %v15927_v19  ;;  %15163 = vmatprep.mubr.msk.bf16.mxu0 %vm16671_vm1, %v18848_v11 }
 0x6d6   : > { %15173 = vmatprep.subr.bf16.mxu0 %v18848_v11 }
 0x6d7   : > { %v7771_v34 = vpop.f32.mrb[72].mxu0 }
 0x6d8   : > { %v14985_v7 = vpop.f32.mrb[73].mxu0 }
 0x6d9   : > { %v7774_v57 = vpop.f32.mrb[74].mxu0  ;;  %15174 = vmatpush3.bf16.msra.mxu0 %v15928_v2  ;;  %v8957_v7 = vld [vmem:[#allocation3 + $0xf3] ss:$2 sm:$0xff] }
 0x6da   : > { %v14986_v3 = vpop.f32.mrb[75].mxu0  ;;  %15187 = vmatprep.subr.bf16.mxu0 %v18848_v11 }
 0x6db   : > { %v8962_v3 = vpack.c.bf16 %v8959_v6, %v8957_v7 }
 0x6dc   : > { %15164 = vmatmul.mubr.msk.bf16.gmra.mrb[180].mxu0 %vm366_vm3, %v8722_v14 }
 0x6dd   : > { %15175 = vmatprep.mubr.msk.bf16.mxu0 %vm16671_vm1, %v18848_v11 }
 0x6df   : > { %v7845_v49 = vpop.f32.mrb[76].mxu0 }
 0x6e0   : > { %v7846_v46 = vadd.f32 %v7845_v49, %v7755_v1  ;;  %v14997_v41 = vpop.f32.mrb[77].mxu0  ;;  %v8842_v1 = vpack.c.bf16 %v8839_v52, %v8837_v51  ;;  %v9071_v49 = vld [vmem:[#allocation3 + $0x78] ss:$2 sm:$0xff] }
 0x6e1   : > { %v7848_v15 = vpop.f32.mrb[78].mxu0 }
 0x6e2   : > { %v7849_v16 = vadd.f32 %v7848_v15, %v7758_v29  ;;  %v14998_v22 = vpop.f32.mrb[79].mxu0  ;;  %v9069_v15 = vld [vmem:[#allocation3 + $0x48] ss:$2 sm:$0xff] }
 0x6e3   : > { %v9080_v22 = vpack.c.bf16 %v9071_v49, %v9069_v15  ;;  %v15945_v15 = vld [vmem:[%s19962_s5 + $0x1e0] sm:$0xff]  }
 0x6e4   : > { %15176 = vmatmul.mubr.msk.bf16.vlgmr.msra.gmra.mrb[184].mxu0 %vm366_vm3, %v8840_v54  ;;  %v15938_v54 = vld [vmem:[%s19962_s5 + $0x1a8] sm:$0xff]  }
 0x6e5   : > { %15188 = vmatpush3.bf16.msra.mxu0 %v15929_v8  ;;  %15179 = vmatprep.mubr.msk.bf16.mxu0 %vm16671_vm1, %v18848_v11 }
 0x6e6   : > { %15189 = vmatprep.subr.bf16.mxu0 %v18848_v11 }
 0x6e7   : > { %v7853_v5 = vpop.f32.mrb[80].mxu0 }
 0x6e8   : > { %v7854_v27 = vadd.f32 %v7853_v5, %v7763_v9  ;;  %v15001_v10 = vpop.f32.mrb[81].mxu0  ;;  %v9075_v5 = vld [vmem:[#allocation3 + $0xd8] ss:$2 sm:$0xff] }
 0x6e9   : > { %v7856_v31 = vpop.f32.mrb[82].mxu0  ;;  %15190 = vmatpush3.bf16.msra.mxu0 %v15930_v48 }
 0x6ea   : > { %v7857_v37 = vadd.f32 %v7856_v31, %v7766_v13  ;;  %v15002_v40 = vpop.f32.mrb[83].mxu0  ;;  %15191 = vmatprep.subr.bf16.mxu0 %v18848_v11  ;;  %v9073_v31 = vld [vmem:[#allocation3 + $0xa8] ss:$2 sm:$0xff] }
 0x6eb   : > { %v9081_v40 = vpack.c.bf16 %v9075_v5, %v9073_v31  ;;  %v15947_v31 = vld [vmem:[%s19962_s5 + $0x1f0] sm:$0xff]  }
 0x6ec   : > { %15180 = vmatmul.mubr.msk.bf16.gmra.mrb[188].mxu0 %vm366_vm3, %v8841_v55  ;;  %v15940_v55 = vld [vmem:[%s19962_s5 + $0x1b8] sm:$0xff]  }
 0x6ed   : > { %15192 = vmatpush3.bf16.msra.mxu0 %v15931_v28  ;;  %15183 = vmatprep.mubr.msk.bf16.mxu0 %vm16671_vm1, %v18848_v11 }
 0x6ee   : > { %15193 = vmatprep.subr.bf16.mxu0 %v18848_v11 }
 0x6ef   : > { %v7861_v23 = vpop.f32.mrb[84].mxu0 }
 0x6f0   : > { %v7862_v36 = vadd.f32 %v7861_v23, %v7771_v34  ;;  %v15005_v24 = vpop.f32.mrb[85].mxu0  ;;  %v9079_v23 = vld [vmem:[#allocation3 + $0x138] ss:$2 sm:$0xff] }
 0x6f1   : > { %v7864_v61 = vpop.f32.mrb[86].mxu0  ;;  %15194 = vmatpush3.bf16.msra.mxu0 %v15932_v59 }
 0x6f2   : > { %v7865_v44 = vadd.f32 %v7864_v61, %v7774_v57  ;;  %v15006_v53 = vpop.f32.mrb[87].mxu0  ;;  %15207 = vmatprep.subr.bf16.mxu0 %v18848_v11  ;;  %v9077_v61 = vld [vmem:[#allocation3 + $0x108] ss:$2 sm:$0xff] }
 0x6f3   : > { %v9082_v53 = vpack.c.bf16 %v9079_v23, %v9077_v61 }
 0x6f4   : > { %15184 = vmatmul.mubr.msk.bf16.gmra.mrb[192].mxu0 %vm366_vm3, %v8842_v1 }
 0x6f5   : > { %15195 = vmatprep.mubr.msk.bf16.mxu0 %vm16671_vm1, %v18848_v11 }
 0x6f7   : > { %v7959_v30 = vpop.f32.mrb[88].mxu0 }
 0x6f8   : > { %v7982_v29 = vadd.f32 %v7959_v30, %v7846_v46  ;;  %v15017_v56 = vpop.f32.mrb[89].mxu0  ;;  %v9191_v30 = vld [vmem:[#allocation3 + $0x79] ss:$2 sm:$0xff] }
 0x6f9   : > { %v7962_v32 = vpop.f32.mrb[90].mxu0 }
 0x6fa   : > { %v7983_v17 = vadd.f32 %v7962_v32, %v7849_v16  ;;  %v15018_v38 = vpop.f32.mrb[91].mxu0  ;;  %v9189_v32 = vld [vmem:[#allocation3 + $0x49] ss:$2 sm:$0xff] }
 0x6fb   : > { %v9200_v38 = vpack.c.bf16 %v9191_v30, %v9189_v32 }
 0x6fc   : > { %15196 = vmatmul.mubr.msk.bf16.vlgmr.msra.gmra.mrb[196].mxu0 %vm366_vm3, %v8960_v47  ;;  %v15942_v47 = vld [vmem:[%s19962_s5 + $0x1c8] sm:$0xff]  }
 0x6fd   : > { %15208 = vmatpush3.bf16.msra.mxu0 %v15933_v39  ;;  %15199 = vmatprep.mubr.msk.bf16.mxu0 %vm16671_vm1, %v18848_v11 }
 0x6fe   : > { %15209 = vmatprep.subr.bf16.mxu0 %v18848_v11 }
 0x6ff   : > { %v7967_v9 = vpop.f32.mrb[92].mxu0 }
 0x700   : > { %v7984_v50 = vadd.f32 %v7967_v9, %v7854_v27  ;;  %v15021_v13 = vpop.f32.mrb[93].mxu0  ;;  %v9195_v9 = vld [vmem:[#allocation3 + $0xd9] ss:$2 sm:$0xff] }
 0x701   : > { %v7970_v0 = vpop.f32.mrb[94].mxu0  ;;  %15210 = vmatpush3.bf16.msra.mxu0 %v15934_v43 }
 0x702   : > { %v7985_v58 = vadd.f32 %v7970_v0, %v7857_v37  ;;  %v15022_v35 = vpop.f32.mrb[95].mxu0  ;;  %15211 = vmatprep.subr.bf16.mxu0 %v18848_v11  ;;  %v9193_v0 = vld [vmem:[#allocation3 + $0xa9] ss:$2 sm:$0xff] }
 0x703   : > { %v9201_v35 = vpack.c.bf16 %v9195_v9, %v9193_v0 }
 0x704   : > { %15200 = vmatmul.mubr.msk.bf16.gmra.mrb[200].mxu0 %vm366_vm3, %v8961_v26  ;;  %v15944_v26 = vld [vmem:[%s19962_s5 + $0x1d8] sm:$0xff]  }
 0x705   : > { %15212 = vmatpush3.bf16.msra.mxu0 %v15935_v20  ;;  %15203 = vmatprep.mubr.msk.bf16.mxu0 %vm16671_vm1, %v18848_v11 }
 0x706   : > { %15213 = vmatprep.subr.bf16.mxu0 %v18848_v11 }
 0x707   : > { %v7975_v19 = vpop.f32.mrb[96].mxu0 }
 0x708   : > { %v7986_v2 = vadd.f32 %v7975_v19, %v7862_v36  ;;  %v15025_v34 = vpop.f32.mrb[97].mxu0  ;;  %v9199_v19 = vld [vmem:[#allocation3 + $0x139] ss:$2 sm:$0xff] }
 0x709   : > { %v7978_v12 = vpop.f32.mrb[98].mxu0  ;;  %15214 = vmatpush3.bf16.msra.mxu0 %v15936_v33 }
 0x70a   : > { %v7987_v57 = vadd.f32 %v7978_v12, %v7865_v44  ;;  %v15026_v18 = vpop.f32.mrb[99].mxu0  ;;  %15227 = vmatprep.subr.bf16.mxu0 %v18848_v11  ;;  %v9197_v12 = vld [vmem:[#allocation3 + $0x109] ss:$2 sm:$0xff] }
 0x70b   : > { %v9202_v18 = vpack.c.bf16 %v9199_v19, %v9197_v12 }
 0x70c   : > { %15204 = vmatmul.mubr.msk.bf16.gmra.mrb[204].mxu0 %vm366_vm3, %v8962_v3 }
 0x70d   : > { %15215 = vmatprep.mubr.msk.bf16.mxu0 %vm16671_vm1, %v18848_v11 }
 0x70f   : > { %v8079_v14 = vpop.f32.mrb[100].mxu0 }
 0x710   : > { %v8102_v42 = vadd.f32 %v8079_v14, %v7982_v29  ;;  %v15037_v46 = vpop.f32.mrb[101].mxu0  ;;  %v9311_v14 = vld [vmem:[#allocation3 + $0x7a] ss:$2 sm:$0xff] }
 0x711   : > { %v8082_v41 = vpop.f32.mrb[102].mxu0 }
 0x712   : > { %v8103_v8 = vadd.f32 %v8082_v41, %v7983_v17  ;;  %v15038_v16 = vpop.f32.mrb[103].mxu0  ;;  %v9309_v41 = vld [vmem:[#allocation3 + $0x4a] ss:$2 sm:$0xff] }
 0x713   : > { %v9320_v16 = vpack.c.bf16 %v9311_v14, %v9309_v41 }
 0x714   : > { %15216 = vmatmul.mubr.msk.bf16.vlgmr.msra.gmra.mrb[208].mxu0 %vm366_vm3, %v9080_v22  ;;  %v15946_v22 = vld [vmem:[%s19962_s5 + $0x1e8] sm:$0xff]  }
 0x715   : > { %15228 = vmatpush3.bf16.msra.mxu0 %v15937_v21  ;;  %15219 = vmatprep.mubr.msk.bf16.mxu0 %vm16671_vm1, %v18848_v11 }
 0x716   : > { %15229 = vmatprep.subr.bf16.mxu0 %v18848_v11 }
 0x717   : > { %v8087_v48 = vpop.f32.mrb[104].mxu0 }
 0x718   : > { %v8104_v63 = vadd.f32 %v8087_v48, %v7984_v50  ;;  %v15041_v27 = vpop.f32.mrb[105].mxu0  ;;  %v9315_v48 = vld [vmem:[#allocation3 + $0xda] ss:$2 sm:$0xff] }
 0x719   : > { %v8090_v10 = vpop.f32.mrb[106].mxu0  ;;  %15230 = vmatpush3.bf16.msra.mxu0 %v15938_v54 }
 0x71a   : > { %v8105_v28 = vadd.f32 %v8090_v10, %v7985_v58  ;;  %v15042_v37 = vpop.f32.mrb[107].mxu0  ;;  %15231 = vmatprep.subr.bf16.mxu0 %v18848_v11  ;;  %v9313_v10 = vld [vmem:[#allocation3 + $0xaa] ss:$2 sm:$0xff] }
 0x71b   : > { %v9321_v37 = vpack.c.bf16 %v9315_v48, %v9313_v10 }
 0x71c   : > { %15220 = vmatmul.mubr.msk.bf16.gmra.mrb[212].mxu0 %vm366_vm3, %v9081_v40  ;;  %v15948_v40 = vld [vmem:[%s19962_s5 + $0x1f8] sm:$0xff]  }
 0x71d   : > { %15232 = vmatpush3.bf16.msra.mxu0 %v15939_v60  ;;  %15223 = vmatprep.mubr.msk.bf16.mxu0 %vm16671_vm1, %v18848_v11 }
 0x71e   : > { %15233 = vmatprep.subr.bf16.mxu0 %v18848_v11 }
 0x71f   : > { %v8095_v59 = vpop.f32.mrb[108].mxu0 }
 0x720   : > { %v8106_v52 = vadd.f32 %v8095_v59, %v7986_v2  ;;  %v15045_v36 = vpop.f32.mrb[109].mxu0  ;;  %v9319_v59 = vld [vmem:[#allocation3 + $0x13a] ss:$2 sm:$0xff] }
 0x721   : > { %v8098_v24 = vpop.f32.mrb[110].mxu0  ;;  %15234 = vmatpush3.bf16.msra.mxu0 %v15940_v55 }
 0x722   : > { %v8107_v51 = vadd.f32 %v8098_v24, %v7987_v57  ;;  %v15046_v44 = vpop.f32.mrb[111].mxu0  ;;  %15247 = vmatprep.subr.bf16.mxu0 %v18848_v11  ;;  %v9317_v24 = vld [vmem:[#allocation3 + $0x10a] ss:$2 sm:$0xff] }
 0x723   : > { %v9322_v44 = vpack.c.bf16 %v9319_v59, %v9317_v24 }
 0x724   : > { %15224 = vmatmul.mubr.msk.bf16.gmra.mrb[216].mxu0 %vm366_vm3, %v9082_v53 }
 0x725   : > { %15235 = vmatprep.mubr.msk.bf16.mxu0 %vm16671_vm1, %v18848_v11 }
 0x727   : > { %v8199_v1 = vpop.f32.mrb[112].mxu0 }
 0x728   : > { %v8222_v4 = vadd.f32 %v8199_v1, %v8102_v42  ;;  %v15057_v29 = vpop.f32.mrb[113].mxu0  ;;  %v9431_v1 = vld [vmem:[#allocation3 + $0x7b] ss:$2 sm:$0xff] }
 0x729   : > { %v8202_v56 = vpop.f32.mrb[114].mxu0 }
 0x72a   : > { %v8223_v39 = vadd.f32 %v8202_v56, %v8103_v8  ;;  %v15058_v17 = vpop.f32.mrb[115].mxu0  ;;  %v9429_v56 = vld [vmem:[#allocation3 + $0x4b] ss:$2 sm:$0xff] }
 0x72c   : > { %15236 = vmatmul.mubr.msk.bf16.vlgmr.msra.gmra.mrb[220].mxu0 %vm366_vm3, %v9200_v38  ;;  %v9435_v38 = vld [vmem:[#allocation3 + $0xdb] ss:$2 sm:$0xff] }
 0x72d   : > { %15248 = vmatpush3.bf16.msra.mxu0 %v15941_v25  ;;  %15239 = vmatprep.mubr.msk.bf16.mxu0 %vm16671_vm1, %v18848_v11 }
 0x72e   : > { %15249 = vmatprep.subr.bf16.mxu0 %v18848_v11 }
 0x72f   : > { %v8207_v43 = vpop.f32.mrb[116].mxu0 }
 0x730   : > { %v8224_v45 = vadd.f32 %v8207_v43, %v8104_v63  ;;  %v15061_v50 = vpop.f32.mrb[117].mxu0 }
 0x731   : > { %v8210_v13 = vpop.f32.mrb[118].mxu0  ;;  %15250 = vmatpush3.bf16.msra.mxu0 %v15942_v47 }
 0x732   : > { %v8225_v20 = vadd.f32 %v8210_v13, %v8105_v28  ;;  %v15062_v58 = vpop.f32.mrb[119].mxu0  ;;  %15251 = vmatprep.subr.bf16.mxu0 %v18848_v11 }
 0x734   : > { %15240 = vmatmul.mubr.msk.bf16.gmra.mrb[224].mxu0 %vm366_vm3, %v9201_v35 }
 0x735   : > { %15252 = vmatpush3.bf16.msra.mxu0 %v15943_v62  ;;  %15243 = vmatprep.mubr.msk.bf16.mxu0 %vm16671_vm1, %v18848_v11 }
 0x736   : > { %15253 = vmatprep.subr.bf16.mxu0 %v18848_v11 }
 0x737   : > { %v8215_v33 = vpop.f32.mrb[120].mxu0 }
 0x738   : > { %v8226_v6 = vadd.f32 %v8215_v33, %v8106_v52  ;;  %v15065_v2 = vpop.f32.mrb[121].mxu0  ;;  %v9437_v33 = vld [vmem:[#allocation3 + $0x10b] ss:$2 sm:$0xff] }
 0x739   : > { %v8218_v34 = vpop.f32.mrb[122].mxu0  ;;  %15254 = vmatpush3.bf16.msra.mxu0 %v15944_v26 }
 0x73a   : > { %v8227_v7 = vadd.f32 %v8218_v34, %v8107_v51  ;;  %v15066_v57 = vpop.f32.mrb[123].mxu0  ;;  %15267 = vmatprep.subr.bf16.mxu0 %v18848_v11 }
 0x73c   : > { %15244 = vmatmul.mubr.msk.bf16.gmra.mrb[228].mxu0 %vm366_vm3, %v9202_v18 }
 0x73d   : > { %15255 = vmatprep.mubr.msk.bf16.mxu0 %vm16671_vm1, %v18848_v11 }
 0x73f   : > { %v8319_v3 = vpop.f32.mrb[124].mxu0 }
 0x740   : > { %v8342_v49 = vadd.f32 %v8319_v3, %v8222_v4  ;;  %v15077_v42 = vpop.f32.mrb[125].mxu0 }
 0x741   : > { %v8322_v46 = vpop.f32.mrb[126].mxu0 }
 0x742   : > { %v8343_v21 = vadd.f32 %v8322_v46, %v8223_v39  ;;  %v15078_v8 = vpop.f32.mrb[127].mxu0  ;;  %v9440_v39 = vpack.c.bf16 %v9431_v1, %v9429_v56 }
 0x744   : > { %15256 = vmatmul.mubr.msk.bf16.vlgmr.msra.gmra.mrb[232].mxu0 %vm366_vm3, %v9320_v16 }
 0x745   : > { %15268 = vmatpush3.bf16.msra.mxu0 %v15945_v15  ;;  %15259 = vmatprep.mubr.msk.bf16.mxu0 %vm16671_vm1, %v18848_v11 }
 0x746   : > { %15269 = vmatprep.subr.bf16.mxu0 %v18848_v11 }
 0x747   : > { %v8327_v54 = vpop.f32.mrb[128].mxu0 }
 0x748   : > { %v8344_v5 = vadd.f32 %v8327_v54, %v8224_v45  ;;  %v15081_v63 = vpop.f32.mrb[129].mxu0  ;;  %v9433_v45 = vld [vmem:[#allocation3 + $0xab] ss:$2 sm:$0xff] }
 0x749   : > { %v8330_v27 = vpop.f32.mrb[130].mxu0  ;;  %15270 = vmatpush3.bf16.msra.mxu0 %v15946_v22  ;;  %v9441_v0 = vpack.c.bf16 %v9435_v38, %v9433_v45 }
 0x74a   : > { %v8345_v60 = vadd.f32 %v8330_v27, %v8225_v20  ;;  %v15082_v28 = vpop.f32.mrb[131].mxu0  ;;  %15271 = vmatprep.subr.bf16.mxu0 %v18848_v11  ;;  %v9439_v20 = vld [vmem:[#allocation3 + $0x13b] ss:$2 sm:$0xff] }
 0x74b   : > { %v9442_v2 = vpack.c.bf16 %v9439_v20, %v9437_v33 }
 0x74c   : > { %15260 = vmatmul.mubr.msk.bf16.gmra.mrb[236].mxu0 %vm366_vm3, %v9321_v37 }
 0x74d   : > { %15272 = vmatpush3.bf16.msra.mxu0 %v15947_v31  ;;  %15263 = vmatprep.mubr.msk.bf16.mxu0 %vm16671_vm1, %v18848_v11 }
 0x74e   : > { %15273 = vmatprep.subr.bf16.mxu0 %v18848_v11 }
 0x74f   : > { %v8335_v55 = vpop.f32.mrb[132].mxu0 }
 0x750   : > { %v8346_v23 = vadd.f32 %v8335_v55, %v8226_v6  ;;  %v15085_v52 = vpop.f32.mrb[133].mxu0 }
 0x751   : > { %v8338_v36 = vpop.f32.mrb[134].mxu0  ;;  %15274 = vmatpush3.bf16.msra.mxu0 %v15948_v40 }
 0x752   : > { %v8347_v61 = vadd.f32 %v8338_v36, %v8227_v7  ;;  %v15086_v51 = vpop.f32.mrb[135].mxu0 }
 0x754   : > { %15264 = vmatmul.mubr.msk.bf16.gmra.mrb[240].mxu0 %vm366_vm3, %v9322_v44 }
 0x755   : > { %15275 = vmatprep.mubr.msk.bf16.mxu0 %vm16671_vm1, %v18848_v11 }
 0x757   : > { %v8439_v53 = vpop.f32.mrb[136].mxu0 }
 0x758   : > { %v8462_v30 = vadd.f32 %v8439_v53, %v8342_v49  ;;  %v15097_v4 = vpop.f32.mrb[137].mxu0 }
 0x759   : > { %v8442_v29 = vpop.f32.mrb[138].mxu0 }
 0x75a   : > { %v8463_v32 = vadd.f32 %v8442_v29, %v8343_v21  ;;  %v15098_v25 = vpop.f32.mrb[139].mxu0 }
 0x75c   : > { %15276 = vmatmul.mubr.msk.bf16.vlgmr.msra.gmra.mrb[244].mxu0 %vm366_vm3, %v9440_v39 }
 0x75d   : > { %15279 = vmatprep.mubr.msk.bf16.mxu0 %vm16671_vm1, %v18848_v11 }
 0x75f   : > { %v8447_v17 = vpop.f32.mrb[140].mxu0 }
 0x760   : > { %v8464_v47 = vadd.f32 %v8447_v17, %v8344_v5  ;;  %v15101_v43 = vpop.f32.mrb[141].mxu0 }
 0x761   : > { %v8450_v9 = vpop.f32.mrb[142].mxu0 }
 0x762   : > { %v8465_v50 = vadd.f32 %v8450_v9, %v8345_v60  ;;  %v15102_v13 = vpop.f32.mrb[143].mxu0 }
 0x764   : > { %15280 = vmatmul.mubr.msk.bf16.gmra.mrb[248].mxu0 %vm366_vm3, %v9441_v0 }
 0x765   : > { %15283 = vmatprep.mubr.msk.bf16.mxu0 %vm16671_vm1, %v18848_v11 }
 0x767   : > { %v8455_v62 = vpop.f32.mrb[144].mxu0 }
 0x768   : > { %v8466_v58 = vadd.f32 %v8455_v62, %v8346_v23  ;;  %v15105_v35 = vpop.f32.mrb[145].mxu0 }
 0x769   : > { %v8458_v26 = vpop.f32.mrb[146].mxu0 }
 0x76a   : > { %v8467_v19 = vadd.f32 %v8458_v26, %v8347_v61  ;;  %v15106_v6 = vpop.f32.mrb[147].mxu0 }
 0x76c   : > { %15284 = vmatmul.mubr.msk.bf16.gmra.mrb[252].mxu0 %vm366_vm3, %v9442_v2 }
 0x76f   : > { %v8559_v34 = vpop.f32.mrb[148].mxu0 }
 0x770   : > { %v8582_v12 = vadd.f32 %v8559_v34, %v8462_v30  ;;  %v15117_v7 = vpop.f32.mrb[149].mxu0 }
 0x771   : > { %v8562_v57 = vpop.f32.mrb[150].mxu0 }
 0x772   : > { %v8583_v18 = vadd.f32 %v8562_v57, %v8463_v32  ;;  %v15118_v3 = vpop.f32.mrb[151].mxu0 }
 0x777   : > { %v8567_v14 = vpop.f32.mrb[152].mxu0 }
 0x778   : > { %v8584_v49 = vadd.f32 %v8567_v14, %v8464_v47  ;;  %v15121_v11 = vpop.f32.mrb[153].mxu0 }
 0x779   : > { %v8570_v42 = vpop.f32.mrb[154].mxu0 }
 0x77a   : > { %v8585_v46 = vadd.f32 %v8570_v42, %v8465_v50  ;;  %v15122_v41 = vpop.f32.mrb[155].mxu0 }
 0x77f   : > { %v8575_v15 = vpop.f32.mrb[156].mxu0 }
 0x780   : > { %v8586_v21 = vadd.f32 %v8575_v15, %v8466_v58  ;;  %v15125_v8 = vpop.f32.mrb[157].mxu0 }
 0x781   : > { %v8578_v16 = vpop.f32.mrb[158].mxu0  ;;  %v15949_v8 = vld [vmem:[%s19964_s7 + $0x80] ss:$8 sps:$4 sm:$0xff]  }
 0x782   : > { %v8587_v22 = vadd.f32 %v8578_v16, %v8467_v19  ;;  %v15126_v54 = vpop.f32.mrb[159].mxu0  ;;  %v15951_v16 = vld [vmem:[%s19964_s7 + $0x84] ss:$8 sps:$4 sm:$0xff]  }
 0x783   : > { %9725 = vmatprep.subr.bf16.mxu0 %v15951_v16 }
 0x784   : > { %9726 = vmatpush1.bf16.msra.mxu0 %v15949_v8 }
 0x787   : > { %v8679_v48 = vpop.f32.mrb[160].mxu0 }
 0x788   : > { %v8702_v5 = vadd.f32 %v8679_v48, %v8582_v12  ;;  %v15137_v63 = vpop.f32.mrb[161].mxu0 }
 0x789   : > { %v8682_v27 = vpop.f32.mrb[162].mxu0  ;;  %v15952_v63 = vld [vmem:[%s19964_s7 + $0x90] ss:$8 sps:$4 sm:$0xff]  }
 0x78a   : > { %v8703_v10 = vadd.f32 %v8682_v27, %v8583_v18  ;;  %v15138_v31 = vpop.f32.mrb[163].mxu0 }
 0x78b   : > { %v16672_v31 = vmov 0  }
 0x78c   : > { %9757 = vmatprep.mubr.bf16.mxu0 %v16672_v31 }
 0x78f   : > { %v8687_v60 = vpop.f32.mrb[164].mxu0 }
 0x790   : > { %v8704_v28 = vadd.f32 %v8687_v60, %v8584_v49  ;;  %v15141_v37 = vpop.f32.mrb[165].mxu0 }
 0x791   : > { %v8690_v40 = vpop.f32.mrb[166].mxu0  ;;  %v15955_v37 = vld [vmem:[%s19964_s7 + $0xa0] ss:$8 sps:$4 sm:$0xff]  }
 0x792   : > { %v8705_v55 = vadd.f32 %v8690_v40, %v8585_v46  ;;  %v15142_v59 = vpop.f32.mrb[167].mxu0  ;;  %v15960_v40 = vld [vmem:[%s19964_s7 + $0xb4] ss:$8 sps:$4 sm:$0xff]  }
 0x797   : > { %v8695_v23 = vpop.f32.mrb[168].mxu0 }
 0x798   : > { %v8706_v52 = vadd.f32 %v8695_v23, %v8586_v21  ;;  %v15145_v36 = vpop.f32.mrb[169].mxu0 }
 0x799   : > { %v8698_v24 = vpop.f32.mrb[170].mxu0 }
 0x79a   : > { %v8707_v61 = vadd.f32 %v8698_v24, %v8587_v22  ;;  %v15146_v51 = vpop.f32.mrb[171].mxu0  ;;  %v15954_v22 = vld [vmem:[%s19964_s7 + $0x94] ss:$8 sps:$4 sm:$0xff]   ;;  %v15963_v24 = vld [vmem:[%s19964_s7 + $0xc4] ss:$8 sps:$4 sm:$0xff]  }
 0x79b   : > { %9727 = vmatprep.subr.bf16.mxu0 %v15954_v22 }
 0x79c   : > { %9728 = vmatpush1.bf16.msra.mxu0 %v15952_v63 }
 0x79f   : > { %v8799_v44 = vpop.f32.mrb[172].mxu0 }
 0x7a0   : > { %v8822_v53 = vadd.f32 %v8799_v44, %v8702_v5  ;;  %v15157_v1 = vpop.f32.mrb[173].mxu0  ;;  %v15961_v44 = vld [vmem:[%s19964_s7 + $0xc0] ss:$8 sps:$4 sm:$0xff]  }
 0x7a1   : > { %v8802_v30 = vpop.f32.mrb[174].mxu0 }
 0x7a2   : > { %v8823_v4 = vadd.f32 %v8802_v30, %v8703_v10  ;;  %v15158_v29 = vpop.f32.mrb[175].mxu0  ;;  %v15957_v10 = vld [vmem:[%s19964_s7 + $0xa4] ss:$8 sps:$4 sm:$0xff]  }
 0x7a3   : > { %9729 = vmatprep.subr.bf16.mxu0 %v15957_v10  ;;  %v15964_v29 = vld [vmem:[%s19964_s7 + $0xd0] ss:$8 sps:$4 sm:$0xff]  }
 0x7a4   : > { %9730 = vmatpush1.bf16.msra.mxu0 %v15955_v37 }
 0x7a5   : > { %9731 = vmatprep.subr.bf16.mxu0 %v15960_v40 }
 0x7a7   : > { %v8807_v56 = vpop.f32.mrb[176].mxu0 }
 0x7a8   : > { %v8824_v32 = vadd.f32 %v8807_v56, %v8704_v28  ;;  %v15161_v25 = vpop.f32.mrb[177].mxu0 }
 0x7a9   : > { %v8810_v39 = vpop.f32.mrb[178].mxu0 }
 0x7aa   : > { %v8825_v17 = vadd.f32 %v8810_v39, %v8705_v55  ;;  %v15162_v38 = vpop.f32.mrb[179].mxu0 }
 0x7ab   : > { %v15972_v38 = vld [vmem:[%s19964_s7 + $0xf4] ss:$8 sps:$4 sm:$0xff]  }
 0x7af   : > { %v8815_v47 = vpop.f32.mrb[180].mxu0 }
 0x7b0   : > { %v8826_v43 = vadd.f32 %v8815_v47, %v8706_v52  ;;  %v15165_v9 = vpop.f32.mrb[181].mxu0  ;;  %v15958_v52 = vld [vmem:[%s19964_s7 + $0xb0] ss:$8 sps:$4 sm:$0xff]  }
 0x7b1   : > { %v8818_v45 = vpop.f32.mrb[182].mxu0  ;;  %9732 = vmatpush1.bf16.msra.mxu0 %v15958_v52 }
 0x7b2   : > { %v8827_v50 = vadd.f32 %v8818_v45, %v8707_v61  ;;  %v15166_v13 = vpop.f32.mrb[183].mxu0  ;;  %9733 = vmatprep.subr.bf16.mxu0 %v15963_v24  ;;  %v15970_v45 = vld [vmem:[%s19964_s7 + $0xf0] ss:$8 sps:$4 sm:$0xff]  }
 0x7b3   : > { %v15975_v13 = vld [vmem:[%s19964_s7 + $0x4] ss:$8 sps:$4 sm:$0xff]  }
 0x7b5   : > { %9734 = vmatpush1.bf16.msra.mxu0 %v15961_v44  ;;  %v13355_v44 = vld [vmem:[%s19963_s6] ss:$0 sm:$0xff] }
 0x7b7   : > { %v8919_v0 = vpop.f32.mrb[184].mxu0 }
 0x7b8   : > { %v8942_v62 = vadd.f32 %v8919_v0, %v8822_v53  ;;  %v15177_v20 = vpop.f32.mrb[185].mxu0  ;;  %v15966_v53 = vld [vmem:[%s19964_s7 + $0xd4] ss:$8 sps:$4 sm:$0xff]  }
 0x7b9   : > { %v8922_v58 = vpop.f32.mrb[186].mxu0  ;;  %9735 = vmatprep.subr.bf16.mxu0 %v15966_v53 }
 0x7ba   : > { %v8943_v35 = vadd.f32 %v8922_v58, %v8823_v4  ;;  %v15178_v26 = vpop.f32.mrb[187].mxu0  ;;  %9736 = vmatpush1.bf16.msra.mxu0 %v15964_v29 }
 0x7bf   : > { %v8927_v33 = vpop.f32.mrb[188].mxu0 }
 0x7c0   : > { %v8944_v19 = vadd.f32 %v8927_v33, %v8824_v32  ;;  %v15181_v6 = vpop.f32.mrb[189].mxu0  ;;  %v15969_v32 = vld [vmem:[%s19964_s7 + $0xe4] ss:$8 sps:$4 sm:$0xff]  }
 0x7c1   : > { %v8930_v2 = vpop.f32.mrb[190].mxu0  ;;  %9737 = vmatprep.subr.bf16.mxu0 %v15969_v32 }
 0x7c2   : > { %v8945_v34 = vadd.f32 %v8930_v2, %v8825_v17  ;;  %v15182_v12 = vpop.f32.mrb[191].mxu0  ;;  %v15967_v17 = vld [vmem:[%s19964_s7 + $0xe0] ss:$8 sps:$4 sm:$0xff]  }
 0x7c3   : > { %9738 = vmatpush1.bf16.msra.mxu0 %v15967_v17 }
 0x7c4   : > { %9739 = vmatprep.subr.bf16.mxu0 %v15972_v38 }
 0x7c7   : > { %v8935_v7 = vpop.f32.mrb[192].mxu0  ;;  %9740 = vmatpush1.bf16.msra.mxu0 %v15970_v45 }
 0x7c8   : > { %v8946_v57 = vadd.f32 %v8935_v7, %v8826_v43  ;;  %v15185_v18 = vpop.f32.mrb[193].mxu0  ;;  %9848 = vmatprep.subr.bf16.mxu0 %v15975_v13 }
 0x7c9   : > { %v8938_v3 = vpop.f32.mrb[194].mxu0 }
 0x7ca   : > { %v8947_v14 = vadd.f32 %v8938_v3, %v8827_v50  ;;  %v15186_v49 = vpop.f32.mrb[195].mxu0 }
 0x7cf   : > { %v9039_v11 = vpop.f32.mrb[196].mxu0 }
 0x7d0   : > { %v9062_v42 = vadd.f32 %v9039_v11, %v8942_v62  ;;  %v15197_v46 = vpop.f32.mrb[197].mxu0 }
 0x7d1   : > { %v9042_v41 = vpop.f32.mrb[198].mxu0 }
 0x7d2   : > { %v9063_v15 = vadd.f32 %v9042_v41, %v8943_v35  ;;  %v15198_v21 = vpop.f32.mrb[199].mxu0 }
 0x7d7   : > { %v9047_v54 = vpop.f32.mrb[200].mxu0 }
 0x7d8   : > { %v9064_v48 = vadd.f32 %v9047_v54, %v8944_v19  ;;  %v15201_v5 = vpop.f32.mrb[201].mxu0 }
 0x7d9   : > { %v9050_v27 = vpop.f32.mrb[202].mxu0 }
 0x7da   : > { %v9065_v60 = vadd.f32 %v9050_v27, %v8945_v34  ;;  %v15202_v28 = vpop.f32.mrb[203].mxu0 }
 0x7df   : > { %v9055_v55 = vpop.f32.mrb[204].mxu0 }
 0x7e0   : > { %v9066_v59 = vadd.f32 %v9055_v55, %v8946_v57  ;;  %v15205_v23 = vpop.f32.mrb[205].mxu0 }
 0x7e1   : > { %v9058_v36 = vpop.f32.mrb[206].mxu0 }
 0x7e2   : > { %v9067_v61 = vadd.f32 %v9058_v36, %v8947_v14  ;;  %v15206_v51 = vpop.f32.mrb[207].mxu0 }
 0x7e7   : > { %v9159_v1 = vpop.f32.mrb[208].mxu0 }
 0x7e8   : > { %v9182_v30 = vadd.f32 %v9159_v1, %v9062_v42  ;;  %v15217_v4 = vpop.f32.mrb[209].mxu0 }
 0x7e9   : > { %v9162_v56 = vpop.f32.mrb[210].mxu0 }
 0x7ea   : > { %v9183_v25 = vadd.f32 %v9162_v56, %v9063_v15  ;;  %v15218_v39 = vpop.f32.mrb[211].mxu0 }
 0x7ef   : > { %v9167_v47 = vpop.f32.mrb[212].mxu0 }
 0x7f0   : > { %v9184_v43 = vadd.f32 %v9167_v47, %v9064_v48  ;;  %v15221_v9 = vpop.f32.mrb[213].mxu0 }
 0x7f1   : > { %v9170_v50 = vpop.f32.mrb[214].mxu0 }
 0x7f2   : > { %v9185_v0 = vadd.f32 %v9170_v50, %v9065_v60  ;;  %v15222_v62 = vpop.f32.mrb[215].mxu0 }
 0x7f7   : > { %v9175_v20 = vpop.f32.mrb[216].mxu0 }
 0x7f8   : > { %v9186_v58 = vadd.f32 %v9175_v20, %v9066_v59  ;;  %v15225_v35 = vpop.f32.mrb[217].mxu0 }
 0x7f9   : > { %v9178_v26 = vpop.f32.mrb[218].mxu0 }
 0x7fa   : > { %v9187_v33 = vadd.f32 %v9178_v26, %v9067_v61  ;;  %v15226_v19 = vpop.f32.mrb[219].mxu0 }
 0x7ff   : > { %v9279_v6 = vpop.f32.mrb[220].mxu0 }
 0x800   : > { %v9302_v2 = vadd.f32 %v9279_v6, %v9182_v30  ;;  %v15237_v34 = vpop.f32.mrb[221].mxu0 }
 0x801   : > { %v9282_v12 = vpop.f32.mrb[222].mxu0 }
 0x802   : > { %v9303_v7 = vadd.f32 %v9282_v12, %v9183_v25  ;;  %v15238_v57 = vpop.f32.mrb[223].mxu0 }
 0x807   : > { %v9287_v18 = vpop.f32.mrb[224].mxu0 }
 0x808   : > { %v9304_v3 = vadd.f32 %v9287_v18, %v9184_v43  ;;  %v15241_v14 = vpop.f32.mrb[225].mxu0 }
 0x809   : > { %v9290_v49 = vpop.f32.mrb[226].mxu0 }
 0x80a   : > { %v9305_v11 = vadd.f32 %v9290_v49, %v9185_v0  ;;  %v15242_v42 = vpop.f32.mrb[227].mxu0 }
 0x80f   : > { %v9295_v46 = vpop.f32.mrb[228].mxu0 }
 0x810   : > { %v9306_v41 = vadd.f32 %v9295_v46, %v9186_v58  ;;  %v15245_v15 = vpop.f32.mrb[229].mxu0 }
 0x811   : > { %v9298_v21 = vpop.f32.mrb[230].mxu0 }
 0x812   : > { %v9307_v8 = vadd.f32 %v9298_v21, %v9187_v33  ;;  %v15246_v16 = vpop.f32.mrb[231].mxu0 }
 0x817   : > { %v9399_v22 = vpop.f32.mrb[232].mxu0 }
 0x818   : > { %v9422_v54 = vadd.f32 %v9399_v22, %v9302_v2  ;;  %v15257_v48 = vpop.f32.mrb[233].mxu0 }
 0x819   : > { %v9402_v5 = vpop.f32.mrb[234].mxu0 }
 0x81a   : > { %v9423_v63 = vadd.f32 %v9402_v5, %v9303_v7  ;;  %v15258_v27 = vpop.f32.mrb[235].mxu0 }
 0x81f   : > { %v9407_v10 = vpop.f32.mrb[236].mxu0 }
 0x820   : > { %v9424_v60 = vadd.f32 %v9407_v10, %v9304_v3  ;;  %v15261_v28 = vpop.f32.mrb[237].mxu0 }
 0x821   : > { %v9410_v37 = vpop.f32.mrb[238].mxu0 }
 0x822   : > { %v9425_v40 = vadd.f32 %v9410_v37, %v9305_v11  ;;  %v15262_v55 = vpop.f32.mrb[239].mxu0 }
 0x827   : > { %v9415_v59 = vpop.f32.mrb[240].mxu0 }
 0x828   : > { %v9426_v23 = vadd.f32 %v9415_v59, %v9306_v41  ;;  %v15265_v52 = vpop.f32.mrb[241].mxu0 }
 0x829   : > { %v9418_v36 = vpop.f32.mrb[242].mxu0 }
 0x82a   : > { %v9427_v24 = vadd.f32 %v9418_v36, %v9307_v8  ;;  %v15266_v61 = vpop.f32.mrb[243].mxu0  ;;  %v15976_v36 = vld [vmem:[%s19964_s7 + $0x10] ss:$8 sps:$4 sm:$0xff]  }
 0x82b   : > { %v15979_v61 = vld [vmem:[%s19964_s7 + $0x20] ss:$8 sps:$4 sm:$0xff]  }
 0x82f   : > { %v9519_v51 = vpop.f32.mrb[244].mxu0 }
 0x830   : > { %v9542_v53 = vadd.f32 %v9519_v51, %v9422_v54  ;;  %v15277_v1 = vpop.f32.mrb[245].mxu0  ;;  %v15984_v51 = vld [vmem:[%s19964_s7 + $0x34] ss:$8 sps:$4 sm:$0xff]  }
 0x831   : > { %v9522_v30 = vpop.f32.mrb[246].mxu0  ;;  %v15985_v1 = vld [vmem:[%s19964_s7 + $0x40] ss:$8 sps:$4 sm:$0xff]  }
 0x832   : > { %v9555_v4 = vadd.f32 %v13355_v44, %v9542_v53  ;;  %v9543_v29 = vadd.f32 %v9522_v30, %v9423_v63  ;;  %v15278_v56 = vpop.f32.mrb[247].mxu0  ;;  %v15987_v53 = vld [vmem:[%s19964_s7 + $0x44] ss:$8 sps:$4 sm:$0xff]   ;;  %v15990_v30 = vld [vmem:[%s19964_s7 + $0x54] ss:$8 sps:$4 sm:$0xff]  }
 0x833   : > { %v15991_v56 = vld [vmem:[%s19964_s7 + $0x60] ss:$8 sps:$4 sm:$0xff]  }
 0x834   : > { %v9567_v32 = vmin.f32 %v9555_v4, 0.0  ;;  %v9556_v25 = vadd.f32 %v13355_v44, %v9543_v29  ;;  %vm9561_vm3 = vcmp.gt.f32.partialorder %v9555_v4, 0.0  ;;  %v15993_v29 = vld [vmem:[%s19964_s7 + $0x64] ss:$8 sps:$4 sm:$0xff]  }
 0x836   : > { %v9573_v39 = vmul.f32 1.442695, %v9567_v32  ;;  %v9568_v17 = vmin.f32 %v9556_v25, 0.0  ;;  %vm9562_vm1 = vcmp.gt.f32.partialorder %v9556_v25, 0.0  ;;  %v15996_v32 = vld [vmem:[%s19964_s7 + $0x74] ss:$8 sps:$4 sm:$0xff]  }
 0x837   : > { %v9527_v38 = vpop.f32.mrb[248].mxu0 }
 0x838   : > { %16637 = vpow2.f32 %v9573_v39  ;;  %v9575_v47 = vmul.f32 1.442695, %v9568_v17  ;;  %v9544_v43 = vadd.f32 %v9527_v38, %v9424_v60  ;;  %v15281_v9 = vpop.f32.mrb[249].mxu0  ;;  %v15973_v60 = vld [vmem:[%s19964_s7] ss:$8 sps:$4 sm:$0xff]  }
 0x839   : > { %v9530_v45 = vpop.f32.mrb[250].mxu0  ;;  %v15999_v39 = vld [vmem:[%s19964_s7 + $0x104] ss:$8 sps:$4 sm:$0xff]   ;;  %v16002_v9 = vld [vmem:[%s19964_s7 + $0x114] ss:$8 sps:$4 sm:$0xff]  }
 0x83a   : > { %16639 = vpow2.f32 %v9575_v47  ;;  %v9557_v50 = vadd.f32 %v13355_v44, %v9544_v43  ;;  %v9545_v13 = vadd.f32 %v9530_v45, %v9425_v40  ;;  %v15282_v0 = vpop.f32.mrb[251].mxu0  ;;  %v15997_v47 = vld [vmem:[%s19964_s7 + $0x100] ss:$8 sps:$4 sm:$0xff]   ;;  %v16000_v45 = vld [vmem:[%s19964_s7 + $0x110] ss:$8 sps:$4 sm:$0xff]  }
 0x83b   : > { %v16008_v0 = vld [vmem:[%s19964_s7 + $0x134] ss:$8 sps:$4 sm:$0xff]  }
 0x83c   : > { %v9569_v62 = vmin.f32 %v9557_v50, 0.0  ;;  %v9558_v20 = vadd.f32 %v13355_v44, %v9545_v13  ;;  %vm9563_vm4 = vcmp.gt.f32.partialorder %v9557_v50, 0.0  ;;  %v16003_v13 = vld [vmem:[%s19964_s7 + $0x120] ss:$8 sps:$4 sm:$0xff]  }
 0x83e   : > { %v9577_v58 = vmul.f32 1.442695, %v9569_v62  ;;  %v9570_v35 = vmin.f32 %v9558_v20, 0.0  ;;  %vm9564_vm5 = vcmp.gt.f32.partialorder %v9558_v20, 0.0  ;;  %v16006_v62 = vld [vmem:[%s19964_s7 + $0x130] ss:$8 sps:$4 sm:$0xff]  }
 0x83f   : > { %v9535_v26 = vpop.f32.mrb[252].mxu0 }
 0x840   : > { %16641 = vpow2.f32 %v9577_v58  ;;  %v9579_v33 = vmul.f32 1.442695, %v9570_v35  ;;  %v9546_v19 = vadd.f32 %v9535_v26, %v9426_v23  ;;  %v15285_v6 = vpop.f32.mrb[253].mxu0  ;;  %v15978_v23 = vld [vmem:[%s19964_s7 + $0x14] ss:$8 sps:$4 sm:$0xff]  }
 0x841   : > { %v9538_v2 = vpop.f32.mrb[254].mxu0  ;;  %v16009_v58 = vld [vmem:[%s19964_s7 + $0x140] ss:$8 sps:$4 sm:$0xff]   ;;  %v16014_v35 = vld [vmem:[%s19964_s7 + $0x154] ss:$8 sps:$4 sm:$0xff]  }
 0x842   : > { %v16638_v34 = vpop.eup %16637  ;;  %16643 = vpow2.f32 %v9579_v33  ;;  %v9559_v12 = vadd.f32 %v13355_v44, %v9546_v19  ;;  %v9547_v7 = vadd.f32 %v9538_v2, %v9427_v24  ;;  %v15286_v57 = vpop.f32.mrb[255].mxu0  ;;  %v15981_v24 = vld [vmem:[%s19964_s7 + $0x24] ss:$8 sps:$4 sm:$0xff]   ;;  %v16012_v26 = vld [vmem:[%s19964_s7 + $0x150] ss:$8 sps:$4 sm:$0xff]  }
 0x843   : > { %v13356_v18 = vadd.f32 -1.0, %v16638_v34  ;;  %v16017_v33 = vld [vmem:[%s19964_s7 + $0x164] ss:$8 sps:$4 sm:$0xff]   ;;  %v16015_v19 = vld [vmem:[%s19964_s7 + $0x160] ss:$8 sps:$4 sm:$0xff]  }
 0x844   : > { %v16640_v3 = vpop.eup %16639  ;;  %v9571_v14 = vmin.f32 %v9559_v12, 0.0  ;;  %v9560_v49 = vadd.f32 %v13355_v44, %v9547_v7  ;;  %vm9565_vm6 = vcmp.gt.f32.partialorder %v9559_v12, 0.0  ;;  %v15982_v44 = vld [vmem:[%s19964_s7 + $0x30] ss:$8 sps:$4 sm:$0xff]   ;;  %v16020_v6 = vld [vmem:[%s19964_s7 + $0x174] ss:$8 sps:$4 sm:$0xff]  }
 0x845   : > { %v9591_v11 = vsel %vm9561_vm3, %v9555_v4, %v13356_v18  ;;  %v13357_v42 = vadd.f32 -1.0, %v16640_v3  ;;  %v15988_v4 = vld [vmem:[%s19964_s7 + $0x50] ss:$8 sps:$4 sm:$0xff]   ;;  %v16023_v34 = vld [vmem:[%s19964_s7 + $0x184] ss:$8 sps:$4 sm:$0xff]  }
 0x846   : > { %9597 = vst [vmem:[#allocation4] sm:$0xff] %v9591_v11  ;;  %v9581_v46 = vmul.f32 1.442695, %v9571_v14  ;;  %v9572_v41 = vmin.f32 %v9560_v49, 0.0  ;;  %vm9566_vm7 = vcmp.gt.f32.partialorder %v9560_v49, 0.0 }
 0x847   : > { %v9592_v15 = vsel %vm9562_vm1, %v9556_v25, %v13357_v42  ;;  %v15994_v25 = vld [vmem:[%s19964_s7 + $0x70] ss:$8 sps:$4 sm:$0xff]   ;;  %v16021_v57 = vld [vmem:[%s19964_s7 + $0x180] ss:$8 sps:$4 sm:$0xff]   ;;  %v16026_v3 = vld [vmem:[%s19964_s7 + $0x194] ss:$8 sps:$4 sm:$0xff]  }
 0x848   : > { %9598 = vst [vmem:[#allocation4 + $0x18] sm:$0xff] %v9592_v15  ;;  %16645 = vpow2.f32 %v9581_v46  ;;  %v9583_v21 = vmul.f32 1.442695, %v9572_v41  ;;  %v16018_v2 = vld [vmem:[%s19964_s7 + $0x170] ss:$8 sps:$4 sm:$0xff]  }
 0x849   : > { %v16024_v14 = vld [vmem:[%s19964_s7 + $0x190] ss:$8 sps:$4 sm:$0xff]   ;;  %v16027_v11 = vld [vmem:[%s19964_s7 + $0x1a0] ss:$8 sps:$4 sm:$0xff]   ;;  %v16032_v42 = vld [vmem:[%s19964_s7 + $0x1b4] ss:$8 sps:$4 sm:$0xff]  }
 0x84a   : > { %v16642_v8 = vpop.eup %16641  ;;  %16647 = vpow2.f32 %v9583_v21  ;;  %v16030_v46 = vld [vmem:[%s19964_s7 + $0x1b0] ss:$8 sps:$4 sm:$0xff]   ;;  %v16035_v41 = vld [vmem:[%s19964_s7 + $0x1c4] ss:$8 sps:$4 sm:$0xff]   ;;  %v16033_v15 = vld [vmem:[%s19964_s7 + $0x1c0] ss:$8 sps:$4 sm:$0xff]  }
 0x84b   : > { %v13358_v16 = vadd.f32 -1.0, %v16642_v8  ;;  %v16038_v21 = vld [vmem:[%s19964_s7 + $0x1d4] ss:$8 sps:$4 sm:$0xff]   ;;  %v16036_v8 = vld [vmem:[%s19964_s7 + $0x1d0] ss:$8 sps:$4 sm:$0xff]  }
 0x84c   : > { %v16644_v22 = vpop.eup %16643 }
 0x84d   : > { %v9593_v54 = vsel %vm9563_vm4, %v9557_v50, %v13358_v16  ;;  %v13359_v48 = vadd.f32 -1.0, %v16644_v22  ;;  %v9624_v28 = vld [vmem:[#allocation4 + $0x1] ss:$2 sm:$0xff]  ;;  %v9603_v38 = vld [vmem:[#allocation4] ss:$2 sm:$0xff] }
 0x84e   : > { %9599 = vst [vmem:[#allocation4 + $0x30] sm:$0xff] %v9593_v54  ;;  %v16005_v50 = vld [vmem:[%s19964_s7 + $0x124] ss:$8 sps:$4 sm:$0xff]   ;;  %v16039_v22 = vld [vmem:[%s19964_s7 + $0x1e0] ss:$8 sps:$4 sm:$0xff]  }
 0x84f   : > { %v9594_v5 = vsel %vm9564_vm5, %v9558_v20, %v13359_v48  ;;  %v16011_v20 = vld [vmem:[%s19964_s7 + $0x144] ss:$8 sps:$4 sm:$0xff]   ;;  %v16044_v54 = vld [vmem:[%s19964_s7 + $0x1f4] ss:$8 sps:$4 sm:$0xff]   ;;  %v16042_v48 = vld [vmem:[%s19964_s7 + $0x1f0] ss:$8 sps:$4 sm:$0xff]  }
 0x850   : > { %9600 = vst [vmem:[#allocation4 + $0x48] sm:$0xff] %v9594_v5  ;;  %v9892_v7 = vld [vmem:[#allocation4 + $0x2] ss:$2 sm:$0xff] }
 0x851   : > { %v16041_v16 = vld [vmem:[%s19964_s7 + $0x1e4] ss:$8 sps:$4 sm:$0xff]  }
 0x852   : > { %v16646_v63 = vpop.eup %16645  ;;  %v16047_v5 = vld [vmem:[%s19964_s7 + $0x204] ss:$8 sps:$4 sm:$0xff]  }
 0x853   : > { %v13360_v27 = vadd.f32 -1.0, %v16646_v63 }
 0x854   : > { %v16648_v10 = vpop.eup %16647 }
 0x855   : > { %v9626_v37 = vld [vmem:[#allocation4 + $0x31] ss:$2 sm:$0xff]  ;;  %v9595_v40 = vsel %vm9565_vm6, %v9559_v12, %v13360_v27  ;;  %v13361_v55 = vadd.f32 -1.0, %v16648_v10  ;;  %v9605_v17 = vld [vmem:[#allocation4 + $0x30] ss:$2 sm:$0xff] }
 0x856   : > { %9601 = vst [vmem:[#allocation4 + $0x60] sm:$0xff] %v9595_v40  ;;  %v9627_v59 = vpack.c.bf16 %v9626_v37, %v9624_v28  ;;  %v9606_v43 = vpack.c.bf16 %v9605_v17, %v9603_v38  ;;  %v9894_v12 = vld [vmem:[#allocation4 + $0x32] ss:$2 sm:$0xff]  ;;  %v10043_v63 = vld [vmem:[#allocation4 + $0x33] ss:$2 sm:$0xff] }
 0x857   : > { %v9596_v52 = vsel %vm9566_vm7, %v9560_v49, %v13361_v55  ;;  %v9895_v18 = vpack.c.bf16 %v9894_v12, %v9892_v7  ;;  %v16029_v49 = vld [vmem:[%s19964_s7 + $0x1a4] ss:$8 sps:$4 sm:$0xff]   ;;  %v16045_v10 = vld [vmem:[%s19964_s7 + $0x200] ss:$8 sps:$4 sm:$0xff]   ;;  %v16050_v28 = vld [vmem:[%s19964_s7 + $0x214] ss:$8 sps:$4 sm:$0xff]  }
 0x858   : > { %9602 = vst [vmem:[#allocation4 + $0x78] sm:$0xff] %v9596_v52  ;;  %9758 = vmatmul.mubr.bf16.vlgmr.msra.gmra.mrb[0].mxu0 %v9627_v59  ;;  %v10041_v27 = vld [vmem:[#allocation4 + $0x3] ss:$2 sm:$0xff] }
 0x859   : > { %9849 = vmatpush1.bf16.msra.mxu0 %v15973_v60  ;;  %9880 = vmatprep.mubr.bf16.mxu0 %v16672_v31  ;;  %v10044_v60 = vpack.c.bf16 %v10043_v63, %v10041_v27  ;;  %v16048_v37 = vld [vmem:[%s19964_s7 + $0x210] ss:$8 sps:$4 sm:$0xff]   ;;  %v16053_v40 = vld [vmem:[%s19964_s7 + $0x224] ss:$8 sps:$4 sm:$0xff]   ;;  %v16051_v55 = vld [vmem:[%s19964_s7 + $0x220] ss:$8 sps:$4 sm:$0xff]  }
 0x85a   : > { %9850 = vmatprep.subr.bf16.mxu0 %v15978_v23  ;;  %v16056_v59 = vld [vmem:[%s19964_s7 + $0x234] ss:$8 sps:$4 sm:$0xff]   ;;  %v16054_v23 = vld [vmem:[%s19964_s7 + $0x230] ss:$8 sps:$4 sm:$0xff]   ;;  %v16059_v52 = vld [vmem:[%s19964_s7 + $0x244] ss:$8 sps:$4 sm:$0xff]  }
 0x85b   : > { %v16077_v17 = vld [vmem:[%s19964_s7 + $0x2a4] ss:$8 sps:$4 sm:$0xff]   ;;  %v16075_v38 = vld [vmem:[%s19964_s7 + $0x2a0] ss:$8 sps:$4 sm:$0xff]  }
 0x85c   : > { %v16101_v12 = vld [vmem:[%s19964_s7 + $0x324] ss:$8 sps:$4 sm:$0xff]   ;;  %v16099_v7 = vld [vmem:[%s19964_s7 + $0x320] ss:$8 sps:$4 sm:$0xff]  }
 0x85d   : > { %9851 = vmatpush1.bf16.msra.mxu0 %v15976_v36  ;;  %v16057_v36 = vld [vmem:[%s19964_s7 + $0x240] ss:$8 sps:$4 sm:$0xff]   ;;  %v16125_v63 = vld [vmem:[%s19964_s7 + $0x3a4] ss:$8 sps:$4 sm:$0xff]  }
 0x85e   : > { %9852 = vmatprep.subr.bf16.mxu0 %v15981_v24  ;;  %v16062_v24 = vld [vmem:[%s19964_s7 + $0x254] ss:$8 sps:$4 sm:$0xff]   ;;  %v16123_v27 = vld [vmem:[%s19964_s7 + $0x3a0] ss:$8 sps:$4 sm:$0xff]  }
 0x861   : > { %9853 = vmatpush1.bf16.msra.mxu0 %v15979_v61  ;;  %v16060_v61 = vld [vmem:[%s19964_s7 + $0x250] ss:$8 sps:$4 sm:$0xff]  }
 0x862   : > { %9854 = vmatprep.subr.bf16.mxu0 %v15984_v51  ;;  %v16065_v51 = vld [vmem:[%s19964_s7 + $0x264] ss:$8 sps:$4 sm:$0xff]  }
 0x865   : > { %9855 = vmatpush1.bf16.msra.mxu0 %v15982_v44  ;;  %v16063_v44 = vld [vmem:[%s19964_s7 + $0x260] ss:$8 sps:$4 sm:$0xff]  }
 0x866   : > { %9856 = vmatprep.subr.bf16.mxu0 %v15987_v53  ;;  %v16068_v53 = vld [vmem:[%s19964_s7 + $0x274] ss:$8 sps:$4 sm:$0xff]  }
 0x869   : > { %9857 = vmatpush1.bf16.msra.mxu0 %v15985_v1  ;;  %v16066_v1 = vld [vmem:[%s19964_s7 + $0x270] ss:$8 sps:$4 sm:$0xff]  }
 0x86a   : > { %9858 = vmatprep.subr.bf16.mxu0 %v15990_v30  ;;  %v16071_v30 = vld [vmem:[%s19964_s7 + $0x284] ss:$8 sps:$4 sm:$0xff]  }
 0x86d   : > { %9859 = vmatpush1.bf16.msra.mxu0 %v15988_v4  ;;  %v10192_v4 = vld [vmem:[#allocation4 + $0x48] ss:$2 sm:$0xff] }
 0x86e   : > { %9860 = vmatprep.subr.bf16.mxu0 %v15993_v29  ;;  %v10190_v29 = vld [vmem:[#allocation4 + $0x18] ss:$2 sm:$0xff] }
 0x871   : > { %9861 = vmatpush1.bf16.msra.mxu0 %v15991_v56  ;;  %v16069_v56 = vld [vmem:[%s19964_s7 + $0x280] ss:$8 sps:$4 sm:$0xff]  }
 0x872   : > { %9862 = vmatprep.subr.bf16.mxu0 %v15996_v32  ;;  %v10193_v32 = vpack.c.bf16 %v10192_v4, %v10190_v29  ;;  %v16149_v4 = vld [vmem:[%s19964_s7 + $0x424] ss:$8 sps:$4 sm:$0xff]   ;;  %v16147_v29 = vld [vmem:[%s19964_s7 + $0x420] ss:$8 sps:$4 sm:$0xff]  }
 0x875   : > { %9863 = vmatpush1.bf16.msra.mxu0 %v15994_v25  ;;  %v16074_v25 = vld [vmem:[%s19964_s7 + $0x294] ss:$8 sps:$4 sm:$0xff]  }
 0x876   : > { %9993 = vmatprep.subr.bf16.mxu0 %v15999_v39  ;;  %v16072_v39 = vld [vmem:[%s19964_s7 + $0x290] ss:$8 sps:$4 sm:$0xff]  }
 0x878   : > { %9881 = vmatmul.mubr.bf16.vlgmr.msra.gmra.mrb[0].mxu0 %v9606_v43  ;;  %v16078_v43 = vld [vmem:[%s19964_s7 + $0x2b0] ss:$8 sps:$4 sm:$0xff]  }
 0x879   : > { %9994 = vmatpush1.bf16.msra.mxu0 %v15997_v47  ;;  %10025 = vmatprep.mubr.bf16.mxu0 %v16672_v31  ;;  %v16080_v47 = vld [vmem:[%s19964_s7 + $0x2b4] ss:$8 sps:$4 sm:$0xff]  }
 0x87a   : > { %9995 = vmatprep.subr.bf16.mxu0 %v16002_v9  ;;  %v16083_v9 = vld [vmem:[%s19964_s7 + $0x2c4] ss:$8 sps:$4 sm:$0xff]  }
 0x87d   : > { %9996 = vmatpush1.bf16.msra.mxu0 %v16000_v45  ;;  %v16081_v45 = vld [vmem:[%s19964_s7 + $0x2c0] ss:$8 sps:$4 sm:$0xff]  }
 0x87e   : > { %9997 = vmatprep.subr.bf16.mxu0 %v16005_v50  ;;  %v16086_v50 = vld [vmem:[%s19964_s7 + $0x2d4] ss:$8 sps:$4 sm:$0xff]  }
 0x881   : > { %9998 = vmatpush1.bf16.msra.mxu0 %v16003_v13  ;;  %v16084_v13 = vld [vmem:[%s19964_s7 + $0x2d0] ss:$8 sps:$4 sm:$0xff]  }
 0x882   : > { %9999 = vmatprep.subr.bf16.mxu0 %v16008_v0  ;;  %v16089_v0 = vld [vmem:[%s19964_s7 + $0x2e4] ss:$8 sps:$4 sm:$0xff]  }
 0x885   : > { %10000 = vmatpush1.bf16.msra.mxu0 %v16006_v62  ;;  %v16087_v62 = vld [vmem:[%s19964_s7 + $0x2e0] ss:$8 sps:$4 sm:$0xff]  }
 0x886   : > { %10001 = vmatprep.subr.bf16.mxu0 %v16011_v20  ;;  %v16092_v20 = vld [vmem:[%s19964_s7 + $0x2f4] ss:$8 sps:$4 sm:$0xff]  }
 0x889   : > { %10002 = vmatpush1.bf16.msra.mxu0 %v16009_v58  ;;  %v16090_v58 = vld [vmem:[%s19964_s7 + $0x2f0] ss:$8 sps:$4 sm:$0xff]  }
 0x88a   : > { %10003 = vmatprep.subr.bf16.mxu0 %v16014_v35  ;;  %v16095_v35 = vld [vmem:[%s19964_s7 + $0x304] ss:$8 sps:$4 sm:$0xff]  }
 0x88d   : > { %10004 = vmatpush1.bf16.msra.mxu0 %v16012_v26  ;;  %v10341_v26 = vld [vmem:[#allocation4 + $0x49] ss:$2 sm:$0xff] }
 0x88e   : > { %10005 = vmatprep.subr.bf16.mxu0 %v16017_v33  ;;  %v10339_v33 = vld [vmem:[#allocation4 + $0x19] ss:$2 sm:$0xff] }
 0x891   : > { %10006 = vmatpush1.bf16.msra.mxu0 %v16015_v19  ;;  %v16093_v19 = vld [vmem:[%s19964_s7 + $0x300] ss:$8 sps:$4 sm:$0xff]  }
 0x892   : > { %10007 = vmatprep.subr.bf16.mxu0 %v16020_v6  ;;  %v10342_v6 = vpack.c.bf16 %v10341_v26, %v10339_v33  ;;  %v16173_v26 = vld [vmem:[%s19964_s7 + $0x4a4] ss:$8 sps:$4 sm:$0xff]   ;;  %v16171_v33 = vld [vmem:[%s19964_s7 + $0x4a0] ss:$8 sps:$4 sm:$0xff]  }
 0x895   : > { %10008 = vmatpush1.bf16.msra.mxu0 %v16018_v2  ;;  %v16098_v2 = vld [vmem:[%s19964_s7 + $0x314] ss:$8 sps:$4 sm:$0xff]  }
 0x896   : > { %10142 = vmatprep.subr.bf16.mxu0 %v16023_v34  ;;  %v16096_v34 = vld [vmem:[%s19964_s7 + $0x310] ss:$8 sps:$4 sm:$0xff]  }
 0x898   : > { %10026 = vmatmul.mubr.bf16.vlgmr.msra.gmra.mrb[0].mxu0 %v9895_v18  ;;  %v16102_v18 = vld [vmem:[%s19964_s7 + $0x330] ss:$8 sps:$4 sm:$0xff]  }
 0x899   : > { %10143 = vmatpush1.bf16.msra.mxu0 %v16021_v57  ;;  %10174 = vmatprep.mubr.bf16.mxu0 %v16672_v31  ;;  %v16104_v57 = vld [vmem:[%s19964_s7 + $0x334] ss:$8 sps:$4 sm:$0xff]  }
 0x89a   : > { %10144 = vmatprep.subr.bf16.mxu0 %v16026_v3  ;;  %v16107_v3 = vld [vmem:[%s19964_s7 + $0x344] ss:$8 sps:$4 sm:$0xff]  }
 0x89d   : > { %10145 = vmatpush1.bf16.msra.mxu0 %v16024_v14  ;;  %v16105_v14 = vld [vmem:[%s19964_s7 + $0x340] ss:$8 sps:$4 sm:$0xff]  }
 0x89e   : > { %10146 = vmatprep.subr.bf16.mxu0 %v16029_v49  ;;  %v16110_v49 = vld [vmem:[%s19964_s7 + $0x354] ss:$8 sps:$4 sm:$0xff]  }
 0x8a1   : > { %10147 = vmatpush1.bf16.msra.mxu0 %v16027_v11  ;;  %v16108_v11 = vld [vmem:[%s19964_s7 + $0x350] ss:$8 sps:$4 sm:$0xff]  }
 0x8a2   : > { %10148 = vmatprep.subr.bf16.mxu0 %v16032_v42  ;;  %v16113_v42 = vld [vmem:[%s19964_s7 + $0x364] ss:$8 sps:$4 sm:$0xff]  }
 0x8a5   : > { %10149 = vmatpush1.bf16.msra.mxu0 %v16030_v46  ;;  %v16111_v46 = vld [vmem:[%s19964_s7 + $0x360] ss:$8 sps:$4 sm:$0xff]  }
 0x8a6   : > { %10150 = vmatprep.subr.bf16.mxu0 %v16035_v41  ;;  %v16116_v41 = vld [vmem:[%s19964_s7 + $0x374] ss:$8 sps:$4 sm:$0xff]  }
 0x8a9   : > { %10151 = vmatpush1.bf16.msra.mxu0 %v16033_v15  ;;  %v16114_v15 = vld [vmem:[%s19964_s7 + $0x370] ss:$8 sps:$4 sm:$0xff]  }
 0x8aa   : > { %10152 = vmatprep.subr.bf16.mxu0 %v16038_v21  ;;  %v16119_v21 = vld [vmem:[%s19964_s7 + $0x384] ss:$8 sps:$4 sm:$0xff]  }
 0x8ad   : > { %10153 = vmatpush1.bf16.msra.mxu0 %v16036_v8  ;;  %v10490_v8 = vld [vmem:[#allocation4 + $0x4a] ss:$2 sm:$0xff] }
 0x8ae   : > { %10154 = vmatprep.subr.bf16.mxu0 %v16041_v16  ;;  %v10488_v16 = vld [vmem:[#allocation4 + $0x1a] ss:$2 sm:$0xff] }
 0x8b1   : > { %10155 = vmatpush1.bf16.msra.mxu0 %v16039_v22  ;;  %v16117_v22 = vld [vmem:[%s19964_s7 + $0x380] ss:$8 sps:$4 sm:$0xff]  }
 0x8b2   : > { %10156 = vmatprep.subr.bf16.mxu0 %v16044_v54  ;;  %v10491_v54 = vpack.c.bf16 %v10490_v8, %v10488_v16  ;;  %v16197_v8 = vld [vmem:[%s19964_s7 + $0x524] ss:$8 sps:$4 sm:$0xff]   ;;  %v16195_v16 = vld [vmem:[%s19964_s7 + $0x520] ss:$8 sps:$4 sm:$0xff]  }
 0x8b5   : > { %10157 = vmatpush1.bf16.msra.mxu0 %v16042_v48  ;;  %v16122_v48 = vld [vmem:[%s19964_s7 + $0x394] ss:$8 sps:$4 sm:$0xff]  }
 0x8b6   : > { %10291 = vmatprep.subr.bf16.mxu0 %v16047_v5  ;;  %v16120_v5 = vld [vmem:[%s19964_s7 + $0x390] ss:$8 sps:$4 sm:$0xff]  }
 0x8b8   : > { %10175 = vmatmul.mubr.bf16.vlgmr.msra.gmra.mrb[0].mxu0 %v10044_v60  ;;  %v16126_v60 = vld [vmem:[%s19964_s7 + $0x3b0] ss:$8 sps:$4 sm:$0xff]  }
 0x8b9   : > { %10292 = vmatpush1.bf16.msra.mxu0 %v16045_v10  ;;  %10323 = vmatprep.mubr.bf16.mxu0 %v16672_v31  ;;  %v16128_v10 = vld [vmem:[%s19964_s7 + $0x3b4] ss:$8 sps:$4 sm:$0xff]  }
 0x8ba   : > { %10293 = vmatprep.subr.bf16.mxu0 %v16050_v28  ;;  %v16131_v28 = vld [vmem:[%s19964_s7 + $0x3c4] ss:$8 sps:$4 sm:$0xff]  }
 0x8bd   : > { %10294 = vmatpush1.bf16.msra.mxu0 %v16048_v37  ;;  %v16129_v37 = vld [vmem:[%s19964_s7 + $0x3c0] ss:$8 sps:$4 sm:$0xff]  }
 0x8be   : > { %10295 = vmatprep.subr.bf16.mxu0 %v16053_v40  ;;  %v16134_v40 = vld [vmem:[%s19964_s7 + $0x3d4] ss:$8 sps:$4 sm:$0xff]  }
 0x8c1   : > { %10296 = vmatpush1.bf16.msra.mxu0 %v16051_v55  ;;  %v16132_v55 = vld [vmem:[%s19964_s7 + $0x3d0] ss:$8 sps:$4 sm:$0xff]  }
 0x8c2   : > { %10297 = vmatprep.subr.bf16.mxu0 %v16056_v59  ;;  %v16137_v59 = vld [vmem:[%s19964_s7 + $0x3e4] ss:$8 sps:$4 sm:$0xff]  }
 0x8c5   : > { %10298 = vmatpush1.bf16.msra.mxu0 %v16054_v23  ;;  %v16135_v23 = vld [vmem:[%s19964_s7 + $0x3e0] ss:$8 sps:$4 sm:$0xff]  }
 0x8c6   : > { %10299 = vmatprep.subr.bf16.mxu0 %v16059_v52  ;;  %v16140_v52 = vld [vmem:[%s19964_s7 + $0x3f4] ss:$8 sps:$4 sm:$0xff]  }
 0x8c9   : > { %10300 = vmatpush1.bf16.msra.mxu0 %v16057_v36  ;;  %v16138_v36 = vld [vmem:[%s19964_s7 + $0x3f0] ss:$8 sps:$4 sm:$0xff]  }
 0x8ca   : > { %10301 = vmatprep.subr.bf16.mxu0 %v16062_v24  ;;  %v16143_v24 = vld [vmem:[%s19964_s7 + $0x404] ss:$8 sps:$4 sm:$0xff]  }
 0x8cd   : > { %10302 = vmatpush1.bf16.msra.mxu0 %v16060_v61  ;;  %v10639_v61 = vld [vmem:[#allocation4 + $0x4b] ss:$2 sm:$0xff] }
 0x8ce   : > { %10303 = vmatprep.subr.bf16.mxu0 %v16065_v51  ;;  %v10637_v51 = vld [vmem:[#allocation4 + $0x1b] ss:$2 sm:$0xff] }
 0x8d1   : > { %10304 = vmatpush1.bf16.msra.mxu0 %v16063_v44  ;;  %v16141_v44 = vld [vmem:[%s19964_s7 + $0x400] ss:$8 sps:$4 sm:$0xff]  }
 0x8d2   : > { %10305 = vmatprep.subr.bf16.mxu0 %v16068_v53  ;;  %v10640_v53 = vpack.c.bf16 %v10639_v61, %v10637_v51  ;;  %v16221_v61 = vld [vmem:[%s19964_s7 + $0x5a4] ss:$8 sps:$4 sm:$0xff]   ;;  %v16219_v51 = vld [vmem:[%s19964_s7 + $0x5a0] ss:$8 sps:$4 sm:$0xff]  }
 0x8d5   : > { %10306 = vmatpush1.bf16.msra.mxu0 %v16066_v1  ;;  %v16146_v1 = vld [vmem:[%s19964_s7 + $0x414] ss:$8 sps:$4 sm:$0xff]  }
 0x8d6   : > { %10440 = vmatprep.subr.bf16.mxu0 %v16071_v30  ;;  %v16144_v30 = vld [vmem:[%s19964_s7 + $0x410] ss:$8 sps:$4 sm:$0xff]  }
 0x8d8   : > { %10324 = vmatmul.mubr.bf16.vlgmr.msra.gmra.mrb[0].mxu0 %v10193_v32  ;;  %v16150_v32 = vld [vmem:[%s19964_s7 + $0x430] ss:$8 sps:$4 sm:$0xff]  }
 0x8d9   : > { %10441 = vmatpush1.bf16.msra.mxu0 %v16069_v56  ;;  %10472 = vmatprep.mubr.bf16.mxu0 %v16672_v31  ;;  %v16152_v56 = vld [vmem:[%s19964_s7 + $0x434] ss:$8 sps:$4 sm:$0xff]  }
 0x8da   : > { %10442 = vmatprep.subr.bf16.mxu0 %v16074_v25  ;;  %v16155_v25 = vld [vmem:[%s19964_s7 + $0x444] ss:$8 sps:$4 sm:$0xff]  }
 0x8dd   : > { %10443 = vmatpush1.bf16.msra.mxu0 %v16072_v39  ;;  %v16153_v39 = vld [vmem:[%s19964_s7 + $0x440] ss:$8 sps:$4 sm:$0xff]  }
 0x8de   : > { %10444 = vmatprep.subr.bf16.mxu0 %v16077_v17  ;;  %v16158_v17 = vld [vmem:[%s19964_s7 + $0x454] ss:$8 sps:$4 sm:$0xff]  }
 0x8e1   : > { %10445 = vmatpush1.bf16.msra.mxu0 %v16075_v38  ;;  %v16156_v38 = vld [vmem:[%s19964_s7 + $0x450] ss:$8 sps:$4 sm:$0xff]  }
 0x8e2   : > { %10446 = vmatprep.subr.bf16.mxu0 %v16080_v47  ;;  %v16161_v47 = vld [vmem:[%s19964_s7 + $0x464] ss:$8 sps:$4 sm:$0xff]  }
 0x8e5   : > { %10447 = vmatpush1.bf16.msra.mxu0 %v16078_v43  ;;  %v16159_v43 = vld [vmem:[%s19964_s7 + $0x460] ss:$8 sps:$4 sm:$0xff]  }
 0x8e6   : > { %10448 = vmatprep.subr.bf16.mxu0 %v16083_v9  ;;  %v16164_v9 = vld [vmem:[%s19964_s7 + $0x474] ss:$8 sps:$4 sm:$0xff]  }
 0x8e9   : > { %10449 = vmatpush1.bf16.msra.mxu0 %v16081_v45  ;;  %v16162_v45 = vld [vmem:[%s19964_s7 + $0x470] ss:$8 sps:$4 sm:$0xff]  }
 0x8ea   : > { %10450 = vmatprep.subr.bf16.mxu0 %v16086_v50  ;;  %v16167_v50 = vld [vmem:[%s19964_s7 + $0x484] ss:$8 sps:$4 sm:$0xff]  }
 0x8ed   : > { %10451 = vmatpush1.bf16.msra.mxu0 %v16084_v13  ;;  %v10788_v13 = vld [vmem:[#allocation4 + $0x60] ss:$2 sm:$0xff] }
 0x8ee   : > { %10452 = vmatprep.subr.bf16.mxu0 %v16089_v0  ;;  %v10786_v0 = vld [vmem:[#allocation4 + $0x30] ss:$2 sm:$0xff] }
 0x8f1   : > { %10453 = vmatpush1.bf16.msra.mxu0 %v16087_v62  ;;  %v16165_v62 = vld [vmem:[%s19964_s7 + $0x480] ss:$8 sps:$4 sm:$0xff]  }
 0x8f2   : > { %10454 = vmatprep.subr.bf16.mxu0 %v16092_v20  ;;  %v10789_v20 = vpack.c.bf16 %v10788_v13, %v10786_v0  ;;  %v16245_v13 = vld [vmem:[%s19964_s7 + $0x624] ss:$8 sps:$4 sm:$0xff]   ;;  %v16243_v0 = vld [vmem:[%s19964_s7 + $0x620] ss:$8 sps:$4 sm:$0xff]  }
 0x8f5   : > { %10455 = vmatpush1.bf16.msra.mxu0 %v16090_v58  ;;  %v16170_v58 = vld [vmem:[%s19964_s7 + $0x494] ss:$8 sps:$4 sm:$0xff]  }
 0x8f6   : > { %10589 = vmatprep.subr.bf16.mxu0 %v16095_v35  ;;  %v16168_v35 = vld [vmem:[%s19964_s7 + $0x490] ss:$8 sps:$4 sm:$0xff]  }
 0x8f8   : > { %10473 = vmatmul.mubr.bf16.vlgmr.msra.gmra.mrb[0].mxu0 %v10342_v6  ;;  %v16174_v6 = vld [vmem:[%s19964_s7 + $0x4b0] ss:$8 sps:$4 sm:$0xff]  }
 0x8f9   : > { %10590 = vmatpush1.bf16.msra.mxu0 %v16093_v19  ;;  %10621 = vmatprep.mubr.bf16.mxu0 %v16672_v31  ;;  %v16176_v19 = vld [vmem:[%s19964_s7 + $0x4b4] ss:$8 sps:$4 sm:$0xff]  }
 0x8fa   : > { %10591 = vmatprep.subr.bf16.mxu0 %v16098_v2  ;;  %v16179_v2 = vld [vmem:[%s19964_s7 + $0x4c4] ss:$8 sps:$4 sm:$0xff]  }
 0x8fd   : > { %10592 = vmatpush1.bf16.msra.mxu0 %v16096_v34  ;;  %v16177_v34 = vld [vmem:[%s19964_s7 + $0x4c0] ss:$8 sps:$4 sm:$0xff]  }
 0x8fe   : > { %10593 = vmatprep.subr.bf16.mxu0 %v16101_v12  ;;  %v16182_v12 = vld [vmem:[%s19964_s7 + $0x4d4] ss:$8 sps:$4 sm:$0xff]  }
 0x901   : > { %10594 = vmatpush1.bf16.msra.mxu0 %v16099_v7  ;;  %v16180_v7 = vld [vmem:[%s19964_s7 + $0x4d0] ss:$8 sps:$4 sm:$0xff]  }
 0x902   : > { %10595 = vmatprep.subr.bf16.mxu0 %v16104_v57  ;;  %v16185_v57 = vld [vmem:[%s19964_s7 + $0x4e4] ss:$8 sps:$4 sm:$0xff]  }
 0x905   : > { %10596 = vmatpush1.bf16.msra.mxu0 %v16102_v18  ;;  %v16183_v18 = vld [vmem:[%s19964_s7 + $0x4e0] ss:$8 sps:$4 sm:$0xff]  }
 0x906   : > { %10597 = vmatprep.subr.bf16.mxu0 %v16107_v3  ;;  %v16188_v3 = vld [vmem:[%s19964_s7 + $0x4f4] ss:$8 sps:$4 sm:$0xff]  }
 0x909   : > { %10598 = vmatpush1.bf16.msra.mxu0 %v16105_v14  ;;  %v16186_v14 = vld [vmem:[%s19964_s7 + $0x4f0] ss:$8 sps:$4 sm:$0xff]  }
 0x90a   : > { %10599 = vmatprep.subr.bf16.mxu0 %v16110_v49  ;;  %v16191_v49 = vld [vmem:[%s19964_s7 + $0x504] ss:$8 sps:$4 sm:$0xff]  }
 0x90d   : > { %10600 = vmatpush1.bf16.msra.mxu0 %v16108_v11  ;;  %v10937_v11 = vld [vmem:[#allocation4 + $0x61] ss:$2 sm:$0xff] }
 0x90e   : > { %10601 = vmatprep.subr.bf16.mxu0 %v16113_v42  ;;  %v10935_v42 = vld [vmem:[#allocation4 + $0x31] ss:$2 sm:$0xff] }
 0x911   : > { %10602 = vmatpush1.bf16.msra.mxu0 %v16111_v46  ;;  %v16189_v46 = vld [vmem:[%s19964_s7 + $0x500] ss:$8 sps:$4 sm:$0xff]  }
 0x912   : > { %10603 = vmatprep.subr.bf16.mxu0 %v16116_v41  ;;  %v10938_v41 = vpack.c.bf16 %v10937_v11, %v10935_v42  ;;  %v16269_v11 = vld [vmem:[%s19964_s7 + $0x6a4] ss:$8 sps:$4 sm:$0xff]   ;;  %v16267_v42 = vld [vmem:[%s19964_s7 + $0x6a0] ss:$8 sps:$4 sm:$0xff]  }
 0x915   : > { %10604 = vmatpush1.bf16.msra.mxu0 %v16114_v15  ;;  %v16194_v15 = vld [vmem:[%s19964_s7 + $0x514] ss:$8 sps:$4 sm:$0xff]  }
 0x916   : > { %10738 = vmatprep.subr.bf16.mxu0 %v16119_v21  ;;  %v16192_v21 = vld [vmem:[%s19964_s7 + $0x510] ss:$8 sps:$4 sm:$0xff]  }
 0x918   : > { %10622 = vmatmul.mubr.bf16.vlgmr.msra.gmra.mrb[0].mxu0 %v10491_v54  ;;  %v16198_v54 = vld [vmem:[%s19964_s7 + $0x530] ss:$8 sps:$4 sm:$0xff]  }
 0x919   : > { %10739 = vmatpush1.bf16.msra.mxu0 %v16117_v22  ;;  %10770 = vmatprep.mubr.bf16.mxu0 %v16672_v31  ;;  %v16200_v22 = vld [vmem:[%s19964_s7 + $0x534] ss:$8 sps:$4 sm:$0xff]  }
 0x91a   : > { %10740 = vmatprep.subr.bf16.mxu0 %v16122_v48  ;;  %v16203_v48 = vld [vmem:[%s19964_s7 + $0x544] ss:$8 sps:$4 sm:$0xff]  }
 0x91d   : > { %10741 = vmatpush1.bf16.msra.mxu0 %v16120_v5  ;;  %v16201_v5 = vld [vmem:[%s19964_s7 + $0x540] ss:$8 sps:$4 sm:$0xff]  }
 0x91e   : > { %10742 = vmatprep.subr.bf16.mxu0 %v16125_v63  ;;  %v16206_v63 = vld [vmem:[%s19964_s7 + $0x554] ss:$8 sps:$4 sm:$0xff]  }
 0x921   : > { %10743 = vmatpush1.bf16.msra.mxu0 %v16123_v27  ;;  %v16204_v27 = vld [vmem:[%s19964_s7 + $0x550] ss:$8 sps:$4 sm:$0xff]  }
 0x922   : > { %10744 = vmatprep.subr.bf16.mxu0 %v16128_v10  ;;  %v16209_v10 = vld [vmem:[%s19964_s7 + $0x564] ss:$8 sps:$4 sm:$0xff]  }
 0x925   : > { %10745 = vmatpush1.bf16.msra.mxu0 %v16126_v60  ;;  %v16207_v60 = vld [vmem:[%s19964_s7 + $0x560] ss:$8 sps:$4 sm:$0xff]  }
 0x926   : > { %10746 = vmatprep.subr.bf16.mxu0 %v16131_v28  ;;  %v16212_v28 = vld [vmem:[%s19964_s7 + $0x574] ss:$8 sps:$4 sm:$0xff]  }
 0x929   : > { %10747 = vmatpush1.bf16.msra.mxu0 %v16129_v37  ;;  %v16210_v37 = vld [vmem:[%s19964_s7 + $0x570] ss:$8 sps:$4 sm:$0xff]  }
 0x92a   : > { %10748 = vmatprep.subr.bf16.mxu0 %v16134_v40  ;;  %v16215_v40 = vld [vmem:[%s19964_s7 + $0x584] ss:$8 sps:$4 sm:$0xff]  }
 0x92d   : > { %10749 = vmatpush1.bf16.msra.mxu0 %v16132_v55  ;;  %v11086_v55 = vld [vmem:[#allocation4 + $0x62] ss:$2 sm:$0xff] }
 0x92e   : > { %10750 = vmatprep.subr.bf16.mxu0 %v16137_v59  ;;  %v11084_v59 = vld [vmem:[#allocation4 + $0x32] ss:$2 sm:$0xff] }
 0x931   : > { %10751 = vmatpush1.bf16.msra.mxu0 %v16135_v23  ;;  %v16213_v23 = vld [vmem:[%s19964_s7 + $0x580] ss:$8 sps:$4 sm:$0xff]  }
 0x932   : > { %10752 = vmatprep.subr.bf16.mxu0 %v16140_v52  ;;  %v11087_v52 = vpack.c.bf16 %v11086_v55, %v11084_v59  ;;  %v16293_v55 = vld [vmem:[%s19964_s7 + $0x724] ss:$8 sps:$4 sm:$0xff]   ;;  %v16291_v59 = vld [vmem:[%s19964_s7 + $0x720] ss:$8 sps:$4 sm:$0xff]  }
 0x935   : > { %10753 = vmatpush1.bf16.msra.mxu0 %v16138_v36  ;;  %v16218_v36 = vld [vmem:[%s19964_s7 + $0x594] ss:$8 sps:$4 sm:$0xff]  }
 0x936   : > { %10887 = vmatprep.subr.bf16.mxu0 %v16143_v24  ;;  %v16216_v24 = vld [vmem:[%s19964_s7 + $0x590] ss:$8 sps:$4 sm:$0xff]  }
 0x938   : > { %10771 = vmatmul.mubr.bf16.vlgmr.msra.gmra.mrb[0].mxu0 %v10640_v53  ;;  %v16222_v53 = vld [vmem:[%s19964_s7 + $0x5b0] ss:$8 sps:$4 sm:$0xff]  }
 0x939   : > { %10888 = vmatpush1.bf16.msra.mxu0 %v16141_v44  ;;  %10919 = vmatprep.mubr.bf16.mxu0 %v16672_v31  ;;  %v16224_v44 = vld [vmem:[%s19964_s7 + $0x5b4] ss:$8 sps:$4 sm:$0xff]  }
 0x93a   : > { %10889 = vmatprep.subr.bf16.mxu0 %v16146_v1  ;;  %v16227_v1 = vld [vmem:[%s19964_s7 + $0x5c4] ss:$8 sps:$4 sm:$0xff]  }
 0x93d   : > { %10890 = vmatpush1.bf16.msra.mxu0 %v16144_v30  ;;  %v16225_v30 = vld [vmem:[%s19964_s7 + $0x5c0] ss:$8 sps:$4 sm:$0xff]  }
 0x93e   : > { %10891 = vmatprep.subr.bf16.mxu0 %v16149_v4  ;;  %v16230_v4 = vld [vmem:[%s19964_s7 + $0x5d4] ss:$8 sps:$4 sm:$0xff]  }
 0x941   : > { %10892 = vmatpush1.bf16.msra.mxu0 %v16147_v29  ;;  %v16228_v29 = vld [vmem:[%s19964_s7 + $0x5d0] ss:$8 sps:$4 sm:$0xff]  }
 0x942   : > { %10893 = vmatprep.subr.bf16.mxu0 %v16152_v56  ;;  %v16233_v56 = vld [vmem:[%s19964_s7 + $0x5e4] ss:$8 sps:$4 sm:$0xff]  }
 0x945   : > { %10894 = vmatpush1.bf16.msra.mxu0 %v16150_v32  ;;  %v16231_v32 = vld [vmem:[%s19964_s7 + $0x5e0] ss:$8 sps:$4 sm:$0xff]  }
 0x946   : > { %10895 = vmatprep.subr.bf16.mxu0 %v16155_v25  ;;  %v16236_v25 = vld [vmem:[%s19964_s7 + $0x5f4] ss:$8 sps:$4 sm:$0xff]  }
 0x949   : > { %10896 = vmatpush1.bf16.msra.mxu0 %v16153_v39  ;;  %v16234_v39 = vld [vmem:[%s19964_s7 + $0x5f0] ss:$8 sps:$4 sm:$0xff]  }
 0x94a   : > { %10897 = vmatprep.subr.bf16.mxu0 %v16158_v17  ;;  %v16239_v17 = vld [vmem:[%s19964_s7 + $0x604] ss:$8 sps:$4 sm:$0xff]  }
 0x94d   : > { %10898 = vmatpush1.bf16.msra.mxu0 %v16156_v38  ;;  %v11235_v38 = vld [vmem:[#allocation4 + $0x63] ss:$2 sm:$0xff] }
 0x94e   : > { %10899 = vmatprep.subr.bf16.mxu0 %v16161_v47  ;;  %v11233_v47 = vld [vmem:[#allocation4 + $0x33] ss:$2 sm:$0xff] }
 0x951   : > { %10900 = vmatpush1.bf16.msra.mxu0 %v16159_v43  ;;  %v16237_v43 = vld [vmem:[%s19964_s7 + $0x600] ss:$8 sps:$4 sm:$0xff]  }
 0x952   : > { %10901 = vmatprep.subr.bf16.mxu0 %v16164_v9  ;;  %v11236_v9 = vpack.c.bf16 %v11235_v38, %v11233_v47  ;;  %v16317_v38 = vld [vmem:[%s19964_s7 + $0x7a4] ss:$8 sps:$4 sm:$0xff]   ;;  %v16315_v47 = vld [vmem:[%s19964_s7 + $0x7a0] ss:$8 sps:$4 sm:$0xff]  }
 0x955   : > { %10902 = vmatpush1.bf16.msra.mxu0 %v16162_v45  ;;  %v16242_v45 = vld [vmem:[%s19964_s7 + $0x614] ss:$8 sps:$4 sm:$0xff]  }
 0x956   : > { %11036 = vmatprep.subr.bf16.mxu0 %v16167_v50  ;;  %v16240_v50 = vld [vmem:[%s19964_s7 + $0x610] ss:$8 sps:$4 sm:$0xff]  }
 0x958   : > { %10920 = vmatmul.mubr.bf16.vlgmr.msra.gmra.mrb[0].mxu0 %v10789_v20  ;;  %v16246_v20 = vld [vmem:[%s19964_s7 + $0x630] ss:$8 sps:$4 sm:$0xff]  }
 0x959   : > { %11037 = vmatpush1.bf16.msra.mxu0 %v16165_v62  ;;  %11068 = vmatprep.mubr.bf16.mxu0 %v16672_v31  ;;  %v16248_v62 = vld [vmem:[%s19964_s7 + $0x634] ss:$8 sps:$4 sm:$0xff]  }
 0x95a   : > { %11038 = vmatprep.subr.bf16.mxu0 %v16170_v58  ;;  %v16251_v58 = vld [vmem:[%s19964_s7 + $0x644] ss:$8 sps:$4 sm:$0xff]  }
 0x95d   : > { %11039 = vmatpush1.bf16.msra.mxu0 %v16168_v35  ;;  %v16249_v35 = vld [vmem:[%s19964_s7 + $0x640] ss:$8 sps:$4 sm:$0xff]  }
 0x95e   : > { %11040 = vmatprep.subr.bf16.mxu0 %v16173_v26  ;;  %v16254_v26 = vld [vmem:[%s19964_s7 + $0x654] ss:$8 sps:$4 sm:$0xff]  }
 0x961   : > { %11041 = vmatpush1.bf16.msra.mxu0 %v16171_v33  ;;  %v16252_v33 = vld [vmem:[%s19964_s7 + $0x650] ss:$8 sps:$4 sm:$0xff]  }
 0x962   : > { %11042 = vmatprep.subr.bf16.mxu0 %v16176_v19  ;;  %v16257_v19 = vld [vmem:[%s19964_s7 + $0x664] ss:$8 sps:$4 sm:$0xff]  }
 0x965   : > { %11043 = vmatpush1.bf16.msra.mxu0 %v16174_v6  ;;  %v16255_v6 = vld [vmem:[%s19964_s7 + $0x660] ss:$8 sps:$4 sm:$0xff]  }
 0x966   : > { %11044 = vmatprep.subr.bf16.mxu0 %v16179_v2  ;;  %v16260_v2 = vld [vmem:[%s19964_s7 + $0x674] ss:$8 sps:$4 sm:$0xff]  }
 0x969   : > { %11045 = vmatpush1.bf16.msra.mxu0 %v16177_v34  ;;  %v16258_v34 = vld [vmem:[%s19964_s7 + $0x670] ss:$8 sps:$4 sm:$0xff]  }
 0x96a   : > { %11046 = vmatprep.subr.bf16.mxu0 %v16182_v12  ;;  %v16263_v12 = vld [vmem:[%s19964_s7 + $0x684] ss:$8 sps:$4 sm:$0xff]  }
 0x96d   : > { %11047 = vmatpush1.bf16.msra.mxu0 %v16180_v7  ;;  %v11384_v7 = vld [vmem:[#allocation4 + $0x78] ss:$2 sm:$0xff] }
 0x96e   : > { %11048 = vmatprep.subr.bf16.mxu0 %v16185_v57  ;;  %v11382_v57 = vld [vmem:[#allocation4 + $0x48] ss:$2 sm:$0xff] }
 0x971   : > { %11049 = vmatpush1.bf16.msra.mxu0 %v16183_v18  ;;  %v16261_v18 = vld [vmem:[%s19964_s7 + $0x680] ss:$8 sps:$4 sm:$0xff]  }
 0x972   : > { %11050 = vmatprep.subr.bf16.mxu0 %v16188_v3  ;;  %v11385_v3 = vpack.c.bf16 %v11384_v7, %v11382_v57 }
 0x975   : > { %11051 = vmatpush1.bf16.msra.mxu0 %v16186_v14  ;;  %v16266_v14 = vld [vmem:[%s19964_s7 + $0x694] ss:$8 sps:$4 sm:$0xff]  }
 0x976   : > { %11185 = vmatprep.subr.bf16.mxu0 %v16191_v49  ;;  %v16264_v49 = vld [vmem:[%s19964_s7 + $0x690] ss:$8 sps:$4 sm:$0xff]  }
 0x978   : > { %11069 = vmatmul.mubr.bf16.vlgmr.msra.gmra.mrb[0].mxu0 %v10938_v41  ;;  %v16270_v41 = vld [vmem:[%s19964_s7 + $0x6b0] ss:$8 sps:$4 sm:$0xff]  }
 0x979   : > { %11186 = vmatpush1.bf16.msra.mxu0 %v16189_v46  ;;  %11217 = vmatprep.mubr.bf16.mxu0 %v16672_v31  ;;  %v16272_v46 = vld [vmem:[%s19964_s7 + $0x6b4] ss:$8 sps:$4 sm:$0xff]  }
 0x97a   : > { %11187 = vmatprep.subr.bf16.mxu0 %v16194_v15  ;;  %v16275_v15 = vld [vmem:[%s19964_s7 + $0x6c4] ss:$8 sps:$4 sm:$0xff]  }
 0x97d   : > { %11188 = vmatpush1.bf16.msra.mxu0 %v16192_v21  ;;  %v16273_v21 = vld [vmem:[%s19964_s7 + $0x6c0] ss:$8 sps:$4 sm:$0xff]  }
 0x97e   : > { %11189 = vmatprep.subr.bf16.mxu0 %v16197_v8  ;;  %v16278_v8 = vld [vmem:[%s19964_s7 + $0x6d4] ss:$8 sps:$4 sm:$0xff]  }
 0x981   : > { %11190 = vmatpush1.bf16.msra.mxu0 %v16195_v16  ;;  %v16276_v16 = vld [vmem:[%s19964_s7 + $0x6d0] ss:$8 sps:$4 sm:$0xff]  }
 0x982   : > { %11191 = vmatprep.subr.bf16.mxu0 %v16200_v22  ;;  %v16281_v22 = vld [vmem:[%s19964_s7 + $0x6e4] ss:$8 sps:$4 sm:$0xff]  }
 0x985   : > { %11192 = vmatpush1.bf16.msra.mxu0 %v16198_v54  ;;  %v16279_v54 = vld [vmem:[%s19964_s7 + $0x6e0] ss:$8 sps:$4 sm:$0xff]  }
 0x986   : > { %11193 = vmatprep.subr.bf16.mxu0 %v16203_v48  ;;  %v16284_v48 = vld [vmem:[%s19964_s7 + $0x6f4] ss:$8 sps:$4 sm:$0xff]  }
 0x989   : > { %11194 = vmatpush1.bf16.msra.mxu0 %v16201_v5  ;;  %v16282_v5 = vld [vmem:[%s19964_s7 + $0x6f0] ss:$8 sps:$4 sm:$0xff]  }
 0x98a   : > { %11195 = vmatprep.subr.bf16.mxu0 %v16206_v63  ;;  %v16287_v63 = vld [vmem:[%s19964_s7 + $0x704] ss:$8 sps:$4 sm:$0xff]  }
 0x98d   : > { %11196 = vmatpush1.bf16.msra.mxu0 %v16204_v27  ;;  %v11533_v27 = vld [vmem:[#allocation4 + $0x79] ss:$2 sm:$0xff] }
 0x98e   : > { %11197 = vmatprep.subr.bf16.mxu0 %v16209_v10  ;;  %v11531_v10 = vld [vmem:[#allocation4 + $0x49] ss:$2 sm:$0xff] }
 0x991   : > { %11198 = vmatpush1.bf16.msra.mxu0 %v16207_v60  ;;  %v16285_v60 = vld [vmem:[%s19964_s7 + $0x700] ss:$8 sps:$4 sm:$0xff]  }
 0x992   : > { %11199 = vmatprep.subr.bf16.mxu0 %v16212_v28  ;;  %v11534_v28 = vpack.c.bf16 %v11533_v27, %v11531_v10 }
 0x995   : > { %11200 = vmatpush1.bf16.msra.mxu0 %v16210_v37  ;;  %v16290_v37 = vld [vmem:[%s19964_s7 + $0x714] ss:$8 sps:$4 sm:$0xff]  }
 0x996   : > { %11334 = vmatprep.subr.bf16.mxu0 %v16215_v40  ;;  %v16288_v40 = vld [vmem:[%s19964_s7 + $0x710] ss:$8 sps:$4 sm:$0xff]  }
 0x998   : > { %11218 = vmatmul.mubr.bf16.vlgmr.msra.gmra.mrb[0].mxu0 %v11087_v52  ;;  %v16294_v52 = vld [vmem:[%s19964_s7 + $0x730] ss:$8 sps:$4 sm:$0xff]  }
 0x999   : > { %11335 = vmatpush1.bf16.msra.mxu0 %v16213_v23  ;;  %11366 = vmatprep.mubr.bf16.mxu0 %v16672_v31  ;;  %v16296_v23 = vld [vmem:[%s19964_s7 + $0x734] ss:$8 sps:$4 sm:$0xff]  }
 0x99a   : > { %11336 = vmatprep.subr.bf16.mxu0 %v16218_v36  ;;  %v16299_v36 = vld [vmem:[%s19964_s7 + $0x744] ss:$8 sps:$4 sm:$0xff]  }
 0x99d   : > { %11337 = vmatpush1.bf16.msra.mxu0 %v16216_v24  ;;  %v16297_v24 = vld [vmem:[%s19964_s7 + $0x740] ss:$8 sps:$4 sm:$0xff]  }
 0x99e   : > { %11338 = vmatprep.subr.bf16.mxu0 %v16221_v61  ;;  %v16302_v61 = vld [vmem:[%s19964_s7 + $0x754] ss:$8 sps:$4 sm:$0xff]  }
 0x9a1   : > { %11339 = vmatpush1.bf16.msra.mxu0 %v16219_v51  ;;  %v16300_v51 = vld [vmem:[%s19964_s7 + $0x750] ss:$8 sps:$4 sm:$0xff]  }
 0x9a2   : > { %11340 = vmatprep.subr.bf16.mxu0 %v16224_v44  ;;  %v16305_v44 = vld [vmem:[%s19964_s7 + $0x764] ss:$8 sps:$4 sm:$0xff]  }
 0x9a5   : > { %11341 = vmatpush1.bf16.msra.mxu0 %v16222_v53  ;;  %v16303_v53 = vld [vmem:[%s19964_s7 + $0x760] ss:$8 sps:$4 sm:$0xff]  }
 0x9a6   : > { %11342 = vmatprep.subr.bf16.mxu0 %v16227_v1  ;;  %v16308_v1 = vld [vmem:[%s19964_s7 + $0x774] ss:$8 sps:$4 sm:$0xff]  }
 0x9a9   : > { %11343 = vmatpush1.bf16.msra.mxu0 %v16225_v30  ;;  %v16306_v30 = vld [vmem:[%s19964_s7 + $0x770] ss:$8 sps:$4 sm:$0xff]  }
 0x9aa   : > { %11344 = vmatprep.subr.bf16.mxu0 %v16230_v4  ;;  %v16311_v4 = vld [vmem:[%s19964_s7 + $0x784] ss:$8 sps:$4 sm:$0xff]  }
 0x9ad   : > { %11345 = vmatpush1.bf16.msra.mxu0 %v16228_v29  ;;  %v11682_v29 = vld [vmem:[#allocation4 + $0x7a] ss:$2 sm:$0xff] }
 0x9ae   : > { %11346 = vmatprep.subr.bf16.mxu0 %v16233_v56  ;;  %v11680_v56 = vld [vmem:[#allocation4 + $0x4a] ss:$2 sm:$0xff] }
 0x9b1   : > { %11347 = vmatpush1.bf16.msra.mxu0 %v16231_v32  ;;  %v16309_v32 = vld [vmem:[%s19964_s7 + $0x780] ss:$8 sps:$4 sm:$0xff]  }
 0x9b2   : > { %11348 = vmatprep.subr.bf16.mxu0 %v16236_v25  ;;  %v11683_v25 = vpack.c.bf16 %v11682_v29, %v11680_v56 }
 0x9b5   : > { %11349 = vmatpush1.bf16.msra.mxu0 %v16234_v39  ;;  %v16314_v39 = vld [vmem:[%s19964_s7 + $0x794] ss:$8 sps:$4 sm:$0xff]  }
 0x9b6   : > { %11483 = vmatprep.subr.bf16.mxu0 %v16239_v17  ;;  %v16312_v17 = vld [vmem:[%s19964_s7 + $0x790] ss:$8 sps:$4 sm:$0xff]  }
 0x9b8   : > { %11367 = vmatmul.mubr.bf16.vlgmr.msra.gmra.mrb[0].mxu0 %v11236_v9  ;;  %v16323_v9 = vld [vmem:[%s19964_s7 + $0x7c4] ss:$8 sps:$4 sm:$0xff]  }
 0x9b9   : > { %11484 = vmatpush1.bf16.msra.mxu0 %v16237_v43  ;;  %11515 = vmatprep.mubr.bf16.mxu0 %v16672_v31  ;;  %v16320_v43 = vld [vmem:[%s19964_s7 + $0x7b4] ss:$8 sps:$4 sm:$0xff]  }
 0x9ba   : > { %11485 = vmatprep.subr.bf16.mxu0 %v16242_v45  ;;  %v16321_v45 = vld [vmem:[%s19964_s7 + $0x7c0] ss:$8 sps:$4 sm:$0xff]  }
 0x9bd   : > { %11486 = vmatpush1.bf16.msra.mxu0 %v16240_v50  ;;  %v16326_v50 = vld [vmem:[%s19964_s7 + $0x7d4] ss:$8 sps:$4 sm:$0xff]  }
 0x9be   : > { %11487 = vmatprep.subr.bf16.mxu0 %v16245_v13  ;;  %v16324_v13 = vld [vmem:[%s19964_s7 + $0x7d0] ss:$8 sps:$4 sm:$0xff]  }
 0x9c1   : > { %11488 = vmatpush1.bf16.msra.mxu0 %v16243_v0  ;;  %v16329_v0 = vld [vmem:[%s19964_s7 + $0x7e4] ss:$8 sps:$4 sm:$0xff]  }
 0x9c2   : > { %11489 = vmatprep.subr.bf16.mxu0 %v16248_v62  ;;  %v16327_v62 = vld [vmem:[%s19964_s7 + $0x7e0] ss:$8 sps:$4 sm:$0xff]  }
 0x9c5   : > { %11490 = vmatpush1.bf16.msra.mxu0 %v16246_v20  ;;  %v16332_v20 = vld [vmem:[%s19964_s7 + $0x7f4] ss:$8 sps:$4 sm:$0xff]  }
 0x9c6   : > { %11491 = vmatprep.subr.bf16.mxu0 %v16251_v58  ;;  %v16330_v58 = vld [vmem:[%s19964_s7 + $0x7f0] ss:$8 sps:$4 sm:$0xff]  }
 0x9c9   : > { %11492 = vmatpush1.bf16.msra.mxu0 %v16249_v35  ;;  %v11831_v35 = vld [vmem:[#allocation4 + $0x7b] ss:$2 sm:$0xff] }
 0x9ca   : > { %11493 = vmatprep.subr.bf16.mxu0 %v16254_v26  ;;  %v11829_v26 = vld [vmem:[#allocation4 + $0x4b] ss:$2 sm:$0xff] }
 0x9cd   : > { %11494 = vmatpush1.bf16.msra.mxu0 %v16252_v33  ;;  %v11832_v33 = vpack.c.bf16 %v11831_v35, %v11829_v26 }
 0x9ce   : > { %11495 = vmatprep.subr.bf16.mxu0 %v16257_v19  ;;  %v11979_v19 = vlaneseq }
 0x9d1   : > { %11496 = vmatpush1.bf16.msra.mxu0 %v16255_v6  ;;  %v11980_v6 = vshrl.u32 %v11979_v19, 7 }
 0x9d2   : > { %11497 = vmatprep.subr.bf16.mxu0 %v16260_v2 }
 0x9d3   : > { %v11981_v2 = vsub.s32 0, %v11980_v6 }
 0x9d5   : > { %11498 = vmatpush1.bf16.msra.mxu0 %v16258_v34  ;;  %v11977_v34 = vld [vmem:[%s19965_s8] sm:$0x3] }
 0x9d6   : > { %11632 = vmatprep.subr.bf16.mxu0 %v16263_v12  ;;  %v11985_v12 = vsub.s32 1, %v11980_v6  ;;  %v11982_v7 = vrot.slane %v11977_v34, %v11981_v2 }
 0x9d8   : > { %11516 = vmatmul.mubr.bf16.vlgmr.msra.gmra.mrb[0].mxu0 %v11385_v3  ;;  %v11986_v57 = vrot.slane %v11977_v34, %v11985_v12 }
 0x9d9   : > { %11633 = vmatpush1.bf16.msra.mxu0 %v16261_v18  ;;  %11664 = vmatprep.mubr.bf16.mxu0 %v16672_v31 }
 0x9da   : > { %11634 = vmatprep.subr.bf16.mxu0 %v16266_v14 }
 0x9dd   : > { %11635 = vmatpush1.bf16.msra.mxu0 %v16264_v49 }
 0x9de   : > { %11636 = vmatprep.subr.bf16.mxu0 %v16269_v11 }
 0x9e1   : > { %11637 = vmatpush1.bf16.msra.mxu0 %v16267_v42 }
 0x9e2   : > { %11638 = vmatprep.subr.bf16.mxu0 %v16272_v46 }
 0x9e5   : > { %11639 = vmatpush1.bf16.msra.mxu0 %v16270_v41 }
 0x9e6   : > { %11640 = vmatprep.subr.bf16.mxu0 %v16275_v15 }
 0x9e9   : > { %11641 = vmatpush1.bf16.msra.mxu0 %v16273_v21 }
 0x9ea   : > { %11642 = vmatprep.subr.bf16.mxu0 %v16278_v8 }
 0x9ed   : > { %11643 = vmatpush1.bf16.msra.mxu0 %v16276_v16 }
 0x9ee   : > { %11644 = vmatprep.subr.bf16.mxu0 %v16281_v22 }
 0x9f1   : > { %11645 = vmatpush1.bf16.msra.mxu0 %v16279_v54 }
 0x9f2   : > { %11646 = vmatprep.subr.bf16.mxu0 %v16284_v48 }
 0x9f5   : > { %11647 = vmatpush1.bf16.msra.mxu0 %v16282_v5 }
 0x9f6   : > { %11781 = vmatprep.subr.bf16.mxu0 %v16287_v63 }
 0x9f8   : > { %11665 = vmatmul.mubr.bf16.vlgmr.msra.gmra.mrb[0].mxu0 %v11534_v28 }
 0x9f9   : > { %11782 = vmatpush1.bf16.msra.mxu0 %v16285_v60  ;;  %11813 = vmatprep.mubr.bf16.mxu0 %v16672_v31 }
 0x9fa   : > { %11783 = vmatprep.subr.bf16.mxu0 %v16290_v37 }
 0x9fd   : > { %11784 = vmatpush1.bf16.msra.mxu0 %v16288_v40 }
 0x9fe   : > { %11785 = vmatprep.subr.bf16.mxu0 %v16293_v55 }
 0xa01   : > { %11786 = vmatpush1.bf16.msra.mxu0 %v16291_v59 }
 0xa02   : > { %11787 = vmatprep.subr.bf16.mxu0 %v16296_v23 }
 0xa05   : > { %11788 = vmatpush1.bf16.msra.mxu0 %v16294_v52 }
 0xa06   : > { %11789 = vmatprep.subr.bf16.mxu0 %v16299_v36 }
 0xa09   : > { %11790 = vmatpush1.bf16.msra.mxu0 %v16297_v24 }
 0xa0a   : > { %11791 = vmatprep.subr.bf16.mxu0 %v16302_v61 }
 0xa0d   : > { %11792 = vmatpush1.bf16.msra.mxu0 %v16300_v51 }
 0xa0e   : > { %11793 = vmatprep.subr.bf16.mxu0 %v16305_v44 }
 0xa11   : > { %11794 = vmatpush1.bf16.msra.mxu0 %v16303_v53 }
 0xa12   : > { %11795 = vmatprep.subr.bf16.mxu0 %v16308_v1 }
 0xa15   : > { %11796 = vmatpush1.bf16.msra.mxu0 %v16306_v30 }
 0xa16   : > { %11930 = vmatprep.subr.bf16.mxu0 %v16311_v4 }
 0xa18   : > { %11814 = vmatmul.mubr.bf16.vlgmr.msra.gmra.mrb[0].mxu0 %v11683_v25 }
 0xa19   : > { %11931 = vmatpush1.bf16.msra.mxu0 %v16309_v32  ;;  %11962 = vmatprep.mubr.bf16.mxu0 %v16672_v31  ;;  %v16318_v31 = vld [vmem:[%s19964_s7 + $0x7b0] ss:$8 sps:$4 sm:$0xff]  }
 0xa1a   : > { %11932 = vmatprep.subr.bf16.mxu0 %v16314_v39 }
 0xa1d   : > { %11933 = vmatpush1.bf16.msra.mxu0 %v16312_v17 }
 0xa1e   : > { %11934 = vmatprep.subr.bf16.mxu0 %v16317_v38 }
 0xa21   : > { %11935 = vmatpush1.bf16.msra.mxu0 %v16315_v47 }
 0xa22   : > { %11936 = vmatprep.subr.bf16.mxu0 %v16320_v43 }
 0xa25   : > { %11937 = vmatpush1.bf16.msra.mxu0 %v16318_v31 }
 0xa26   : > { %11938 = vmatprep.subr.bf16.mxu0 %v16323_v9 }
 0xa29   : > { %11939 = vmatpush1.bf16.msra.mxu0 %v16321_v45 }
 0xa2a   : > { %11940 = vmatprep.subr.bf16.mxu0 %v16326_v50 }
 0xa2d   : > { %11941 = vmatpush1.bf16.msra.mxu0 %v16324_v13 }
 0xa2e   : > { %11942 = vmatprep.subr.bf16.mxu0 %v16329_v0 }
 0xa31   : > { %11943 = vmatpush1.bf16.msra.mxu0 %v16327_v62 }
 0xa32   : > { %11944 = vmatprep.subr.bf16.mxu0 %v16332_v20 }
 0xa35   : > { %11945 = vmatpush1.bf16.msra.mxu0 %v16330_v58 }
 0xa38   : > { %11963 = vmatmul.mubr.bf16.vlgmr.msra.gmra.mrb[0].mxu0 %v11832_v33 }
 0xb0b   : > { %v11964_v18 = vpop.f32.mrb[0].mxu0 }
 0xb0c   : > { %v11989_v3 = vadd.f32 %v11982_v7, %v11964_v18  ;;  %v11966_v14 = vpop.f32.mrb[1].mxu0 }
 0xb0d   : > { %v11990_v49 = vadd.f32 %v11986_v57, %v11966_v14  ;;  %v11968_v11 = vpop.f32.mrb[2].mxu0 }
 0xb0e   : > { %v11997_v42 = vmin.f32 %v11989_v3, 0.0  ;;  %v11991_v46 = vadd.f32 %v11982_v7, %v11968_v11  ;;  %v11970_v41 = vpop.f32.mrb[3].mxu0  ;;  %vm11993_vm8 = vcmp.gt.f32.partialorder %v11989_v3, 0.0 }
 0xb0f   : > { %v11998_v15 = vmin.f32 %v11990_v49, 0.0  ;;  %v11992_v21 = vadd.f32 %v11986_v57, %v11970_v41  ;;  %vm11994_vm9 = vcmp.gt.f32.partialorder %v11990_v49, 0.0 }
 0xb10   : > { %v12001_v8 = vmul.f32 1.442695, %v11997_v42  ;;  %v11999_v16 = vmin.f32 %v11991_v46, 0.0  ;;  %vm11995_vm10 = vcmp.gt.f32.partialorder %v11991_v46, 0.0 }
 0xb11   : > { %v12003_v22 = vmul.f32 1.442695, %v11998_v15  ;;  %v12000_v54 = vmin.f32 %v11992_v21, 0.0  ;;  %vm11996_vm11 = vcmp.gt.f32.partialorder %v11992_v21, 0.0 }
 0xb12   : > { %16649 = vpow2.f32 %v12001_v8  ;;  %v12005_v48 = vmul.f32 1.442695, %v11999_v16 }
 0xb13   : > { %16651 = vpow2.f32 %v12003_v22  ;;  %v12007_v5 = vmul.f32 1.442695, %v12000_v54 }
 0xb14   : > { %16653 = vpow2.f32 %v12005_v48 }
 0xb15   : > { %16655 = vpow2.f32 %v12007_v5 }
 0xb1c   : > { %v16650_v63 = vpop.eup %16649 }
 0xb1d   : > { %v16652_v27 = vpop.eup %16651  ;;  %v13858_v10 = vadd.f32 -1.0, %v16650_v63 }
 0xb1e   : > { %v16654_v60 = vpop.eup %16653  ;;  %v13859_v28 = vadd.f32 -1.0, %v16652_v27 }
 0xb1f   : > { %v16656_v37 = vpop.eup %16655  ;;  %v12013_v40 = vsel %vm11993_vm8, %v11989_v3, %v13858_v10  ;;  %v13860_v55 = vadd.f32 -1.0, %v16654_v60 }
 0xb20   : > { %v12014_v59 = vsel %vm11994_vm9, %v11990_v49, %v13859_v28  ;;  %v13861_v23 = vadd.f32 -1.0, %v16656_v37 }
 0xb21   : > { %v12019_v52 = vcombine.low %v12013_v40, %v12014_v59  ;;  %v12015_v36 = vsel %vm11995_vm10, %v11991_v46, %v13860_v55 }
 0xb22   : > { %v12016_v24 = vsel %vm11996_vm11, %v11992_v21, %v13861_v23 }
 0xb23   : > { %12021 = vst [vmem:[%s332_s21] sm:$0x33] %v12019_v52  ;;  %v12024_v61 = vcombine.low %v12015_v36, %v12016_v24 }
 0xb25   : > { %v12025_v51 = vrot.slane %v12024_v61, 6 }
 0xb27   : > { %12027 = vst [vmem:[%s332_s21] sm:$0xcc] %v12025_v51 }
 0xb28 PF: > { %s19_s30 = sadd.s32 1, %s16668_s30  }
 0xb29   : > { %p16_p4 = scmp.ge.s32.totalorder %s19_s30, 4  }
 0xb2b   :  { %18 = sbr.rel (!%p16_p4) target bundleno = 1 (0x1), region = 707 }

</bundles_post_ra>
